<compile_context>
chip_gen: v6e
topology: v6e:2x2x1
jax: 0.10.0
libtpu: 0.0.40
codegen_flags: <defaults>
</compile_context>

<pallas_src>
import functools

import jax
import jax.numpy as jnp
from jax.experimental import pallas as pl
from jax.experimental.pallas import tpu as pltpu


# --------------------------------- fused kernel ---------------------------------

def _encoder_kernel(x_ref, w1_ref, s1_ref, b1_ref,
                    w2_ref, s2_ref, b2_ref,
                    w3_ref, b3_ref, mask_ref,
                    o_ref, a1_ref, a2_ref, col_ref,
                    *, K, pad, Wp, L, G):
    """Fused conv->BN->ReLU6 x2 -> conv for B images (one grid step).

    Activation layout: (channels, G + B*Pimg + G) bf16 in VMEM.  The B images'
    flattened padded spatial grids (Pimg = Hp*Wp each) are concatenated on the
    lane axis, with G = pad*Wp + pad zero guard lanes at both ends, so every conv
    tap (kh, kw) is a single static lane-shifted slice of width L = B*Pimg.
    Valid output pixels never read across an image boundary (the padded border
    absorbs the shift); cross-image reads only happen at padding output pixels,
    which are masked (layers 1-2) or cropped away outside the kernel (layer 3).
    """

    def conv(a_ref, w_ref):
        ci = a_ref.shape[0]
        rows = K * K * ci
        # im2col: stack the K*K shifted slices along the contraction axis (bf16,
        # no per-tap casts), then ONE MXU matmul with contraction depth K*K*ci.
        for kh in range(K):
            for kw in range(K):
                t = kh * K + kw
                start = G + (kh - pad) * Wp + (kw - pad)             # static offset
                col_ref[t * ci:(t + 1) * ci, :] = a_ref[:, start:start + L]
        return jnp.dot(w_ref[...], col_ref[0:rows, :],
                       preferred_element_type=jnp.float32)           # (Co, L) f32

    mask = mask_ref[...]                     # (1, L) f32: 1 at valid pixels, 0 at padding

    # Zero only the guard bands each step; the interior [G, G+L) is fully
    # rewritten below.  (Per-step on purpose: safe under "parallel" megacore
    # sharding, unlike a program_id==0 gate.)
    z1 = jnp.zeros((a1_ref.shape[0], G), a1_ref.dtype)
    a1_ref[:, 0:G] = z1
    a1_ref[:, G + L:G + L + G] = z1
    z2 = jnp.zeros((a2_ref.shape[0], G), a2_ref.dtype)
    a2_ref[:, 0:G] = z2
    a2_ref[:, G + L:G + L + G] = z2

    # Layer 1: Conv2d(C -> 5, 5x5, pad=2) + folded BN + ReLU6
    y = conv(x_ref, w1_ref)
    y = jnp.clip(y * s1_ref[...] + b1_ref[...], 0.0, 6.0) * mask
    a1_ref[:, G:G + L] = y.astype(a1_ref.dtype)

    # Layer 2: Conv2d(5 -> 50, 5x5, pad=2) + folded BN + ReLU6
    y = conv(a1_ref, w2_ref)
    y = jnp.clip(y * s2_ref[...] + b2_ref[...], 0.0, 6.0) * mask
    a2_ref[:, G:G + L] = y.astype(a2_ref.dtype)

    # Layer 3: Conv2d(50 -> 3, 5x5, pad=2) + bias (no BN / ReLU6)
    y = conv(a2_ref, w3_ref)
    o_ref[...] = (y + b3_ref[...]).astype(o_ref.dtype)


# ----------------------------------- forward ------------------------------------

def image_encoder_forward(x_nchw, params, *, batch_tile=None):
    """Full ImageEncoder forward. Input/output layout: NCHW (PyTorch convention)."""
    (w1p, s1, sh1), (w2p, s2, sh2), (w3p, b3c) = params
    N, C, H, W = x_nchw.shape
    co1, co2, co3 = w1p.shape[0], w2p.shape[0], w3p.shape[0]
    K = int(round((w1p.shape[1] // C) ** 0.5))
    pad_ = K // 2
    Hp, Wp = H + 2 * pad_, W + 2 * pad_
    Pimg = Hp * Wp
    G = pad_ * Wp + pad_                      # max |flat shift| of any conv tap

    # Batch tile: widen the matmul lane axis while keeping >=2 grid steps so both
    # v7x TensorCores get work.  VMEM per step stays well under the 32 MiB scoped
    # default for B<=8 (largest buffer: (K*K*co2, B*Pimg) bf16 im2col staging).
    if batch_tile is None:
        B = max(1, min(8, N // 2))
    else:
        B = max(1, int(batch_tile))
    Ng = -(-N // B)                           # ceil(N / B) grid steps
    Npad = Ng * B
    L = B * Pimg                              # lane extent per grid step
    Lg = L + 2 * G
    Rmax = K * K * max(C, co1, co2)           # im2col staging rows (largest layer)

    # glue (tiny, XLA-side): NCHW -> (Ng, C, G + B*Pimg + G) bf16 with zero guards
    xp = jnp.pad(x_nchw, ((0, Npad - N), (0, 0), (pad_, pad_), (pad_, pad_)))
    xg = xp.reshape(Ng, B, C, Pimg).transpose(0, 2, 1, 3).reshape(Ng, C, L)
    xg = jnp.pad(xg, ((0, 0), (0, 0), (G, G))).astype(jnp.bfloat16)

    # valid-pixel mask over one padded image grid, tiled across the B images
    mh = (jnp.arange(Hp) >= pad_) & (jnp.arange(Hp) < pad_ + H)
    mw = (jnp.arange(Wp) >= pad_) & (jnp.arange(Wp) < pad_ + W)
    mimg = (mh[:, None] & mw[None, :]).astype(jnp.float32).reshape(Pimg)
    mask = jnp.tile(mimg, B).reshape(1, L)

    kernel = functools.partial(_encoder_kernel, K=K, pad=pad_, Wp=Wp, L=L, G=G)

    out = pl.pallas_call(
        kernel,
        out_shape=jax.ShapeDtypeStruct((Ng, co3, L), jnp.float32),
        grid=(Ng,),
        in_specs=[
            pl.BlockSpec((None, C, Lg), lambda n: (n, 0, 0)),       # per-step images (bf16)
            pl.BlockSpec((co1, K * K * C), lambda n: (0, 0)),       # w1 (bf16)
            pl.BlockSpec((co1, 1), lambda n: (0, 0)),               # BN1 scale (f32)
            pl.BlockSpec((co1, 1), lambda n: (0, 0)),               # BN1 shift (f32)
            pl.BlockSpec((co2, K * K * co1), lambda n: (0, 0)),     # w2 (bf16)
            pl.BlockSpec((co2, 1), lambda n: (0, 0)),
            pl.BlockSpec((co2, 1), lambda n: (0, 0)),
            pl.BlockSpec((co3, K * K * co2), lambda n: (0, 0)),     # w3 (bf16)
            pl.BlockSpec((co3, 1), lambda n: (0, 0)),               # conv3 bias (f32)
            pl.BlockSpec((1, L), lambda n: (0, 0)),                 # mask (f32)
        ],
        out_specs=pl.BlockSpec((None, co3, L), lambda n: (n, 0, 0)),
        scratch_shapes=[
            pltpu.VMEM((co1, Lg), jnp.bfloat16),   # layer-1 output / layer-2 input
            pltpu.VMEM((co2, Lg), jnp.bfloat16),   # layer-2 output / layer-3 input
            pltpu.VMEM((Rmax, L), jnp.bfloat16),   # im2col staging, reused by all layers
        ],
        compiler_params=pltpu.CompilerParams(
            dimension_semantics=("parallel",),     # image groups across TCs (v7x)
        ),
    )(xg, w1p, s1, sh1, w2p, s2, sh2, w3p, b3c, mask)

    # crop padded spatial grid back to (N, Co, H, W)
    out = out.reshape(Ng, co3, B, Pimg).transpose(0, 2, 1, 3).reshape(Npad, co3, Hp, Wp)
    return out[:N, :, pad_:pad_ + H, pad_:pad_ + W]


# ------------------------- parameter packing / init / fold ----------------------

def pack_conv_weight(w_oihw):
    """PyTorch (Co, Ci, K, K) -> (Co, K*K*Ci) bf16, column order (kh, kw, ci),
    matching the kernel's im2col row order (tap-major, channel-minor)."""
    Co, Ci, K, _ = w_oihw.shape
    return (jnp.transpose(w_oihw, (0, 2, 3, 1))
            .reshape(Co, K * K * Ci).astype(jnp.bfloat16))


def _conv_params(key, co, ci, K=5):
    k1, k2 = jax.random.split(key)
    bound = 1.0 / ((ci * K * K) ** 0.5)
    w = jax.random.uniform(k1, (co, ci, K, K), jnp.float32, -bound, bound)
    b = jax.random.uniform(k2, (co,), jnp.float32, -bound, bound)
    return w, b


def _bn_params(key, c):
    k1, k2, k3, k4 = jax.random.split(key, 4)
    gamma = jax.random.uniform(k1, (c,), jnp.float32, 0.5, 1.5)
    beta = jax.random.uniform(k2, (c,), jnp.float32, -0.1, 0.1)
    mean = jax.random.uniform(k3, (c,), jnp.float32, -0.1, 0.1)
    var = jax.random.uniform(k4, (c,), jnp.float32, 0.5, 1.5)
    return gamma, beta, mean, var


def _fold_bn(gamma, beta, mean, var, conv_bias, eps=1e-5):
    s = gamma / jnp.sqrt(var + eps)
    return s, beta + (conv_bias - mean) * s


# ------------------------------------- main --------------------------------------

if __name__ == "__main__":
    key = jax.random.PRNGKey(0)
    keys = jax.random.split(key, 8)

    N, C, H, W = 2, 4, 16, 16
    x_nchw = jax.random.normal(keys[0], (N, C, H, W), jnp.float32)

    eps = 1e-5
    w1, b1 = _conv_params(keys[1], 5, C)
    g1, be1, m1, v1 = _bn_params(keys[2], 5)
    w2, b2 = _conv_params(keys[3], 50, 5)
    g2, be2, m2, v2 = _bn_params(keys[4], 50)
    w3, b3 = _conv_params(keys[5], 3, 50)

    s1, sh1 = _fold_bn(g1, be1, m1, v1, b1, eps)
    s2, sh2 = _fold_bn(g2, be2, m2, v2, b2, eps)

    # hoisted, one-time weight repacking (kernel layout, bf16) + folded-BN vectors
    params = (
        (pack_conv_weight(w1), s1.reshape(-1, 1), sh1.reshape(-1, 1)),
        (pack_conv_weight(w2), s2.reshape(-1, 1), sh2.reshape(-1, 1)),
        (pack_conv_weight(w3), b3.reshape(-1, 1)),
    )

    fwd = jax.jit(image_encoder_forward)
    out = jax.block_until_ready(fwd(x_nchw, params))
    assert out.shape == (N, 3, H, W), out.shape

    # Pure-JAX reference (NCHW, same eval-mode BN semantics) for a sanity check.
    def _ref(x):
        def conv(x, w, b):
            y = jax.lax.conv_general_dilated(
                x, w, (1, 1), ((2, 2), (2, 2)),
                dimension_numbers=("NCHW", "OIHW", "NCHW"),
                precision=jax.lax.Precision.HIGHEST)
            return y + b[None, :, None, None]

        def bn(x, g, be, m, v):
            return (x - m[None, :, None, None]) / jnp.sqrt(v[None, :, None, None] + eps) \
                   * g[None, :, None, None] + be[None, :, None, None]

        relu6 = lambda t: jnp.clip(t, 0.0, 6.0)
        y = relu6(bn(conv(x, w1, b1), g1, be1, m1, v1))
        y = relu6(bn(conv(y, w2, b2), g2, be2, m2, v2))
        return conv(y, w3, b3)

    ref = jax.block_until_ready(_ref(x_nchw))
    max_err = float(jnp.max(jnp.abs(out - ref)))
    if not (max_err < 5e-2):
        raise SystemExit(f"FAIL: max abs error {max_err}")

    print("KERNEL_OK")
</pallas_src>

<mosaic_0001>
module attributes {stable_mosaic.version = 11 : i64} {
  func.func @_encoder_kernel(%arg0: i32, %arg1: memref<1x4x484xbf16, #tpu.memory_space<vmem>>, %arg2: memref<5x100xbf16, #tpu.memory_space<vmem>>, %arg3: memref<5x1xf32, #tpu.memory_space<vmem>>, %arg4: memref<5x1xf32, #tpu.memory_space<vmem>>, %arg5: memref<50x125xbf16, #tpu.memory_space<vmem>>, %arg6: memref<50x1xf32, #tpu.memory_space<vmem>>, %arg7: memref<50x1xf32, #tpu.memory_space<vmem>>, %arg8: memref<3x1250xbf16, #tpu.memory_space<vmem>>, %arg9: memref<3x1xf32, #tpu.memory_space<vmem>>, %arg10: memref<1x400xf32, #tpu.memory_space<vmem>>, %arg11: memref<1x3x400xf32, #tpu.memory_space<vmem>>, %arg12: memref<5x484xbf16, #tpu.memory_space<vmem>>, %arg13: memref<50x484xbf16, #tpu.memory_space<vmem>>, %arg14: memref<1250x400xbf16, #tpu.memory_space<vmem>>) attributes {dimension_semantics = [#tpu.dimension_semantics<parallel>], iteration_bounds = array<i64: 2>, scalar_prefetch = 0 : i64, scratch_operands = 3 : i64, tpu.core_type = #tpu.core_type<tc>, window_params = [{transform_indices = @transform_0, window_bounds = array<i64: 1, 4, 484>}, {pipeline_mode = #tpu.pipeline_mode<synchronous>, transform_indices = @transform_1, window_bounds = array<i64: 5, 100>}, {pipeline_mode = #tpu.pipeline_mode<synchronous>, transform_indices = @transform_2, window_bounds = array<i64: 5, 1>}, {pipeline_mode = #tpu.pipeline_mode<synchronous>, transform_indices = @transform_3, window_bounds = array<i64: 5, 1>}, {pipeline_mode = #tpu.pipeline_mode<synchronous>, transform_indices = @transform_4, window_bounds = array<i64: 50, 125>}, {pipeline_mode = #tpu.pipeline_mode<synchronous>, transform_indices = @transform_5, window_bounds = array<i64: 50, 1>}, {pipeline_mode = #tpu.pipeline_mode<synchronous>, transform_indices = @transform_6, window_bounds = array<i64: 50, 1>}, {pipeline_mode = #tpu.pipeline_mode<synchronous>, transform_indices = @transform_7, window_bounds = array<i64: 3, 1250>}, {pipeline_mode = #tpu.pipeline_mode<synchronous>, transform_indices = @transform_8, window_bounds = array<i64: 3, 1>}, {pipeline_mode = #tpu.pipeline_mode<synchronous>, transform_indices = @transform_9, window_bounds = array<i64: 1, 400>}, {transform_indices = @transform_10, window_bounds = array<i64: 1, 3, 400>}]} {
    %c0 = arith.constant 0 : index
    %c0_0 = arith.constant 0 : index
    %0 = vector.load %arg10[%c0, %c0_0] : memref<1x400xf32, #tpu.memory_space<vmem>>, vector<1x400xf32>
    %cst = arith.constant 0.000000e+00 : bf16
    %1 = vector.broadcast %cst : bf16 to vector<5x42xbf16>
    %c0_1 = arith.constant 0 : index
    %c0_2 = arith.constant 0 : index
    %2 = vector.load %arg12[%c0_1, %c0_2] : memref<5x484xbf16, #tpu.memory_space<vmem>>, vector<5x42xbf16>
    tpu.vector_store %arg12[%c0_1, %c0_2], %1 {strides = array<i32>} : memref<5x484xbf16, #tpu.memory_space<vmem>>, vector<5x42xbf16>,
    %c0_3 = arith.constant 0 : index
    %c442 = arith.constant 442 : index
    %3 = vector.load %arg12[%c0_3, %c442] : memref<5x484xbf16, #tpu.memory_space<vmem>>, vector<5x42xbf16>
    tpu.vector_store %arg12[%c0_3, %c442], %1 {strides = array<i32>} : memref<5x484xbf16, #tpu.memory_space<vmem>>, vector<5x42xbf16>,
    %cst_4 = arith.constant 0.000000e+00 : bf16
    %4 = vector.broadcast %cst_4 : bf16 to vector<50x42xbf16>
    %c0_5 = arith.constant 0 : index
    %c0_6 = arith.constant 0 : index
    %5 = vector.load %arg13[%c0_5, %c0_6] : memref<50x484xbf16, #tpu.memory_space<vmem>>, vector<50x42xbf16>
    tpu.vector_store %arg13[%c0_5, %c0_6], %4 {strides = array<i32>} : memref<50x484xbf16, #tpu.memory_space<vmem>>, vector<50x42xbf16>,
    %c0_7 = arith.constant 0 : index
    %c442_8 = arith.constant 442 : index
    %6 = vector.load %arg13[%c0_7, %c442_8] : memref<50x484xbf16, #tpu.memory_space<vmem>>, vector<50x42xbf16>
    tpu.vector_store %arg13[%c0_7, %c442_8], %4 {strides = array<i32>} : memref<50x484xbf16, #tpu.memory_space<vmem>>, vector<50x42xbf16>,
    %c0_9 = arith.constant 0 : index
    %c0_10 = arith.constant 0 : index
    %c0_11 = arith.constant 0 : index
    %7 = vector.load %arg1[%c0_9, %c0_10, %c0_11] : memref<1x4x484xbf16, #tpu.memory_space<vmem>>, vector<1x4x400xbf16>
    %8 = vector.shape_cast %7 : vector<1x4x400xbf16> to vector<4x400xbf16>
    %c0_12 = arith.constant 0 : index
    %c0_13 = arith.constant 0 : index
    %9 = vector.load %arg14[%c0_12, %c0_13] : memref<1250x400xbf16, #tpu.memory_space<vmem>>, vector<4x400xbf16>
    tpu.vector_store %arg14[%c0_12, %c0_13], %8 {strides = array<i32>} : memref<1250x400xbf16, #tpu.memory_space<vmem>>, vector<4x400xbf16>,
    %c0_14 = arith.constant 0 : index
    %c0_15 = arith.constant 0 : index
    %c1 = arith.constant 1 : index
    %10 = vector.load %arg1[%c0_14, %c0_15, %c1] : memref<1x4x484xbf16, #tpu.memory_space<vmem>>, vector<1x4x400xbf16>
    %11 = vector.shape_cast %10 : vector<1x4x400xbf16> to vector<4x400xbf16>
    %c4 = arith.constant 4 : index
    %c0_16 = arith.constant 0 : index
    %12 = vector.load %arg14[%c4, %c0_16] : memref<1250x400xbf16, #tpu.memory_space<vmem>>, vector<4x400xbf16>
    tpu.vector_store %arg14[%c4, %c0_16], %11 {strides = array<i32>} : memref<1250x400xbf16, #tpu.memory_space<vmem>>, vector<4x400xbf16>,
    %c0_17 = arith.constant 0 : index
    %c0_18 = arith.constant 0 : index
    %c2 = arith.constant 2 : index
    %13 = vector.load %arg1[%c0_17, %c0_18, %c2] : memref<1x4x484xbf16, #tpu.memory_space<vmem>>, vector<1x4x400xbf16>
    %14 = vector.shape_cast %13 : vector<1x4x400xbf16> to vector<4x400xbf16>
    %c8 = arith.constant 8 : index
    %c0_19 = arith.constant 0 : index
    %15 = vector.load %arg14[%c8, %c0_19] : memref<1250x400xbf16, #tpu.memory_space<vmem>>, vector<4x400xbf16>
    tpu.vector_store %arg14[%c8, %c0_19], %14 {strides = array<i32>} : memref<1250x400xbf16, #tpu.memory_space<vmem>>, vector<4x400xbf16>,
    %c0_20 = arith.constant 0 : index
    %c0_21 = arith.constant 0 : index
    %c3 = arith.constant 3 : index
    %16 = vector.load %arg1[%c0_20, %c0_21, %c3] : memref<1x4x484xbf16, #tpu.memory_space<vmem>>, vector<1x4x400xbf16>
    %17 = vector.shape_cast %16 : vector<1x4x400xbf16> to vector<4x400xbf16>
    %c12 = arith.constant 12 : index
    %c0_22 = arith.constant 0 : index
    %18 = vector.load %arg14[%c12, %c0_22] : memref<1250x400xbf16, #tpu.memory_space<vmem>>, vector<4x400xbf16>
    tpu.vector_store %arg14[%c12, %c0_22], %17 {strides = array<i32>} : memref<1250x400xbf16, #tpu.memory_space<vmem>>, vector<4x400xbf16>,
    %c0_23 = arith.constant 0 : index
    %c0_24 = arith.constant 0 : index
    %c4_25 = arith.constant 4 : index
    %19 = vector.load %arg1[%c0_23, %c0_24, %c4_25] : memref<1x4x484xbf16, #tpu.memory_space<vmem>>, vector<1x4x400xbf16>
    %20 = vector.shape_cast %19 : vector<1x4x400xbf16> to vector<4x400xbf16>
    %c16 = arith.constant 16 : index
    %c0_26 = arith.constant 0 : index
    %21 = vector.load %arg14[%c16, %c0_26] : memref<1250x400xbf16, #tpu.memory_space<vmem>>, vector<4x400xbf16>
    tpu.vector_store %arg14[%c16, %c0_26], %20 {strides = array<i32>} : memref<1250x400xbf16, #tpu.memory_space<vmem>>, vector<4x400xbf16>,
    %c0_27 = arith.constant 0 : index
    %c0_28 = arith.constant 0 : index
    %c20 = arith.constant 20 : index
    %22 = vector.load %arg1[%c0_27, %c0_28, %c20] : memref<1x4x484xbf16, #tpu.memory_space<vmem>>, vector<1x4x400xbf16>
    %23 = vector.shape_cast %22 : vector<1x4x400xbf16> to vector<4x400xbf16>
    %c20_29 = arith.constant 20 : index
    %c0_30 = arith.constant 0 : index
    %24 = vector.load %arg14[%c20_29, %c0_30] : memref<1250x400xbf16, #tpu.memory_space<vmem>>, vector<4x400xbf16>
    tpu.vector_store %arg14[%c20_29, %c0_30], %23 {strides = array<i32>} : memref<1250x400xbf16, #tpu.memory_space<vmem>>, vector<4x400xbf16>,
    %c0_31 = arith.constant 0 : index
    %c0_32 = arith.constant 0 : index
    %c21 = arith.constant 21 : index
    %25 = vector.load %arg1[%c0_31, %c0_32, %c21] : memref<1x4x484xbf16, #tpu.memory_space<vmem>>, vector<1x4x400xbf16>
    %26 = vector.shape_cast %25 : vector<1x4x400xbf16> to vector<4x400xbf16>
    %c24 = arith.constant 24 : index
    %c0_33 = arith.constant 0 : index
    %27 = vector.load %arg14[%c24, %c0_33] : memref<1250x400xbf16, #tpu.memory_space<vmem>>, vector<4x400xbf16>
    tpu.vector_store %arg14[%c24, %c0_33], %26 {strides = array<i32>} : memref<1250x400xbf16, #tpu.memory_space<vmem>>, vector<4x400xbf16>,
    %c0_34 = arith.constant 0 : index
    %c0_35 = arith.constant 0 : index
    %c22 = arith.constant 22 : index
    %28 = vector.load %arg1[%c0_34, %c0_35, %c22] : memref<1x4x484xbf16, #tpu.memory_space<vmem>>, vector<1x4x400xbf16>
    %29 = vector.shape_cast %28 : vector<1x4x400xbf16> to vector<4x400xbf16>
    %c28 = arith.constant 28 : index
    %c0_36 = arith.constant 0 : index
    %30 = vector.load %arg14[%c28, %c0_36] : memref<1250x400xbf16, #tpu.memory_space<vmem>>, vector<4x400xbf16>
    tpu.vector_store %arg14[%c28, %c0_36], %29 {strides = array<i32>} : memref<1250x400xbf16, #tpu.memory_space<vmem>>, vector<4x400xbf16>,
    %c0_37 = arith.constant 0 : index
    %c0_38 = arith.constant 0 : index
    %c23 = arith.constant 23 : index
    %31 = vector.load %arg1[%c0_37, %c0_38, %c23] : memref<1x4x484xbf16, #tpu.memory_space<vmem>>, vector<1x4x400xbf16>
    %32 = vector.shape_cast %31 : vector<1x4x400xbf16> to vector<4x400xbf16>
    %c32 = arith.constant 32 : index
    %c0_39 = arith.constant 0 : index
    %33 = vector.load %arg14[%c32, %c0_39] : memref<1250x400xbf16, #tpu.memory_space<vmem>>, vector<4x400xbf16>
    tpu.vector_store %arg14[%c32, %c0_39], %32 {strides = array<i32>} : memref<1250x400xbf16, #tpu.memory_space<vmem>>, vector<4x400xbf16>,
    %c0_40 = arith.constant 0 : index
    %c0_41 = arith.constant 0 : index
    %c24_42 = arith.constant 24 : index
    %34 = vector.load %arg1[%c0_40, %c0_41, %c24_42] : memref<1x4x484xbf16, #tpu.memory_space<vmem>>, vector<1x4x400xbf16>
    %35 = vector.shape_cast %34 : vector<1x4x400xbf16> to vector<4x400xbf16>
    %c36 = arith.constant 36 : index
    %c0_43 = arith.constant 0 : index
    %36 = vector.load %arg14[%c36, %c0_43] : memref<1250x400xbf16, #tpu.memory_space<vmem>>, vector<4x400xbf16>
    tpu.vector_store %arg14[%c36, %c0_43], %35 {strides = array<i32>} : memref<1250x400xbf16, #tpu.memory_space<vmem>>, vector<4x400xbf16>,
    %c0_44 = arith.constant 0 : index
    %c0_45 = arith.constant 0 : index
    %c40 = arith.constant 40 : index
    %37 = vector.load %arg1[%c0_44, %c0_45, %c40] : memref<1x4x484xbf16, #tpu.memory_space<vmem>>, vector<1x4x400xbf16>
    %38 = vector.shape_cast %37 : vector<1x4x400xbf16> to vector<4x400xbf16>
    %c40_46 = arith.constant 40 : index
    %c0_47 = arith.constant 0 : index
    %39 = vector.load %arg14[%c40_46, %c0_47] : memref<1250x400xbf16, #tpu.memory_space<vmem>>, vector<4x400xbf16>
    tpu.vector_store %arg14[%c40_46, %c0_47], %38 {strides = array<i32>} : memref<1250x400xbf16, #tpu.memory_space<vmem>>, vector<4x400xbf16>,
    %c0_48 = arith.constant 0 : index
    %c0_49 = arith.constant 0 : index
    %c41 = arith.constant 41 : index
    %40 = vector.load %arg1[%c0_48, %c0_49, %c41] : memref<1x4x484xbf16, #tpu.memory_space<vmem>>, vector<1x4x400xbf16>
    %41 = vector.shape_cast %40 : vector<1x4x400xbf16> to vector<4x400xbf16>
    %c44 = arith.constant 44 : index
    %c0_50 = arith.constant 0 : index
    %42 = vector.load %arg14[%c44, %c0_50] : memref<1250x400xbf16, #tpu.memory_space<vmem>>, vector<4x400xbf16>
    tpu.vector_store %arg14[%c44, %c0_50], %41 {strides = array<i32>} : memref<1250x400xbf16, #tpu.memory_space<vmem>>, vector<4x400xbf16>,
    %c0_51 = arith.constant 0 : index
    %c0_52 = arith.constant 0 : index
    %c42 = arith.constant 42 : index
    %43 = vector.load %arg1[%c0_51, %c0_52, %c42] : memref<1x4x484xbf16, #tpu.memory_space<vmem>>, vector<1x4x400xbf16>
    %44 = vector.shape_cast %43 : vector<1x4x400xbf16> to vector<4x400xbf16>
    %c48 = arith.constant 48 : index
    %c0_53 = arith.constant 0 : index
    %45 = vector.load %arg14[%c48, %c0_53] : memref<1250x400xbf16, #tpu.memory_space<vmem>>, vector<4x400xbf16>
    tpu.vector_store %arg14[%c48, %c0_53], %44 {strides = array<i32>} : memref<1250x400xbf16, #tpu.memory_space<vmem>>, vector<4x400xbf16>,
    %c0_54 = arith.constant 0 : index
    %c0_55 = arith.constant 0 : index
    %c43 = arith.constant 43 : index
    %46 = vector.load %arg1[%c0_54, %c0_55, %c43] : memref<1x4x484xbf16, #tpu.memory_space<vmem>>, vector<1x4x400xbf16>
    %47 = vector.shape_cast %46 : vector<1x4x400xbf16> to vector<4x400xbf16>
    %c52 = arith.constant 52 : index
    %c0_56 = arith.constant 0 : index
    %48 = vector.load %arg14[%c52, %c0_56] : memref<1250x400xbf16, #tpu.memory_space<vmem>>, vector<4x400xbf16>
    tpu.vector_store %arg14[%c52, %c0_56], %47 {strides = array<i32>} : memref<1250x400xbf16, #tpu.memory_space<vmem>>, vector<4x400xbf16>,
    %c0_57 = arith.constant 0 : index
    %c0_58 = arith.constant 0 : index
    %c44_59 = arith.constant 44 : index
    %49 = vector.load %arg1[%c0_57, %c0_58, %c44_59] : memref<1x4x484xbf16, #tpu.memory_space<vmem>>, vector<1x4x400xbf16>
    %50 = vector.shape_cast %49 : vector<1x4x400xbf16> to vector<4x400xbf16>
    %c56 = arith.constant 56 : index
    %c0_60 = arith.constant 0 : index
    %51 = vector.load %arg14[%c56, %c0_60] : memref<1250x400xbf16, #tpu.memory_space<vmem>>, vector<4x400xbf16>
    tpu.vector_store %arg14[%c56, %c0_60], %50 {strides = array<i32>} : memref<1250x400xbf16, #tpu.memory_space<vmem>>, vector<4x400xbf16>,
    %c0_61 = arith.constant 0 : index
    %c0_62 = arith.constant 0 : index
    %c60 = arith.constant 60 : index
    %52 = vector.load %arg1[%c0_61, %c0_62, %c60] : memref<1x4x484xbf16, #tpu.memory_space<vmem>>, vector<1x4x400xbf16>
    %53 = vector.shape_cast %52 : vector<1x4x400xbf16> to vector<4x400xbf16>
    %c60_63 = arith.constant 60 : index
    %c0_64 = arith.constant 0 : index
    %54 = vector.load %arg14[%c60_63, %c0_64] : memref<1250x400xbf16, #tpu.memory_space<vmem>>, vector<4x400xbf16>
    tpu.vector_store %arg14[%c60_63, %c0_64], %53 {strides = array<i32>} : memref<1250x400xbf16, #tpu.memory_space<vmem>>, vector<4x400xbf16>,
    %c0_65 = arith.constant 0 : index
    %c0_66 = arith.constant 0 : index
    %c61 = arith.constant 61 : index
    %55 = vector.load %arg1[%c0_65, %c0_66, %c61] : memref<1x4x484xbf16, #tpu.memory_space<vmem>>, vector<1x4x400xbf16>
    %56 = vector.shape_cast %55 : vector<1x4x400xbf16> to vector<4x400xbf16>
    %c64 = arith.constant 64 : index
    %c0_67 = arith.constant 0 : index
    %57 = vector.load %arg14[%c64, %c0_67] : memref<1250x400xbf16, #tpu.memory_space<vmem>>, vector<4x400xbf16>
    tpu.vector_store %arg14[%c64, %c0_67], %56 {strides = array<i32>} : memref<1250x400xbf16, #tpu.memory_space<vmem>>, vector<4x400xbf16>,
    %c0_68 = arith.constant 0 : index
    %c0_69 = arith.constant 0 : index
    %c62 = arith.constant 62 : index
    %58 = vector.load %arg1[%c0_68, %c0_69, %c62] : memref<1x4x484xbf16, #tpu.memory_space<vmem>>, vector<1x4x400xbf16>
    %59 = vector.shape_cast %58 : vector<1x4x400xbf16> to vector<4x400xbf16>
    %c68 = arith.constant 68 : index
    %c0_70 = arith.constant 0 : index
    %60 = vector.load %arg14[%c68, %c0_70] : memref<1250x400xbf16, #tpu.memory_space<vmem>>, vector<4x400xbf16>
    tpu.vector_store %arg14[%c68, %c0_70], %59 {strides = array<i32>} : memref<1250x400xbf16, #tpu.memory_space<vmem>>, vector<4x400xbf16>,
    %c0_71 = arith.constant 0 : index
    %c0_72 = arith.constant 0 : index
    %c63 = arith.constant 63 : index
    %61 = vector.load %arg1[%c0_71, %c0_72, %c63] : memref<1x4x484xbf16, #tpu.memory_space<vmem>>, vector<1x4x400xbf16>
    %62 = vector.shape_cast %61 : vector<1x4x400xbf16> to vector<4x400xbf16>
    %c72 = arith.constant 72 : index
    %c0_73 = arith.constant 0 : index
    %63 = vector.load %arg14[%c72, %c0_73] : memref<1250x400xbf16, #tpu.memory_space<vmem>>, vector<4x400xbf16>
    tpu.vector_store %arg14[%c72, %c0_73], %62 {strides = array<i32>} : memref<1250x400xbf16, #tpu.memory_space<vmem>>, vector<4x400xbf16>,
    %c0_74 = arith.constant 0 : index
    %c0_75 = arith.constant 0 : index
    %c64_76 = arith.constant 64 : index
    %64 = vector.load %arg1[%c0_74, %c0_75, %c64_76] : memref<1x4x484xbf16, #tpu.memory_space<vmem>>, vector<1x4x400xbf16>
    %65 = vector.shape_cast %64 : vector<1x4x400xbf16> to vector<4x400xbf16>
    %c76 = arith.constant 76 : index
    %c0_77 = arith.constant 0 : index
    %66 = vector.load %arg14[%c76, %c0_77] : memref<1250x400xbf16, #tpu.memory_space<vmem>>, vector<4x400xbf16>
    tpu.vector_store %arg14[%c76, %c0_77], %65 {strides = array<i32>} : memref<1250x400xbf16, #tpu.memory_space<vmem>>, vector<4x400xbf16>,
    %c0_78 = arith.constant 0 : index
    %c0_79 = arith.constant 0 : index
    %c80 = arith.constant 80 : index
    %67 = vector.load %arg1[%c0_78, %c0_79, %c80] : memref<1x4x484xbf16, #tpu.memory_space<vmem>>, vector<1x4x400xbf16>
    %68 = vector.shape_cast %67 : vector<1x4x400xbf16> to vector<4x400xbf16>
    %c80_80 = arith.constant 80 : index
    %c0_81 = arith.constant 0 : index
    %69 = vector.load %arg14[%c80_80, %c0_81] : memref<1250x400xbf16, #tpu.memory_space<vmem>>, vector<4x400xbf16>
    tpu.vector_store %arg14[%c80_80, %c0_81], %68 {strides = array<i32>} : memref<1250x400xbf16, #tpu.memory_space<vmem>>, vector<4x400xbf16>,
    %c0_82 = arith.constant 0 : index
    %c0_83 = arith.constant 0 : index
    %c81 = arith.constant 81 : index
    %70 = vector.load %arg1[%c0_82, %c0_83, %c81] : memref<1x4x484xbf16, #tpu.memory_space<vmem>>, vector<1x4x400xbf16>
    %71 = vector.shape_cast %70 : vector<1x4x400xbf16> to vector<4x400xbf16>
    %c84 = arith.constant 84 : index
    %c0_84 = arith.constant 0 : index
    %72 = vector.load %arg14[%c84, %c0_84] : memref<1250x400xbf16, #tpu.memory_space<vmem>>, vector<4x400xbf16>
    tpu.vector_store %arg14[%c84, %c0_84], %71 {strides = array<i32>} : memref<1250x400xbf16, #tpu.memory_space<vmem>>, vector<4x400xbf16>,
    %c0_85 = arith.constant 0 : index
    %c0_86 = arith.constant 0 : index
    %c82 = arith.constant 82 : index
    %73 = vector.load %arg1[%c0_85, %c0_86, %c82] : memref<1x4x484xbf16, #tpu.memory_space<vmem>>, vector<1x4x400xbf16>
    %74 = vector.shape_cast %73 : vector<1x4x400xbf16> to vector<4x400xbf16>
    %c88 = arith.constant 88 : index
    %c0_87 = arith.constant 0 : index
    %75 = vector.load %arg14[%c88, %c0_87] : memref<1250x400xbf16, #tpu.memory_space<vmem>>, vector<4x400xbf16>
    tpu.vector_store %arg14[%c88, %c0_87], %74 {strides = array<i32>} : memref<1250x400xbf16, #tpu.memory_space<vmem>>, vector<4x400xbf16>,
    %c0_88 = arith.constant 0 : index
    %c0_89 = arith.constant 0 : index
    %c83 = arith.constant 83 : index
    %76 = vector.load %arg1[%c0_88, %c0_89, %c83] : memref<1x4x484xbf16, #tpu.memory_space<vmem>>, vector<1x4x400xbf16>
    %77 = vector.shape_cast %76 : vector<1x4x400xbf16> to vector<4x400xbf16>
    %c92 = arith.constant 92 : index
    %c0_90 = arith.constant 0 : index
    %78 = vector.load %arg14[%c92, %c0_90] : memref<1250x400xbf16, #tpu.memory_space<vmem>>, vector<4x400xbf16>
    tpu.vector_store %arg14[%c92, %c0_90], %77 {strides = array<i32>} : memref<1250x400xbf16, #tpu.memory_space<vmem>>, vector<4x400xbf16>,
    %c0_91 = arith.constant 0 : index
    %c0_92 = arith.constant 0 : index
    %c84_93 = arith.constant 84 : index
    %79 = vector.load %arg1[%c0_91, %c0_92, %c84_93] : memref<1x4x484xbf16, #tpu.memory_space<vmem>>, vector<1x4x400xbf16>
    %80 = vector.shape_cast %79 : vector<1x4x400xbf16> to vector<4x400xbf16>
    %c96 = arith.constant 96 : index
    %c0_94 = arith.constant 0 : index
    %81 = vector.load %arg14[%c96, %c0_94] : memref<1250x400xbf16, #tpu.memory_space<vmem>>, vector<4x400xbf16>
    tpu.vector_store %arg14[%c96, %c0_94], %80 {strides = array<i32>} : memref<1250x400xbf16, #tpu.memory_space<vmem>>, vector<4x400xbf16>,
    %c0_95 = arith.constant 0 : index
    %c0_96 = arith.constant 0 : index
    %82 = vector.load %arg2[%c0_95, %c0_96] : memref<5x100xbf16, #tpu.memory_space<vmem>>, vector<5x100xbf16>
    %c0_97 = arith.constant 0 : index
    %c0_98 = arith.constant 0 : index
    %83 = vector.load %arg14[%c0_97, %c0_98] : memref<1250x400xbf16, #tpu.memory_space<vmem>>, vector<100x400xbf16>
    %cst_99 = arith.constant dense<0.000000e+00> : vector<5x400xf32>
    %84 = tpu.matmul %82, %83, %cst_99 {dimension_numbers = #tpu.dot_dimension_numbers<[1], [0], [0], [1], [0, 0, 1, 1], [], []>} : vector<5x100xbf16>, vector<100x400xbf16>, vector<5x400xf32> -> vector<5x400xf32>
    %c0_100 = arith.constant 0 : index
    %c0_101 = arith.constant 0 : index
    %85 = vector.load %arg3[%c0_100, %c0_101] : memref<5x1xf32, #tpu.memory_space<vmem>>, vector<5x1xf32>
    %86 = vector.broadcast %85 : vector<5x1xf32> to vector<5x400xf32>
    %87 = arith.mulf %84, %86 : vector<5x400xf32>
    %c0_102 = arith.constant 0 : index
    %c0_103 = arith.constant 0 : index
    %88 = vector.load %arg4[%c0_102, %c0_103] : memref<5x1xf32, #tpu.memory_space<vmem>>, vector<5x1xf32>
    %89 = vector.broadcast %88 : vector<5x1xf32> to vector<5x400xf32>
    %90 = arith.addf %87, %89 : vector<5x400xf32>
    %cst_104 = arith.constant 0.000000e+00 : f32
    %cst_105 = arith.constant 6.000000e+00 : f32
    %91 = vector.broadcast %cst_104 : f32 to vector<5x400xf32>
    %92 = arith.maximumf %91, %90 : vector<5x400xf32>
    %93 = vector.broadcast %cst_105 : f32 to vector<5x400xf32>
    %94 = arith.minimumf %93, %92 : vector<5x400xf32>
    %95 = vector.broadcast %0 : vector<1x400xf32> to vector<5x400xf32>
    %96 = arith.mulf %94, %95 : vector<5x400xf32>
    %97 = arith.truncf %96 : vector<5x400xf32> to vector<5x400xbf16>
    %c0_106 = arith.constant 0 : index
    %c42_107 = arith.constant 42 : index
    %98 = vector.load %arg12[%c0_106, %c42_107] : memref<5x484xbf16, #tpu.memory_space<vmem>>, vector<5x400xbf16>
    tpu.vector_store %arg12[%c0_106, %c42_107], %97 {strides = array<i32>} : memref<5x484xbf16, #tpu.memory_space<vmem>>, vector<5x400xbf16>,
    %c0_108 = arith.constant 0 : index
    %c0_109 = arith.constant 0 : index
    %99 = vector.load %arg12[%c0_108, %c0_109] : memref<5x484xbf16, #tpu.memory_space<vmem>>, vector<5x400xbf16>
    %c0_110 = arith.constant 0 : index
    %c0_111 = arith.constant 0 : index
    %100 = vector.load %arg14[%c0_110, %c0_111] : memref<1250x400xbf16, #tpu.memory_space<vmem>>, vector<5x400xbf16>
    tpu.vector_store %arg14[%c0_110, %c0_111], %99 {strides = array<i32>} : memref<1250x400xbf16, #tpu.memory_space<vmem>>, vector<5x400xbf16>,
    %c0_112 = arith.constant 0 : index
    %c1_113 = arith.constant 1 : index
    %101 = vector.load %arg12[%c0_112, %c1_113] : memref<5x484xbf16, #tpu.memory_space<vmem>>, vector<5x400xbf16>
    %c5 = arith.constant 5 : index
    %c0_114 = arith.constant 0 : index
    %102 = vector.load %arg14[%c5, %c0_114] : memref<1250x400xbf16, #tpu.memory_space<vmem>>, vector<5x400xbf16>
    tpu.vector_store %arg14[%c5, %c0_114], %101 {strides = array<i32>} : memref<1250x400xbf16, #tpu.memory_space<vmem>>, vector<5x400xbf16>,
    %c0_115 = arith.constant 0 : index
    %c2_116 = arith.constant 2 : index
    %103 = vector.load %arg12[%c0_115, %c2_116] : memref<5x484xbf16, #tpu.memory_space<vmem>>, vector<5x400xbf16>
    %c10 = arith.constant 10 : index
    %c0_117 = arith.constant 0 : index
    %104 = vector.load %arg14[%c10, %c0_117] : memref<1250x400xbf16, #tpu.memory_space<vmem>>, vector<5x400xbf16>
    tpu.vector_store %arg14[%c10, %c0_117], %103 {strides = array<i32>} : memref<1250x400xbf16, #tpu.memory_space<vmem>>, vector<5x400xbf16>,
    %c0_118 = arith.constant 0 : index
    %c3_119 = arith.constant 3 : index
    %105 = vector.load %arg12[%c0_118, %c3_119] : memref<5x484xbf16, #tpu.memory_space<vmem>>, vector<5x400xbf16>
    %c15 = arith.constant 15 : index
    %c0_120 = arith.constant 0 : index
    %106 = vector.load %arg14[%c15, %c0_120] : memref<1250x400xbf16, #tpu.memory_space<vmem>>, vector<5x400xbf16>
    tpu.vector_store %arg14[%c15, %c0_120], %105 {strides = array<i32>} : memref<1250x400xbf16, #tpu.memory_space<vmem>>, vector<5x400xbf16>,
    %c0_121 = arith.constant 0 : index
    %c4_122 = arith.constant 4 : index
    %107 = vector.load %arg12[%c0_121, %c4_122] : memref<5x484xbf16, #tpu.memory_space<vmem>>, vector<5x400xbf16>
    %c20_123 = arith.constant 20 : index
    %c0_124 = arith.constant 0 : index
    %108 = vector.load %arg14[%c20_123, %c0_124] : memref<1250x400xbf16, #tpu.memory_space<vmem>>, vector<5x400xbf16>
    tpu.vector_store %arg14[%c20_123, %c0_124], %107 {strides = array<i32>} : memref<1250x400xbf16, #tpu.memory_space<vmem>>, vector<5x400xbf16>,
    %c0_125 = arith.constant 0 : index
    %c20_126 = arith.constant 20 : index
    %109 = vector.load %arg12[%c0_125, %c20_126] : memref<5x484xbf16, #tpu.memory_space<vmem>>, vector<5x400xbf16>
    %c25 = arith.constant 25 : index
    %c0_127 = arith.constant 0 : index
    %110 = vector.load %arg14[%c25, %c0_127] : memref<1250x400xbf16, #tpu.memory_space<vmem>>, vector<5x400xbf16>
    tpu.vector_store %arg14[%c25, %c0_127], %109 {strides = array<i32>} : memref<1250x400xbf16, #tpu.memory_space<vmem>>, vector<5x400xbf16>,
    %c0_128 = arith.constant 0 : index
    %c21_129 = arith.constant 21 : index
    %111 = vector.load %arg12[%c0_128, %c21_129] : memref<5x484xbf16, #tpu.memory_space<vmem>>, vector<5x400xbf16>
    %c30 = arith.constant 30 : index
    %c0_130 = arith.constant 0 : index
    %112 = vector.load %arg14[%c30, %c0_130] : memref<1250x400xbf16, #tpu.memory_space<vmem>>, vector<5x400xbf16>
    tpu.vector_store %arg14[%c30, %c0_130], %111 {strides = array<i32>} : memref<1250x400xbf16, #tpu.memory_space<vmem>>, vector<5x400xbf16>,
    %c0_131 = arith.constant 0 : index
    %c22_132 = arith.constant 22 : index
    %113 = vector.load %arg12[%c0_131, %c22_132] : memref<5x484xbf16, #tpu.memory_space<vmem>>, vector<5x400xbf16>
    %c35 = arith.constant 35 : index
    %c0_133 = arith.constant 0 : index
    %114 = vector.load %arg14[%c35, %c0_133] : memref<1250x400xbf16, #tpu.memory_space<vmem>>, vector<5x400xbf16>
    tpu.vector_store %arg14[%c35, %c0_133], %113 {strides = array<i32>} : memref<1250x400xbf16, #tpu.memory_space<vmem>>, vector<5x400xbf16>,
    %c0_134 = arith.constant 0 : index
    %c23_135 = arith.constant 23 : index
    %115 = vector.load %arg12[%c0_134, %c23_135] : memref<5x484xbf16, #tpu.memory_space<vmem>>, vector<5x400xbf16>
    %c40_136 = arith.constant 40 : index
    %c0_137 = arith.constant 0 : index
    %116 = vector.load %arg14[%c40_136, %c0_137] : memref<1250x400xbf16, #tpu.memory_space<vmem>>, vector<5x400xbf16>
    tpu.vector_store %arg14[%c40_136, %c0_137], %115 {strides = array<i32>} : memref<1250x400xbf16, #tpu.memory_space<vmem>>, vector<5x400xbf16>,
    %c0_138 = arith.constant 0 : index
    %c24_139 = arith.constant 24 : index
    %117 = vector.load %arg12[%c0_138, %c24_139] : memref<5x484xbf16, #tpu.memory_space<vmem>>, vector<5x400xbf16>
    %c45 = arith.constant 45 : index
    %c0_140 = arith.constant 0 : index
    %118 = vector.load %arg14[%c45, %c0_140] : memref<1250x400xbf16, #tpu.memory_space<vmem>>, vector<5x400xbf16>
    tpu.vector_store %arg14[%c45, %c0_140], %117 {strides = array<i32>} : memref<1250x400xbf16, #tpu.memory_space<vmem>>, vector<5x400xbf16>,
    %c0_141 = arith.constant 0 : index
    %c40_142 = arith.constant 40 : index
    %119 = vector.load %arg12[%c0_141, %c40_142] : memref<5x484xbf16, #tpu.memory_space<vmem>>, vector<5x400xbf16>
    %c50 = arith.constant 50 : index
    %c0_143 = arith.constant 0 : index
    %120 = vector.load %arg14[%c50, %c0_143] : memref<1250x400xbf16, #tpu.memory_space<vmem>>, vector<5x400xbf16>
    tpu.vector_store %arg14[%c50, %c0_143], %119 {strides = array<i32>} : memref<1250x400xbf16, #tpu.memory_space<vmem>>, vector<5x400xbf16>,
    %c0_144 = arith.constant 0 : index
    %c41_145 = arith.constant 41 : index
    %121 = vector.load %arg12[%c0_144, %c41_145] : memref<5x484xbf16, #tpu.memory_space<vmem>>, vector<5x400xbf16>
    %c55 = arith.constant 55 : index
    %c0_146 = arith.constant 0 : index
    %122 = vector.load %arg14[%c55, %c0_146] : memref<1250x400xbf16, #tpu.memory_space<vmem>>, vector<5x400xbf16>
    tpu.vector_store %arg14[%c55, %c0_146], %121 {strides = array<i32>} : memref<1250x400xbf16, #tpu.memory_space<vmem>>, vector<5x400xbf16>,
    %c0_147 = arith.constant 0 : index
    %c42_148 = arith.constant 42 : index
    %123 = vector.load %arg12[%c0_147, %c42_148] : memref<5x484xbf16, #tpu.memory_space<vmem>>, vector<5x400xbf16>
    %c60_149 = arith.constant 60 : index
    %c0_150 = arith.constant 0 : index
    %124 = vector.load %arg14[%c60_149, %c0_150] : memref<1250x400xbf16, #tpu.memory_space<vmem>>, vector<5x400xbf16>
    tpu.vector_store %arg14[%c60_149, %c0_150], %123 {strides = array<i32>} : memref<1250x400xbf16, #tpu.memory_space<vmem>>, vector<5x400xbf16>,
    %c0_151 = arith.constant 0 : index
    %c43_152 = arith.constant 43 : index
    %125 = vector.load %arg12[%c0_151, %c43_152] : memref<5x484xbf16, #tpu.memory_space<vmem>>, vector<5x400xbf16>
    %c65 = arith.constant 65 : index
    %c0_153 = arith.constant 0 : index
    %126 = vector.load %arg14[%c65, %c0_153] : memref<1250x400xbf16, #tpu.memory_space<vmem>>, vector<5x400xbf16>
    tpu.vector_store %arg14[%c65, %c0_153], %125 {strides = array<i32>} : memref<1250x400xbf16, #tpu.memory_space<vmem>>, vector<5x400xbf16>,
    %c0_154 = arith.constant 0 : index
    %c44_155 = arith.constant 44 : index
    %127 = vector.load %arg12[%c0_154, %c44_155] : memref<5x484xbf16, #tpu.memory_space<vmem>>, vector<5x400xbf16>
    %c70 = arith.constant 70 : index
    %c0_156 = arith.constant 0 : index
    %128 = vector.load %arg14[%c70, %c0_156] : memref<1250x400xbf16, #tpu.memory_space<vmem>>, vector<5x400xbf16>
    tpu.vector_store %arg14[%c70, %c0_156], %127 {strides = array<i32>} : memref<1250x400xbf16, #tpu.memory_space<vmem>>, vector<5x400xbf16>,
    %c0_157 = arith.constant 0 : index
    %c60_158 = arith.constant 60 : index
    %129 = vector.load %arg12[%c0_157, %c60_158] : memref<5x484xbf16, #tpu.memory_space<vmem>>, vector<5x400xbf16>
    %c75 = arith.constant 75 : index
    %c0_159 = arith.constant 0 : index
    %130 = vector.load %arg14[%c75, %c0_159] : memref<1250x400xbf16, #tpu.memory_space<vmem>>, vector<5x400xbf16>
    tpu.vector_store %arg14[%c75, %c0_159], %129 {strides = array<i32>} : memref<1250x400xbf16, #tpu.memory_space<vmem>>, vector<5x400xbf16>,
    %c0_160 = arith.constant 0 : index
    %c61_161 = arith.constant 61 : index
    %131 = vector.load %arg12[%c0_160, %c61_161] : memref<5x484xbf16, #tpu.memory_space<vmem>>, vector<5x400xbf16>
    %c80_162 = arith.constant 80 : index
    %c0_163 = arith.constant 0 : index
    %132 = vector.load %arg14[%c80_162, %c0_163] : memref<1250x400xbf16, #tpu.memory_space<vmem>>, vector<5x400xbf16>
    tpu.vector_store %arg14[%c80_162, %c0_163], %131 {strides = array<i32>} : memref<1250x400xbf16, #tpu.memory_space<vmem>>, vector<5x400xbf16>,
    %c0_164 = arith.constant 0 : index
    %c62_165 = arith.constant 62 : index
    %133 = vector.load %arg12[%c0_164, %c62_165] : memref<5x484xbf16, #tpu.memory_space<vmem>>, vector<5x400xbf16>
    %c85 = arith.constant 85 : index
    %c0_166 = arith.constant 0 : index
    %134 = vector.load %arg14[%c85, %c0_166] : memref<1250x400xbf16, #tpu.memory_space<vmem>>, vector<5x400xbf16>
    tpu.vector_store %arg14[%c85, %c0_166], %133 {strides = array<i32>} : memref<1250x400xbf16, #tpu.memory_space<vmem>>, vector<5x400xbf16>,
    %c0_167 = arith.constant 0 : index
    %c63_168 = arith.constant 63 : index
    %135 = vector.load %arg12[%c0_167, %c63_168] : memref<5x484xbf16, #tpu.memory_space<vmem>>, vector<5x400xbf16>
    %c90 = arith.constant 90 : index
    %c0_169 = arith.constant 0 : index
    %136 = vector.load %arg14[%c90, %c0_169] : memref<1250x400xbf16, #tpu.memory_space<vmem>>, vector<5x400xbf16>
    tpu.vector_store %arg14[%c90, %c0_169], %135 {strides = array<i32>} : memref<1250x400xbf16, #tpu.memory_space<vmem>>, vector<5x400xbf16>,
    %c0_170 = arith.constant 0 : index
    %c64_171 = arith.constant 64 : index
    %137 = vector.load %arg12[%c0_170, %c64_171] : memref<5x484xbf16, #tpu.memory_space<vmem>>, vector<5x400xbf16>
    %c95 = arith.constant 95 : index
    %c0_172 = arith.constant 0 : index
    %138 = vector.load %arg14[%c95, %c0_172] : memref<1250x400xbf16, #tpu.memory_space<vmem>>, vector<5x400xbf16>
    tpu.vector_store %arg14[%c95, %c0_172], %137 {strides = array<i32>} : memref<1250x400xbf16, #tpu.memory_space<vmem>>, vector<5x400xbf16>,
    %c0_173 = arith.constant 0 : index
    %c80_174 = arith.constant 80 : index
    %139 = vector.load %arg12[%c0_173, %c80_174] : memref<5x484xbf16, #tpu.memory_space<vmem>>, vector<5x400xbf16>
    %c100 = arith.constant 100 : index
    %c0_175 = arith.constant 0 : index
    %140 = vector.load %arg14[%c100, %c0_175] : memref<1250x400xbf16, #tpu.memory_space<vmem>>, vector<5x400xbf16>
    tpu.vector_store %arg14[%c100, %c0_175], %139 {strides = array<i32>} : memref<1250x400xbf16, #tpu.memory_space<vmem>>, vector<5x400xbf16>,
    %c0_176 = arith.constant 0 : index
    %c81_177 = arith.constant 81 : index
    %141 = vector.load %arg12[%c0_176, %c81_177] : memref<5x484xbf16, #tpu.memory_space<vmem>>, vector<5x400xbf16>
    %c105 = arith.constant 105 : index
    %c0_178 = arith.constant 0 : index
    %142 = vector.load %arg14[%c105, %c0_178] : memref<1250x400xbf16, #tpu.memory_space<vmem>>, vector<5x400xbf16>
    tpu.vector_store %arg14[%c105, %c0_178], %141 {strides = array<i32>} : memref<1250x400xbf16, #tpu.memory_space<vmem>>, vector<5x400xbf16>,
    %c0_179 = arith.constant 0 : index
    %c82_180 = arith.constant 82 : index
    %143 = vector.load %arg12[%c0_179, %c82_180] : memref<5x484xbf16, #tpu.memory_space<vmem>>, vector<5x400xbf16>
    %c110 = arith.constant 110 : index
    %c0_181 = arith.constant 0 : index
    %144 = vector.load %arg14[%c110, %c0_181] : memref<1250x400xbf16, #tpu.memory_space<vmem>>, vector<5x400xbf16>
    tpu.vector_store %arg14[%c110, %c0_181], %143 {strides = array<i32>} : memref<1250x400xbf16, #tpu.memory_space<vmem>>, vector<5x400xbf16>,
    %c0_182 = arith.constant 0 : index
    %c83_183 = arith.constant 83 : index
    %145 = vector.load %arg12[%c0_182, %c83_183] : memref<5x484xbf16, #tpu.memory_space<vmem>>, vector<5x400xbf16>
    %c115 = arith.constant 115 : index
    %c0_184 = arith.constant 0 : index
    %146 = vector.load %arg14[%c115, %c0_184] : memref<1250x400xbf16, #tpu.memory_space<vmem>>, vector<5x400xbf16>
    tpu.vector_store %arg14[%c115, %c0_184], %145 {strides = array<i32>} : memref<1250x400xbf16, #tpu.memory_space<vmem>>, vector<5x400xbf16>,
    %c0_185 = arith.constant 0 : index
    %c84_186 = arith.constant 84 : index
    %147 = vector.load %arg12[%c0_185, %c84_186] : memref<5x484xbf16, #tpu.memory_space<vmem>>, vector<5x400xbf16>
    %c120 = arith.constant 120 : index
    %c0_187 = arith.constant 0 : index
    %148 = vector.load %arg14[%c120, %c0_187] : memref<1250x400xbf16, #tpu.memory_space<vmem>>, vector<5x400xbf16>
    tpu.vector_store %arg14[%c120, %c0_187], %147 {strides = array<i32>} : memref<1250x400xbf16, #tpu.memory_space<vmem>>, vector<5x400xbf16>,
    %c0_188 = arith.constant 0 : index
    %c0_189 = arith.constant 0 : index
    %149 = vector.load %arg5[%c0_188, %c0_189] : memref<50x125xbf16, #tpu.memory_space<vmem>>, vector<50x125xbf16>
    %c0_190 = arith.constant 0 : index
    %c0_191 = arith.constant 0 : index
    %150 = vector.load %arg14[%c0_190, %c0_191] : memref<1250x400xbf16, #tpu.memory_space<vmem>>, vector<125x400xbf16>
    %cst_192 = arith.constant dense<0.000000e+00> : vector<50x400xf32>
    %151 = tpu.matmul %149, %150, %cst_192 {dimension_numbers = #tpu.dot_dimension_numbers<[1], [0], [0], [1], [0, 0, 1, 1], [], []>} : vector<50x125xbf16>, vector<125x400xbf16>, vector<50x400xf32> -> vector<50x400xf32>
    %c0_193 = arith.constant 0 : index
    %c0_194 = arith.constant 0 : index
    %152 = vector.load %arg6[%c0_193, %c0_194] : memref<50x1xf32, #tpu.memory_space<vmem>>, vector<50x1xf32>
    %153 = vector.broadcast %152 : vector<50x1xf32> to vector<50x400xf32>
    %154 = arith.mulf %151, %153 : vector<50x400xf32>
    %c0_195 = arith.constant 0 : index
    %c0_196 = arith.constant 0 : index
    %155 = vector.load %arg7[%c0_195, %c0_196] : memref<50x1xf32, #tpu.memory_space<vmem>>, vector<50x1xf32>
    %156 = vector.broadcast %155 : vector<50x1xf32> to vector<50x400xf32>
    %157 = arith.addf %154, %156 : vector<50x400xf32>
    %cst_197 = arith.constant 0.000000e+00 : f32
    %cst_198 = arith.constant 6.000000e+00 : f32
    %158 = vector.broadcast %cst_197 : f32 to vector<50x400xf32>
    %159 = arith.maximumf %158, %157 : vector<50x400xf32>
    %160 = vector.broadcast %cst_198 : f32 to vector<50x400xf32>
    %161 = arith.minimumf %160, %159 : vector<50x400xf32>
    %162 = vector.broadcast %0 : vector<1x400xf32> to vector<50x400xf32>
    %163 = arith.mulf %161, %162 : vector<50x400xf32>
    %164 = arith.truncf %163 : vector<50x400xf32> to vector<50x400xbf16>
    %c0_199 = arith.constant 0 : index
    %c42_200 = arith.constant 42 : index
    %165 = vector.load %arg13[%c0_199, %c42_200] : memref<50x484xbf16, #tpu.memory_space<vmem>>, vector<50x400xbf16>
    tpu.vector_store %arg13[%c0_199, %c42_200], %164 {strides = array<i32>} : memref<50x484xbf16, #tpu.memory_space<vmem>>, vector<50x400xbf16>,
    %c0_201 = arith.constant 0 : index
    %c0_202 = arith.constant 0 : index
    %166 = vector.load %arg13[%c0_201, %c0_202] : memref<50x484xbf16, #tpu.memory_space<vmem>>, vector<50x400xbf16>
    %c0_203 = arith.constant 0 : index
    %c0_204 = arith.constant 0 : index
    %167 = vector.load %arg14[%c0_203, %c0_204] : memref<1250x400xbf16, #tpu.memory_space<vmem>>, vector<50x400xbf16>
    tpu.vector_store %arg14[%c0_203, %c0_204], %166 {strides = array<i32>} : memref<1250x400xbf16, #tpu.memory_space<vmem>>, vector<50x400xbf16>,
    %c0_205 = arith.constant 0 : index
    %c1_206 = arith.constant 1 : index
    %168 = vector.load %arg13[%c0_205, %c1_206] : memref<50x484xbf16, #tpu.memory_space<vmem>>, vector<50x400xbf16>
    %c50_207 = arith.constant 50 : index
    %c0_208 = arith.constant 0 : index
    %169 = vector.load %arg14[%c50_207, %c0_208] : memref<1250x400xbf16, #tpu.memory_space<vmem>>, vector<50x400xbf16>
    tpu.vector_store %arg14[%c50_207, %c0_208], %168 {strides = array<i32>} : memref<1250x400xbf16, #tpu.memory_space<vmem>>, vector<50x400xbf16>,
    %c0_209 = arith.constant 0 : index
    %c2_210 = arith.constant 2 : index
    %170 = vector.load %arg13[%c0_209, %c2_210] : memref<50x484xbf16, #tpu.memory_space<vmem>>, vector<50x400xbf16>
    %c100_211 = arith.constant 100 : index
    %c0_212 = arith.constant 0 : index
    %171 = vector.load %arg14[%c100_211, %c0_212] : memref<1250x400xbf16, #tpu.memory_space<vmem>>, vector<50x400xbf16>
    tpu.vector_store %arg14[%c100_211, %c0_212], %170 {strides = array<i32>} : memref<1250x400xbf16, #tpu.memory_space<vmem>>, vector<50x400xbf16>,
    %c0_213 = arith.constant 0 : index
    %c3_214 = arith.constant 3 : index
    %172 = vector.load %arg13[%c0_213, %c3_214] : memref<50x484xbf16, #tpu.memory_space<vmem>>, vector<50x400xbf16>
    %c150 = arith.constant 150 : index
    %c0_215 = arith.constant 0 : index
    %173 = vector.load %arg14[%c150, %c0_215] : memref<1250x400xbf16, #tpu.memory_space<vmem>>, vector<50x400xbf16>
    tpu.vector_store %arg14[%c150, %c0_215], %172 {strides = array<i32>} : memref<1250x400xbf16, #tpu.memory_space<vmem>>, vector<50x400xbf16>,
    %c0_216 = arith.constant 0 : index
    %c4_217 = arith.constant 4 : index
    %174 = vector.load %arg13[%c0_216, %c4_217] : memref<50x484xbf16, #tpu.memory_space<vmem>>, vector<50x400xbf16>
    %c200 = arith.constant 200 : index
    %c0_218 = arith.constant 0 : index
    %175 = vector.load %arg14[%c200, %c0_218] : memref<1250x400xbf16, #tpu.memory_space<vmem>>, vector<50x400xbf16>
    tpu.vector_store %arg14[%c200, %c0_218], %174 {strides = array<i32>} : memref<1250x400xbf16, #tpu.memory_space<vmem>>, vector<50x400xbf16>,
    %c0_219 = arith.constant 0 : index
    %c20_220 = arith.constant 20 : index
    %176 = vector.load %arg13[%c0_219, %c20_220] : memref<50x484xbf16, #tpu.memory_space<vmem>>, vector<50x400xbf16>
    %c250 = arith.constant 250 : index
    %c0_221 = arith.constant 0 : index
    %177 = vector.load %arg14[%c250, %c0_221] : memref<1250x400xbf16, #tpu.memory_space<vmem>>, vector<50x400xbf16>
    tpu.vector_store %arg14[%c250, %c0_221], %176 {strides = array<i32>} : memref<1250x400xbf16, #tpu.memory_space<vmem>>, vector<50x400xbf16>,
    %c0_222 = arith.constant 0 : index
    %c21_223 = arith.constant 21 : index
    %178 = vector.load %arg13[%c0_222, %c21_223] : memref<50x484xbf16, #tpu.memory_space<vmem>>, vector<50x400xbf16>
    %c300 = arith.constant 300 : index
    %c0_224 = arith.constant 0 : index
    %179 = vector.load %arg14[%c300, %c0_224] : memref<1250x400xbf16, #tpu.memory_space<vmem>>, vector<50x400xbf16>
    tpu.vector_store %arg14[%c300, %c0_224], %178 {strides = array<i32>} : memref<1250x400xbf16, #tpu.memory_space<vmem>>, vector<50x400xbf16>,
    %c0_225 = arith.constant 0 : index
    %c22_226 = arith.constant 22 : index
    %180 = vector.load %arg13[%c0_225, %c22_226] : memref<50x484xbf16, #tpu.memory_space<vmem>>, vector<50x400xbf16>
    %c350 = arith.constant 350 : index
    %c0_227 = arith.constant 0 : index
    %181 = vector.load %arg14[%c350, %c0_227] : memref<1250x400xbf16, #tpu.memory_space<vmem>>, vector<50x400xbf16>
    tpu.vector_store %arg14[%c350, %c0_227], %180 {strides = array<i32>} : memref<1250x400xbf16, #tpu.memory_space<vmem>>, vector<50x400xbf16>,
    %c0_228 = arith.constant 0 : index
    %c23_229 = arith.constant 23 : index
    %182 = vector.load %arg13[%c0_228, %c23_229] : memref<50x484xbf16, #tpu.memory_space<vmem>>, vector<50x400xbf16>
    %c400 = arith.constant 400 : index
    %c0_230 = arith.constant 0 : index
    %183 = vector.load %arg14[%c400, %c0_230] : memref<1250x400xbf16, #tpu.memory_space<vmem>>, vector<50x400xbf16>
    tpu.vector_store %arg14[%c400, %c0_230], %182 {strides = array<i32>} : memref<1250x400xbf16, #tpu.memory_space<vmem>>, vector<50x400xbf16>,
    %c0_231 = arith.constant 0 : index
    %c24_232 = arith.constant 24 : index
    %184 = vector.load %arg13[%c0_231, %c24_232] : memref<50x484xbf16, #tpu.memory_space<vmem>>, vector<50x400xbf16>
    %c450 = arith.constant 450 : index
    %c0_233 = arith.constant 0 : index
    %185 = vector.load %arg14[%c450, %c0_233] : memref<1250x400xbf16, #tpu.memory_space<vmem>>, vector<50x400xbf16>
    tpu.vector_store %arg14[%c450, %c0_233], %184 {strides = array<i32>} : memref<1250x400xbf16, #tpu.memory_space<vmem>>, vector<50x400xbf16>,
    %c0_234 = arith.constant 0 : index
    %c40_235 = arith.constant 40 : index
    %186 = vector.load %arg13[%c0_234, %c40_235] : memref<50x484xbf16, #tpu.memory_space<vmem>>, vector<50x400xbf16>
    %c500 = arith.constant 500 : index
    %c0_236 = arith.constant 0 : index
    %187 = vector.load %arg14[%c500, %c0_236] : memref<1250x400xbf16, #tpu.memory_space<vmem>>, vector<50x400xbf16>
    tpu.vector_store %arg14[%c500, %c0_236], %186 {strides = array<i32>} : memref<1250x400xbf16, #tpu.memory_space<vmem>>, vector<50x400xbf16>,
    %c0_237 = arith.constant 0 : index
    %c41_238 = arith.constant 41 : index
    %188 = vector.load %arg13[%c0_237, %c41_238] : memref<50x484xbf16, #tpu.memory_space<vmem>>, vector<50x400xbf16>
    %c550 = arith.constant 550 : index
    %c0_239 = arith.constant 0 : index
    %189 = vector.load %arg14[%c550, %c0_239] : memref<1250x400xbf16, #tpu.memory_space<vmem>>, vector<50x400xbf16>
    tpu.vector_store %arg14[%c550, %c0_239], %188 {strides = array<i32>} : memref<1250x400xbf16, #tpu.memory_space<vmem>>, vector<50x400xbf16>,
    %c0_240 = arith.constant 0 : index
    %c42_241 = arith.constant 42 : index
    %190 = vector.load %arg13[%c0_240, %c42_241] : memref<50x484xbf16, #tpu.memory_space<vmem>>, vector<50x400xbf16>
    %c600 = arith.constant 600 : index
    %c0_242 = arith.constant 0 : index
    %191 = vector.load %arg14[%c600, %c0_242] : memref<1250x400xbf16, #tpu.memory_space<vmem>>, vector<50x400xbf16>
    tpu.vector_store %arg14[%c600, %c0_242], %190 {strides = array<i32>} : memref<1250x400xbf16, #tpu.memory_space<vmem>>, vector<50x400xbf16>,
    %c0_243 = arith.constant 0 : index
    %c43_244 = arith.constant 43 : index
    %192 = vector.load %arg13[%c0_243, %c43_244] : memref<50x484xbf16, #tpu.memory_space<vmem>>, vector<50x400xbf16>
    %c650 = arith.constant 650 : index
    %c0_245 = arith.constant 0 : index
    %193 = vector.load %arg14[%c650, %c0_245] : memref<1250x400xbf16, #tpu.memory_space<vmem>>, vector<50x400xbf16>
    tpu.vector_store %arg14[%c650, %c0_245], %192 {strides = array<i32>} : memref<1250x400xbf16, #tpu.memory_space<vmem>>, vector<50x400xbf16>,
    %c0_246 = arith.constant 0 : index
    %c44_247 = arith.constant 44 : index
    %194 = vector.load %arg13[%c0_246, %c44_247] : memref<50x484xbf16, #tpu.memory_space<vmem>>, vector<50x400xbf16>
    %c700 = arith.constant 700 : index
    %c0_248 = arith.constant 0 : index
    %195 = vector.load %arg14[%c700, %c0_248] : memref<1250x400xbf16, #tpu.memory_space<vmem>>, vector<50x400xbf16>
    tpu.vector_store %arg14[%c700, %c0_248], %194 {strides = array<i32>} : memref<1250x400xbf16, #tpu.memory_space<vmem>>, vector<50x400xbf16>,
    %c0_249 = arith.constant 0 : index
    %c60_250 = arith.constant 60 : index
    %196 = vector.load %arg13[%c0_249, %c60_250] : memref<50x484xbf16, #tpu.memory_space<vmem>>, vector<50x400xbf16>
    %c750 = arith.constant 750 : index
    %c0_251 = arith.constant 0 : index
    %197 = vector.load %arg14[%c750, %c0_251] : memref<1250x400xbf16, #tpu.memory_space<vmem>>, vector<50x400xbf16>
    tpu.vector_store %arg14[%c750, %c0_251], %196 {strides = array<i32>} : memref<1250x400xbf16, #tpu.memory_space<vmem>>, vector<50x400xbf16>,
    %c0_252 = arith.constant 0 : index
    %c61_253 = arith.constant 61 : index
    %198 = vector.load %arg13[%c0_252, %c61_253] : memref<50x484xbf16, #tpu.memory_space<vmem>>, vector<50x400xbf16>
    %c800 = arith.constant 800 : index
    %c0_254 = arith.constant 0 : index
    %199 = vector.load %arg14[%c800, %c0_254] : memref<1250x400xbf16, #tpu.memory_space<vmem>>, vector<50x400xbf16>
    tpu.vector_store %arg14[%c800, %c0_254], %198 {strides = array<i32>} : memref<1250x400xbf16, #tpu.memory_space<vmem>>, vector<50x400xbf16>,
    %c0_255 = arith.constant 0 : index
    %c62_256 = arith.constant 62 : index
    %200 = vector.load %arg13[%c0_255, %c62_256] : memref<50x484xbf16, #tpu.memory_space<vmem>>, vector<50x400xbf16>
    %c850 = arith.constant 850 : index
    %c0_257 = arith.constant 0 : index
    %201 = vector.load %arg14[%c850, %c0_257] : memref<1250x400xbf16, #tpu.memory_space<vmem>>, vector<50x400xbf16>
    tpu.vector_store %arg14[%c850, %c0_257], %200 {strides = array<i32>} : memref<1250x400xbf16, #tpu.memory_space<vmem>>, vector<50x400xbf16>,
    %c0_258 = arith.constant 0 : index
    %c63_259 = arith.constant 63 : index
    %202 = vector.load %arg13[%c0_258, %c63_259] : memref<50x484xbf16, #tpu.memory_space<vmem>>, vector<50x400xbf16>
    %c900 = arith.constant 900 : index
    %c0_260 = arith.constant 0 : index
    %203 = vector.load %arg14[%c900, %c0_260] : memref<1250x400xbf16, #tpu.memory_space<vmem>>, vector<50x400xbf16>
    tpu.vector_store %arg14[%c900, %c0_260], %202 {strides = array<i32>} : memref<1250x400xbf16, #tpu.memory_space<vmem>>, vector<50x400xbf16>,
    %c0_261 = arith.constant 0 : index
    %c64_262 = arith.constant 64 : index
    %204 = vector.load %arg13[%c0_261, %c64_262] : memref<50x484xbf16, #tpu.memory_space<vmem>>, vector<50x400xbf16>
    %c950 = arith.constant 950 : index
    %c0_263 = arith.constant 0 : index
    %205 = vector.load %arg14[%c950, %c0_263] : memref<1250x400xbf16, #tpu.memory_space<vmem>>, vector<50x400xbf16>
    tpu.vector_store %arg14[%c950, %c0_263], %204 {strides = array<i32>} : memref<1250x400xbf16, #tpu.memory_space<vmem>>, vector<50x400xbf16>,
    %c0_264 = arith.constant 0 : index
    %c80_265 = arith.constant 80 : index
    %206 = vector.load %arg13[%c0_264, %c80_265] : memref<50x484xbf16, #tpu.memory_space<vmem>>, vector<50x400xbf16>
    %c1000 = arith.constant 1000 : index
    %c0_266 = arith.constant 0 : index
    %207 = vector.load %arg14[%c1000, %c0_266] : memref<1250x400xbf16, #tpu.memory_space<vmem>>, vector<50x400xbf16>
    tpu.vector_store %arg14[%c1000, %c0_266], %206 {strides = array<i32>} : memref<1250x400xbf16, #tpu.memory_space<vmem>>, vector<50x400xbf16>,
    %c0_267 = arith.constant 0 : index
    %c81_268 = arith.constant 81 : index
    %208 = vector.load %arg13[%c0_267, %c81_268] : memref<50x484xbf16, #tpu.memory_space<vmem>>, vector<50x400xbf16>
    %c1050 = arith.constant 1050 : index
    %c0_269 = arith.constant 0 : index
    %209 = vector.load %arg14[%c1050, %c0_269] : memref<1250x400xbf16, #tpu.memory_space<vmem>>, vector<50x400xbf16>
    tpu.vector_store %arg14[%c1050, %c0_269], %208 {strides = array<i32>} : memref<1250x400xbf16, #tpu.memory_space<vmem>>, vector<50x400xbf16>,
    %c0_270 = arith.constant 0 : index
    %c82_271 = arith.constant 82 : index
    %210 = vector.load %arg13[%c0_270, %c82_271] : memref<50x484xbf16, #tpu.memory_space<vmem>>, vector<50x400xbf16>
    %c1100 = arith.constant 1100 : index
    %c0_272 = arith.constant 0 : index
    %211 = vector.load %arg14[%c1100, %c0_272] : memref<1250x400xbf16, #tpu.memory_space<vmem>>, vector<50x400xbf16>
    tpu.vector_store %arg14[%c1100, %c0_272], %210 {strides = array<i32>} : memref<1250x400xbf16, #tpu.memory_space<vmem>>, vector<50x400xbf16>,
    %c0_273 = arith.constant 0 : index
    %c83_274 = arith.constant 83 : index
    %212 = vector.load %arg13[%c0_273, %c83_274] : memref<50x484xbf16, #tpu.memory_space<vmem>>, vector<50x400xbf16>
    %c1150 = arith.constant 1150 : index
    %c0_275 = arith.constant 0 : index
    %213 = vector.load %arg14[%c1150, %c0_275] : memref<1250x400xbf16, #tpu.memory_space<vmem>>, vector<50x400xbf16>
    tpu.vector_store %arg14[%c1150, %c0_275], %212 {strides = array<i32>} : memref<1250x400xbf16, #tpu.memory_space<vmem>>, vector<50x400xbf16>,
    %c0_276 = arith.constant 0 : index
    %c84_277 = arith.constant 84 : index
    %214 = vector.load %arg13[%c0_276, %c84_277] : memref<50x484xbf16, #tpu.memory_space<vmem>>, vector<50x400xbf16>
    %c1200 = arith.constant 1200 : index
    %c0_278 = arith.constant 0 : index
    %215 = vector.load %arg14[%c1200, %c0_278] : memref<1250x400xbf16, #tpu.memory_space<vmem>>, vector<50x400xbf16>
    tpu.vector_store %arg14[%c1200, %c0_278], %214 {strides = array<i32>} : memref<1250x400xbf16, #tpu.memory_space<vmem>>, vector<50x400xbf16>,
    %c0_279 = arith.constant 0 : index
    %c0_280 = arith.constant 0 : index
    %216 = vector.load %arg8[%c0_279, %c0_280] : memref<3x1250xbf16, #tpu.memory_space<vmem>>, vector<3x1250xbf16>
    %c0_281 = arith.constant 0 : index
    %c0_282 = arith.constant 0 : index
    %217 = vector.load %arg14[%c0_281, %c0_282] : memref<1250x400xbf16, #tpu.memory_space<vmem>>, vector<1250x400xbf16>
    %cst_283 = arith.constant dense<0.000000e+00> : vector<3x400xf32>
    %218 = tpu.matmul %216, %217, %cst_283 {dimension_numbers = #tpu.dot_dimension_numbers<[1], [0], [0], [1], [0, 0, 1, 1], [], []>} : vector<3x1250xbf16>, vector<1250x400xbf16>, vector<3x400xf32> -> vector<3x400xf32>
    %c0_284 = arith.constant 0 : index
    %c0_285 = arith.constant 0 : index
    %219 = vector.load %arg9[%c0_284, %c0_285] : memref<3x1xf32, #tpu.memory_space<vmem>>, vector<3x1xf32>
    %220 = vector.broadcast %219 : vector<3x1xf32> to vector<3x400xf32>
    %221 = arith.addf %218, %220 : vector<3x400xf32>
    %c0_286 = arith.constant 0 : index
    %c0_287 = arith.constant 0 : index
    %c0_288 = arith.constant 0 : index
    %222 = vector.load %arg11[%c0_286, %c0_287, %c0_288] : memref<1x3x400xf32, #tpu.memory_space<vmem>>, vector<1x3x400xf32>
    %223 = vector.shape_cast %222 : vector<1x3x400xf32> to vector<3x400xf32>
    %224 = vector.shape_cast %221 : vector<3x400xf32> to vector<1x3x400xf32>
    tpu.vector_store %arg11[%c0_286, %c0_287, %c0_288], %224 {strides = array<i32>} : memref<1x3x400xf32, #tpu.memory_space<vmem>>, vector<1x3x400xf32>,
    return
  }
  func.func @transform_0(%arg0: i32) -> (i32, i32, i32) {
    %c0_i32 = arith.constant 0 : i32
    %c0_i32_0 = arith.constant 0 : i32
    %c0_i32_1 = arith.constant 0 : i32
    return %arg0, %c0_i32, %c0_i32_0 : i32, i32, i32
  }
  func.func @transform_1(%arg0: i32) -> (i32, i32) {
    %c0_i32 = arith.constant 0 : i32
    %c0_i32_0 = arith.constant 0 : i32
    %c0_i32_1 = arith.constant 0 : i32
    return %c0_i32, %c0_i32_0 : i32, i32
  }
  func.func @transform_2(%arg0: i32) -> (i32, i32) {
    %c0_i32 = arith.constant 0 : i32
    %c0_i32_0 = arith.constant 0 : i32
    %c0_i32_1 = arith.constant 0 : i32
    return %c0_i32, %c0_i32_0 : i32, i32
  }
  func.func @transform_3(%arg0: i32) -> (i32, i32) {
    %c0_i32 = arith.constant 0 : i32
    %c0_i32_0 = arith.constant 0 : i32
    %c0_i32_1 = arith.constant 0 : i32
    return %c0_i32, %c0_i32_0 : i32, i32
  }
  func.func @transform_4(%arg0: i32) -> (i32, i32) {
    %c0_i32 = arith.constant 0 : i32
    %c0_i32_0 = arith.constant 0 : i32
    %c0_i32_1 = arith.constant 0 : i32
    return %c0_i32, %c0_i32_0 : i32, i32
  }
  func.func @transform_5(%arg0: i32) -> (i32, i32) {
    %c0_i32 = arith.constant 0 : i32
    %c0_i32_0 = arith.constant 0 : i32
    %c0_i32_1 = arith.constant 0 : i32
    return %c0_i32, %c0_i32_0 : i32, i32
  }
  func.func @transform_6(%arg0: i32) -> (i32, i32) {
    %c0_i32 = arith.constant 0 : i32
    %c0_i32_0 = arith.constant 0 : i32
    %c0_i32_1 = arith.constant 0 : i32
    return %c0_i32, %c0_i32_0 : i32, i32
  }
  func.func @transform_7(%arg0: i32) -> (i32, i32) {
    %c0_i32 = arith.constant 0 : i32
    %c0_i32_0 = arith.constant 0 : i32
    %c0_i32_1 = arith.constant 0 : i32
    return %c0_i32, %c0_i32_0 : i32, i32
  }
  func.func @transform_8(%arg0: i32) -> (i32, i32) {
    %c0_i32 = arith.constant 0 : i32
    %c0_i32_0 = arith.constant 0 : i32
    %c0_i32_1 = arith.constant 0 : i32
    return %c0_i32, %c0_i32_0 : i32, i32
  }
  func.func @transform_9(%arg0: i32) -> (i32, i32) {
    %c0_i32 = arith.constant 0 : i32
    %c0_i32_0 = arith.constant 0 : i32
    %c0_i32_1 = arith.constant 0 : i32
    return %c0_i32, %c0_i32_0 : i32, i32
  }
  func.func @transform_10(%arg0: i32) -> (i32, i32, i32) {
    %c0_i32 = arith.constant 0 : i32
    %c0_i32_0 = arith.constant 0 : i32
    %c0_i32_1 = arith.constant 0 : i32
    return %arg0, %c0_i32, %c0_i32_0 : i32, i32, i32
  }
}

</mosaic_0001>

<bundles_post_ra>
// kernel: image_encoder_forward.1
= control target key start
LH: loop header
LB: loop body
LE: loop exit
PB: predicated region body
PF: predicated region fallthrough
CT: control target
= control target key end

     0   :  { %s10338_s13 = smov 0   ;;  %s14474_s0 = inlined_call_operand.vmem [shape: bf16[2,4,484], index: 0, kind: input, shape index: {}]   ;;  %s14475_s1 = inlined_call_operand.vmem [shape: bf16[5,100], index: 1, kind: input, shape index: {}]   ;;  %s14476_s2 = inlined_call_operand.vmem [shape: f32[5,1], index: 2, kind: input, shape index: {}]   ;;  %s14477_s3 = inlined_call_operand.vmem [shape: f32[5,1], index: 3, kind: input, shape index: {}]   ;;  %s14478_s4 = inlined_call_operand.vmem [shape: bf16[50,125], index: 4, kind: input, shape index: {}]   ;;  %s14479_s5 = inlined_call_operand.vmem [shape: f32[50,1], index: 5, kind: input, shape index: {}]   ;;  %s14480_s6 = inlined_call_operand.vmem [shape: f32[50,1], index: 6, kind: input, shape index: {}]   ;;  %s14481_s7 = inlined_call_operand.vmem [shape: bf16[3,1250], index: 7, kind: input, shape index: {}]   ;;  %s14482_s8 = inlined_call_operand.vmem [shape: f32[3,1], index: 8, kind: input, shape index: {}]   ;;  %s14483_s9 = inlined_call_operand.vmem [shape: f32[1,400], index: 9, kind: input, shape index: {}]   ;;  %s14484_s10 = inlined_call_operand.vmem [shape: f32[2,3,400], index: 10, kind: output, shape index: {}]  }
   0x1   :  { %14594 = sst [smem:[#allocation5_spill]] %s14474_s0 }
   0x2   :  { %14595 = sst [smem:[#allocation6_spill]] %s14475_s1 }
   0x3   :  { %14596 = sst [smem:[#allocation7_spill]] %s14476_s2 }
   0x4   :  { %14597 = sst [smem:[#allocation8_spill]] %s14477_s3 }
   0x5 LB: > { %s9261_s14 = sadd.s32 4294967295, %s10253_s13   ;;  %p9265_p0 = scmp.ge.s32.totalorder %s10253_s13, 1  ;;  %s10253_s13 = sphi %s10338_s13, %s20_s13  }
   0x6   : > { %p312_p1 = scmp.lt.s32.totalorder %s10253_s13, 3 }
   0x8   : > { %p313_p2 = pnand %p9265_p0, %p312_p1 }
   0x9   : > { %p350_p3 = scmp.lt.s32.totalorder (!%p313_p2), %s9261_s14, 1  ;;  %s14598_s0 = sld [smem:[#allocation5_spill]] (!%p313_p2) }
   0xa   : > { %316 = sbr.rel (%p313_p2) target bundleno = 2338 (0x922), region = 60  ;;  %s14543_s19 = smov (!%p313_p2), 44  }
   0xb   : > { %s14553_s20 = smov (!%p313_p2), 48   ;;  %s14489_s21 = smov (!%p313_p2), 47  }
   0xc   : > { %s14545_s22 = smov (!%p313_p2), 46   ;;  %s14495_s23 = smov (!%p313_p2), 45  }
   0xd   : > { %s14555_s24 = smov (!%p313_p2), 67   ;;  %s14487_s25 = smov (!%p313_p2), 66  }
   0xe   : > { %s14547_s26 = smov (!%p313_p2), 65   ;;  %s14507_s27 = smov (!%p313_p2), 64  }
   0xf   : > { %v404_v0 = vlaneseq  ;;  %v10255_v1 = vmov 1983009808   ;;  %s15368_s14 = smov (!%p350_p3, %s9261_s14), 1  ;;  %vm14529_vm0 = vcmask 1041408   ;;  %vm14527_vm1 = vcmask 128004   ;;  %s14515_s28 = smov 86  }
  0x10   : > { %v402_v2 = vunpack.c.l.s4 %v10255_v1  ;;  %s9686_s15 = sshll.u32 %s15368_s14, 3  ;;  %vm10369_vm2 = vmor %vm14527_vm1, %vm14529_vm0  ;;  %s14501_s29 = smov 85   ;;  %v10280_v13 = vmov 0   ;;  %v2844_v16 = vld [vmem:[%s14479_s5] sm:$0xff]  ;;  %v2845_v17 = vld [vmem:[%s14479_s5 + $0x8] sm:$0xff]  ;;  %vm14521_vm3 = vcmask 1043458  }
  0x11   : > { %v10348_v3 = vshrl.u32 %v404_v0, 7  ;;  %s354_s18 = scalar_lea.vmem %s14598_s0, %s9686_s15  ;;  %s14549_s30 = smov 84   ;;  %1368 = vmatprep.mubr.bf16.mxu0 %v10280_v13  ;;  %1409 = vmatprep.mubr.bf16.mxu1 %v10280_v13  ;;  %v2846_v18 = vld [vmem:[%s14479_s5 + $0x10] sm:$0xff]  ;;  %v2847_v19 = vld [vmem:[%s14479_s5 + $0x18] sm:$0xff]  ;;  %v2848_v20 = vld [vmem:[%s14479_s5 + $0x20] sm:$0xff]  ;;  %vm14519_vm4 = vcmask 130054  }
  0x12   : > { %v403_v4 = vunpack.c.0.s8 %v402_v2  ;;  %v1132_v6 = vld [vmem:[%s354_s18] sm:$0xff]  ;;  %s14491_s11 = smov 68   ;;  %s14575_s12 = smov 105   ;;  %9740 = vset.pattern.permute.xlu0 %v10280_v13  ;;  %9741 = vset.pattern.permute.xlu1 %v10280_v13  ;;  %v2849_v21 = vld [vmem:[%s14479_s5 + $0x28] sm:$0xff]  ;;  %v2916_v23 = vld [vmem:[%s14480_s6 + $0x10] sm:$0xff]  ;;  %vm14568_vm5 = vcmask 1043456  }
  0x13   : > { %v1134_v8 = vcombine.high %v1132_v6, %v1132_v6  ;;  %9270 = vst.sshfl [vmem:[#allocation4] sm:$0xf pattern:$0x76325410] %v1132_v6  ;;  %v1041_v10 = vcombine.low %v1132_v6, %v1132_v6  ;;  %s14485_s15 = smov 104   ;;  %s14551_s16 = smov 88   ;;  %vm10519_vm8 = vmor %vm14519_vm4, %vm14521_vm3 }
  0x14   : > { %v10355_v5 = vsub.s32 %v403_v4, %v10348_v3  ;;  %s14503_s17 = smov 87   ;;  %s14511_s18 = smov 124   ;;  %v2915_v22 = vld [vmem:[%s14480_s6 + $0x8] sm:$0xff]  ;;  %v2917_v26 = vld [vmem:[%s14480_s6 + $0x18] sm:$0xff]  ;;  %v2850_v27 = vld [vmem:[%s14479_s5 + $0x30] sm:$0x3] }
  0x15   : > { %s14601_s2 = sld [smem:[#allocation7_spill]]  ;;  %vm14557_vm6 = vcmask 359424   ;;  %vm14518_vm7 = vcmask 384000   ;;  %v2914_v30 = vld [vmem:[%s14480_s6] sm:$0xff]  ;;  %vm14540_vm9 = vcmask 392192   ;;  %v2919_v42 = vld [vmem:[%s14480_s6 + $0x28] sm:$0xff] }
  0x16   : > { %v10358_v7 = vrot.slane %v1132_v6, %v10355_v5  ;;  %v10365_v9 = vrot.slane %v1134_v8, %v10355_v5  ;;  %v10381_v12 = vrot.slane %v1041_v10, %v10355_v5  ;;  %s14602_s3 = sld [smem:[#allocation8_spill]]  ;;  %v2918_v31 = vld [vmem:[%s14480_s6 + $0x20] sm:$0xff]  ;;  %v2920_v43 = vld [vmem:[%s14480_s6 + $0x30] sm:$0x3]  ;;  %vm14539_vm10 = vcmask 375808   ;;  %s14819_s0 = smov 67  }
  0x17   : > { %vm14523_vm11 = vcmask 367616   ;;  %vm14558_vm12 = vcmask 547840   ;;  %vm14517_vm13 = vcmask 539648   ;;  %vm14541_vm14 = vcmask 531456   ;;  %s14605_s1 = sld [smem:[#allocation6_spill]] }
  0x18   : > { %1149 = vrot.lane.b32.xlu0 %v10358_v7, %s14543_s19  ;;  %1025 = vrot.lane.b32.xlu1 %v10358_v7, %s14553_s20  ;;  %414 = vst.msk [vmem:[#allocation4 + $0x8] sm:$0x33] %vm10369_vm2, %v10365_v9  ;;  %vm14525_vm15 = vcmask 523264   ;;  %vm14534_vm4 = vcmask 687104   ;;  %vm14559_vm3 = vcmask 859136   ;;  %vm14530_vm1 = vcmask 875520  }
  0x1b   : > { %v1418_v14 = vld [vmem:[%s14601_s2] sm:$0x1f]  ;;  %s14829_s2 = smov 84  }
  0x1c   : > { %1151 = vrot.lane.b32.xlu0 %v10365_v9, %s14543_s19  ;;  %1058 = vrot.lane.b32.xlu1 %v10358_v7, %s14489_s21  ;;  %v1428_v15 = vld [vmem:[%s14602_s3] sm:$0x1f]  ;;  %s15014_s3 = smov 65  }
  0x20   : > { %1056 = vrot.lane.b32.xlu0 %v10381_v12, %s14489_s21  ;;  %1027 = vrot.lane.b32.xlu1 %v10365_v9, %s14553_s20  ;;  %s14499_s21 = smov 106  }
  0x24   : > { %1087 = vrot.lane.b32.xlu0 %v10358_v7, %s14545_s22  ;;  %1089 = vrot.lane.b32.xlu1 %v10365_v9, %s14545_s22 }
  0x28   : > { %1118 = vrot.lane.b32.xlu0 %v10381_v12, %s14495_s23  ;;  %1120 = vrot.lane.b32.xlu1 %v10358_v7, %s14495_s23  ;;  %s14505_s23 = smov 125  }
  0x2c   : > { %901 = vrot.lane.b32.xlu0 %v10358_v7, %s14555_s24  ;;  %903 = vrot.lane.b32.xlu1 %v10365_v9, %s14555_s24 }
  0x30   : > { %932 = vrot.lane.b32.xlu0 %v10381_v12, %s14487_s25  ;;  %934 = vrot.lane.b32.xlu1 %v10358_v7, %s14487_s25  ;;  %s14509_s25 = smov 107  }
  0x34   : > { %963 = vrot.lane.b32.xlu0 %v10358_v7, %s14547_s26  ;;  %965 = vrot.lane.b32.xlu1 %v10365_v9, %s14547_s26 }
  0x38   : > { %994 = vrot.lane.b32.xlu0 %v10381_v12, %s14507_s27  ;;  %996 = vrot.lane.b32.xlu1 %v10358_v7, %s14507_s27  ;;  %s14626_s27 = smov 45  }
  0x3c   : > { %777 = vrot.lane.b32.xlu0 %v10358_v7, %s14515_s28  ;;  %779 = vrot.lane.b32.xlu1 %v10365_v9, %s14515_s28  ;;  %s14617_s28 = smov 126  }
  0x40   : > { %808 = vrot.lane.b32.xlu0 %v10381_v12, %s14501_s29  ;;  %810 = vrot.lane.b32.xlu1 %v10358_v7, %s14501_s29  ;;  %s14623_s29 = smov 87  }
  0x44   : > { %839 = vrot.lane.b32.xlu0 %v10358_v7, %s14549_s30  ;;  %841 = vrot.lane.b32.xlu1 %v10365_v9, %s14549_s30 }
  0x48   : > { %870 = vrot.lane.b32.xlu0 %v10381_v12, %s14491_s11  ;;  %872 = vrot.lane.b32.xlu1 %v10358_v7, %s14491_s11  ;;  %s14497_s11 = smov 127  }
  0x4c   : > { %653 = vrot.lane.b32.xlu0 %v10358_v7, %s14575_s12  ;;  %655 = vrot.lane.b32.xlu1 %v10365_v9, %s14575_s12 }
  0x50   : > { %684 = vrot.lane.b32.xlu0 %v10381_v12, %s14485_s15  ;;  %686 = vrot.lane.b32.xlu1 %v10358_v7, %s14485_s15  ;;  %s14493_s15 = smov 108  }
  0x54   : > { %715 = vrot.lane.b32.xlu0 %v10358_v7, %s14551_s16  ;;  %717 = vrot.lane.b32.xlu1 %v10365_v9, %s14551_s16 }
  0x58   : > { %746 = vrot.lane.b32.xlu0 %v10381_v12, %s14503_s17  ;;  %748 = vrot.lane.b32.xlu1 %v10358_v7, %s14503_s17  ;;  %s14624_s17 = smov 125  }
  0x5c   : > { %529 = vrot.lane.b32.xlu0 %v10358_v7, %s14511_s18  ;;  %531 = vrot.lane.b32.xlu1 %v10365_v9, %s14511_s18  ;;  %s14616_s18 = smov 86  }
  0x60   : > { %560 = vrot.lane.b32.xlu0 %v10381_v12, %s14493_s15  ;;  %562 = vrot.lane.b32.xlu1 %v10358_v7, %s14493_s15  ;;  %s14513_s15 = smov 126  }
  0x64   : > { %591 = vrot.lane.b32.xlu0 %v10358_v7, %s14509_s25  ;;  %593 = vrot.lane.b32.xlu1 %v10365_v9, %s14509_s25  ;;  %s14577_s25 = smov 42  }
  0x68   : > { %622 = vrot.lane.b32.xlu0 %v10381_v12, %s14499_s21  ;;  %624 = vrot.lane.b32.xlu1 %v10358_v7, %s14499_s21  ;;  %s14621_s21 = smov 107  }
  0x6c   : > { %434 = vrot.lane.b32.xlu1 %v10358_v7, %s14497_s11  ;;  %432 = vrot.lane.b32.xlu0 %v10381_v12, %s14497_s11  ;;  %s14622_s11 = smov 64  }
  0x70   : > { %469 = vrot.lane.b32.xlu1 %v10365_v9, %s14513_s15  ;;  %467 = vrot.lane.b32.xlu0 %v10358_v7, %s14513_s15  ;;  %s14618_s15 = smov 124  }
  0x74   : > { %500 = vrot.lane.b32.xlu1 %v10358_v7, %s14505_s23  ;;  %498 = vrot.lane.b32.xlu0 %v10381_v12, %s14505_s23  ;;  %s14625_s23 = smov 85  }
  0x78   : > { %1421 = vperm.xlu0 %9740, %v1418_v14   ;;  %1431 = vperm.xlu1 %9741, %v1428_v15  }
  0x7c   : > { %2853 = vperm.xlu0 %9740, %v2844_v16   ;;  %2858 = vperm.xlu1 %9741, %v2845_v17  }
  0x80   : > { %2863 = vperm.xlu0 %9740, %v2846_v18   ;;  %2868 = vperm.xlu1 %9741, %v2847_v19  }
  0x84   : > { %2873 = vperm.xlu0 %9740, %v2848_v20   ;;  %2878 = vperm.xlu1 %9741, %v2849_v21  }
  0x88   : > { %2928 = vperm.xlu0 %9740, %v2915_v22   ;;  %2933 = vperm.xlu1 %9741, %v2916_v23  }
  0x8a   : > { %v1150_v24 = vpop.permute.xlu0 %1149  ;;  %v1026_v25 = vpop.permute.xlu1 %1025 }
  0x8b   : > { %v1153_v32 = vrot.slane %v1150_v24, 4  ;;  %v1029_v44 = vrot.slane %v1026_v25, 4 }
  0x8c   : > { %2938 = vperm.xlu0 %9740, %v2917_v26   ;;  %2883 = vperm.xlu1 %9741, %v2850_v27  }
  0x8e   : > { %v1152_v28 = vpop.permute.xlu0 %1151  ;;  %v1059_v29 = vpop.permute.xlu1 %1058 }
  0x8f   : > { %v1154_v33 = vrot.slane %v1152_v28, 4  ;;  %v1061_v35 = vrot.slane %v1059_v29, 4 }
  0x90   : > { %2923 = vperm.xlu0 %9740, %v2914_v30   ;;  %2943 = vperm.xlu1 %9741, %v2918_v31  }
  0x91   : > { %v1155_v36 = vsel %vm14568_vm5, %v1153_v32, %v1154_v33  ;;  %v1158_v37 = vsel %vm14557_vm6, %v1152_v28, %v1154_v33  ;;  %v1065_v38 = vsel %vm14518_vm7, %v1059_v29, %v1061_v35 }
  0x92   : > { %v1157_v39 = vsel %vm14557_vm6, %v1150_v24, %v1155_v36  ;;  %1162 = vst.msk [vmem:[#allocation4 + $0xc8] sm:$0x33] %vm10369_vm2, %v1158_v37  ;;  %v1057_v40 = vpop.permute.xlu0 %1056  ;;  %v1028_v41 = vpop.permute.xlu1 %1027 }
  0x93   : > { %1069 = vst.msk [vmem:[#allocation4 + $0xa8] sm:$0xcc] %vm10519_vm8, %v1065_v38  ;;  %1161 = vst [vmem:[#allocation4 + $0xc0] sm:$0x33] %v1157_v39  ;;  %v1060_v45 = vrot.slane %v1057_v40, 4  ;;  %v1030_v46 = vrot.slane %v1028_v41, 4 }
  0x94   : > { %2948 = vperm.xlu0 %9740, %v2919_v42   ;;  %2953 = vperm.xlu1 %9741, %v2920_v43  }
  0x95   : > { %v1062_v47 = vsel %vm14568_vm5, %v1060_v45, %v1061_v35  ;;  %v1031_v48 = vsel %vm14568_vm5, %v1029_v44, %v1030_v46  ;;  %v1034_v49 = vsel %vm14540_vm9, %v1028_v41, %v1030_v46 }
  0x96   : > { %v1064_v50 = vsel %vm14518_vm7, %v1057_v40, %v1062_v47  ;;  %v1033_v51 = vsel %vm14540_vm9, %v1026_v25, %v1031_v48  ;;  %1038 = vst.msk [vmem:[#allocation4 + $0xa8] sm:$0x33] %vm10369_vm2, %v1034_v49  ;;  %v1088_v52 = vpop.permute.xlu0 %1087  ;;  %v1090_v53 = vpop.permute.xlu1 %1089  ;;  %vm14520_vm7 = vcmask 695296  }
  0x97   : > { %1068 = vst [vmem:[#allocation4 + $0xa0] sm:$0xcc] %v1064_v50  ;;  %1037 = vst [vmem:[#allocation4 + $0xa0] sm:$0x33] %v1033_v51  ;;  %v1091_v54 = vrot.slane %v1088_v52, 4  ;;  %v1092_v55 = vrot.slane %v1090_v53, 4 }
  0x99   : > { %v1093_v56 = vsel %vm14568_vm5, %v1091_v54, %v1092_v55  ;;  %v1096_v57 = vsel %vm14539_vm10, %v1090_v53, %v1092_v55  ;;  %v1189_v58 = vld [vmem:[#allocation4 + $0xc8] sm:$0x33] }
  0x9a   : > { %v1095_v59 = vsel %vm14539_vm10, %v1088_v52, %v1093_v56  ;;  %1100 = vst.msk [vmem:[#allocation4 + $0xb8] sm:$0x33] %vm10369_vm2, %v1096_v57  ;;  %v1119_v60 = vpop.permute.xlu0 %1118  ;;  %v1121_v61 = vpop.permute.xlu1 %1120  ;;  %v9298_v62 = vcombine.high %v1189_v58, %v1189_v58  ;;  %v1188_v63 = vld [vmem:[#allocation4 + $0xc0] sm:$0x33]  ;;  %v9297_v0 = vcombine.low %v1189_v58, %v1189_v58 }
  0x9b   : > { %1099 = vst [vmem:[#allocation4 + $0xb0] sm:$0x33] %v1095_v59  ;;  %v1122_v1 = vrot.slane %v1119_v60, 4  ;;  %v1123_v2 = vrot.slane %v1121_v61, 4  ;;  %v9296_v4 = vcombine.high %v1188_v63, %v1188_v63  ;;  %v9295_v6 = vcombine.low %v1188_v63, %v1188_v63 }
  0x9c   : > { %9301 = vmatprep.subr.msk.bf16.mxu1 %vm14529_vm0, %v9298_v62  ;;  %v1331_v7 = vsel %vm14529_vm0, %v9297_v0, 0 }
  0x9d   : > { %v1124_v8 = vsel %vm14568_vm5, %v1122_v1, %v1123_v2  ;;  %v1127_v9 = vsel %vm14523_vm11, %v1121_v61, %v1123_v2  ;;  %9299 = vmatprep.subr.msk.bf16.mxu0 %vm14529_vm0, %v9296_v4  ;;  %1380 = vmatpush1.bf16.msra.mxu1 %v1331_v7  ;;  %v1325_v10 = vsel %vm14529_vm0, %v9295_v6, 0  ;;  %vm14532_vm0 = vcmask 1039360  }
  0x9e   : > { %v1126_v12 = vsel %vm14523_vm11, %v1119_v60, %v1124_v8  ;;  %1131 = vst.msk [vmem:[#allocation4 + $0xb8] sm:$0xcc] %vm10519_vm8, %v1127_v9  ;;  %1339 = vmatpush1.bf16.msra.mxu0 %v1325_v10  ;;  %v902_v14 = vpop.permute.xlu0 %901  ;;  %v904_v15 = vpop.permute.xlu1 %903  ;;  %vm14538_vm11 = vcmask 719872  }
  0x9f   : > { %1130 = vst [vmem:[#allocation4 + $0xb0] sm:$0xcc] %v1126_v12  ;;  %v905_v16 = vrot.slane %v902_v14, 4  ;;  %v906_v17 = vrot.slane %v904_v15, 4 }
  0xa1   : > { %v907_v18 = vsel %vm14568_vm5, %v905_v16, %v906_v17  ;;  %v910_v19 = vsel %vm14558_vm12, %v904_v15, %v906_v17 }
  0xa2   : > { %v909_v20 = vsel %vm14558_vm12, %v902_v14, %v907_v18  ;;  %914 = vst.msk [vmem:[#allocation4 + $0x88] sm:$0x33] %vm10369_vm2, %v910_v19  ;;  %v933_v21 = vpop.permute.xlu0 %932  ;;  %v935_v22 = vpop.permute.xlu1 %934 }
  0xa3   : > { %913 = vst [vmem:[#allocation4 + $0x80] sm:$0x33] %v909_v20  ;;  %v936_v23 = vrot.slane %v933_v21, 4  ;;  %v937_v24 = vrot.slane %v935_v22, 4 }
  0xa5   : > { %v938_v25 = vsel %vm14568_vm5, %v936_v23, %v937_v24  ;;  %v941_v26 = vsel %vm14517_vm13, %v935_v22, %v937_v24  ;;  %v9763_v27 = vld [vmem:[#allocation4 + $0xac] ss:$16 sps:$4 sm:$0xff]   ;;  %v9767_v28 = vld [vmem:[#allocation4 + $0xa8] ss:$16 sps:$4 sm:$0xff]  }
  0xa6   : > { %v940_v29 = vsel %vm14517_vm13, %v933_v21, %v938_v25  ;;  %945 = vst.msk [vmem:[#allocation4 + $0x88] sm:$0xcc] %vm10519_vm8, %v941_v26  ;;  %v964_v30 = vpop.permute.xlu0 %963  ;;  %v966_v31 = vpop.permute.xlu1 %965  ;;  %v9765_v32 = vld [vmem:[#allocation4 + $0xa4] ss:$16 sps:$4 sm:$0xff]   ;;  %v9768_v33 = vld [vmem:[#allocation4 + $0xa0] ss:$16 sps:$4 sm:$0xff]   ;;  %1381 = vmatprep.subr.bf16.mxu1 %v9763_v27 }
  0xa7   : > { %944 = vst [vmem:[#allocation4 + $0x80] sm:$0xcc] %v940_v29  ;;  %v967_v35 = vrot.slane %v964_v30, 4  ;;  %v968_v36 = vrot.slane %v966_v31, 4  ;;  %1340 = vmatprep.subr.bf16.mxu0 %v9765_v32  ;;  %1382 = vmatpush1.bf16.msra.mxu1 %v9767_v28  ;;  %vm14537_vm13 = vcmask 703488  }
  0xa8   : > { %1341 = vmatpush1.bf16.msra.mxu0 %v9768_v33 }
  0xa9   : > { %v969_v37 = vsel %vm14568_vm5, %v967_v35, %v968_v36  ;;  %v972_v38 = vsel %vm14541_vm14, %v966_v31, %v968_v36 }
  0xaa   : > { %v971_v39 = vsel %vm14541_vm14, %v964_v30, %v969_v37  ;;  %976 = vst.msk [vmem:[#allocation4 + $0x98] sm:$0x33] %vm10369_vm2, %v972_v38  ;;  %v995_v40 = vpop.permute.xlu0 %994  ;;  %v997_v41 = vpop.permute.xlu1 %996 }
  0xab   : > { %975 = vst [vmem:[#allocation4 + $0x90] sm:$0x33] %v971_v39  ;;  %v998_v42 = vrot.slane %v995_v40, 4  ;;  %v999_v43 = vrot.slane %v997_v41, 4 }
  0xad   : > { %v1000_v44 = vsel %vm14568_vm5, %v998_v42, %v999_v43  ;;  %v1003_v45 = vsel %vm14525_vm15, %v997_v41, %v999_v43 }
  0xae   : > { %v1002_v46 = vsel %vm14525_vm15, %v995_v40, %v1000_v44  ;;  %1007 = vst.msk [vmem:[#allocation4 + $0x98] sm:$0xcc] %vm10519_vm8, %v1003_v45  ;;  %v778_v47 = vpop.permute.xlu0 %777  ;;  %v780_v48 = vpop.permute.xlu1 %779  ;;  %vm14535_vm15 = vcmask 1014784  }
  0xaf   : > { %1006 = vst [vmem:[#allocation4 + $0x90] sm:$0xcc] %v1002_v46  ;;  %v781_v49 = vrot.slane %v778_v47, 4  ;;  %v782_v50 = vrot.slane %v780_v48, 4 }
  0xb1   : > { %v783_v51 = vsel %vm14568_vm5, %v781_v49, %v782_v50  ;;  %v786_v52 = vsel %vm14537_vm13, %v780_v48, %v782_v50 }
  0xb2   : > { %v785_v53 = vsel %vm14537_vm13, %v778_v47, %v783_v51  ;;  %790 = vst.msk [vmem:[#allocation4 + $0x68] sm:$0x33] %vm10369_vm2, %v786_v52  ;;  %v809_v54 = vpop.permute.xlu0 %808  ;;  %v811_v55 = vpop.permute.xlu1 %810 }
  0xb3   : > { %789 = vst [vmem:[#allocation4 + $0x60] sm:$0x33] %v785_v53  ;;  %v812_v56 = vrot.slane %v809_v54, 4  ;;  %v813_v57 = vrot.slane %v811_v55, 4 }
  0xb5   : > { %v814_v58 = vsel %vm14568_vm5, %v812_v56, %v813_v57  ;;  %v817_v59 = vsel %vm14520_vm7, %v811_v55, %v813_v57  ;;  %v9769_v60 = vld [vmem:[#allocation4 + $0x8c] ss:$16 sps:$4 sm:$0xff]   ;;  %v9773_v61 = vld [vmem:[#allocation4 + $0x88] ss:$16 sps:$4 sm:$0xff]  }
  0xb6   : > { %v816_v62 = vsel %vm14520_vm7, %v809_v54, %v814_v58  ;;  %821 = vst.msk [vmem:[#allocation4 + $0x68] sm:$0xcc] %vm10519_vm8, %v817_v59  ;;  %v840_v63 = vpop.permute.xlu0 %839  ;;  %v842_v0 = vpop.permute.xlu1 %841  ;;  %v9771_v1 = vld [vmem:[#allocation4 + $0x84] ss:$16 sps:$4 sm:$0xff]   ;;  %v9774_v2 = vld [vmem:[#allocation4 + $0x80] ss:$16 sps:$4 sm:$0xff]   ;;  %1383 = vmatprep.subr.bf16.mxu1 %v9769_v60 }
  0xb7   : > { %820 = vst [vmem:[#allocation4 + $0x60] sm:$0xcc] %v816_v62  ;;  %v843_v4 = vrot.slane %v840_v63, 4  ;;  %v844_v6 = vrot.slane %v842_v0, 4  ;;  %1342 = vmatprep.subr.bf16.mxu0 %v9771_v1  ;;  %1384 = vmatpush1.bf16.msra.mxu1 %v9773_v61  ;;  %vm14522_vm7 = vcmask 556032  }
  0xb8   : > { %1343 = vmatpush1.bf16.msra.mxu0 %v9774_v2 }
  0xb9   : > { %v845_v7 = vsel %vm14568_vm5, %v843_v4, %v844_v6  ;;  %v848_v8 = vsel %vm14534_vm4, %v842_v0, %v844_v6 }
  0xba   : > { %v847_v9 = vsel %vm14534_vm4, %v840_v63, %v845_v7  ;;  %852 = vst.msk [vmem:[#allocation4 + $0x78] sm:$0x33] %vm10369_vm2, %v848_v8  ;;  %v871_v10 = vpop.permute.xlu0 %870  ;;  %v873_v12 = vpop.permute.xlu1 %872  ;;  %vm363_vm4 = vsmask.f32 2304 }
  0xbb   : > { %851 = vst [vmem:[#allocation4 + $0x70] sm:$0x33] %v847_v9  ;;  %v874_v14 = vrot.slane %v871_v10, 4  ;;  %v875_v15 = vrot.slane %v873_v12, 4 }
  0xbd   : > { %v876_v16 = vsel %vm14568_vm5, %v874_v14, %v875_v15  ;;  %v879_v17 = vsel %vm14522_vm7, %v873_v12, %v875_v15 }
  0xbe   : > { %v878_v18 = vsel %vm14522_vm7, %v871_v10, %v876_v16  ;;  %883 = vst.msk [vmem:[#allocation4 + $0x78] sm:$0xcc] %vm10519_vm8, %v879_v17  ;;  %v654_v19 = vpop.permute.xlu0 %653  ;;  %v656_v20 = vpop.permute.xlu1 %655  ;;  %vm14524_vm7 = vcmask 850944  }
  0xbf   : > { %882 = vst [vmem:[#allocation4 + $0x70] sm:$0xcc] %v878_v18  ;;  %v657_v21 = vrot.slane %v654_v19, 4  ;;  %v658_v22 = vrot.slane %v656_v20, 4 }
  0xc1   : > { %v659_v23 = vsel %vm14568_vm5, %v657_v21, %v658_v22  ;;  %v662_v24 = vsel %vm14559_vm3, %v656_v20, %v658_v22 }
  0xc2   : > { %v661_v25 = vsel %vm14559_vm3, %v654_v19, %v659_v23  ;;  %666 = vst.msk [vmem:[#allocation4 + $0x48] sm:$0x33] %vm10369_vm2, %v662_v24  ;;  %v685_v26 = vpop.permute.xlu0 %684  ;;  %v687_v27 = vpop.permute.xlu1 %686 }
  0xc3   : > { %665 = vst [vmem:[#allocation4 + $0x40] sm:$0x33] %v661_v25  ;;  %v688_v28 = vrot.slane %v685_v26, 4  ;;  %v689_v29 = vrot.slane %v687_v27, 4 }
  0xc5   : > { %v690_v30 = vsel %vm14568_vm5, %v688_v28, %v689_v29  ;;  %v693_v31 = vsel %vm14524_vm7, %v687_v27, %v689_v29  ;;  %v9775_v32 = vld [vmem:[#allocation4 + $0x6c] ss:$16 sps:$4 sm:$0xff]   ;;  %v9779_v33 = vld [vmem:[#allocation4 + $0x68] ss:$16 sps:$4 sm:$0xff]  }
  0xc6   : > { %v692_v35 = vsel %vm14524_vm7, %v685_v26, %v690_v30  ;;  %697 = vst.msk [vmem:[#allocation4 + $0x48] sm:$0xcc] %vm10519_vm8, %v693_v31  ;;  %v716_v36 = vpop.permute.xlu0 %715  ;;  %v718_v37 = vpop.permute.xlu1 %717  ;;  %v9777_v38 = vld [vmem:[#allocation4 + $0x64] ss:$16 sps:$4 sm:$0xff]   ;;  %v9780_v39 = vld [vmem:[#allocation4 + $0x60] ss:$16 sps:$4 sm:$0xff]   ;;  %1385 = vmatprep.subr.bf16.mxu1 %v9775_v32 }
  0xc7   : > { %696 = vst [vmem:[#allocation4 + $0x40] sm:$0xcc] %v692_v35  ;;  %v719_v40 = vrot.slane %v716_v36, 4  ;;  %v720_v41 = vrot.slane %v718_v37, 4  ;;  %1344 = vmatprep.subr.bf16.mxu0 %v9777_v38  ;;  %1386 = vmatpush1.bf16.msra.mxu1 %v9779_v33  ;;  %vm14526_vm7 = vcmask 711680  }
  0xc8   : > { %1345 = vmatpush1.bf16.msra.mxu0 %v9780_v39 }
  0xc9   : > { %v721_v42 = vsel %vm14568_vm5, %v719_v40, %v720_v41  ;;  %v724_v43 = vsel %vm14538_vm11, %v718_v37, %v720_v41 }
  0xca   : > { %v723_v44 = vsel %vm14538_vm11, %v716_v36, %v721_v42  ;;  %728 = vst.msk [vmem:[#allocation4 + $0x58] sm:$0x33] %vm10369_vm2, %v724_v43  ;;  %v747_v45 = vpop.permute.xlu0 %746  ;;  %v749_v46 = vpop.permute.xlu1 %748  ;;  %vm1508_vm11 = vcmask 473092  }
  0xcb   : > { %727 = vst [vmem:[#allocation4 + $0x50] sm:$0x33] %v723_v44  ;;  %v750_v47 = vrot.slane %v747_v45, 4  ;;  %v751_v48 = vrot.slane %v749_v46, 4 }
  0xcd   : > { %v752_v49 = vsel %vm14568_vm5, %v750_v47, %v751_v48  ;;  %v755_v50 = vsel %vm14526_vm7, %v749_v46, %v751_v48 }
  0xce   : > { %v754_v51 = vsel %vm14526_vm7, %v747_v45, %v752_v49  ;;  %759 = vst.msk [vmem:[#allocation4 + $0x58] sm:$0xcc] %vm10519_vm8, %v755_v50  ;;  %v530_v52 = vpop.permute.xlu0 %529  ;;  %v532_v53 = vpop.permute.xlu1 %531  ;;  %vm14528_vm7 = vcmask 883712  }
  0xcf   : > { %758 = vst [vmem:[#allocation4 + $0x50] sm:$0xcc] %v754_v51  ;;  %v533_v54 = vrot.slane %v530_v52, 4  ;;  %v534_v55 = vrot.slane %v532_v53, 4 }
  0xd1   : > { %v535_v56 = vsel %vm14568_vm5, %v533_v54, %v534_v55  ;;  %v538_v57 = vsel %vm14535_vm15, %v532_v53, %v534_v55 }
  0xd2   : > { %v537_v58 = vsel %vm14535_vm15, %v530_v52, %v535_v56  ;;  %542 = vst.msk [vmem:[#allocation4 + $0x28] sm:$0x33] %vm10369_vm2, %v538_v57  ;;  %v561_v59 = vpop.permute.xlu0 %560  ;;  %v563_v60 = vpop.permute.xlu1 %562  ;;  %v1163_v56 = vld [vmem:[%s14605_s1] sm:$0x7]  ;;  %s14823_s1 = smov 48  }
  0xd3   : > { %541 = vst [vmem:[#allocation4 + $0x20] sm:$0x33] %v537_v58  ;;  %v564_v61 = vrot.slane %v561_v59, 4  ;;  %v565_v62 = vrot.slane %v563_v60, 4  ;;  %v365_v57 = vld [vmem:[#allocation2] sm:$0x7] }
  0xd5   : > { %v566_v63 = vsel %vm14568_vm5, %v564_v61, %v565_v62  ;;  %v569_v0 = vsel %vm14528_vm7, %v563_v60, %v565_v62  ;;  %v9781_v1 = vld [vmem:[#allocation4 + $0x4c] ss:$16 sps:$4 sm:$0xff]   ;;  %v9785_v2 = vld [vmem:[#allocation4 + $0x48] ss:$16 sps:$4 sm:$0xff]  }
  0xd6   : > { %v568_v4 = vsel %vm14528_vm7, %v561_v59, %v566_v63  ;;  %573 = vst.msk [vmem:[#allocation4 + $0x28] sm:$0xcc] %vm10519_vm8, %v569_v0  ;;  %v592_v6 = vpop.permute.xlu0 %591  ;;  %v594_v7 = vpop.permute.xlu1 %593  ;;  %v9783_v8 = vld [vmem:[#allocation4 + $0x44] ss:$16 sps:$4 sm:$0xff]   ;;  %v9786_v9 = vld [vmem:[#allocation4 + $0x40] ss:$16 sps:$4 sm:$0xff]   ;;  %1387 = vmatprep.subr.bf16.mxu1 %v9781_v1 }
  0xd7   : > { %572 = vst [vmem:[#allocation4 + $0x20] sm:$0xcc] %v568_v4  ;;  %v595_v10 = vrot.slane %v592_v6, 4  ;;  %v596_v12 = vrot.slane %v594_v7, 4  ;;  %1346 = vmatprep.subr.bf16.mxu0 %v9783_v8  ;;  %1388 = vmatpush1.bf16.msra.mxu1 %v9785_v2  ;;  %vm14531_vm7 = vcmask 867328   ;;  %v1457_v1 = vsub.s32 2, %v10348_v3 }
  0xd8   : > { %1347 = vmatpush1.bf16.msra.mxu0 %v9786_v9  ;;  %v370_v59 = vld [vmem:[#allocation2 + $0xc] sm:$0x7] }
  0xd9   : > { %v597_v14 = vsel %vm14568_vm5, %v595_v10, %v596_v12  ;;  %v600_v15 = vsel %vm14530_vm1, %v594_v7, %v596_v12  ;;  %v1461_v10 = vsub.s32 3, %v10348_v3  ;;  %v361_v12 = vld [vmem:[%s14483_s9] sm:$0xf] }
  0xda   : > { %v599_v16 = vsel %vm14530_vm1, %v592_v6, %v597_v14  ;;  %604 = vst.msk [vmem:[#allocation4 + $0x38] sm:$0x33] %vm10369_vm2, %v600_v15  ;;  %v623_v17 = vpop.permute.xlu0 %622  ;;  %v625_v18 = vpop.permute.xlu1 %624  ;;  %vm14536_vm1 = vcmask 1031168   ;;  %v1449_v15 = vsub.s32 0, %v10348_v3 }
  0xdb   : > { %603 = vst [vmem:[#allocation4 + $0x30] sm:$0x33] %v599_v16  ;;  %v626_v19 = vrot.slane %v623_v17, 4  ;;  %v627_v20 = vrot.slane %v625_v18, 4 }
  0xdd   : > { %v628_v21 = vsel %vm14568_vm5, %v626_v19, %v627_v20  ;;  %v631_v22 = vsel %vm14531_vm7, %v625_v18, %v627_v20  ;;  %v10667_v20 = vrot.slane %v361_v12, %v1457_v1 }
  0xde   : > { %v630_v23 = vsel %vm14531_vm7, %v623_v17, %v628_v21  ;;  %635 = vst.msk [vmem:[#allocation4 + $0x38] sm:$0xcc] %vm10519_vm8, %v631_v22  ;;  %v435_v24 = vpop.permute.xlu1 %434  ;;  %v433_v25 = vpop.permute.xlu0 %432  ;;  %vm14533_vm7 = vcmask 1022976   ;;  %v1453_v17 = vsub.s32 1, %v10348_v3 }
  0xdf   : > { %634 = vst [vmem:[#allocation4 + $0x30] sm:$0xcc] %v630_v23  ;;  %v437_v26 = vrot.slane %v435_v24, 4  ;;  %v436_v27 = vrot.slane %v433_v25, 4 }
  0xe1   : > { %v442_v28 = vsel %vm14532_vm0, %v435_v24, %v437_v26  ;;  %v439_v29 = vsel %vm14568_vm5, %v436_v27, %v437_v26 }
  0xe2   : > { %449 = vst.msk [vmem:[#allocation4 + $0x8] sm:$0xcc] %vm10519_vm8, %v442_v28  ;;  %v441_v30 = vsel %vm14532_vm0, %v433_v25, %v439_v29  ;;  %v470_v31 = vpop.permute.xlu1 %469  ;;  %v468_v32 = vpop.permute.xlu0 %467  ;;  %vm1320_vm0 = vcmask 818176   ;;  %v10669_v28 = vrot.slane %v361_v12, %v1461_v10 }
  0xe3   : > { %445 = vst [vmem:[#allocation4] sm:$0xcc] %v441_v30  ;;  %v472_v33 = vrot.slane %v470_v31, 4  ;;  %v471_v35 = vrot.slane %v468_v32, 4 }
  0xe5   : > { %v476_v36 = vsel %vm14536_vm1, %v470_v31, %v472_v33  ;;  %v473_v37 = vsel %vm14568_vm5, %v471_v35, %v472_v33  ;;  %v9787_v38 = vld [vmem:[#allocation4 + $0x2c] ss:$16 sps:$4 sm:$0xff]   ;;  %v9791_v39 = vld [vmem:[#allocation4 + $0x28] ss:$16 sps:$4 sm:$0xff]   ;;  %v10671_v31 = vrot.slane %v361_v12, %v1449_v15  ;;  %v10673_v33 = vrot.slane %v361_v12, %v1453_v17 }
  0xe6   : > { %480 = vst.msk [vmem:[#allocation4 + $0x18] sm:$0x33] %vm10369_vm2, %v476_v36  ;;  %v475_v40 = vsel %vm14536_vm1, %v468_v32, %v473_v37  ;;  %v501_v41 = vpop.permute.xlu1 %500  ;;  %v499_v42 = vpop.permute.xlu0 %498  ;;  %v9789_v43 = vld [vmem:[#allocation4 + $0x24] ss:$16 sps:$4 sm:$0xff]   ;;  %v9792_v44 = vld [vmem:[#allocation4 + $0x20] ss:$16 sps:$4 sm:$0xff]   ;;  %1389 = vmatprep.subr.bf16.mxu1 %v9787_v38 }
  0xe7   : > { %479 = vst [vmem:[#allocation4 + $0x10] sm:$0x33] %v475_v40  ;;  %v503_v45 = vrot.slane %v501_v41, 4  ;;  %v502_v46 = vrot.slane %v499_v42, 4  ;;  %1348 = vmatprep.subr.bf16.mxu0 %v9789_v43  ;;  %1390 = vmatpush1.bf16.msra.mxu1 %v9791_v39  ;;  %vm368_vm1 = vcmask 813520  }
  0xe8   : > { %1349 = vmatpush1.bf16.msra.mxu0 %v9792_v44  ;;  %vm369_vm13 = vmand %vm368_vm1, %vm363_vm4  ;;  %vm14542_vm1 = vcmask 1046532  }
  0xe9   : > { %v507_v47 = vsel %vm14533_vm7, %v501_v41, %v503_v45  ;;  %v504_v48 = vsel %vm14568_vm5, %v502_v46, %v503_v45  ;;  %v1165_v50 = vld [vmem:[#allocation4 + $0x8] sm:$0xff]  ;;  %v371_v60 = vsel %vm369_vm13, 0, %v370_v59  ;;  %vm14562_vm13 = vcmask 1042432  }
  0xea   : > { %511 = vst.msk [vmem:[#allocation4 + $0x18] sm:$0xcc] %vm10519_vm8, %v507_v47  ;;  %v506_v49 = vsel %vm14533_vm7, %v499_v42, %v504_v48  ;;  %vm362_vm7 = vcmask 337920   ;;  %372 = vst [vmem:[#allocation2 + $0xc] sm:$0x7] %v371_v60 }
  0xeb   : > { %510 = vst [vmem:[#allocation4 + $0x10] sm:$0xcc] %v506_v49  ;;  %vm364_vm15 = vmand %vm362_vm7, %vm363_vm4  ;;  %vm1500_vm7 = vsmask.f32 6400  ;;  %v1517_v10 = vld [vmem:[#allocation4] sm:$0x77] }
  0xec   : > { %v366_v58 = vsel %vm364_vm15, 0, %v365_v57  ;;  %vm10716_vm10 = vmand %vm14542_vm1, %vm1500_vm7 }
  0xed   : > { %367 = vst [vmem:[#allocation2] sm:$0x7] %v366_v58  ;;  %vm10722_vm9 = vmand %vm14562_vm13, %vm363_vm4 }
  0xee   : > { %vm10727_vm14 = vmand %vm1508_vm11, %vm1500_vm7 }
  0xef   : > { %vm10746_vm11 = vmor %vm10716_vm10, %vm10722_vm9 }
  0xf1   : > { %v1167_v51 = vld [vmem:[#allocation4 + $0x18] sm:$0xff]  ;;  %v1511_v1 = vld [vmem:[#allocation2 + $0x8] sm:$0x77] }
  0xf2   : > { %v9793_v52 = vld [vmem:[#allocation4 + $0xc] ss:$16 sps:$4 sm:$0xff]   ;;  %v9795_v53 = vld [vmem:[#allocation4 + $0x4] ss:$16 sps:$4 sm:$0xff]   ;;  %v9273_v54 = vcombine.low %v1165_v50, %v1167_v51  ;;  %v9797_v55 = vld [vmem:[#allocation4] ss:$16 sps:$4 sm:$0xff]  }
  0xf3   : > { %1391 = vmatprep.subr.bf16.mxu1 %v9793_v52  ;;  %1350 = vmatprep.subr.bf16.mxu0 %v9795_v53  ;;  %v1422_v61 = vpop.permute.xlu0 %1421  ;;  %v1432_v2 = vpop.permute.xlu1 %1431 }
  0xf4   : > { %1392 = vmatpush1.bf16.msra.mxu1 %v9273_v54  ;;  %1351 = vmatpush1.bf16.msra.mxu0 %v9797_v55 }
  0xf7   : > { %9302 = vmatmul.mubr.msk.bf16.vlgmr.msra.gmra.mxu1 %vm1320_vm0, %v1163_v56  ;;  %9300 = vmatmul.mubr.msk.bf16.vlgmr.msra.gmra.mxu0 %vm1320_vm0, %v1163_v56  ;;  %v10681_v42 = vpop.permute.xlu0 %2853  ;;  %v10683_v43 = vpop.permute.xlu1 %2858  ;;  %vm1497_vm0 = vcmask 1042768  }
  0xf8   : > { %2805 = vmatprep.mubr.bf16.mxu1 %v10280_v13  ;;  %2734 = vmatprep.mubr.bf16.mxu0 %v10280_v13  ;;  %vm10710_vm15 = vmand %vm1497_vm0, %vm363_vm4  ;;  %vm14560_vm0 = vcmask 343040  }
  0xf9   : > { %vm1502_vm1 = vmor %vm10716_vm10, %vm10710_vm15  ;;  %vm14561_vm10 = vcmask 129028   ;;  %vm14563_vm15 = vcmask 1047557  }
  0xfa   : > { %vm1510_vm4 = vmor %vm10727_vm14, %vm10722_vm9 }
  0xfb   : > { %v10685_v44 = vpop.permute.xlu0 %2863  ;;  %v10687_v45 = vpop.permute.xlu1 %2868  ;;  %vm1521_vm14 = vmand %vm14561_vm10, %vm1500_vm7  ;;  %vm1607_vm7 = vsmask.f32 3328 }
  0xff   : > { %v10689_v46 = vpop.permute.xlu0 %2873  ;;  %v10691_v47 = vpop.permute.xlu1 %2878 }
 0x103   : > { %v10693_v48 = vpop.permute.xlu0 %2928  ;;  %v10695_v49 = vpop.permute.xlu1 %2933 }
 0x107   : > { %v10697_v50 = vpop.permute.xlu0 %2938  ;;  %v10699_v51 = vpop.permute.xlu1 %2883 }
 0x10b   : > { %v10701_v52 = vpop.permute.xlu0 %2923  ;;  %v10703_v53 = vpop.permute.xlu1 %2943 }
 0x10f   : > { %v10705_v54 = vpop.permute.xlu0 %2948  ;;  %v10707_v55 = vpop.permute.xlu1 %2953 }
 0x1b7   : > { %v1411_v62 = vpop.f32.mrf.mxu1  ;;  %v1370_v63 = vpop.f32.mrf.mxu0 }
 0x1b8   : > { %v1426_v0 = vmul.f32 %v1422_v61, %v1411_v62  ;;  %v1424_v4 = vmul.f32 %v1422_v61, %v1370_v63  ;;  %v1503_v63 = vld [vmem:[#allocation2] sm:$0x77] }
 0x1b9   : > { %v1413_v6 = vpop.f32.mrf.mxu1  ;;  %v1372_v8 = vpop.f32.mrf.mxu0 }
 0x1ba   : > { %v1436_v7 = vadd.f32 %v1432_v2, %v1426_v0  ;;  %v1427_v9 = vmul.f32 %v1422_v61, %v1413_v6  ;;  %v1434_v14 = vadd.f32 %v1432_v2, %v1424_v4  ;;  %v1425_v16 = vmul.f32 %v1422_v61, %v1372_v8 }
 0x1bb   : > { %v1415_v18 = vpop.f32.mrf.mxu1  ;;  %v1374_v22 = vpop.f32.mrf.mxu0 }
 0x1bc   : > { %v1440_v19 = vmax.f32 %v1436_v7, 0.0  ;;  %v1437_v21 = vadd.f32 %v1432_v2, %v1427_v9  ;;  %v1438_v23 = vmax.f32 %v1434_v14, 0.0  ;;  %v1435_v24 = vadd.f32 %v1432_v2, %v1425_v16 }
 0x1bd   : > { %v1416_v25 = vpop.f32.mrf.mxu1  ;;  %v1375_v29 = vpop.f32.mrf.mxu0 }
 0x1be   : > { %v1444_v26 = vmin.f32 %v1440_v19, 6.0  ;;  %v1441_v27 = vmax.f32 %v1437_v21, 0.0  ;;  %v1442_v30 = vmin.f32 %v1438_v23, 6.0  ;;  %v1439_v32 = vmax.f32 %v1435_v24, 0.0 }
 0x1c0   : > { %v1469_v3 = vmul.f32 %v10667_v20, %v1444_v26  ;;  %v1445_v35 = vmin.f32 %v1441_v27, 6.0  ;;  %v1443_v36 = vmin.f32 %v1439_v32, 6.0  ;;  %v1467_v38 = vmul.f32 %v10671_v31, %v1442_v30 }
 0x1c2   : > { %v1470_v37 = vmul.f32 %v10669_v28, %v1445_v35  ;;  %v1468_v39 = vmul.f32 %v10673_v33, %v1443_v36 }
 0x1c4   : > { %v9689_v40 = vpack.c.bf16 %v1470_v37, %v1469_v3  ;;  %v9688_v41 = vpack.c.bf16 %v1468_v39, %v1467_v38 }
 0x1c6   : > { %1487 = vrot.lane.b32.xlu0 %v9689_v40, %s14577_s25  ;;  %1485 = vrot.lane.b32.xlu1 %v9688_v41, %s14577_s25  ;;  %s14812_s25 = smov 105  }
 0x238   : > { %v1488_v60 = vpop.permute.xlu0 %1487  ;;  %v1486_v61 = vpop.permute.xlu1 %1485 }
 0x239   : > { %v1490_v62 = vrot.slane %v1488_v60, 4  ;;  %v1489_v0 = vrot.slane %v1486_v61, 4 }
 0x23b   : > { %v1492_v2 = vsel %vm14560_vm0, %v1489_v0, %v1486_v61  ;;  %v1493_v4 = vsel %vm14568_vm5, %v1489_v0, %v1490_v62 }
 0x23c   : > { %v1504_v6 = vsel %vm1502_vm1, %v1492_v2, %v1503_v63  ;;  %v1494_v7 = vsel %vm14560_vm0, %v1493_v4, %v1488_v60  ;;  %vm10788_vm1 = vmor %vm1521_vm14, %vm10722_vm9  ;;  %vm14565_vm9 = vcmask 1043457   ;;  %vm14564_vm14 = vcmask 130053  }
 0x23d   : > { %1505 = vst [vmem:[#allocation2] sm:$0x77] %v1504_v6  ;;  %v1512_v8 = vsel %vm1510_vm4, %v1494_v7, %v1511_v1  ;;  %vm1610_vm4 = vsmask.f32 7424  ;;  %vm14644_vm0 = vcmask 375808  }
 0x23e   : > { %1513 = vst [vmem:[#allocation2 + $0x8] sm:$0x77] %v1512_v8 }
 0x244   : > { %v1514_v12 = vld [vmem:[#allocation2] sm:$0x77] }
 0x245   : > { %v2439_v14 = vld [vmem:[#allocation2] sm:$0x77]  ;;  %v1518_v16 = vsel %vm10746_vm11, %v1514_v12, %v1517_v10  ;;  %v2440_v18 = vld [vmem:[#allocation2 + $0x8] sm:$0x77] }
 0x246   : > { %v1863_v15 = vld [vmem:[#allocation2] sm:$0x77]  ;;  %2443 = vrot.lane.b32.xlu1 %v2439_v14, %s14543_s19  ;;  %1519 = vst [vmem:[#allocation4] sm:$0x77] %v1518_v16  ;;  %v2152_v19 = vld [vmem:[#allocation2 + $0x8] sm:$0x77] }
 0x247   : > { %1867 = vrot.lane.b32.xlu0 %v1863_v15, %s14575_s12  ;;  %v2151_v17 = vld [vmem:[#allocation2] sm:$0x77]  ;;  %v1864_v21 = vld [vmem:[#allocation2 + $0x8] sm:$0x77] }
 0x248   : > { %v10756_v22 = vld [vmem:[#allocation2] sm:$0x77]  ;;  %v2223_v26 = vld [vmem:[#allocation2 + $0x8] sm:$0x77] }
 0x249   : > { %v2222_v23 = vld [vmem:[#allocation2] sm:$0x77]  ;;  %v2082_v24 = vrot.slane %v10756_v22, 5  ;;  %v2227_v29 = vrot.slane %v2223_v26, 7  ;;  %v10765_v32 = vld [vmem:[#allocation2 + $0x8] sm:$0x77] }
 0x24a   : > { %2155 = vrot.lane.b32.xlu1 %v2151_v17, %s14555_s24  ;;  %v2226_v25 = vrot.slane %v2222_v23, 7  ;;  %v2295_v27 = vld [vmem:[#allocation2] sm:$0x77]  ;;  %v2300_v35 = vrot.slane %v10765_v32, 6  ;;  %v2367_v37 = vld [vmem:[#allocation2 + $0x8] sm:$0x77] }
 0x24b   : > { %2445 = vrot.lane.b32.xlu0 %v2440_v18, %s14543_s19  ;;  %v2299_v30 = vrot.slane %v2295_v27, 6  ;;  %v2366_v3 = vld [vmem:[#allocation2] sm:$0x77]  ;;  %v2371_v39 = vrot.slane %v2367_v37, 5  ;;  %v1935_v41 = vld [vmem:[#allocation2 + $0x8] sm:$0x77] }
 0x24c   : > { %v2370_v36 = vrot.slane %v2366_v3, 5  ;;  %v1934_v38 = vld [vmem:[#allocation2] sm:$0x77]  ;;  %v1939_v57 = vrot.slane %v1935_v41, 7  ;;  %v2008_v60 = vld [vmem:[#allocation2 + $0x8] sm:$0x77] }
 0x24d   : > { %v1938_v40 = vrot.slane %v1934_v38, 7  ;;  %v2007_v56 = vld [vmem:[#allocation2] sm:$0x77]  ;;  %v2012_v62 = vrot.slane %v2008_v60, 6  ;;  %v1590_v1 = vld [vmem:[#allocation2 + $0x8] sm:$0x77] }
 0x24e   : > { %1869 = vrot.lane.b32.xlu1 %v1864_v21, %s14575_s12  ;;  %v2011_v59 = vrot.slane %v2007_v56, 6  ;;  %v1589_v61 = vld [vmem:[#allocation2] sm:$0x77]  ;;  %v1594_v4 = vrot.slane %v1590_v1, 7  ;;  %v10782_v7 = vld [vmem:[#allocation2 + $0x8] sm:$0x77] }
 0x24f   : > { %2157 = vrot.lane.b32.xlu0 %v2152_v19, %s14555_s24  ;;  %v1593_v63 = vrot.slane %v1589_v61, 7  ;;  %v1682_v0 = vld [vmem:[#allocation2] sm:$0x77]  ;;  %v1515_v8 = vld [vmem:[#allocation2 + $0x8] sm:$0x77]  ;;  %v1687_v14 = vrot.slane %v10782_v7, 6 }
 0x250   : > { %v1686_v2 = vrot.slane %v1682_v0, 6  ;;  %v1770_v6 = vld [vmem:[#allocation2] sm:$0x77]  ;;  %v1523_v15 = vld [vmem:[#allocation4 + $0x8] sm:$0x77]  ;;  %v2372_v21 = vrot.slane %v2370_v36, 4 }
 0x251   : > { %v1774_v12 = vrot.slane %v1770_v6, 5  ;;  %v2079_v16 = vld [vmem:[#allocation2 + $0x8] sm:$0x77]  ;;  %v1524_v18 = vsel %vm10788_vm1, %v1515_v8, %v1523_v15  ;;  %v10801_v27 = vld [vmem:[#allocation2] sm:$0x77]  ;;  %v2013_v3 = vrot.slane %v2011_v59, 4 }
 0x252   : > { %2228 = vrot.lane.b32.xlu1 %v2226_v25, %s14547_s26  ;;  %v1771_v17 = vld [vmem:[#allocation2 + $0x8] sm:$0x77]  ;;  %1525 = vst [vmem:[#allocation4 + $0x8] sm:$0x77] %v1524_v18  ;;  %v2083_v19 = vrot.slane %v2079_v16, 5  ;;  %v2301_v25 = vrot.slane %v2299_v30, 4 }
 0x253   : > { %2086 = vrot.lane.b32.xlu0 %v2082_v24, %s14549_s30  ;;  %v1775_v58 = vrot.slane %v1771_v17, 5  ;;  %v1776_v23 = vrot.slane %v1774_v12, 4  ;;  %v1688_v26 = vrot.slane %v1686_v2, 4  ;;  %v2373_v37 = vrot.slane %v2371_v39, 4  ;;  %v10829_v32 = vld [vmem:[#allocation2] sm:$0x77] }
 0x254   : > { %v2248_v38 = vshll.u32 %v10801_v27, 16  ;;  %v2045_v61 = vld [vmem:[#allocation2] sm:$0x77]  ;;  %s14627_s19 = smov 68   ;;  %s14633_s24 = smov 127  }
 0x255   : > { %v2048_v0 = vshrl.u32 %v2045_v61, 16  ;;  %v2404_v1 = vld [vmem:[#allocation2] sm:$0x77]  ;;  %s14795_s12 = smov 42  }
 0x256   : > { %2303 = vrot.lane.b32.xlu1 %v2299_v30, %s14553_s20  ;;  %v2084_v30 = vrot.slane %v2082_v24, 4  ;;  %v10815_v41 = vrot.slane %v2248_v38, 5  ;;  %v2116_v8 = vld [vmem:[#allocation2] sm:$0x77]  ;;  %v2410_v18 = vshll.u32 %v2404_v1, 16 }
 0x257   : > { %2230 = vrot.lane.b32.xlu0 %v2227_v29, %s14547_s26  ;;  %v10803_v29 = vld [vmem:[#allocation2 + $0x8] sm:$0x77]  ;;  %v2050_v17 = vrot.slane %v2048_v0, 7  ;;  %s14629_s26 = smov 66  }
 0x25a   : > { %2374 = vrot.lane.b32.xlu1 %v2370_v36, %s14545_s22  ;;  %v2252_v36 = vshll.u32 %v10803_v29, 16 }
 0x25b   : > { %2305 = vrot.lane.b32.xlu0 %v2300_v35, %s14553_s20 }
 0x25c   : > { %v10817_v56 = vrot.slane %v2252_v36, 5 }
 0x25e   : > { %1940 = vrot.lane.b32.xlu1 %v1938_v40, %s14551_s16  ;;  %v2302_v40 = vrot.slane %v2300_v35, 4  ;;  %v9742_v24 = vpack.i.bf16 %v10817_v56, %v10815_v41  ;;  %v10831_v35 = vld [vmem:[#allocation2 + $0x8] sm:$0x77] }
 0x25f   : > { %2376 = vrot.lane.b32.xlu0 %v2371_v39, %s14545_s22  ;;  %v10821_v39 = vld [vmem:[#allocation2 + $0x8] sm:$0x77] }
 0x260   : > { %v1964_v22 = vshll.u32 %v10821_v39, 16 }
 0x262   : > { %2015 = vrot.lane.b32.xlu1 %v2011_v59, %s14616_s18  ;;  %v2014_v59 = vrot.slane %v2012_v62, 4  ;;  %v10839_v7 = vrot.slane %v1964_v22, 5 }
 0x263   : > { %1942 = vrot.lane.b32.xlu0 %v1939_v57, %s14551_s16  ;;  %v10819_v57 = vld [vmem:[#allocation2] sm:$0x77]  ;;  %s14631_s16 = smov 104  }
 0x264   : > { %v1960_v60 = vshll.u32 %v10819_v57, 16 }
 0x266   : > { %1595 = vrot.lane.b32.xlu1 %v1593_v63, %s14617_s28  ;;  %v1625_v63 = vshll.u32 %v10829_v32, 16  ;;  %v10837_v6 = vrot.slane %v1960_v60, 5 }
 0x267   : > { %2017 = vrot.lane.b32.xlu0 %v2012_v62, %s14616_s18  ;;  %v1629_v62 = vshll.u32 %v10831_v35, 16 }
 0x268   : > { %v10843_v15 = vrot.slane %v1625_v63, 5  ;;  %v2334_v63 = vld [vmem:[#allocation2 + $0x8] sm:$0x77] }
 0x269   : > { %v10845_v16 = vrot.slane %v1629_v62, 5 }
 0x26a   : > { %1690 = vrot.lane.b32.xlu1 %v1686_v2, %s14618_s15  ;;  %v2085_v2 = vrot.slane %v2083_v19, 4 }
 0x26b   : > { %1597 = vrot.lane.b32.xlu0 %v1594_v4, %s14617_s28  ;;  %v1777_v4 = vrot.slane %v1775_v58, 4  ;;  %v9752_v38 = vpack.i.bf16 %v10845_v16, %v10843_v15 }
 0x26e   : > { %1778 = vrot.lane.b32.xlu1 %v1774_v12, %s14621_s21  ;;  %v2407_v12 = vshrl.u32 %v2404_v1, 16 }
 0x26f   : > { %1692 = vrot.lane.b32.xlu0 %v1687_v14, %s14618_s15 }
 0x272   : > { %2088 = vrot.lane.b32.xlu1 %v2083_v19, %s14549_s30  ;;  %v9747_v19 = vpack.i.bf16 %v10839_v7, %v10837_v6 }
 0x273   : > { %1780 = vrot.lane.b32.xlu0 %v1775_v58, %s14621_s21  ;;  %v2119_v58 = vshrl.u32 %v2116_v8, 16 }
 0x276   : > { %2378 = vrot.lane.b32.xlu1 %v2372_v21, %s14545_s22  ;;  %v1689_v21 = vrot.slane %v1687_v14, 4  ;;  %v2121_v14 = vrot.slane %v2119_v58, 6 }
 0x277   : > { %1782 = vrot.lane.b32.xlu0 %v1776_v23, %s14621_s21  ;;  %v2122_v23 = vshll.u32 %v2116_v8, 16 }
 0x27a   : > { %2307 = vrot.lane.b32.xlu1 %v2301_v25, %s14553_s20  ;;  %v2333_v25 = vld [vmem:[#allocation2] sm:$0x77] }
 0x27b   : > { %1694 = vrot.lane.b32.xlu0 %v1688_v26, %s14618_s15  ;;  %v2051_v26 = vshll.u32 %v2045_v61, 16 }
 0x27d   : > { %v2053_v36 = vor.u32 %v2051_v26, %v2050_v17  ;;  %v2343_v17 = vshrl.u32 %v2334_v63, 16 }
 0x27e   : > { %2019 = vrot.lane.b32.xlu1 %v2013_v3, %s14616_s18  ;;  %v2405_v3 = vld [vmem:[#allocation2 + $0x8] sm:$0x77] }
 0x27f   : > { %2380 = vrot.lane.b32.xlu0 %v2373_v37, %s14545_s22  ;;  %v2409_v37 = vrot.slane %v2407_v12, 6  ;;  %v2415_v60 = vshrl.u32 %v2405_v3, 16  ;;  %v2418_v22 = vshll.u32 %v2405_v3, 16  ;;  %s14628_s22 = smov 47  }
 0x281   : > { %v2417_v8 = vrot.slane %v2415_v60, 6  ;;  %v2420_v12 = vrot.slane %v2418_v22, 7 }
 0x282   : > { %2090 = vrot.lane.b32.xlu1 %v2084_v30, %s14549_s30  ;;  %v2412_v30 = vrot.slane %v2410_v18, 7  ;;  %v2173_v18 = vld [vmem:[#allocation2 + $0x8] sm:$0x77] }
 0x283   : > { %2309 = vrot.lane.b32.xlu0 %v2302_v40, %s14553_s20  ;;  %v2336_v40 = vshrl.u32 %v2333_v25, 16  ;;  %v2183_v26 = vshrl.u32 %v2173_v18, 16  ;;  %v2186_v3 = vshll.u32 %v2173_v18, 16  ;;  %s14632_s20 = smov 108  }
 0x284   : > { %v2413_v61 = vor.u32 %v2412_v30, %v2409_v37  ;;  %v1884_v37 = vld [vmem:[#allocation2] sm:$0x77] }
 0x285   : > { %v2338_v62 = vrot.slane %v2336_v40, 7  ;;  %v2345_v40 = vrot.slane %v2343_v17, 7  ;;  %v1887_v60 = vshrl.u32 %v1884_v37, 16 }
 0x286   : > { %9743 = vrot.lane.b32.xlu1 %v9742_v24, %s14622_s11  ;;  %v2172_v24 = vld [vmem:[#allocation2] sm:$0x77] }
 0x287   : > { %2021 = vrot.lane.b32.xlu0 %v2014_v59, %s14616_s18  ;;  %v2124_v59 = vrot.slane %v2122_v23, 7  ;;  %v2175_v0 = vshrl.u32 %v2172_v24, 16  ;;  %v2178_v1 = vshll.u32 %v2172_v24, 16  ;;  %v2185_v24 = vrot.slane %v2183_v26, 5 }
 0x289   : > { %v2180_v30 = vrot.slane %v2178_v1, 6  ;;  %v1885_v1 = vld [vmem:[#allocation2 + $0x8] sm:$0x77] }
 0x28a   : > { %1784 = vrot.lane.b32.xlu1 %v1777_v4, %s14621_s21  ;;  %v2125_v4 = vor.u32 %v2124_v59, %v2121_v14  ;;  %v1822_v14 = vld [vmem:[#allocation2 + $0x8] sm:$0x77]  ;;  %v1895_v26 = vshrl.u32 %v1885_v1, 16 }
 0x28b   : > { %2092 = vrot.lane.b32.xlu0 %v2085_v2, %s14549_s30  ;;  %v1821_v2 = vld [vmem:[#allocation2] sm:$0x77]  ;;  %v1832_v18 = vshrl.u32 %v1822_v14, 16  ;;  %s14630_s30 = smov 106  }
 0x28c   : > { %v1827_v23 = vshll.u32 %v1821_v2, 16 }
 0x28e   : > { %1696 = vrot.lane.b32.xlu1 %v1689_v21, %s14618_s15  ;;  %v2339_v21 = vshll.u32 %v2333_v25, 16  ;;  %v2346_v25 = vshll.u32 %v2334_v63, 16  ;;  %v1829_v22 = vrot.slane %v1827_v23, 7 }
 0x28f   : > { %9748 = vrot.lane.b32.xlu0 %v9747_v19, %s14623_s29  ;;  %v1824_v19 = vshrl.u32 %v1821_v2, 16 }
 0x290   : > { %v2341_v58 = vor.u32 %v2339_v21, %v2338_v62  ;;  %v1890_v62 = vshll.u32 %v1884_v37, 16  ;;  %v1526_v37 = vld [vmem:[#allocation2] sm:$0x77] }
 0x291   : > { %v1826_v59 = vrot.slane %v1824_v19, 6 }
 0x292   : > { %9753 = vrot.lane.b32.xlu1 %v9752_v38, %s14624_s17  ;;  %v2421_v38 = vor.u32 %v2420_v12, %v2417_v8  ;;  %v1835_v8 = vshll.u32 %v1822_v14, 16  ;;  %v1889_v12 = vrot.slane %v1887_v60, 5  ;;  %v1892_v21 = vrot.slane %v1890_v62, 6  ;;  %v1527_v62 = vld [vmem:[#allocation2 + $0x8] sm:$0x77] }
 0x293   : > { %2061 = vrot.lane.b32.xlu0 %v2053_v36, %s14625_s23  ;;  %v2177_v36 = vrot.slane %v2175_v0, 5  ;;  %v1730_v0 = vld [vmem:[#allocation2] sm:$0x77]  ;;  %v1830_v63 = vor.u32 %v1829_v22, %v1826_v59  ;;  %v1532_v14 = vshll.u32 %v1526_v37, 16  ;;  %v1897_v59 = vrot.slane %v1895_v26, 5 }
 0x294   : > { %v1733_v19 = vshrl.u32 %v1730_v0, 16  ;;  %v1837_v23 = vrot.slane %v1835_v8, 7 }
 0x295   : > { %v10859_v2 = vor.u32 %v2180_v30, %v2177_v36  ;;  %v10869_v36 = vor.u32 %v1892_v21, %v1889_v12  ;;  %v1534_v8 = vrot.slane %v1532_v14, 6  ;;  %v1537_v21 = vshrl.u32 %v1527_v62, 16 }
 0x296   : > { %2422 = vrot.lane.b32.xlu1 %v2413_v61, %s14626_s27  ;;  %v2188_v61 = vrot.slane %v2186_v3, 6  ;;  %v1898_v3 = vshll.u32 %v1885_v1, 16  ;;  %v1735_v30 = vrot.slane %v1733_v19, 7  ;;  %v1540_v19 = vshll.u32 %v1527_v62, 16 }
 0x297   : > { %2134 = vrot.lane.b32.xlu0 %v2125_v4, %s14627_s19  ;;  %v2348_v4 = vor.u32 %v2346_v25, %v2345_v40  ;;  %v1529_v40 = vshrl.u32 %v1526_v37, 16  ;;  %v2255_v37 = vshrl.u32 %v10801_v27, 16  ;;  %v2190_v27 = vrot.slane %v10859_v2, 4 }
 0x298   : > { %v10864_v17 = vor.u32 %v2188_v61, %v2185_v24  ;;  %v1900_v60 = vrot.slane %v1898_v3, 6  ;;  %v2046_v24 = vld [vmem:[#allocation2 + $0x8] sm:$0x77]  ;;  %v1736_v61 = vshll.u32 %v1730_v0, 16  ;;  %v1542_v14 = vrot.slane %v1540_v19, 6 }
 0x299   : > { %v2055_v1 = vshrl.u32 %v2046_v24, 16 }
 0x29a   : > { %2349 = vrot.lane.b32.xlu1 %v2341_v58, %s14628_s22  ;;  %v1834_v58 = vrot.slane %v1832_v18, 6  ;;  %v1531_v18 = vrot.slane %v1529_v40, 5  ;;  %v10874_v12 = vor.u32 %v1900_v60, %v1897_v59  ;;  %v1539_v40 = vrot.slane %v1537_v21, 5 }
 0x29b   : > { %2424 = vrot.lane.b32.xlu0 %v2421_v38, %s14626_s27  ;;  %v1731_v38 = vld [vmem:[#allocation2 + $0x8] sm:$0x77]  ;;  %v2057_v26 = vrot.slane %v2055_v1, 7  ;;  %v2058_v59 = vshll.u32 %v2046_v24, 16  ;;  %v1967_v1 = vshrl.u32 %v10819_v57, 16  ;;  %v2191_v9 = vrot.slane %v10864_v17, 4 }
 0x29c   : > { %v1838_v25 = vor.u32 %v1837_v23, %v1834_v58  ;;  %v1740_v22 = vshrl.u32 %v1731_v38, 16  ;;  %v2117_v58 = vld [vmem:[#allocation2 + $0x8] sm:$0x77]  ;;  %v1743_v0 = vshll.u32 %v1731_v38, 16  ;;  %v1535_v23 = vor.u32 %v1534_v8, %v1531_v18 }
 0x29d   : > { %v2127_v3 = vshrl.u32 %v2117_v58, 16  ;;  %v2060_v60 = vor.u32 %v2058_v59, %v2057_v26  ;;  %v2257_v38 = vrot.slane %v2255_v37, 4  ;;  %v1969_v26 = vrot.slane %v1967_v1, 4  ;;  %v2454_v59 = vld [vmem:[#allocation4 + $0xf0] sm:$0x77] }
 0x29e   : > { %2192 = vrot.lane.b32.xlu1 %v10859_v2, %s14629_s26 }
 0x29f   : > { %2351 = vrot.lane.b32.xlu0 %v2348_v4, %s14628_s22  ;;  %v1738_v4 = vor.u32 %v1736_v61, %v1735_v30  ;;  %v10882_v61 = vor.u32 %v1542_v14, %v1539_v40  ;;  %v2258_v18 = vor.u32 %v2257_v38, %v10815_v41  ;;  %v1970_v40 = vor.u32 %v1969_v26, %v10837_v6 }
 0x2a2   : > { %1839 = vrot.lane.b32.xlu1 %v1830_v63, %s14630_s30  ;;  %v1742_v63 = vrot.slane %v1740_v22, 7  ;;  %v2129_v22 = vrot.slane %v2127_v3, 6  ;;  %v1637_v3 = vshrl.u32 %v10831_v35, 16 }
 0x2a3   : > { %2194 = vrot.lane.b32.xlu0 %v10864_v17, %s14629_s26 }
 0x2a4   : > { %v1745_v30 = vor.u32 %v1743_v0, %v1742_v63  ;;  %v1632_v63 = vshrl.u32 %v10829_v32, 16  ;;  %v1544_v0 = vrot.slane %v1535_v23, 4  ;;  %v1902_v32 = vrot.slane %v10869_v36, 4 }
 0x2a6   : > { %1904 = vrot.lane.b32.xlu1 %v10869_v36, %s14631_s16  ;;  %v1634_v41 = vrot.slane %v1632_v63, 4  ;;  %v1639_v36 = vrot.slane %v1637_v3, 4 }
 0x2a7   : > { %1841 = vrot.lane.b32.xlu0 %v1838_v25, %s14630_s30  ;;  %v2130_v25 = vshll.u32 %v2117_v58, 16  ;;  %v2259_v58 = vrot.slane %v2258_v18, 4 }
 0x2a8   : > { %v1635_v35 = vor.u32 %v1634_v41, %v10843_v15 }
 0x2a9   : > { %v2132_v62 = vrot.slane %v2130_v25, 7 }
 0x2aa   : > { %1746 = vrot.lane.b32.xlu1 %v1738_v4, %s14632_s20  ;;  %v2260_v4 = vshrl.u32 %v10803_v29, 16  ;;  %v1972_v29 = vshrl.u32 %v10821_v39, 16  ;;  %v1636_v1 = vrot.slane %v1635_v35, 4 }
 0x2ab   : > { %1906 = vrot.lane.b32.xlu0 %v10874_v12, %s14631_s16  ;;  %v2133_v24 = vor.u32 %v2132_v62, %v2129_v22 }
 0x2ac   : > { %v2262_v8 = vrot.slane %v2260_v4, 4  ;;  %v1974_v57 = vrot.slane %v1972_v29, 4  ;;  %v1640_v29 = vor.u32 %v1639_v36, %v10845_v16  ;;  %v2242_v36 = vld [vmem:[#allocation4 + $0xb8] sm:$0xee] }
 0x2ae   : > { %1546 = vrot.lane.b32.xlu1 %v1535_v23, %s14633_s24  ;;  %v2263_v2 = vor.u32 %v2262_v8, %v10817_v56  ;;  %v2457_v23 = vld [vmem:[#allocation4 + $0xf8] sm:$0x77]  ;;  %v1903_v56 = vrot.slane %v10874_v12, 4 }
 0x2af   : > { %1748 = vrot.lane.b32.xlu0 %v1745_v30, %s14632_s20 }
 0x2b0   : > { %v2264_v39 = vrot.slane %v2263_v2, 4  ;;  %v2169_v2 = vld [vmem:[#allocation4 + $0xa8] sm:$0x77] }
 0x2b2   : > { %2063 = vrot.lane.b32.xlu1 %v2060_v60, %s14625_s23  ;;  %v1975_v60 = vor.u32 %v1974_v57, %v10839_v7  ;;  %v1878_v57 = vld [vmem:[#allocation4 + $0x50] sm:$0x77] }
 0x2b3   : > { %1548 = vrot.lane.b32.xlu0 %v10882_v61, %s14633_s24 }
 0x2b4   : > { %v1976_v63 = vrot.slane %v1975_v60, 4 }
 0x2b6   : > { %2136 = vrot.lane.b32.xlu1 %v2133_v24, %s14627_s19  ;;  %v1971_v24 = vrot.slane %v1970_v40, 4 }
 0x2b7   : > { %2196 = vrot.lane.b32.xlu0 %v2190_v27, %s14629_s26 }
 0x2b8   : > { %v2444_v21 = vpop.permute.xlu1 %2443 }
 0x2b9   : > { %v1868_v19 = vpop.permute.xlu0 %1867  ;;  %v2447_v14 = vrot.slane %v2444_v21, 4 }
 0x2ba   : > { %2269 = vrot.lane.b32.xlu1 %v2259_v58, %s14622_s11  ;;  %v1871_v62 = vrot.slane %v1868_v19, 4 }
 0x2bb   : > { %1550 = vrot.lane.b32.xlu0 %v1544_v0, %s14633_s24 }
 0x2bc   : > { %v2156_v37 = vpop.permute.xlu1 %2155 }
 0x2bd   : > { %v2446_v30 = vpop.permute.xlu0 %2445  ;;  %v2159_v15 = vrot.slane %v2156_v37, 4 }
 0x2be   : > { %v2448_v25 = vrot.slane %v2446_v30, 4  ;;  %1908 = vrot.lane.b32.xlu1 %v1902_v32, %s14631_s16  ;;  %v2166_v32 = vld [vmem:[#allocation4 + $0xa0] sm:$0x77] }
 0x2bf   : > { %2271 = vrot.lane.b32.xlu0 %v2264_v39, %s14622_s11 }
 0x2c0   : > { %v2449_v22 = vsel %vm14568_vm5, %v2447_v14, %v2448_v25  ;;  %v2451_v6 = vsel %vm14557_vm6, %v2446_v30, %v2448_v25  ;;  %v1870_v4 = vpop.permute.xlu1 %1869 }
 0x2c1   : > { %v2450_v12 = vsel %vm14557_vm6, %v2444_v21, %v2449_v22  ;;  %v2458_v38 = vsel %vm10788_vm1, %v2451_v6, %v2457_v23  ;;  %v2158_v27 = vpop.permute.xlu0 %2157  ;;  %v1872_v18 = vrot.slane %v1870_v4, 4  ;;  %v1881_v21 = vld [vmem:[#allocation4 + $0x58] sm:$0x77]  ;;  %vm1608_vm6 = vmand %vm14565_vm9, %vm1607_vm7  ;;  %v2239_v6 = vld [vmem:[#allocation4 + $0xb0] sm:$0xee] }
 0x2c2   : > { %v2455_v7 = vsel %vm10746_vm11, %v2450_v12, %v2454_v59  ;;  %2459 = vst [vmem:[#allocation4 + $0xf8] sm:$0x77] %v2458_v38  ;;  %v2160_v8 = vrot.slane %v2158_v27, 4  ;;  %1981 = vrot.lane.b32.xlu1 %v1971_v24, %s14623_s29  ;;  %vm1715_vm9 = vsmask.f32 256 }
 0x2c3   : > { %2456 = vst [vmem:[#allocation4 + $0xf0] sm:$0x77] %v2455_v7  ;;  %1910 = vrot.lane.b32.xlu0 %v1903_v56, %s14631_s16  ;;  %v1873_v58 = vsel %vm14568_vm5, %v1871_v62, %v1872_v18  ;;  %v1875_v0 = vsel %vm14559_vm3, %v1870_v4, %v1872_v18 }
 0x2c4   : > { %v2161_v26 = vsel %vm14568_vm5, %v2159_v15, %v2160_v8  ;;  %v2163_v41 = vsel %vm14558_vm12, %v2158_v27, %v2160_v8  ;;  %v1874_v3 = vsel %vm14559_vm3, %v1868_v19, %v1873_v58  ;;  %v1882_v30 = vsel %vm10788_vm1, %v1875_v0, %v1881_v21  ;;  %v2229_v40 = vpop.permute.xlu1 %2228 }
 0x2c5   : > { %v2162_v39 = vsel %vm14558_vm12, %v2156_v37, %v2161_v26  ;;  %v2170_v16 = vsel %vm10788_vm1, %v2163_v41, %v2169_v2  ;;  %v10926_v14 = vpop.permute.xlu0 %2086  ;;  %v1879_v23 = vsel %vm10746_vm11, %v1874_v3, %v1878_v57  ;;  %1883 = vst [vmem:[#allocation4 + $0x58] sm:$0x77] %v1882_v30  ;;  %vm1617_vm1 = vmand %vm14564_vm14, %vm1610_vm4  ;;  %v1641_v37 = vrot.slane %v1640_v29, 4 }
 0x2c6   : > { %v2167_v25 = vsel %vm10746_vm11, %v2162_v39, %v2166_v32  ;;  %2171 = vst [vmem:[#allocation4 + $0xa8] sm:$0x77] %v2170_v16  ;;  %1880 = vst [vmem:[#allocation4 + $0x50] sm:$0x77] %v1879_v23  ;;  %1646 = vrot.lane.b32.xlu1 %v1636_v1, %s14624_s17  ;;  %v2232_v56 = vrot.slane %v2229_v40, 4  ;;  %v1545_v27 = vrot.slane %v10882_v61, 4 }
 0x2c7   : > { %2168 = vst [vmem:[#allocation4 + $0xa0] sm:$0x77] %v2167_v25  ;;  %1983 = vrot.lane.b32.xlu0 %v1976_v63, %s14623_s29  ;;  %vm1611_vm12 = vmand %vm14563_vm15, %vm1610_vm4  ;;  %vm14638_vm4 = vcmask 531456   ;;  %v14642_v21 = vmov 0  ;;  %v1954_v32 = vld [vmem:[#allocation4 + $0x68] sm:$0xee] }
 0x2c8   : > { %v2304_v10 = vpop.permute.xlu1 %2303  ;;  %vm10941_vm11 = vmor %vm1617_vm1, %vm1608_vm6  ;;  %vm14659_vm15 = vcmask 128004   ;;  %vm14574_vm14 = vcmask 1040384  }
 0x2c9   : > { %v2231_v19 = vpop.permute.xlu0 %2230  ;;  %vm10945_vm7 = vmor %vm1611_vm12, %vm1608_vm6  ;;  %v2311_v24 = vrot.slane %v2304_v10, 4  ;;  %vm14567_vm6 = vcmask 1043459   ;;  %vm14566_vm12 = vcmask 130055  }
 0x2ca   : > { %v2233_v35 = vrot.slane %v2231_v19, 4  ;;  %2198 = vrot.lane.b32.xlu1 %v2191_v9, %s14629_s26  ;;  %vm14639_vm3 = vmmov %vm14638_vm4 }
 0x2cb   : > { %1648 = vrot.lane.b32.xlu0 %v1641_v37, %s14624_s17 }
 0x2cc   : > { %v2234_v22 = vsel %vm14568_vm5, %v2232_v56, %v2233_v35  ;;  %v2236_v17 = vsel %vm14638_vm4, %v2231_v19, %v2233_v35  ;;  %v2375_v38 = vpop.permute.xlu1 %2374  ;;  %vm10967_vm4 = vmor %vm14566_vm12, %vm14567_vm6  ;;  %vm14573_vm6 = vcmask 126980  }
 0x2cd   : > { %v2235_v62 = vsel %vm14639_vm3, %v2229_v40, %v2234_v22  ;;  %v2243_v12 = vsel %vm10941_vm11, %v2236_v17, %v2242_v36  ;;  %v2306_v4 = vpop.permute.xlu0 %2305  ;;  %vm14640_vm3 = vcmask 392192   ;;  %v2382_v29 = vrot.slane %v2375_v38, 4  ;;  %v1951_v40 = vld [vmem:[#allocation4 + $0x60] sm:$0xee] }
 0x2ce   : > { %v2240_v15 = vsel %vm10945_vm7, %v2235_v62, %v2239_v6  ;;  %2244 = vst [vmem:[#allocation4 + $0xb8] sm:$0xee] %v2243_v12  ;;  %v2312_v7 = vrot.slane %v2306_v4, 4  ;;  %1552 = vrot.lane.b32.xlu1 %v1545_v27, %s14633_s24  ;;  %vm14641_vm1 = vmmov %vm14640_vm3  ;;  %v14643_v21 = vsel %vm10967_vm4, 4294967295, %v14642_v21 }
 0x2cf   : > { %2241 = vst [vmem:[#allocation4 + $0xb0] sm:$0xee] %v2240_v15 }
 0x2d0   : > { %v2315_v18 = vsel %vm14568_vm5, %v2311_v24, %v2312_v7  ;;  %v2317_v8 = vsel %vm14640_vm3, %v2306_v4, %v2312_v7  ;;  %v1941_v61 = vpop.permute.xlu1 %1940  ;;  %vm14645_vm3 = vmmov %vm14644_vm0  ;;  %v1613_v24 = vld [vmem:[#allocation4 + $0x10] sm:$0xee] }
 0x2d1   : > { %v2316_v1 = vsel %vm14641_vm1, %v2304_v10, %v2315_v18  ;;  %2326 = vst.msk [vmem:[#allocation4 + $0xc8] sm:$0xcc] %vm10519_vm8, %v2317_v8  ;;  %v2377_v63 = vpop.permute.xlu0 %2376  ;;  %v1944_v3 = vrot.slane %v1941_v61, 4  ;;  %vm14646_vm1 = vcmask 719872  }
 0x2d2   : > { %2325 = vst [vmem:[#allocation4 + $0xc0] sm:$0xcc] %v2316_v1  ;;  %v2383_v58 = vrot.slane %v2377_v63, 4  ;;  %vm14647_vm10 = vmmov %vm14646_vm1 }
 0x2d4   : > { %v2386_v0 = vsel %vm14568_vm5, %v2382_v29, %v2383_v58  ;;  %v2388_v2 = vsel %vm14644_vm0, %v2377_v63, %v2383_v58  ;;  %v2016_v41 = vpop.permute.xlu1 %2015  ;;  %vm14648_vm0 = vcmask 703488  }
 0x2d5   : > { %v2387_v26 = vsel %vm14645_vm3, %v2375_v38, %v2386_v0  ;;  %2397 = vst.msk [vmem:[#allocation4 + $0xd8] sm:$0x88] %vm10967_vm4, %v2388_v2  ;;  %v1943_v57 = vpop.permute.xlu0 %1942  ;;  %v2023_v9 = vrot.slane %v2016_v41, 4  ;;  %vm14649_vm3 = vmmov %vm14648_vm0  ;;  %v1619_v38 = vld [vmem:[#allocation4 + $0x18] sm:$0xee] }
 0x2d6   : > { %2396 = vst [vmem:[#allocation4 + $0xd0] sm:$0x88] %v2387_v26  ;;  %v1945_v30 = vrot.slane %v1943_v57, 4  ;;  %v2094_v26 = vrot.slane %v10926_v14, 4 }
 0x2d8   : > { %v1946_v39 = vsel %vm14568_vm5, %v1944_v3, %v1945_v30  ;;  %v1948_v16 = vsel %vm14646_vm1, %v1943_v57, %v1945_v30  ;;  %v1596_v10 = vpop.permute.xlu1 %1595 }
 0x2d9   : > { %v1947_v23 = vsel %vm14647_vm10, %v1941_v61, %v1946_v39  ;;  %v1955_v25 = vsel %vm10941_vm11, %v1948_v16, %v1954_v32  ;;  %v2018_v19 = vpop.permute.xlu0 %2017  ;;  %v1599_v62 = vrot.slane %v1596_v10, 4  ;;  %vm14650_vm10 = vcmask 1031168  }
 0x2da   : > { %v1952_v37 = vsel %vm10945_vm7, %v1947_v23, %v1951_v40  ;;  %1956 = vst [vmem:[#allocation4 + $0x68] sm:$0xee] %v1955_v25  ;;  %v2024_v56 = vrot.slane %v2018_v19, 4  ;;  %vm14651_vm1 = vmmov %vm14650_vm10 }
 0x2db   : > { %1953 = vst [vmem:[#allocation4 + $0x60] sm:$0xee] %v1952_v37 }
 0x2dc   : > { %v2027_v35 = vsel %vm14568_vm5, %v2023_v9, %v2024_v56  ;;  %v2029_v36 = vsel %vm14648_vm0, %v2018_v19, %v2024_v56  ;;  %v1691_v17 = vpop.permute.xlu1 %1690  ;;  %vm14652_vm0 = vcmask 1014784  }
 0x2dd   : > { %v2028_v22 = vsel %vm14649_vm3, %v2016_v41, %v2027_v35  ;;  %2038 = vst.msk [vmem:[#allocation4 + $0x78] sm:$0xcc] %vm10519_vm8, %v2029_v36  ;;  %v1598_v6 = vpop.permute.xlu0 %1597  ;;  %v1698_v1 = vrot.slane %v1691_v17, 4  ;;  %vm14653_vm3 = vmmov %vm14652_vm0  ;;  %v2401_v36 = vld [vmem:[#allocation4 + $0xe8] sm:$0x33] }
 0x2de   : > { %2037 = vst [vmem:[#allocation4 + $0x70] sm:$0xcc] %v2028_v22  ;;  %v1600_v12 = vrot.slane %v1598_v6, 4 }
 0x2e0   : > { %v1601_v4 = vsel %vm14568_vm5, %v1599_v62, %v1600_v12  ;;  %v1603_v27 = vsel %vm14650_vm10, %v1598_v6, %v1600_v12  ;;  %v1779_v18 = vpop.permute.xlu1 %1778  ;;  %v2398_v6 = vld [vmem:[#allocation4 + $0xe0] sm:$0x33] }
 0x2e1   : > { %v1602_v15 = vsel %vm14651_vm1, %v1596_v10, %v1601_v4  ;;  %v1620_v7 = vsel %vm10941_vm11, %v1603_v27, %v1619_v38  ;;  %v1693_v8 = vpop.permute.xlu0 %1692  ;;  %v1786_v41 = vrot.slane %v1779_v18, 4  ;;  %vm14654_vm11 = vcmask 687104  }
 0x2e2   : > { %v1614_v61 = vsel %vm10945_vm7, %v1602_v15, %v1613_v24  ;;  %1621 = vst [vmem:[#allocation4 + $0x18] sm:$0xee] %v1620_v7  ;;  %v1699_v63 = vrot.slane %v1693_v8, 4  ;;  %vm14655_vm7 = vcmask 875520   ;;  %vm14656_vm10 = vmmov %vm14654_vm11 }
 0x2e3   : > { %1615 = vst [vmem:[#allocation4 + $0x10] sm:$0xee] %v1614_v61  ;;  %vm14657_vm1 = vmmov %vm14655_vm7 }
 0x2e4   : > { %v1702_v29 = vsel %vm14568_vm5, %v1698_v1, %v1699_v63  ;;  %v1704_v58 = vsel %vm14652_vm0, %v1693_v8, %v1699_v63  ;;  %v2089_v59 = vpop.permute.xlu1 %2088  ;;  %vm1806_vm0 = vsmask.f32 1280  ;;  %v2330_v8 = vld [vmem:[#allocation4 + $0xd8] sm:$0x11]  ;;  %v2327_v63 = vld [vmem:[#allocation4 + $0xd0] sm:$0x11] }
 0x2e5   : > { %v1703_v0 = vsel %vm14653_vm3, %v1691_v17, %v1702_v29  ;;  %1713 = vst.msk [vmem:[#allocation4 + $0x28] sm:$0xcc] %vm10519_vm8, %v1704_v58  ;;  %v1781_v2 = vpop.permute.xlu0 %1780  ;;  %v2095_v60 = vrot.slane %v2089_v59, 4  ;;  %vm14571_vm3 = vcmask 1045508  }
 0x2e6   : > { %1712 = vst [vmem:[#allocation4 + $0x20] sm:$0xcc] %v1703_v0  ;;  %v1787_v57 = vrot.slane %v1781_v2, 4 }
 0x2e7   : > { %v2098_v3 = vsel %vm14568_vm5, %v2094_v26, %v2095_v60  ;;  %v2100_v30 = vsel %vm14654_vm11, %v2089_v59, %v2095_v60  ;;  %vm1809_vm11 = vsmask.f32 5376 }
 0x2e8   : > { %v1790_v32 = vsel %vm14568_vm5, %v1786_v41, %v1787_v57  ;;  %v1792_v39 = vsel %vm14655_vm7, %v1781_v2, %v1787_v57  ;;  %v2099_v16 = vsel %vm14656_vm10, %v10926_v14, %v2098_v3  ;;  %2109 = vst.msk [vmem:[#allocation4 + $0x88] sm:$0x88] %vm10967_vm4, %v2100_v30  ;;  %v2379_v23 = vpop.permute.xlu1 %2378  ;;  %vm14658_vm7 = vcmask 1041408   ;;  %vm1810_vm10 = vmand %vm14571_vm3, %vm1809_vm11 }
 0x2e9   : > { %v1791_v40 = vsel %vm14657_vm1, %v1779_v18, %v1790_v32  ;;  %1804 = vst.msk [vmem:[#allocation4 + $0x38] sm:$0x88] %vm10967_vm4, %v1792_v39  ;;  %v11012_v25 = vpop.permute.xlu0 %1782  ;;  %2108 = vst [vmem:[#allocation4 + $0x80] sm:$0x88] %v2099_v16  ;;  %vm1718_vm5 = vsmask.f32 4352 }
 0x2ea   : > { %1800 = vst [vmem:[#allocation4 + $0x30] sm:$0x88] %v1791_v40  ;;  %vm1807_vm13 = vmand %vm14658_vm7, %vm1806_vm0  ;;  %vm14572_vm0 = vcmask 1044484   ;;  %v2384_v35 = vrot.slane %v2379_v23, 4  ;;  %vm14666_vm7 = vcmask 1043456   ;;  %vm14673_vm3 = vcmask 1043456  }
 0x2eb   : > { %vm1816_vm1 = vmand %vm14659_vm15, %vm1809_vm11 }
 0x2ec   : > { %v2308_v10 = vpop.permute.xlu1 %2307  ;;  %vm11019_vm12 = vmor %vm1810_vm10, %vm1807_vm13  ;;  %vm14667_vm10 = vcmask 375808  }
 0x2ed   : > { %v11015_v14 = vpop.permute.xlu0 %1694  ;;  %vm11023_vm4 = vmor %vm1816_vm1, %vm1807_vm13  ;;  %v2313_v15 = vrot.slane %v2308_v10, 4 }
 0x2ee   : > { %vm11028_vm15 = vmand %vm14574_vm14, %vm1715_vm9  ;;  %vm1665_vm9 = vsmask.f32 7950 }
 0x2ef   : > { %vm1725_vm11 = vmand %vm14573_vm6, %vm1718_vm5 }
 0x2f0   : > { %v2020_v9 = vpop.permute.xlu1 %2019  ;;  %vm1719_vm13 = vmand %vm14572_vm0, %vm1718_vm5  ;;  %vm1668_vm5 = vsmask.f32 7966  ;;  %vm14674_vm0 = vcmask 392192  }
 0x2f1   : > { %v2381_v56 = vpop.permute.xlu0 %2380  ;;  %vm14668_vm1 = vmmov %vm14667_vm10  ;;  %v2025_v59 = vrot.slane %v2020_v9, 4 }
 0x2f2   : > { %v2385_v22 = vrot.slane %v2381_v56, 4  ;;  %vm14678_vm14 = vmmov %vm14674_vm0 }
 0x2f4   : > { %v2389_v62 = vsel %vm14666_vm7, %v2384_v35, %v2385_v22  ;;  %v2391_v12 = vsel %vm14667_vm10, %v2381_v56, %v2385_v22  ;;  %v11039_v27 = vpop.permute.xlu1 %2090  ;;  %vm11045_vm7 = vmor %vm1725_vm11, %vm11028_vm15  ;;  %vm14675_vm11 = vcmask 1043459   ;;  %v1788_v35 = vrot.slane %v11012_v25, 4  ;;  %v2039_v22 = vld [vmem:[#allocation4 + $0x80] sm:$0x11] }
 0x2f5   : > { %v2390_v38 = vsel %vm14668_vm1, %v2379_v23, %v2389_v62  ;;  %v2402_v4 = vsel %vm11023_vm4, %v2391_v12, %v2401_v36  ;;  %v2310_v24 = vpop.permute.xlu0 %2309  ;;  %vm11051_vm10 = vmor %vm1719_vm13, %vm11028_vm15  ;;  %vm1667_vm1 = vcmask 1047559   ;;  %vm14679_vm15 = vcmask 130055   ;;  %v2042_v23 = vld [vmem:[#allocation4 + $0x88] sm:$0x11] }
 0x2f6   : > { %v2399_v7 = vsel %vm11019_vm12, %v2390_v38, %v2398_v6  ;;  %2403 = vst [vmem:[#allocation4 + $0xe8] sm:$0x33] %v2402_v4  ;;  %v2314_v1 = vrot.slane %v2310_v24, 4  ;;  %vm11058_vm6 = vmand %vm14675_vm11, %vm1665_vm9  ;;  %vm14683_vm9 = vcmask 703488   ;;  %vm14687_vm11 = vcmask 523264  }
 0x2f7   : > { %2400 = vst [vmem:[#allocation4 + $0xe0] sm:$0x33] %v2399_v7  ;;  %vm1675_vm13 = vmand %vm14679_vm15, %vm1668_vm5  ;;  %v14296_v36 = vld.sshfl [vmem:[%s14481_s7 + $0x10] sm:$0x33 pattern:$0x76325410] }
 0x2f8   : > { %v2318_v29 = vsel %vm14673_vm3, %v2313_v15, %v2314_v1  ;;  %v2320_v58 = vsel %vm14674_vm0, %v2310_v24, %v2314_v1  ;;  %v9744_v41 = vpop.permute.xlu1 %9743  ;;  %vm1669_vm3 = vmand %vm1667_vm1, %vm1668_vm5  ;;  %vm14682_vm0 = vcmask 1043456   ;;  %v2290_v24 = vld [vmem:[#allocation4 + $0xb8] sm:$0x88] }
 0x2f9   : > { %v2319_v2 = vsel %vm14678_vm14, %v2308_v10, %v2318_v29  ;;  %v2331_v26 = vsel %vm11045_vm7, %v2320_v58, %v2330_v8  ;;  %v2022_v60 = vpop.permute.xlu0 %2021  ;;  %v9746_v3 = vunpack.i.h.bf16 %v9744_v41  ;;  %v9745_v30 = vunpack.i.l.bf16 %v9744_v41  ;;  %vm11072_vm14 = vmor %vm1675_vm13, %vm11058_vm6  ;;  %v1812_v41 = vld [vmem:[#allocation4 + $0x40] sm:$0x33] }
 0x2fa   : > { %v2328_v57 = vsel %vm11051_vm10, %v2319_v2, %v2327_v63  ;;  %2332 = vst [vmem:[#allocation4 + $0xd8] sm:$0x11] %v2331_v26  ;;  %v2026_v32 = vrot.slane %v2022_v60, 4  ;;  %vm11081_vm5 = vmor %vm1669_vm3, %vm11058_vm6  ;;  %v2096_v8 = vrot.slane %v11039_v27, 4  ;;  %v1700_v58 = vrot.slane %v11015_v14, 4 }
 0x2fb   : > { %2329 = vst [vmem:[#allocation4 + $0xd0] sm:$0x11] %v2328_v57  ;;  %v2274_v16 = vrot.slane %v9746_v3, 4  ;;  %v2273_v40 = vrot.slane %v9745_v30, 4  ;;  %vm14686_vm1 = vmmov %vm14683_vm9  ;;  %vm14691_vm3 = vcmask 875520  }
 0x2fc   : > { %v2030_v10 = vsel %vm14682_vm0, %v2025_v59, %v2026_v32  ;;  %v2032_v56 = vsel %vm14683_vm9, %v2022_v60, %v2026_v32  ;;  %v1785_v62 = vpop.permute.xlu1 %1784  ;;  %vm14688_vm15 = vmmov %vm14682_vm0  ;;  %v1818_v59 = vld [vmem:[#allocation4 + $0x48] sm:$0x33] }
 0x2fd   : > { %v2031_v17 = vsel %vm14686_vm1, %v2020_v9, %v2030_v10  ;;  %v2043_v6 = vsel %vm11045_vm7, %v2032_v56, %v2042_v23  ;;  %v2093_v12 = vpop.permute.xlu0 %2092  ;;  %v2279_v38 = vsel %vm14687_vm11, %v9746_v3, %v2274_v16  ;;  %v2277_v4 = vsel %vm14688_vm15, %v2273_v40, %v2274_v16  ;;  %vm14689_vm6 = vmmov %vm14687_vm11  ;;  %v2287_v9 = vld [vmem:[#allocation4 + $0xb0] sm:$0x88]  ;;  %v2113_v3 = vld [vmem:[#allocation4 + $0x98] sm:$0x33] }
 0x2fe   : > { %v2040_v15 = vsel %vm11051_vm10, %v2031_v17, %v2039_v22  ;;  %2044 = vst [vmem:[#allocation4 + $0x88] sm:$0x11] %v2043_v6  ;;  %v1789_v7 = vrot.slane %v1785_v62, 4  ;;  %v2278_v1 = vsel %vm14689_vm6, %v9745_v30, %v2277_v4  ;;  %v2291_v63 = vsel %vm11072_vm14, %v2279_v38, %v2290_v24  ;;  %vm14690_vm13 = vmmov %vm14682_vm0  ;;  %v2110_v10 = vld [vmem:[#allocation4 + $0x90] sm:$0x33] }
 0x2ff   : > { %2041 = vst [vmem:[#allocation4 + $0x80] sm:$0x11] %v2040_v15  ;;  %v2097_v29 = vrot.slane %v2093_v12, 4  ;;  %v2288_v0 = vsel %vm11081_vm5, %v2278_v1, %v2287_v9  ;;  %2292 = vst [vmem:[#allocation4 + $0xb8] sm:$0x88] %v2291_v63  ;;  %vm14694_vm1 = vcmask 687104  }
 0x300   : > { %v1793_v2 = vsel %vm14690_vm13, %v1788_v35, %v1789_v7  ;;  %v1795_v26 = vsel %vm14691_vm3, %v1785_v62, %v1789_v7  ;;  %2289 = vst [vmem:[#allocation4 + $0xb0] sm:$0x88] %v2288_v0  ;;  %vm14692_vm0 = vmmov %vm14691_vm3  ;;  %v1697_v16 = vpop.permute.xlu1 %1696  ;;  %v1727_v62 = vld [vmem:[#allocation4 + $0x38] sm:$0x11]  ;;  %vm14697_vm6 = vcmask 1014784  }
 0x301   : > { %v1794_v60 = vsel %vm14692_vm0, %v11012_v25, %v1793_v2  ;;  %v1819_v57 = vsel %vm11023_vm4, %v1795_v26, %v1818_v59  ;;  %vm14693_vm9 = vmmov %vm14690_vm13  ;;  %v2103_v32 = vsel %vm14694_vm1, %v2093_v12, %v2097_v29  ;;  %v9749_v40 = vpop.permute.xlu0 %9748  ;;  %v1701_v35 = vrot.slane %v1697_v16, 4  ;;  %v2002_v63 = vld [vmem:[#allocation4 + $0x68] sm:$0x88]  ;;  %v2363_v18 = vld [vmem:[#allocation4 + $0xd8] sm:$0x77] }
 0x302   : > { %v2101_v30 = vsel %vm14693_vm9, %v2096_v8, %v2097_v29  ;;  %v1813_v23 = vsel %vm11019_vm12, %v1794_v60, %v1812_v41  ;;  %1820 = vst [vmem:[#allocation4 + $0x48] sm:$0x33] %v1819_v57  ;;  %vm14695_vm11 = vmmov %vm14694_vm1  ;;  %v2114_v25 = vsel %vm11023_vm4, %v2103_v32, %v2113_v3  ;;  %v9751_v17 = vunpack.i.h.bf16 %v9749_v40  ;;  %v1677_v32 = vld [vmem:[#allocation4 + $0x18] sm:$0x88] }
 0x303   : > { %v2102_v56 = vsel %vm14695_vm11, %v11039_v27, %v2101_v30  ;;  %1814 = vst [vmem:[#allocation4 + $0x40] sm:$0x33] %v1813_v23  ;;  %2115 = vst [vmem:[#allocation4 + $0x98] sm:$0x33] %v2114_v25  ;;  %v9750_v6 = vunpack.i.l.bf16 %v9749_v40  ;;  %v1707_v38 = vsel %vm14697_vm6, %v1697_v16, %v1701_v35  ;;  %vm1850_vm13 = vsmask.f32 7942 }
 0x304   : > { %v2111_v22 = vsel %vm11019_vm12, %v2102_v56, %v2110_v10  ;;  %vm14696_vm15 = vmmov %vm14693_vm9  ;;  %vm1852_vm3 = vsmask.f32 7958  ;;  %v1721_v27 = vld [vmem:[#allocation4 + $0x30] sm:$0x11]  ;;  %v1728_v4 = vsel %vm11045_vm7, %v1707_v38, %v1727_v62  ;;  %v1986_v19 = vrot.slane %v9751_v17, 4  ;;  %v9754_v15 = vpop.permute.xlu1 %9753 }
 0x305   : > { %2112 = vst [vmem:[#allocation4 + $0x90] sm:$0x33] %v2111_v22  ;;  %v1705_v12 = vsel %vm14696_vm15, %v1700_v58, %v1701_v35  ;;  %vm14698_vm0 = vmmov %vm14697_vm6  ;;  %v1985_v24 = vrot.slane %v9750_v6, 4  ;;  %v11121_v7 = vpop.permute.xlu0 %2061  ;;  %v9756_v1 = vunpack.i.h.bf16 %v9754_v15  ;;  %v9755_v9 = vunpack.i.l.bf16 %v9754_v15  ;;  %v1999_v58 = vld [vmem:[#allocation4 + $0x60] sm:$0x88] }
 0x306   : > { %v1706_v37 = vsel %vm14698_vm0, %v11015_v14, %v1705_v12  ;;  %1729 = vst [vmem:[#allocation4 + $0x38] sm:$0x11] %v1728_v4  ;;  %vm14699_vm12 = vcmask 711680   ;;  %vm14700_vm4 = vmmov %vm14693_vm9  ;;  %vm14701_vm9 = vcmask 1043457   ;;  %vm14705_vm1 = vcmask 130053  }
 0x307   : > { %v1722_v8 = vsel %vm11051_vm10, %v1706_v37, %v1721_v27  ;;  %v1991_v29 = vsel %vm14699_vm12, %v9751_v17, %v1986_v19  ;;  %v1989_v14 = vsel %vm14700_vm4, %v1985_v24, %v1986_v19  ;;  %vm11129_vm7 = vmand %vm14701_vm9, %vm1850_vm13  ;;  %v1651_v59 = vrot.slane %v9756_v1, 4  ;;  %v1671_v23 = vld [vmem:[#allocation4 + $0x10] sm:$0x88]  ;;  %v2436_v62 = vld [vmem:[#allocation4 + $0xe8] sm:$0xee] }
 0x308   : > { %1723 = vst [vmem:[#allocation4 + $0x30] sm:$0x11] %v1722_v8  ;;  %v2003_v61 = vsel %vm11072_vm14, %v1991_v29, %v2002_v63  ;;  %vm14704_vm10 = vmmov %vm14699_vm12  ;;  %v1650_v2 = vrot.slane %v9755_v9, 4  ;;  %v2423_v60 = vpop.permute.xlu1 %2422  ;;  %vm1757_vm15 = vsmask.f32 7938  ;;  %vm14708_vm6 = vcmask 1022976  }
 0x309   : > { %v1990_v0 = vsel %vm14704_vm10, %v9750_v6, %v1989_v14  ;;  %vm11138_vm11 = vmand %vm14705_vm1, %vm1852_vm3  ;;  %2004 = vst [vmem:[#allocation4 + $0x68] sm:$0x88] %v2003_v61  ;;  %v11144_v57 = vpop.permute.xlu0 %2134  ;;  %v1656_v3 = vsel %vm14708_vm6, %v9756_v1, %v1651_v59  ;;  %vm14710_vm0 = vcmask 1047557   ;;  %v2426_v17 = vrot.slane %v2423_v60, 4  ;;  %v2433_v37 = vld [vmem:[#allocation4 + $0xe0] sm:$0xee] }
 0x30a   : > { %v2000_v41 = vsel %vm11081_vm5, %v1990_v0, %v1999_v58  ;;  %vm14709_vm13 = vmmov %vm14700_vm4  ;;  %vm1759_vm4 = vsmask.f32 7954  ;;  %v1678_v10 = vsel %vm11072_vm14, %v1656_v3, %v1677_v32  ;;  %vm14719_vm14 = vcmask 1046532   ;;  %v1860_v14 = vld [vmem:[#allocation4 + $0x48] sm:$0xee] }
 0x30b   : > { %2001 = vst [vmem:[#allocation4 + $0x60] sm:$0x88] %v2000_v41  ;;  %v1654_v30 = vsel %vm14709_vm13, %v1650_v2, %v1651_v59  ;;  %vm11150_vm12 = vmand %vm14710_vm0, %vm1852_vm3  ;;  %vm14716_vm3 = vcmask 1042432   ;;  %vm14723_vm0 = vcmask 1043456   ;;  %v2360_v59 = vld [vmem:[#allocation4 + $0xd0] sm:$0x77] }
 0x30c   : > { %vm14713_vm9 = vmmov %vm14708_vm6  ;;  %1679 = vst [vmem:[#allocation4 + $0x18] sm:$0x88] %v1678_v10  ;;  %v2350_v39 = vpop.permute.xlu1 %2349  ;;  %v10282_v3 = vmov 65535  }
 0x30d   : > { %v1655_v40 = vsel %vm14713_vm9, %v9755_v9, %v1654_v30  ;;  %vm11161_vm10 = vmor %vm11138_vm11, %vm11129_vm7  ;;  %v2425_v22 = vpop.permute.xlu0 %2424  ;;  %vm14720_vm11 = vcmask 129028   ;;  %vm14724_vm9 = vcmask 367616   ;;  %v2353_v1 = vrot.slane %v2350_v39, 4 }
 0x30e   : > { %v1672_v25 = vsel %vm11081_vm5, %v1655_v40, %v1671_v23  ;;  %vm11168_vm1 = vmand %vm14716_vm3, %vm1757_vm15  ;;  %v2427_v6 = vrot.slane %v2425_v22, 4  ;;  %vm1569_vm15 = vsmask.f32 7946 }
 0x30f   : > { %1673 = vst [vmem:[#allocation4 + $0x10] sm:$0x88] %v1672_v25  ;;  %vm1760_vm6 = vmand %vm14719_vm14, %vm1759_vm4  ;;  %v2217_v25 = vld [vmem:[#allocation4 + $0xa8] sm:$0xcc] }
 0x310   : > { %vm1765_vm13 = vmand %vm14720_vm11, %vm1759_vm4  ;;  %v2428_v12 = vsel %vm14723_vm0, %v2426_v17, %v2427_v6  ;;  %v2430_v38 = vsel %vm14724_vm9, %v2425_v22, %v2427_v6  ;;  %vm1572_vm4 = vsmask.f32 7962  ;;  %v2193_v24 = vpop.permute.xlu1 %2192  ;;  %vm14730_vm11 = vcmask 1043458   ;;  %v2214_v17 = vld [vmem:[#allocation4 + $0xa0] sm:$0xcc] }
 0x311   : > { %vm11178_vm5 = vmor %vm11150_vm12, %vm11129_vm7  ;;  %v2437_v19 = vsel %vm11161_vm10, %v2430_v38, %v2436_v62  ;;  %v2352_v8 = vpop.permute.xlu0 %2351  ;;  %vm1571_vm12 = vcmask 1047558   ;;  %v2200_v32 = vrot.slane %v2193_v24, 4 }
 0x312   : > { %vm11186_vm3 = vmor %vm1760_vm6, %vm11168_vm1  ;;  %2438 = vst [vmem:[#allocation4 + $0xe8] sm:$0xee] %v2437_v19  ;;  %v2354_v63 = vrot.slane %v2352_v8, 4 }
 0x313   : > { %vm14727_vm14 = vmmov %vm14724_vm9  ;;  %vm14736_vm9 = vcmask 1043456  }
 0x314   : > { %v2429_v4 = vsel %vm14727_vm14, %v2423_v60, %v2428_v12  ;;  %vm11195_vm7 = vmor %vm1765_vm13, %vm11168_vm1  ;;  %vm14733_vm1 = vcmask 130054   ;;  %v2355_v58 = vsel %vm14736_vm9, %v2353_v1, %v2354_v63  ;;  %vm14737_vm14 = vcmask 384000   ;;  %v1840_v41 = vpop.permute.xlu1 %1839 }
 0x315   : > { %v2434_v9 = vsel %vm11178_vm5, %v2429_v4, %v2433_v37  ;;  %vm11203_vm0 = vmand %vm14730_vm11, %vm1569_vm15  ;;  %v2357_v61 = vsel %vm14737_vm14, %v2352_v8, %v2354_v63  ;;  %v2195_v60 = vpop.permute.xlu0 %2194  ;;  %vm2687_vm11 = vcmask 1046528   ;;  %v1843_v4 = vrot.slane %v1840_v41, 4 }
 0x316   : > { %2435 = vst [vmem:[#allocation4 + $0xe0] sm:$0xee] %v2434_v9  ;;  %vm11209_vm13 = vmand %vm14733_vm1, %vm1572_vm4  ;;  %v2364_v26 = vsel %vm11195_vm7, %v2357_v61, %v2363_v18  ;;  %vm14741_vm1 = vcmask 1045504   ;;  %v2201_v23 = vrot.slane %v2195_v60, 4  ;;  %v1855_v61 = vld [vmem:[#allocation4 + $0x40] sm:$0xee] }
 0x317   : > { %vm11216_vm6 = vmand %vm1571_vm12, %vm1572_vm4  ;;  %v2688_v30 = vsel %vm14741_vm1, 4294967295, %v10282_v3  ;;  %2365 = vst [vmem:[#allocation4 + $0xd8] sm:$0x77] %v2364_v26  ;;  %vm14752_vm1 = vcmask 850944  }
 0x318   : > { %vm14740_vm15 = vmmov %vm14737_vm14  ;;  %v2204_v35 = vsel %vm14736_vm9, %v2200_v32, %v2201_v23  ;;  %vm14746_vm14 = vcmask 539648   ;;  %v2689_v22 = vsel %vm2687_vm11, %v2688_v30, 0  ;;  %v1905_v12 = vpop.permute.xlu1 %1904 }
 0x319   : > { %v2356_v2 = vsel %vm14740_vm15, %v2350_v39, %v2355_v58  ;;  %vm11230_vm4 = vmor %vm11209_vm13, %vm11203_vm0  ;;  %v2206_v39 = vsel %vm14746_vm14, %v2195_v60, %v2201_v23  ;;  %v1842_v38 = vpop.permute.xlu0 %1841  ;;  %v9798_v37 = vld [vmem:[#allocation4 + $0xec] ss:$16 sps:$4 sm:$0x7f]   ;;  %v9802_v63 = vld [vmem:[#allocation4 + $0xe8] ss:$16 sps:$4 sm:$0x7f]  }
 0x31a   : > { %v2361_v16 = vsel %vm11186_vm3, %v2356_v2, %v2360_v59  ;;  %vm11238_vm12 = vmor %vm11216_vm6, %vm11203_vm0  ;;  %v2218_v62 = vsel %vm11230_vm4, %v2206_v39, %v2217_v25  ;;  %v1844_v8 = vrot.slane %v1842_v38, 4  ;;  %v2700_v9 = vand.u32 %v9798_v37, %v2689_v22  ;;  %v1929_v23 = vld [vmem:[#allocation4 + $0x58] sm:$0xcc] }
 0x31b   : > { %2362 = vst [vmem:[#allocation4 + $0xd0] sm:$0x77] %v2361_v16  ;;  %vm14747_vm13 = vmmov %vm14746_vm14  ;;  %vm14749_vm0 = vcmask 867328   ;;  %v2697_v60 = vand.u32 %v9802_v63, %v2689_v22  ;;  %v1912_v30 = vrot.slane %v1905_v12, 4 }
 0x31c   : > { %v2205_v6 = vsel %vm14747_vm13, %v2193_v24, %v2204_v35  ;;  %2219 = vst [vmem:[#allocation4 + $0xa8] sm:$0xcc] %v2218_v62  ;;  %vm14748_vm6 = vmmov %vm14736_vm9  ;;  %v1847_v18 = vsel %vm14749_vm0, %v1842_v38, %v1844_v8  ;;  %v1747_v2 = vpop.permute.xlu1 %1746  ;;  %2773 = vmatprep.subr.bf16.mxu1 %v2700_v9  ;;  %v1926_v35 = vld [vmem:[#allocation4 + $0x50] sm:$0xcc]  ;;  %vm14755_vm13 = vcmask 883712  }
 0x31d   : > { %v2215_v19 = vsel %vm11238_vm12, %v2205_v6, %v2214_v17  ;;  %v9800_v1 = vld [vmem:[#allocation4 + $0xe4] ss:$16 sps:$4 sm:$0x7f]   ;;  %v9803_v29 = vld [vmem:[#allocation4 + $0xe0] ss:$16 sps:$4 sm:$0x7f]   ;;  %v1845_v24 = vsel %vm14748_vm6, %v1843_v4, %v1844_v8  ;;  %vm14750_vm15 = vmmov %vm14749_vm0  ;;  %v1861_v59 = vsel %vm11161_vm10, %v1847_v18, %v1860_v14  ;;  %v1907_v26 = vpop.permute.xlu0 %1906  ;;  %2774 = vmatpush1.bf16.msra.mxu1 %v2697_v60 }
 0x31e   : > { %2216 = vst [vmem:[#allocation4 + $0xa0] sm:$0xcc] %v2215_v19  ;;  %v2694_v58 = vand.u32 %v9800_v1, %v2689_v22  ;;  %v1846_v0 = vsel %vm14750_vm15, %v1840_v41, %v1845_v24  ;;  %v2691_v3 = vand.u32 %v9803_v29, %v2689_v22  ;;  %1862 = vst [vmem:[#allocation4 + $0x48] sm:$0xee] %v1861_v59  ;;  %v1913_v16 = vrot.slane %v1907_v26, 4 }
 0x31f   : > { %v1856_v32 = vsel %vm11178_vm5, %v1846_v0, %v1855_v61  ;;  %vm14751_vm11 = vmmov %vm14748_vm6  ;;  %v1750_v62 = vrot.slane %v1747_v2, 4  ;;  %v1767_v4 = vld [vmem:[#allocation4 + $0x38] sm:$0x77]  ;;  %v2065_v1 = vrot.slane %v11121_v7, 4  ;;  %vm14758_vm15 = vcmask 695296  }
 0x320   : > { %2702 = vmatprep.subr.bf16.mxu0 %v2694_v58  ;;  %1857 = vst [vmem:[#allocation4 + $0x40] sm:$0xee] %v1856_v32  ;;  %v1916_v41 = vsel %vm14751_vm11, %v1912_v30, %v1913_v16  ;;  %v1918_v25 = vsel %vm14752_vm1, %v1907_v26, %v1913_v16  ;;  %vm14753_vm9 = vmmov %vm14752_vm1  ;;  %v1547_v17 = vpop.permute.xlu1 %1546  ;;  %v2075_v26 = vld [vmem:[#allocation4 + $0x88] sm:$0x77]  ;;  %vm14760_vm1 = vcmask 1039360  }
 0x321   : > { %2703 = vmatpush1.bf16.msra.mxu0 %v2691_v3  ;;  %v1917_v39 = vsel %vm14753_vm9, %v1905_v12, %v1916_v41  ;;  %v1930_v22 = vsel %vm11230_vm4, %v1918_v25, %v1929_v23  ;;  %v1749_v6 = vpop.permute.xlu0 %1748  ;;  %vm14754_vm14 = vmmov %vm14748_vm6  ;;  %v1762_v12 = vld [vmem:[#allocation4 + $0x30] sm:$0x77]  ;;  %v1554_v24 = vrot.slane %v1547_v17, 4  ;;  %v1581_v60 = vld [vmem:[#allocation4 + $0x8] sm:$0xcc] }
 0x322   : > { %v1927_v38 = vsel %vm11238_vm12, %v1917_v39, %v1926_v35  ;;  %1931 = vst [vmem:[#allocation4 + $0x58] sm:$0xcc] %v1930_v22  ;;  %v1751_v37 = vrot.slane %v1749_v6, 4  ;;  %vm14756_vm6 = vmmov %vm14755_vm13  ;;  %v2072_v32 = vld [vmem:[#allocation4 + $0x80] sm:$0x77]  ;;  %v2138_v22 = vrot.slane %v11144_v57, 4 }
 0x323   : > { %1928 = vst [vmem:[#allocation4 + $0x50] sm:$0xcc] %v1927_v38  ;;  %vm14757_vm0 = vmmov %vm14751_vm11  ;;  %v1575_v23 = vld [vmem:[#allocation4] sm:$0xcc] }
 0x324   : > { %v1752_v19 = vsel %vm14754_vm14, %v1750_v62, %v1751_v37  ;;  %v1754_v8 = vsel %vm14755_vm13, %v1749_v6, %v1751_v37  ;;  %v2064_v29 = vpop.permute.xlu1 %2063  ;;  %vm14759_vm11 = vmmov %vm14757_vm0  ;;  %vm14764_vm13 = vcmask 556032   ;;  %v2148_v62 = vld [vmem:[#allocation4 + $0x98] sm:$0xee]  ;;  %v2145_v37 = vld [vmem:[#allocation4 + $0x90] sm:$0xee] }
 0x325   : > { %v1753_v9 = vsel %vm14756_vm6, %v1747_v2, %v1752_v19  ;;  %v1768_v63 = vsel %vm11195_vm7, %v1754_v8, %v1767_v4  ;;  %v1549_v14 = vpop.permute.xlu0 %1548  ;;  %v2066_v58 = vrot.slane %v2064_v29, 4  ;;  %vm14761_vm9 = vmmov %vm14758_vm15 }
 0x326   : > { %v1763_v18 = vsel %vm11186_vm3, %v1753_v9, %v1762_v12  ;;  %1769 = vst [vmem:[#allocation4 + $0x38] sm:$0x77] %v1768_v63  ;;  %v1555_v61 = vrot.slane %v1549_v14, 4  ;;  %vm14762_vm14 = vmmov %vm14760_vm1 }
 0x327   : > { %1764 = vst [vmem:[#allocation4 + $0x30] sm:$0x77] %v1763_v18  ;;  %v2067_v0 = vsel %vm14757_vm0, %v2065_v1, %v2066_v58  ;;  %v2069_v59 = vsel %vm14758_vm15, %v2064_v29, %v2066_v58 }
 0x328   : > { %v1558_v2 = vsel %vm14759_vm11, %v1554_v24, %v1555_v61  ;;  %v1560_v3 = vsel %vm14760_vm1, %v1549_v14, %v1555_v61  ;;  %v2068_v30 = vsel %vm14761_vm9, %v11121_v7, %v2067_v0  ;;  %v2076_v16 = vsel %vm11195_vm7, %v2069_v59, %v2075_v26  ;;  %v2137_v35 = vpop.permute.xlu1 %2136  ;;  %vm14763_vm7 = vmmov %vm14757_vm0 }
 0x329   : > { %v1559_v41 = vsel %vm14762_vm14, %v1547_v17, %v1558_v2  ;;  %v1582_v25 = vsel %vm11230_vm4, %v1560_v3, %v1581_v60  ;;  %v11282_v39 = vpop.permute.xlu0 %2196  ;;  %v2073_v6 = vsel %vm11186_vm3, %v2068_v30, %v2072_v32  ;;  %2077 = vst [vmem:[#allocation4 + $0x88] sm:$0x77] %v2076_v16  ;;  %v2139_v15 = vrot.slane %v2137_v35, 4  ;;  %vm14765_vm4 = vmmov %vm14764_vm13 }
 0x32a   : > { %v1576_v7 = vsel %vm11238_vm12, %v1559_v41, %v1575_v23  ;;  %1583 = vst [vmem:[#allocation4 + $0x8] sm:$0xcc] %v1582_v25  ;;  %2074 = vst [vmem:[#allocation4 + $0x80] sm:$0x77] %v2073_v6  ;;  %vm14767_vm12 = vcmask 523264   ;;  %vm14774_vm11 = vcmask 850944  }
 0x32b   : > { %1577 = vst [vmem:[#allocation4] sm:$0xcc] %v1576_v7  ;;  %v2140_v17 = vsel %vm14763_vm7, %v2138_v22, %v2139_v15  ;;  %v2142_v40 = vsel %vm14764_vm13, %v2137_v35, %v2139_v15  ;;  %vm14766_vm3 = vmmov %vm14757_vm0  ;;  %vm14770_vm0 = vcmask 126980   ;;  %vm14777_vm14 = vcmask 711680   ;;  %v2493_v6 = vld [vmem:[#allocation4 + $0xd0] sm:$0xff] }
 0x32c   : > { %v2141_v38 = vsel %vm14765_vm4, %v11144_v57, %v2140_v17  ;;  %v2149_v27 = vsel %vm11161_vm10, %v2142_v40, %v2148_v62  ;;  %v2270_v4 = vpop.permute.xlu1 %2269  ;;  %vm14768_vm6 = vmmov %vm14767_vm12  ;;  %vm14769_vm10 = vcmask 1040384   ;;  %v2202_v23 = vrot.slane %v11282_v39, 4 }
 0x32d   : > { %v11295_v19 = vpop.permute.xlu0 %1550  ;;  %v2146_v10 = vsel %vm11178_vm5, %v2141_v38, %v2145_v37  ;;  %2150 = vst [vmem:[#allocation4 + $0x98] sm:$0xee] %v2149_v27  ;;  %v2275_v12 = vrot.slane %v2270_v4, 4  ;;  %vm11306_vm5 = vmor %vm14770_vm0, %vm14769_vm10  ;;  %vm14780_vm4 = vcmask 539648  }
 0x32e   : > { %2147 = vst [vmem:[#allocation4 + $0x90] sm:$0xee] %v2146_v10  ;;  %vm14773_vm15 = vmmov %vm14766_vm3 }
 0x32f   : > { %vm14775_vm1 = vmmov %vm14774_vm11 }
 0x330   : > { %v1909_v8 = vpop.permute.xlu1 %1908  ;;  %vm14776_vm9 = vmmov %vm14766_vm3 }
 0x331   : > { %v2272_v1 = vpop.permute.xlu0 %2271  ;;  %v1914_v24 = vrot.slane %v1909_v8, 4  ;;  %vm14778_vm7 = vmmov %vm14777_vm14 }
 0x332   : > { %v2276_v9 = vrot.slane %v2272_v1, 4  ;;  %vm14779_vm13 = vmmov %vm14766_vm3 }
 0x333   : > { %vm14784_vm0 = vmmov %vm14766_vm3 }
 0x334   : > { %v2280_v63 = vsel %vm14766_vm3, %v2275_v12, %v2276_v9  ;;  %v2282_v57 = vsel %vm14767_vm12, %v2272_v1, %v2276_v9  ;;  %v1982_v56 = vpop.permute.xlu1 %1981  ;;  %vm14781_vm12 = vcmask 1022976   ;;  %v1556_v12 = vrot.slane %v11295_v19, 4 }
 0x335   : > { %v2281_v29 = vsel %vm14768_vm6, %v2270_v4, %v2280_v63  ;;  %2294 = vst.msk [vmem:[#allocation4 + $0xc8] sm:$0x33] %vm10369_vm2, %v2282_v57  ;;  %v1911_v14 = vpop.permute.xlu0 %1910  ;;  %v1987_v60 = vrot.slane %v1982_v56, 4  ;;  %vm14782_vm6 = vmmov %vm14780_vm4 }
 0x336   : > { %2293 = vst [vmem:[#allocation4 + $0xc0] sm:$0x33] %v2281_v29  ;;  %v1915_v18 = vrot.slane %v1911_v14, 4  ;;  %vm14783_vm10 = vmmov %vm14781_vm12 }
 0x338   : > { %v1919_v58 = vsel %vm14773_vm15, %v1914_v24, %v1915_v18  ;;  %v1921_v61 = vsel %vm14774_vm11, %v1911_v14, %v1915_v18  ;;  %v1647_v59 = vpop.permute.xlu1 %1646  ;;  %vm14785_vm15 = vcmask 1039360   ;;  %v9815_v18 = vld [vmem:[#allocation4 + $0x8c] ss:$16 sps:$4 sm:$0xff]  }
 0x339   : > { %v1920_v0 = vsel %vm14775_vm1, %v1909_v8, %v1919_v58  ;;  %1933 = vst.msk [vmem:[#allocation4 + $0x68] sm:$0x11] %vm11306_vm5, %v1921_v61  ;;  %v1984_v26 = vpop.permute.xlu0 %1983  ;;  %v1652_v15 = vrot.slane %v1647_v59, 4  ;;  %vm14786_vm11 = vmmov %vm14785_vm15  ;;  %v9817_v58 = vld [vmem:[#allocation4 + $0x84] ss:$16 sps:$4 sm:$0xff]  }
 0x33a   : > { %1932 = vst [vmem:[#allocation4 + $0x60] sm:$0x11] %v1920_v0  ;;  %v1988_v2 = vrot.slane %v1984_v26, 4  ;;  %v9819_v61 = vld [vmem:[#allocation4 + $0x88] ss:$16 sps:$4 sm:$0xff]   ;;  %vm14787_vm1 = vmmov %vm14783_vm10 }
 0x33b   : > { %v9820_v0 = vld [vmem:[#allocation4 + $0x80] ss:$16 sps:$4 sm:$0xff]  }
 0x33c   : > { %v1992_v3 = vsel %vm14776_vm9, %v1987_v60, %v1988_v2  ;;  %v1994_v30 = vsel %vm14777_vm14, %v1984_v26, %v1988_v2  ;;  %v9804_v32 = vld [vmem:[#allocation4 + $0xcc] ss:$16 sps:$4 sm:$0xff]   ;;  %v9808_v16 = vld [vmem:[#allocation4 + $0xc8] ss:$16 sps:$4 sm:$0xff]   ;;  %v2199_v25 = vpop.permute.xlu1 %2198  ;;  %vm14788_vm9 = vmmov %vm14787_vm1 }
 0x33d   : > { %v1993_v41 = vsel %vm14778_vm7, %v1982_v56, %v1992_v3  ;;  %2006 = vst.msk [vmem:[#allocation4 + $0x78] sm:$0x33] %vm10369_vm2, %v1994_v30  ;;  %v1649_v35 = vpop.permute.xlu0 %1648  ;;  %v2491_v22 = vld [vmem:[#allocation4 + $0xc0] sm:$0xff]  ;;  %v2203_v17 = vrot.slane %v2199_v25, 4  ;;  %2775 = vmatprep.subr.bf16.mxu1 %v9804_v32  ;;  %v9827_v2 = vld [vmem:[#allocation4 + $0x4c] ss:$16 sps:$4 sm:$0xff]   ;;  %vm14789_vm14 = vmmov %vm14787_vm1 }
 0x33e   : > { %v9806_v7 = vld [vmem:[#allocation4 + $0xc4] ss:$16 sps:$4 sm:$0xff]   ;;  %2005 = vst [vmem:[#allocation4 + $0x70] sm:$0x33] %v1993_v41  ;;  %v1653_v40 = vrot.slane %v1649_v35, 4  ;;  %v9333_v62 = vcombine.low %v2491_v22, %v2493_v6  ;;  %2776 = vmatpush1.bf16.msra.mxu1 %v9808_v16  ;;  %vm14790_vm7 = vmmov %vm14787_vm1 }
 0x33f   : > { %2704 = vmatprep.subr.bf16.mxu0 %v9806_v7  ;;  %v2207_v38 = vsel %vm14779_vm13, %v2202_v23, %v2203_v17  ;;  %v2209_v37 = vsel %vm14780_vm4, %v2199_v25, %v2203_v17  ;;  %v9829_v3 = vld [vmem:[#allocation4 + $0x44] ss:$16 sps:$4 sm:$0xff]   ;;  %v9831_v30 = vld [vmem:[#allocation4 + $0x48] ss:$16 sps:$4 sm:$0xff]   ;;  %v9832_v32 = vld [vmem:[#allocation4 + $0x40] ss:$16 sps:$4 sm:$0xff]  }
 0x340   : > { %v1657_v27 = vsel %vm14766_vm3, %v1652_v15, %v1653_v40  ;;  %v1659_v4 = vsel %vm14781_vm12, %v1649_v35, %v1653_v40  ;;  %2705 = vmatpush1.bf16.msra.mxu0 %v9333_v62  ;;  %v2208_v10 = vsel %vm14782_vm6, %v11282_v39, %v2207_v38  ;;  %2221 = vst.msk [vmem:[#allocation4 + $0xb8] sm:$0x11] %vm11306_vm5, %v2209_v37  ;;  %v1553_v1 = vpop.permute.xlu1 %1552  ;;  %v9845_v15 = vld [vmem:[%s14478_s4] sm:$0xff]   ;;  %v9846_v17 = vld [vmem:[%s14478_s4 + $0x8] sm:$0xff]   ;;  %v9847_v40 = vld [vmem:[%s14478_s4 + $0x10] sm:$0xff]   ;;  %vm373_vm6 = vcmask 338944  }
 0x341   : > { %v1658_v8 = vsel %vm14783_vm10, %v1647_v59, %v1657_v27  ;;  %1681 = vst.msk [vmem:[#allocation4 + $0x28] sm:$0x33] %vm10369_vm2, %v1659_v4  ;;  %2220 = vst [vmem:[#allocation4 + $0xb0] sm:$0x11] %v2208_v10  ;;  %v1557_v9 = vrot.slane %v1553_v1, 4  ;;  %vm382_vm10 = vcmask 814544  }
 0x342   : > { %1680 = vst [vmem:[#allocation4 + $0x20] sm:$0x33] %v1658_v8  ;;  %vm14791_vm13 = vmmov %vm14787_vm1  ;;  %v9848_v62 = vld [vmem:[%s14478_s4 + $0x18] ss:$0 sps:$4 sm:$0x11]  }
 0x343   : > { %v1561_v63 = vsel %vm14784_vm0, %v1556_v12, %v1557_v9  ;;  %v1563_v57 = vsel %vm14785_vm15, %v1553_v1, %v1557_v9  ;;  %vm14792_vm4 = vmmov %vm14787_vm1  ;;  %374 = vst.msk [vmem:[#allocation3] sm:$0xf] %vm373_vm6, %v10280_v13  ;;  %vm380_vm0 = vcmask 335872   ;;  %vm389_vm15 = vcmask 811472  }
 0x344   : > { %v1562_v39 = vsel %vm14786_vm11, %v11295_v19, %v1561_v63  ;;  %1588 = vst.msk [vmem:[#allocation4 + $0x18] sm:$0x11] %vm11306_vm5, %v1563_v57  ;;  %v9821_v59 = vld [vmem:[#allocation4 + $0x6c] ss:$16 sps:$4 sm:$0xff]   ;;  %v9825_v26 = vld [vmem:[#allocation4 + $0x68] ss:$16 sps:$4 sm:$0xff]   ;;  %vm14793_vm3 = vmmov %vm14787_vm1 }
 0x345   : > { %1584 = vst [vmem:[#allocation4 + $0x10] sm:$0x11] %v1562_v39  ;;  %v9823_v19 = vld [vmem:[#allocation4 + $0x64] ss:$16 sps:$4 sm:$0xff]   ;;  %v9826_v60 = vld [vmem:[#allocation4 + $0x60] ss:$16 sps:$4 sm:$0xff]   ;;  %vm14794_vm12 = vmmov %vm14787_vm1 }
 0x346   : > { %375 = vst.msk [vmem:[#allocation3 + $0x10] sm:$0xf] %vm373_vm6, %v10280_v13  ;;  %376 = vst.msk [vmem:[#allocation3 + $0x20] sm:$0xf] %vm373_vm6, %v10280_v13  ;;  %vm3219_vm11 = vcmask 1043792  }
 0x347   : > { %v9809_v29 = vld [vmem:[#allocation4 + $0xac] ss:$16 sps:$4 sm:$0xff]   ;;  %v9813_v56 = vld [vmem:[#allocation4 + $0xa8] ss:$16 sps:$4 sm:$0xff]   ;;  %377 = vst.msk [vmem:[#allocation3 + $0x30] sm:$0xf] %vm373_vm6, %v10280_v13 }
 0x348   : > { %v9811_v14 = vld [vmem:[#allocation4 + $0xa4] ss:$16 sps:$4 sm:$0xff]   ;;  %v9814_v24 = vld [vmem:[#allocation4 + $0xa0] ss:$16 sps:$4 sm:$0xff]   ;;  %2777 = vmatprep.subr.bf16.mxu1 %v9809_v29  ;;  %v9833_v16 = vld [vmem:[#allocation4 + $0x2c] ss:$16 sps:$4 sm:$0xff]  }
 0x349   : > { %2706 = vmatprep.subr.bf16.mxu0 %v9811_v14  ;;  %2778 = vmatpush1.bf16.msra.mxu1 %v9813_v56  ;;  %v9835_v23 = vld [vmem:[#allocation4 + $0x24] ss:$16 sps:$4 sm:$0xff]   ;;  %v9837_v41 = vld [vmem:[#allocation4 + $0x28] ss:$16 sps:$4 sm:$0xff]   ;;  %v9838_v25 = vld [vmem:[#allocation4 + $0x20] ss:$16 sps:$4 sm:$0xff]  }
 0x34a   : > { %2707 = vmatpush1.bf16.msra.mxu0 %v9814_v24  ;;  %2779 = vmatprep.subr.bf16.mxu1 %v9815_v18  ;;  %378 = vst.msk [vmem:[#allocation3 + $0x40] sm:$0xf] %vm373_vm6, %v10280_v13  ;;  %379 = vst.msk [vmem:[#allocation3 + $0x50] sm:$0xf] %vm373_vm6, %v10280_v13 }
 0x34b   : > { %2708 = vmatprep.subr.bf16.mxu0 %v9817_v58  ;;  %v9839_v35 = vld [vmem:[#allocation4 + $0xc] ss:$16 sps:$4 sm:$0xff]   ;;  %v9843_v6 = vld [vmem:[#allocation4 + $0x8] ss:$16 sps:$4 sm:$0xff]   ;;  %383 = vst.msk [vmem:[#allocation3 + $0xc] sm:$0xf] %vm382_vm10, %v10280_v13 }
 0x34c   : > { %v9841_v22 = vld [vmem:[#allocation4 + $0x4] ss:$16 sps:$4 sm:$0xff]   ;;  %v9844_v7 = vld [vmem:[#allocation4] ss:$16 sps:$4 sm:$0xff]   ;;  %384 = vst.msk [vmem:[#allocation3 + $0x1c] sm:$0xf] %vm382_vm10, %v10280_v13 }
 0x34d   : > { %2780 = vmatpush1.bf16.msra.mxu1 %v9819_v61  ;;  %385 = vst.msk [vmem:[#allocation3 + $0x2c] sm:$0xf] %vm382_vm10, %v10280_v13  ;;  %386 = vst.msk [vmem:[#allocation3 + $0x3c] sm:$0xf] %vm382_vm10, %v10280_v13 }
 0x34e   : > { %2709 = vmatpush1.bf16.msra.mxu0 %v9820_v0  ;;  %2781 = vmatprep.subr.bf16.mxu1 %v9821_v59  ;;  %387 = vst.msk [vmem:[#allocation3 + $0x4c] sm:$0xf] %vm382_vm10, %v10280_v13  ;;  %388 = vst.msk [vmem:[#allocation3 + $0x5c] sm:$0xf] %vm382_vm10, %v10280_v13 }
 0x34f   : > { %2710 = vmatprep.subr.bf16.mxu0 %v9823_v19  ;;  %381 = vst.msk [vmem:[#allocation3 + $0x60] sm:$0x1] %vm380_vm0, %v10280_v13  ;;  %vm3259_vm0 = vcmask 130052  }
 0x350   : > { %390 = vst.msk [vmem:[#allocation3 + $0x6c] sm:$0x1] %vm389_vm15, %v10280_v13 }
 0x351   : > { %2782 = vmatpush1.bf16.msra.mxu1 %v9825_v26 }
 0x352   : > { %2711 = vmatpush1.bf16.msra.mxu0 %v9826_v60  ;;  %2783 = vmatprep.subr.bf16.mxu1 %v9827_v2 }
 0x353   : > { %2712 = vmatprep.subr.bf16.mxu0 %v9829_v3 }
 0x355   : > { %2784 = vmatpush1.bf16.msra.mxu1 %v9831_v30 }
 0x356   : > { %2713 = vmatpush1.bf16.msra.mxu0 %v9832_v32  ;;  %2785 = vmatprep.subr.bf16.mxu1 %v9833_v16 }
 0x357   : > { %2714 = vmatprep.subr.bf16.mxu0 %v9835_v23 }
 0x359   : > { %2786 = vmatpush1.bf16.msra.mxu1 %v9837_v41 }
 0x35a   : > { %2715 = vmatpush1.bf16.msra.mxu0 %v9838_v25  ;;  %2787 = vmatprep.subr.bf16.mxu1 %v9839_v35 }
 0x35b   : > { %2716 = vmatprep.subr.bf16.mxu0 %v9841_v22 }
 0x35d   : > { %2788 = vmatpush1.bf16.msra.mxu1 %v9843_v6 }
 0x35e   : > { %2717 = vmatpush1.bf16.msra.mxu0 %v9844_v7 }
 0x360   : > { %9345 = vmatmul.mubr.msk.bf16.vlgmr.msra.gmra.mxu1 %vm14787_vm1, %v9845_v15  ;;  %vm3220_vm1 = vcmask 1047556  }
 0x361   : > { %9341 = vmatmul.mubr.msk.bf16.vlgmr.msra.gmra.mxu0 %vm14788_vm9, %v9845_v15  ;;  %2815 = vmatprep.mubr.bf16.mxu1 %v10280_v13  ;;  %vm3224_vm9 = vcmask 474116  }
 0x362   : > { %2744 = vmatprep.mubr.bf16.mxu0 %v10280_v13 }
 0x368   : > { %9346 = vmatmul.mubr.msk.bf16.gmra.mxu1 %vm14789_vm14, %v9846_v17  ;;  %vm11486_vm14 = vmor %vm3220_vm1, %vm3219_vm11 }
 0x369   : > { %9342 = vmatmul.mubr.msk.bf16.gmra.mxu0 %vm14790_vm7, %v9846_v17  ;;  %2825 = vmatprep.mubr.bf16.mxu1 %v10280_v13  ;;  %vm14798_vm7 = vcmask 1043456  }
 0x36a   : > { %2754 = vmatprep.mubr.bf16.mxu0 %v10280_v13 }
 0x370   : > { %9347 = vmatmul.mubr.msk.bf16.gmra.mxu1 %vm14791_vm13, %v9847_v40  ;;  %vm11491_vm13 = vmor %vm3224_vm9, %vm14798_vm7 }
 0x371   : > { %9343 = vmatmul.mubr.msk.bf16.gmra.mxu0 %vm14792_vm4, %v9847_v40  ;;  %2835 = vmatprep.mubr.bf16.mxu1 %v10280_v13  ;;  %vm14801_vm4 = vcmask 343040  }
 0x372   : > { %2764 = vmatprep.mubr.bf16.mxu0 %v10280_v13  ;;  %vm14804_vm6 = vmmov %vm14801_vm4 }
 0x373   : > { %vm14806_vm15 = vmmov %vm14801_vm4 }
 0x374   : > { %vm14810_vm9 = vmmov %vm14801_vm4 }
 0x378   : > { %9348 = vmatmul.mubr.msk.bf16.gmra.mxu1 %vm14793_vm3, %v9848_v62  ;;  %vm14802_vm3 = vmmov %vm14798_vm7 }
 0x379   : > { %9344 = vmatmul.mubr.msk.bf16.gmra.mxu0 %vm14794_vm12, %v9848_v62  ;;  %vm14803_vm12 = vmmov %vm14801_vm4 }
 0x37a   : > { %vm14805_vm10 = vmmov %vm14802_vm3 }
 0x37b   : > { %vm14807_vm11 = vmmov %vm14802_vm3 }
 0x37c   : > { %vm11510_vm1 = vmor %vm3259_vm0, %vm14807_vm11  ;;  %vm3237_vm11 = vcmask 1040720  }
 0x37d   : > { %vm14811_vm7 = vmmov %vm14802_vm3 }
 0x37e   : > { %vm14817_vm0 = vmmov %vm14811_vm7 }
 0x420   : > { %v2807_v38 = vpop.f32.mrf.mxu1 }
 0x421   : > { %v2888_v37 = vmul.f32 %v10681_v42, %v2807_v38  ;;  %v2736_v27 = vpop.f32.mrf.mxu0 }
 0x422   : > { %v2886_v4 = vmul.f32 %v10681_v42, %v2736_v27  ;;  %v2809_v10 = vpop.f32.mrf.mxu1 }
 0x423   : > { %v2958_v8 = vadd.f32 %v10701_v52, %v2888_v37  ;;  %v2889_v1 = vmul.f32 %v10681_v42, %v2809_v10  ;;  %v2738_v12 = vpop.f32.mrf.mxu0 }
 0x424   : > { %v2956_v9 = vadd.f32 %v10701_v52, %v2886_v4  ;;  %v2887_v63 = vmul.f32 %v10681_v42, %v2738_v12  ;;  %v2811_v57 = vpop.f32.mrf.mxu1 }
 0x425   : > { %v2986_v39 = vmax.f32 %v2958_v8, 0.0  ;;  %v2959_v29 = vadd.f32 %v10701_v52, %v2889_v1  ;;  %v2892_v56 = vmul.f32 %v10683_v43, %v2811_v57  ;;  %v2740_v14 = vpop.f32.mrf.mxu0 }
 0x426   : > { %v2984_v24 = vmax.f32 %v2956_v9, 0.0  ;;  %v2957_v18 = vadd.f32 %v10701_v52, %v2887_v63  ;;  %v2890_v58 = vmul.f32 %v10683_v43, %v2740_v14  ;;  %v2813_v61 = vpop.f32.mrf.mxu1 }
 0x427   : > { %v3014_v0 = vmin.f32 %v2986_v39, 6.0  ;;  %v2987_v59 = vmax.f32 %v2959_v29, 0.0  ;;  %v2962_v19 = vadd.f32 %v10693_v48, %v2892_v56  ;;  %v2893_v26 = vmul.f32 %v10683_v43, %v2813_v61  ;;  %v2742_v42 = vpop.f32.mrf.mxu0 }
 0x428   : > { %v3012_v60 = vmin.f32 %v2984_v24, 6.0  ;;  %v2985_v2 = vmax.f32 %v2957_v18, 0.0  ;;  %v2960_v3 = vadd.f32 %v10693_v48, %v2890_v58  ;;  %v2891_v30 = vmul.f32 %v10683_v43, %v2742_v42  ;;  %v2817_v32 = vpop.f32.mrf.mxu1 }
 0x429   : > { %v3015_v16 = vmin.f32 %v2987_v59, 6.0  ;;  %v2990_v23 = vmax.f32 %v2962_v19, 0.0  ;;  %v2963_v52 = vadd.f32 %v10693_v48, %v2893_v26  ;;  %v2746_v41 = vpop.f32.mrf.mxu0  ;;  %v2896_v15 = vmul.f32 %v10685_v44, %v2817_v32 }
 0x42a   : > { %v3013_v25 = vmin.f32 %v2985_v2, 6.0  ;;  %v2988_v35 = vmax.f32 %v2960_v3, 0.0  ;;  %v2961_v22 = vadd.f32 %v10693_v48, %v2891_v30  ;;  %v2819_v6 = vpop.f32.mrf.mxu1  ;;  %v3042_v40 = vmul.f32 %v3014_v0, %v10667_v20 }
 0x42b   : > { %v2991_v7 = vmax.f32 %v2963_v52, 0.0  ;;  %v2748_v17 = vpop.f32.mrf.mxu0  ;;  %v3040_v62 = vmul.f32 %v3012_v60, %v10671_v31  ;;  %v2894_v38 = vmul.f32 %v10685_v44, %v2746_v41  ;;  %v3043_v27 = vmul.f32 %v3015_v16, %v10669_v28 }
 0x42c   : > { %v2989_v43 = vmax.f32 %v2961_v22, 0.0  ;;  %v2821_v37 = vpop.f32.mrf.mxu1  ;;  %v3018_v4 = vmin.f32 %v2990_v23, 6.0  ;;  %v2966_v10 = vadd.f32 %v10695_v49, %v2896_v15  ;;  %v2897_v48 = vmul.f32 %v10685_v44, %v2819_v6 }
 0x42d   : > { %v2750_v8 = vpop.f32.mrf.mxu0  ;;  %v3041_v1 = vmul.f32 %v3013_v25, %v10673_v33  ;;  %v3016_v12 = vmin.f32 %v2988_v35, 6.0  ;;  %v2964_v9 = vadd.f32 %v10695_v49, %v2894_v38  ;;  %v2895_v63 = vmul.f32 %v10685_v44, %v2748_v17 }
 0x42e   : > { %v2823_v57 = vpop.f32.mrf.mxu1  ;;  %v3019_v39 = vmin.f32 %v2991_v7, 6.0  ;;  %v2994_v29 = vmax.f32 %v2966_v10, 0.0  ;;  %v2967_v56 = vadd.f32 %v10695_v49, %v2897_v48  ;;  %v2900_v14 = vmul.f32 %v10687_v45, %v2821_v37 }
 0x42f   : > { %v2752_v24 = vpop.f32.mrf.mxu0  ;;  %v3017_v18 = vmin.f32 %v2989_v43, 6.0  ;;  %v2992_v58 = vmax.f32 %v2964_v9, 0.0  ;;  %v2965_v61 = vadd.f32 %v10695_v49, %v2895_v63  ;;  %v2898_v0 = vmul.f32 %v10687_v45, %v2750_v8 }
 0x430   : > { %v2827_v59 = vpop.f32.mrf.mxu1  ;;  %v3022_v19 = vmin.f32 %v2994_v29, 6.0  ;;  %v2995_v26 = vmax.f32 %v2967_v56, 0.0  ;;  %v2970_v42 = vadd.f32 %v10697_v50, %v2900_v14  ;;  %v2901_v44 = vmul.f32 %v10687_v45, %v2823_v57 }
 0x431   : > { %v2756_v60 = vpop.f32.mrf.mxu0  ;;  %v3020_v2 = vmin.f32 %v2992_v58, 6.0  ;;  %v2993_v3 = vmax.f32 %v2965_v61, 0.0  ;;  %v2968_v30 = vadd.f32 %v10697_v50, %v2898_v0  ;;  %v2899_v32 = vmul.f32 %v10687_v45, %v2752_v24 }
 0x432   : > { %v2829_v16 = vpop.f32.mrf.mxu1  ;;  %v3046_v23 = vmul.f32 %v3018_v4, %v10667_v20  ;;  %v3023_v49 = vmin.f32 %v2995_v26, 6.0  ;;  %v2998_v52 = vmax.f32 %v2970_v42, 0.0  ;;  %v2971_v41 = vadd.f32 %v10697_v50, %v2901_v44 }
 0x433   : > { %v2758_v25 = vpop.f32.mrf.mxu0  ;;  %v3044_v35 = vmul.f32 %v3016_v12, %v10671_v31  ;;  %v3021_v22 = vmin.f32 %v2993_v3, 6.0  ;;  %v2996_v6 = vmax.f32 %v2968_v30, 0.0  ;;  %v2969_v7 = vadd.f32 %v10697_v50, %v2899_v32 }
 0x434   : > { %v2831_v15 = vpop.f32.mrf.mxu1  ;;  %v3047_v17 = vmul.f32 %v3019_v39, %v10669_v28  ;;  %v3045_v43 = vmul.f32 %v3017_v18, %v10673_v33  ;;  %v2999_v45 = vmax.f32 %v2971_v41, 0.0  ;;  %v9691_v38 = vpack.c.bf16 %v3043_v27, %v3042_v40 }
 0x435   : > { %v2760_v37 = vpop.f32.mrf.mxu0  ;;  %v11406_v4 = vmul.f32 %v3022_v19, %v10667_v20  ;;  %v11409_v10 = vmul.f32 %v3020_v2, %v10671_v31  ;;  %v2997_v48 = vmax.f32 %v2969_v7, 0.0  ;;  %v9690_v8 = vpack.c.bf16 %v3041_v1, %v3040_v62 }
 0x436   : > { %v2833_v12 = vpop.f32.mrf.mxu1  ;;  %v11412_v9 = vmul.f32 %v3023_v49, %v10669_v28  ;;  %v3026_v50 = vmin.f32 %v2998_v52, 6.0  ;;  %3144 = vrot.lane.b32.xlu1 %v9691_v38, %s14795_s12  ;;  %v2904_v63 = vmul.f32 %v10689_v46, %v2827_v59  ;;  %v2902_v40 = vmul.f32 %v10689_v46, %v2756_v60 }
 0x437   : > { %v2762_v27 = vpop.f32.mrf.mxu0  ;;  %v3049_v57 = vmul.f32 %v3021_v22, %v10673_v33  ;;  %v3024_v39 = vmin.f32 %v2996_v6, 6.0  ;;  %3142 = vrot.lane.b32.xlu0 %v9690_v8, %s14795_s12  ;;  %v2905_v29 = vmul.f32 %v10689_v46, %v2829_v16  ;;  %v2903_v62 = vmul.f32 %v10689_v46, %v2758_v25 }
 0x438   : > { %v2837_v1 = vpop.f32.mrf.mxu1  ;;  %v3027_v56 = vmin.f32 %v2999_v45, 6.0  ;;  %v2974_v14 = vadd.f32 %v10703_v53, %v2904_v63  ;;  %v2972_v24 = vadd.f32 %v10703_v53, %v2902_v40  ;;  %v9693_v18 = vpack.c.bf16 %v3047_v17, %v3046_v23 }
 0x439   : > { %v2766_v58 = vpop.f32.mrf.mxu0  ;;  %v3025_v61 = vmin.f32 %v2997_v48, 6.0  ;;  %v2975_v0 = vadd.f32 %v10703_v53, %v2905_v29  ;;  %v2973_v59 = vadd.f32 %v10703_v53, %v2903_v62  ;;  %v9692_v19 = vpack.c.bf16 %v3045_v43, %v3044_v35 }
 0x43a   : > { %v2839_v26 = vpop.f32.mrf.mxu1  ;;  %v3002_v42 = vmax.f32 %v2974_v14, 0.0  ;;  %v3000_v44 = vmax.f32 %v2972_v24, 0.0  ;;  %3148 = vrot.lane.b32.xlu1 %v9693_v18, %s14795_s12  ;;  %v2908_v46 = vmul.f32 %v10691_v47, %v2831_v15  ;;  %v2906_v60 = vmul.f32 %v10691_v47, %v2760_v37 }
 0x43b   : > { %v2768_v2 = vpop.f32.mrf.mxu0  ;;  %v3003_v3 = vmax.f32 %v2975_v0, 0.0  ;;  %v3001_v30 = vmax.f32 %v2973_v59, 0.0  ;;  %3146 = vrot.lane.b32.xlu0 %v9692_v19, %s14795_s12  ;;  %v2909_v32 = vmul.f32 %v10691_v47, %v2833_v12  ;;  %v2907_v16 = vmul.f32 %v10691_v47, %v2762_v27 }
 0x43c   : > { %v2841_v53 = vpop.f32.mrf.mxu1  ;;  %v3030_v23 = vmin.f32 %v3002_v42, 6.0  ;;  %v3028_v49 = vmin.f32 %v3000_v44, 6.0  ;;  %v2978_v52 = vadd.f32 %v10705_v54, %v2908_v46  ;;  %v2976_v41 = vadd.f32 %v10705_v54, %v2906_v60 }
 0x43d   : > { %v2770_v25 = vpop.f32.mrf.mxu0  ;;  %v3054_v35 = vmul.f32 %v3026_v50, %v10667_v20  ;;  %v3052_v22 = vmul.f32 %v3024_v39, %v10671_v31  ;;  %v2979_v6 = vadd.f32 %v10705_v54, %v2909_v32  ;;  %v2977_v7 = vadd.f32 %v10705_v54, %v2907_v16 }
 0x43e   : > { %v2842_v15 = vpop.f32.mrf.mxu1  ;;  %v3055_v17 = vmul.f32 %v3027_v56, %v10669_v28  ;;  %v3053_v47 = vmul.f32 %v3025_v61, %v10673_v33  ;;  %v3031_v43 = vmin.f32 %v3003_v3, 6.0  ;;  %v3029_v45 = vmin.f32 %v3001_v30, 6.0 }
 0x43f   : > { %v2771_v38 = vpop.f32.mrf.mxu0  ;;  %v3006_v37 = vmax.f32 %v2978_v52, 0.0  ;;  %v3004_v48 = vmax.f32 %v2976_v41, 0.0  ;;  %v3007_v8 = vmax.f32 %v2979_v6, 0.0  ;;  %v3005_v12 = vmax.f32 %v2977_v7, 0.0 }
 0x440   : > { %v3058_v50 = vmul.f32 %v3030_v23, %v10667_v20  ;;  %v3056_v63 = vmul.f32 %v3028_v49, %v10671_v31  ;;  %v9695_v40 = vpack.c.bf16 %v11412_v9, %v11406_v4  ;;  %v9694_v54 = vpack.c.bf16 %v3049_v57, %v11409_v10 }
 0x441   : > { %v3035_v27 = vmin.f32 %v3007_v8, 6.0  ;;  %v3033_v39 = vmin.f32 %v3005_v12, 6.0  ;;  %v2912_v29 = vmul.f32 %v10699_v51, %v2837_v1  ;;  %v2910_v62 = vmul.f32 %v10699_v51, %v2766_v58 }
 0x442   : > { %v3059_v56 = vmul.f32 %v3031_v43, %v10669_v28  ;;  %v3057_v14 = vmul.f32 %v3029_v45, %v10673_v33  ;;  %3152 = vrot.lane.b32.xlu1 %v9695_v40, %s14795_s12  ;;  %3150 = vrot.lane.b32.xlu0 %v9694_v54, %s14795_s12  ;;  %v2913_v24 = vmul.f32 %v10699_v51, %v2839_v26  ;;  %v3034_v4 = vmin.f32 %v3006_v37, 6.0 }
 0x443   : > { %v3032_v9 = vmin.f32 %v3004_v48, 6.0  ;;  %v2982_v10 = vadd.f32 %v10707_v55, %v2912_v29  ;;  %v2980_v57 = vadd.f32 %v10707_v55, %v2910_v62  ;;  %v2911_v18 = vmul.f32 %v10699_v51, %v2768_v2 }
 0x444   : > { %v2983_v1 = vadd.f32 %v10707_v55, %v2913_v24  ;;  %v9697_v58 = vpack.c.bf16 %v3055_v17, %v3054_v35  ;;  %v9696_v61 = vpack.c.bf16 %v3053_v47, %v3052_v22  ;;  %v3063_v0 = vmul.f32 %v3035_v27, %v10669_v28 }
 0x445   : > { %v3061_v59 = vmul.f32 %v3033_v39, %v10673_v33  ;;  %v3010_v19 = vmax.f32 %v2982_v10, 0.0  ;;  %v3008_v26 = vmax.f32 %v2980_v57, 0.0  ;;  %v2981_v44 = vadd.f32 %v10707_v55, %v2911_v18 }
 0x446   : > { %v3011_v42 = vmax.f32 %v2983_v1, 0.0  ;;  %3156 = vrot.lane.b32.xlu1 %v9697_v58, %s14795_s12  ;;  %3154 = vrot.lane.b32.xlu0 %v9696_v61, %s14795_s12  ;;  %v9699_v46 = vpack.c.bf16 %v3059_v56, %v3058_v50  ;;  %v9698_v60 = vpack.c.bf16 %v3057_v14, %v3056_v63  ;;  %v3062_v3 = vmul.f32 %v3034_v4, %v10667_v20 }
 0x447   : > { %v3038_v51 = vmin.f32 %v3010_v19, 6.0  ;;  %v3060_v2 = vmul.f32 %v3032_v9, %v10671_v31  ;;  %v3036_v30 = vmin.f32 %v3008_v26, 6.0  ;;  %v3009_v16 = vmax.f32 %v2981_v44, 0.0 }
 0x448   : > { %v3039_v32 = vmin.f32 %v3011_v42, 6.0  ;;  %v9701_v23 = vpack.c.bf16 %v3063_v0, %v3062_v3 }
 0x449   : > { %v3037_v53 = vmin.f32 %v3009_v16, 6.0  ;;  %v9700_v49 = vpack.c.bf16 %v3061_v59, %v3060_v2  ;;  %v3066_v52 = vmul.f32 %v3038_v51, %v10667_v20  ;;  %v3064_v41 = vmul.f32 %v3036_v30, %v10671_v31 }
 0x44a   : > { %v3067_v55 = vmul.f32 %v3039_v32, %v10669_v28  ;;  %3160 = vrot.lane.b32.xlu1 %v9699_v46, %s14795_s12  ;;  %3158 = vrot.lane.b32.xlu0 %v9698_v60, %s14795_s12 }
 0x44b   : > { %v3065_v25 = vmul.f32 %v3037_v53, %v10673_v33 }
 0x44c   : > { %v9703_v28 = vpack.c.bf16 %v3067_v55, %v3066_v52 }
 0x44d   : > { %v9702_v35 = vpack.c.bf16 %v3065_v25, %v3064_v41 }
 0x44e   : > { %3164 = vrot.lane.b32.xlu1 %v9701_v23, %s14795_s12  ;;  %3162 = vrot.lane.b32.xlu0 %v9700_v49, %s14795_s12 }
 0x452   : > { %3168 = vrot.lane.b32.xlu1 %v9703_v28, %s14795_s12  ;;  %3166 = vrot.lane.b32.xlu0 %v9702_v35, %s14795_s12  ;;  %s14828_s12 = smov 88  }
 0x4a8   : > { %v3145_v20 = vpop.permute.xlu1 %3144 }
 0x4a9   : > { %v3171_v31 = vrot.slane %v3145_v20, 4  ;;  %v3143_v33 = vpop.permute.xlu0 %3142 }
 0x4aa   : > { %v3170_v13 = vrot.slane %v3143_v33, 4 }
 0x4ac   : > { %v3184_v7 = vsel %vm14801_vm4, %v3170_v13, %v3143_v33  ;;  %v3185_v15 = vsel %vm14802_vm3, %v3170_v13, %v3171_v31  ;;  %v3149_v17 = vpop.permute.xlu1 %3148  ;;  %vm14813_vm3 = vmmov %vm14801_vm4 }
 0x4ad   : > { %v3186_v47 = vsel %vm14803_vm12, %v3185_v15, %v3145_v20  ;;  %3222 = vst.msk [vmem:[#allocation3] sm:$0xff] %vm11486_vm14, %v3184_v7  ;;  %v3173_v43 = vrot.slane %v3149_v17, 4  ;;  %v3147_v45 = vpop.permute.xlu0 %3146  ;;  %vm14814_vm12 = vmmov %vm14811_vm7 }
 0x4ae   : > { %3226 = vst.msk [vmem:[#allocation3 + $0x8] sm:$0xff] %vm11491_vm13, %v3186_v47  ;;  %v3172_v38 = vrot.slane %v3147_v45, 4 }
 0x4b0   : > { %v3187_v37 = vsel %vm14804_vm6, %v3172_v38, %v3147_v45  ;;  %v3188_v48 = vsel %vm14805_vm10, %v3172_v38, %v3173_v43  ;;  %vm14815_vm6 = vmmov %vm14813_vm3 }
 0x4b1   : > { %v3189_v8 = vsel %vm14806_vm15, %v3188_v48, %v3149_v17  ;;  %3227 = vst.msk [vmem:[#allocation3 + $0x10] sm:$0xff] %vm11486_vm14, %v3187_v37  ;;  %vm14816_vm10 = vmmov %vm14813_vm3 }
 0x4b2   : > { %3228 = vst.msk [vmem:[#allocation3 + $0x18] sm:$0xff] %vm11491_vm13, %v3189_v8  ;;  %vm14818_vm15 = vmmov %vm14813_vm3 }
 0x4b4   : > { %v11514_v50 = vld [vmem:[#allocation3] sm:$0xff]  ;;  %v3153_v63 = vpop.permute.xlu1 %3152  ;;  %v3151_v40 = vpop.permute.xlu0 %3150 }
 0x4b5   : > { %v11516_v54 = vld [vmem:[#allocation3 + $0x8] sm:$0xff]  ;;  %3258 = vst [vmem:[#allocation4] sm:$0xff] %v11514_v50  ;;  %v3175_v27 = vrot.slane %v3153_v63, 4  ;;  %v3174_v39 = vrot.slane %v3151_v40, 4  ;;  %3782 = vrot.lane.b32.xlu0 %v11514_v50, %s14618_s15  ;;  %v11593_v31 = vrot.slane %v11514_v50, 7  ;;  %v11597_v13 = vrot.slane %v11514_v50, 5 }
 0x4b6   : > { %3784 = vrot.lane.b32.xlu1 %v11516_v54, %s14618_s15  ;;  %3261 = vst.msk [vmem:[#allocation4 + $0x8] sm:$0xff] %vm11510_vm1, %v11516_v54  ;;  %v11606_v7 = vrot.slane %v11514_v50, 6  ;;  %v11623_v47 = vrot.slane %v11516_v54, 7  ;;  %v11630_v43 = vrot.slane %v11516_v54, 6  ;;  %v11637_v45 = vrot.slane %v11516_v54, 5 }
 0x4b7   : > { %v3190_v29 = vsel %vm14810_vm9, %v3174_v39, %v3151_v40  ;;  %v3191_v62 = vsel %vm14811_vm7, %v3174_v39, %v3175_v27  ;;  %vm14820_vm9 = vmmov %vm14813_vm3 }
 0x4b8   : > { %v11528_v56 = vld [vmem:[#allocation3 + $0x10] sm:$0xff]  ;;  %v3192_v14 = vsel %vm14801_vm4, %v3191_v62, %v3153_v63  ;;  %3229 = vst.msk [vmem:[#allocation3 + $0x20] sm:$0xff] %vm11486_vm14, %v3190_v29  ;;  %v3157_v24 = vpop.permute.xlu1 %3156  ;;  %v3155_v4 = vpop.permute.xlu0 %3154  ;;  %vm14821_vm7 = vmmov %vm14817_vm0  ;;  %vm3241_vm4 = vcmask 471044   ;;  %v3305_v62 = vrot.slane %v11593_v31, 4 }
 0x4b9   : > { %v11533_v9 = vld [vmem:[#allocation3 + $0x18] sm:$0xff]  ;;  %3262 = vst [vmem:[#allocation4 + $0x10] sm:$0xff] %v11528_v56  ;;  %3230 = vst.msk [vmem:[#allocation3 + $0x28] sm:$0xff] %vm11491_vm13, %v3192_v14  ;;  %v3177_v10 = vrot.slane %v3157_v24, 4  ;;  %v3176_v57 = vrot.slane %v3155_v4, 4  ;;  %4372 = vrot.lane.b32.xlu0 %v11514_v50, %s14812_s25  ;;  %v11661_v37 = vld [vmem:[#allocation3 + $0x10] sm:$0xff] }
 0x4ba   : > { %4374 = vrot.lane.b32.xlu1 %v11516_v54, %s14812_s25  ;;  %3263 = vst.msk [vmem:[#allocation4 + $0x18] sm:$0xff] %vm11510_vm1, %v11533_v9  ;;  %v5084_v48 = vrot.slane %v11661_v37, 7  ;;  %v3306_v27 = vrot.slane %v11528_v56, 7  ;;  %v4218_v39 = vrot.slane %v11528_v56, 5  ;;  %v4217_v14 = vrot.slane %v11597_v13, 4 }
 0x4bb   : > { %v3193_v1 = vsel %vm14813_vm3, %v3176_v57, %v3155_v4  ;;  %v3194_v18 = vsel %vm14814_vm12, %v3176_v57, %v3177_v10  ;;  %vm14822_vm12 = vcmask 1044484   ;;  %v3467_v4 = vrot.slane %v11528_v56, 6 }
 0x4bc   : > { %v3195_v58 = vsel %vm14815_vm6, %v3194_v18, %v3157_v24  ;;  %3231 = vst.msk [vmem:[#allocation3 + $0x30] sm:$0xff] %vm11486_vm14, %v3193_v1  ;;  %v3161_v61 = vpop.permute.xlu1 %3160  ;;  %v3159_v0 = vpop.permute.xlu0 %3158  ;;  %vm3239_vm6 = vmor %vm14822_vm12, %vm3237_vm11  ;;  %v11677_v63 = vrot.slane %v5084_v48, 4  ;;  %v3466_v1 = vrot.slane %v11606_v7, 4 }
 0x4bd   : > { %3232 = vst.msk [vmem:[#allocation3 + $0x38] sm:$0xff] %vm11491_vm13, %v3195_v58  ;;  %v3179_v59 = vrot.slane %v3161_v61, 4  ;;  %v3178_v19 = vrot.slane %v3159_v0, 4  ;;  %4962 = vrot.lane.b32.xlu0 %v11514_v50, %s14616_s18  ;;  %vm14830_vm11 = vmmov %vm14822_vm12  ;;  %v3309_v58 = vrot.slane %v11533_v9, 7 }
 0x4be   : > { %4964 = vrot.lane.b32.xlu1 %v11516_v54, %s14616_s18 }
 0x4bf   : > { %v11556_v26 = vld [vmem:[#allocation3 + $0x20] sm:$0xff]  ;;  %v3196_v42 = vsel %vm14816_vm10, %v3178_v19, %v3159_v0  ;;  %v3197_v44 = vsel %vm14817_vm0, %v3178_v19, %v3179_v59  ;;  %vm14824_vm10 = vcmask 1040384   ;;  %v3470_v59 = vrot.slane %v11533_v9, 6 }
 0x4c0   : > { %v11560_v46 = vld [vmem:[#allocation3 + $0x28] sm:$0xff]  ;;  %3264 = vst [vmem:[#allocation4 + $0x20] sm:$0xff] %v11556_v26  ;;  %v3198_v60 = vsel %vm14818_vm15, %v3197_v44, %v3161_v61  ;;  %3233 = vst.msk [vmem:[#allocation3 + $0x40] sm:$0xff] %vm11486_vm14, %v3196_v42  ;;  %v3165_v3 = vpop.permute.xlu1 %3164  ;;  %v3163_v51 = vpop.permute.xlu0 %3162  ;;  %v11668_v8 = vld [vmem:[#allocation3 + $0x20] sm:$0xff]  ;;  %v3308_v61 = vrot.slane %v11623_v47, 4  ;;  %v3469_v19 = vrot.slane %v11630_v43, 4 }
 0x4c1   : > { %3234 = vst.msk [vmem:[#allocation3 + $0x48] sm:$0xff] %vm11491_vm13, %v3198_v60  ;;  %v3181_v2 = vrot.slane %v3165_v3, 4  ;;  %v3180_v30 = vrot.slane %v3163_v51, 4  ;;  %5552 = vrot.lane.b32.xlu0 %v11514_v50, %s14819_s0  ;;  %vm3242_vm0 = vmor %vm3241_vm4, %vm14824_vm10  ;;  %vm14834_vm4 = vcmask 1046532   ;;  %v3631_v44 = vrot.slane %v11533_v9, 5 }
 0x4c2   : > { %3265 = vst.msk [vmem:[#allocation4 + $0x28] sm:$0xff] %vm11510_vm1, %v11560_v46  ;;  %5554 = vrot.lane.b32.xlu1 %v11516_v54, %s14819_s0  ;;  %vm14826_vm15 = vmmov %vm14821_vm7 }
 0x4c3   : > { %v3250_v32 = vld [vmem:[#allocation3 + $0x30] sm:$0xff]  ;;  %v3199_v16 = vsel %vm14820_vm9, %v3180_v30, %v3163_v51  ;;  %v3200_v55 = vsel %vm14821_vm7, %v3180_v30, %v3181_v2  ;;  %vm14831_vm9 = vmmov %vm14824_vm10  ;;  %vm14839_vm10 = vcmask 1041408  }
 0x4c4   : > { %v3251_v53 = vld [vmem:[#allocation3 + $0x38] sm:$0xff]  ;;  %3266 = vst [vmem:[#allocation4 + $0x30] sm:$0xff] %v3250_v32  ;;  %v3201_v23 = vsel %vm14813_vm3, %v3200_v55, %v3165_v3  ;;  %3235 = vst.msk [vmem:[#allocation3 + $0x50] sm:$0xff] %vm11486_vm14, %v3199_v16  ;;  %v3169_v49 = vpop.permute.xlu1 %3168  ;;  %v3167_v52 = vpop.permute.xlu0 %3166  ;;  %v3630_v3 = vrot.slane %v11637_v45, 4 }
 0x4c5   : > { %3236 = vst.msk [vmem:[#allocation3 + $0x58] sm:$0xff] %vm11491_vm13, %v3201_v23  ;;  %v3183_v41 = vrot.slane %v3169_v49, 4  ;;  %v3182_v25 = vrot.slane %v3167_v52, 4  ;;  %6142 = vrot.lane.b32.xlu0 %v11514_v50, %s14823_s1  ;;  %vm14825_vm14 = vmmov %vm14813_vm3  ;;  %v14582_v50 = vrot.slane %v11668_v8, 7 }
 0x4c6   : > { %3267 = vst.msk [vmem:[#allocation4 + $0x38] sm:$0xff] %vm11510_vm1, %v3251_v53  ;;  %6144 = vrot.lane.b32.xlu1 %v11516_v54, %s14823_s1  ;;  %vm14827_vm13 = vmmov %vm14813_vm3  ;;  %vm14835_vm3 = vcmask 1042432  }
 0x4c7   : > { %v3252_v28 = vld [vmem:[#allocation3 + $0x40] sm:$0xff]  ;;  %v3202_v35 = vsel %vm14825_vm14, %v3182_v25, %v3167_v52  ;;  %v3203_v20 = vsel %vm14826_vm15, %v3182_v25, %v3183_v41  ;;  %vm11681_vm7 = vmor %vm14831_vm9, %vm14830_vm11  ;;  %vm14846_vm9 = vcmask 859136  }
 0x4c8   : > { %v3253_v33 = vld [vmem:[#allocation3 + $0x48] sm:$0xff]  ;;  %3268 = vst [vmem:[#allocation4 + $0x40] sm:$0xff] %v3252_v28  ;;  %v3204_v22 = vsel %vm14827_vm13, %v3203_v20, %v3169_v49  ;;  %3240 = vst.msk [vmem:[#allocation3 + $0x60] sm:$0x11] %vm3239_vm6, %v3202_v35  ;;  %v11690_v54 = vsel %vm11681_vm7, %v11677_v63, %v14582_v50  ;;  %v3307_v24 = vsel %vm11681_vm7, %v3305_v62, %v3306_v27  ;;  %vm14838_vm6 = vcmask 1045508  }
 0x4c9   : > { %3243 = vst.msk [vmem:[#allocation3 + $0x68] sm:$0x11] %vm3242_vm0, %v3204_v22  ;;  %3341 = vrot.lane.b32.xlu0 %v11593_v31, %s14633_s24  ;;  %vm11714_vm12 = vmor %vm14835_vm3, %vm14834_vm4  ;;  %v11757_v0 = vsel %vm11681_vm7, %v3308_v61, %v3309_v58 }
 0x4ca   : > { %3269 = vst.msk [vmem:[#allocation4 + $0x48] sm:$0xff] %vm11510_vm1, %v3253_v33  ;;  %4253 = vrot.lane.b32.xlu1 %v11597_v13, %s14630_s30  ;;  %vm11729_vm0 = vmor %vm14839_vm10, %vm14838_vm6  ;;  %v4219_v57 = vsel %vm11714_vm12, %v4217_v14, %v4218_v39  ;;  %v3632_v32 = vsel %vm11714_vm12, %v3630_v3, %v3631_v44  ;;  %vm14849_vm6 = vcmask 703488  }
 0x4cb   : > { %v3254_v6 = vld [vmem:[#allocation3 + $0x50] sm:$0xff]  ;;  %v3468_v18 = vsel %vm11729_vm0, %v3466_v1, %v3467_v4  ;;  %v11768_v42 = vsel %vm11729_vm0, %v3469_v19, %v3470_v59  ;;  %vm14842_vm14 = vmmov %vm14826_vm15  ;;  %vm14843_vm15 = vcmask 1014784  }
 0x4cc   : > { %v3255_v15 = vld [vmem:[#allocation3 + $0x58] sm:$0xff]  ;;  %3270 = vst [vmem:[#allocation4 + $0x50] sm:$0xff] %v3254_v6  ;;  %vm14844_vm13 = vmmov %vm14843_vm15 }
 0x4cd   : > { %3502 = vrot.lane.b32.xlu0 %v11606_v7, %s14617_s28  ;;  %3271 = vst.msk [vmem:[#allocation4 + $0x58] sm:$0xff] %vm11510_vm1, %v3255_v15  ;;  %vm14845_vm11 = vmmov %vm14842_vm14 }
 0x4ce   : > { %4096 = vrot.lane.b32.xlu1 %v11606_v7, %s14621_s21  ;;  %vm14847_vm4 = vmmov %vm14846_vm9 }
 0x4cf   : > { %v3256_v17 = vld [vmem:[#allocation3 + $0x60] sm:$0x11]  ;;  %vm14848_vm3 = vmmov %vm14845_vm11 }
 0x4d0   : > { %3272 = vst [vmem:[#allocation4 + $0x60] sm:$0x11] %v3256_v17  ;;  %v3257_v38 = vld [vmem:[#allocation3 + $0x68] sm:$0x11]  ;;  %vm14850_vm10 = vmmov %vm14849_vm6 }
 0x4d1   : > { %3663 = vrot.lane.b32.xlu0 %v11597_v13, %s14624_s17  ;;  %3273 = vst.msk [vmem:[#allocation4 + $0x68] sm:$0x11] %vm11306_vm5, %v3257_v38 }
 0x4d2   : > { %3939 = vrot.lane.b32.xlu1 %v11593_v31, %s14632_s20 }
 0x4d5   : > { %4529 = vrot.lane.b32.xlu0 %v11593_v31, %s14631_s16 }
 0x4d6   : > { %4686 = vrot.lane.b32.xlu1 %v11606_v7, %s14828_s12 }
 0x4d9   : > { %5709 = vrot.lane.b32.xlu0 %v11593_v31, %s14629_s26 }
 0x4da   : > { %3343 = vrot.lane.b32.xlu1 %v11623_v47, %s14633_s24 }
 0x4dd   : > { %4843 = vrot.lane.b32.xlu0 %v11597_v13, %s14623_s29 }
 0x4de   : > { %3504 = vrot.lane.b32.xlu1 %v11630_v43, %s14617_s28 }
 0x4e1   : > { %5433 = vrot.lane.b32.xlu0 %v11597_v13, %s14627_s19 }
 0x4e2   : > { %3665 = vrot.lane.b32.xlu1 %v11637_v45, %s14624_s17 }
 0x4e5   : > { %5276 = vrot.lane.b32.xlu0 %v11606_v7, %s14829_s2 }
 0x4e6   : > { %4531 = vrot.lane.b32.xlu1 %v11623_v47, %s14631_s16 }
 0x4e9   : > { %6023 = vrot.lane.b32.xlu0 %v11597_v13, %s14622_s11 }
 0x4ea   : > { %5711 = vrot.lane.b32.xlu1 %v11623_v47, %s14629_s26 }
 0x4ed   : > { %4255 = vrot.lane.b32.xlu0 %v11637_v45, %s14630_s30 }
 0x4ee   : > { %4845 = vrot.lane.b32.xlu1 %v11637_v45, %s14623_s29 }
 0x4f1   : > { %4098 = vrot.lane.b32.xlu0 %v11630_v43, %s14621_s21 }
 0x4f2   : > { %5435 = vrot.lane.b32.xlu1 %v11637_v45, %s14627_s19 }
 0x4f5   : > { %3941 = vrot.lane.b32.xlu0 %v11623_v47, %s14632_s20 }
 0x4f6   : > { %5278 = vrot.lane.b32.xlu1 %v11630_v43, %s14829_s2 }
 0x4f9   : > { %4688 = vrot.lane.b32.xlu0 %v11630_v43, %s14828_s12 }
 0x4fa   : > { %6025 = vrot.lane.b32.xlu1 %v11637_v45, %s14622_s11 }
 0x4fd   : > { %3786 = vrot.lane.b32.xlu0 %v11528_v56, %s14618_s15 }
 0x4fe   : > { %3788 = vrot.lane.b32.xlu1 %v11533_v9, %s14618_s15 }
 0x501   : > { %4376 = vrot.lane.b32.xlu0 %v11528_v56, %s14812_s25 }
 0x502   : > { %4378 = vrot.lane.b32.xlu1 %v11533_v9, %s14812_s25 }
 0x505   : > { %4966 = vrot.lane.b32.xlu0 %v11528_v56, %s14616_s18 }
 0x506   : > { %4968 = vrot.lane.b32.xlu1 %v11533_v9, %s14616_s18 }
 0x509   : > { %5556 = vrot.lane.b32.xlu0 %v11528_v56, %s14819_s0 }
 0x50a   : > { %5558 = vrot.lane.b32.xlu1 %v11533_v9, %s14819_s0 }
 0x50d   : > { %6146 = vrot.lane.b32.xlu0 %v11528_v56, %s14823_s1 }
 0x50e   : > { %6148 = vrot.lane.b32.xlu1 %v11533_v9, %s14823_s1 }
 0x511   : > { %3345 = vrot.lane.b32.xlu0 %v3307_v24, %s14633_s24 }
 0x512   : > { %4257 = vrot.lane.b32.xlu1 %v4219_v57, %s14630_s30 }
 0x515   : > { %3506 = vrot.lane.b32.xlu0 %v3468_v18, %s14617_s28 }
 0x516   : > { %4100 = vrot.lane.b32.xlu1 %v3468_v18, %s14621_s21 }
 0x519   : > { %3667 = vrot.lane.b32.xlu0 %v4219_v57, %s14624_s17 }
 0x51a   : > { %3943 = vrot.lane.b32.xlu1 %v3307_v24, %s14632_s20 }
 0x51d   : > { %4533 = vrot.lane.b32.xlu0 %v3307_v24, %s14631_s16 }
 0x51e   : > { %4690 = vrot.lane.b32.xlu1 %v3468_v18, %s14828_s12 }
 0x521   : > { %5713 = vrot.lane.b32.xlu0 %v3307_v24, %s14629_s26 }
 0x522   : > { %3347 = vrot.lane.b32.xlu1 %v11757_v0, %s14633_s24 }
 0x525   : > { %4847 = vrot.lane.b32.xlu0 %v4219_v57, %s14623_s29 }
 0x526   : > { %3508 = vrot.lane.b32.xlu1 %v11768_v42, %s14617_s28 }
 0x527   : > { %v3783_v60 = vpop.permute.xlu0 %3782 }
 0x528   : > { %v3810_v51 = vrot.slane %v3783_v60, 4  ;;  %v3785_v2 = vpop.permute.xlu1 %3784 }
 0x529   : > { %v3811_v30 = vrot.slane %v3785_v2, 4  ;;  %5437 = vrot.lane.b32.xlu0 %v4219_v57, %s14627_s19 }
 0x52a   : > { %3669 = vrot.lane.b32.xlu1 %v3632_v32, %s14624_s17 }
 0x52b   : > { %v3824_v16 = vsel %vm14842_vm14, %v3810_v51, %v3811_v30  ;;  %v3826_v55 = vsel %vm14843_vm15, %v3785_v2, %v3811_v30  ;;  %v4373_v53 = vpop.permute.xlu0 %4372  ;;  %vm14851_vm14 = vmmov %vm14848_vm3  ;;  %vm14852_vm15 = vcmask 547840  }
 0x52c   : > { %v3825_v23 = vsel %vm14844_vm13, %v3783_v60, %v3824_v16  ;;  %3860 = vst.msk [vmem:[#allocation4 + $0x198] sm:$0xff] %vm11510_vm1, %v3826_v55  ;;  %v4400_v49 = vrot.slane %v4373_v53, 4  ;;  %v4375_v52 = vpop.permute.xlu1 %4374  ;;  %vm14853_vm13 = vmmov %vm14852_vm15 }
 0x52d   : > { %3859 = vst [vmem:[#allocation4 + $0x190] sm:$0xff] %v3825_v23  ;;  %v4401_v41 = vrot.slane %v4375_v52, 4  ;;  %5280 = vrot.lane.b32.xlu0 %v3468_v18, %s14829_s2 }
 0x52e   : > { %4535 = vrot.lane.b32.xlu1 %v11757_v0, %s14631_s16 }
 0x52f   : > { %v4414_v25 = vsel %vm14845_vm11, %v4400_v49, %v4401_v41  ;;  %v4416_v28 = vsel %vm14846_vm9, %v4375_v52, %v4401_v41  ;;  %v4963_v35 = vpop.permute.xlu0 %4962  ;;  %vm14854_vm11 = vmmov %vm14848_vm3  ;;  %vm14855_vm9 = vcmask 392192  }
 0x530   : > { %v4415_v20 = vsel %vm14847_vm4, %v4373_v53, %v4414_v25  ;;  %4450 = vst.msk [vmem:[#allocation4 + $0x328] sm:$0xff] %vm11510_vm1, %v4416_v28  ;;  %v4990_v31 = vrot.slane %v4963_v35, 4  ;;  %v4965_v33 = vpop.permute.xlu1 %4964  ;;  %vm14856_vm4 = vmmov %vm14855_vm9 }
 0x531   : > { %4449 = vst [vmem:[#allocation4 + $0x320] sm:$0xff] %v4415_v20  ;;  %v4991_v22 = vrot.slane %v4965_v33, 4  ;;  %6027 = vrot.lane.b32.xlu0 %v4219_v57, %s14622_s11 }
 0x532   : > { %5715 = vrot.lane.b32.xlu1 %v11757_v0, %s14629_s26 }
 0x533   : > { %v5004_v13 = vsel %vm14848_vm3, %v4990_v31, %v4991_v22  ;;  %v5006_v6 = vsel %vm14849_vm6, %v4965_v33, %v4991_v22  ;;  %v5553_v7 = vpop.permute.xlu0 %5552  ;;  %vm14857_vm3 = vcmask 1043457   ;;  %vm14858_vm6 = vcmask 130053  }
 0x534   : > { %v5005_v15 = vsel %vm14850_vm10, %v4963_v35, %v5004_v13  ;;  %5040 = vst.msk [vmem:[#allocation4 + $0x4b8] sm:$0xff] %vm11510_vm1, %v5006_v6  ;;  %v5580_v17 = vrot.slane %v5553_v7, 4  ;;  %v5555_v47 = vpop.permute.xlu1 %5554  ;;  %vm11845_vm10 = vmor %vm14858_vm6, %vm14857_vm3  ;;  %vm14867_vm6 = vcmask 1022976  }
 0x535   : > { %5039 = vst [vmem:[#allocation4 + $0x4b0] sm:$0xff] %v5005_v15  ;;  %v5581_v43 = vrot.slane %v5555_v47, 4  ;;  %4259 = vrot.lane.b32.xlu0 %v3632_v32, %s14630_s30  ;;  %v3312_v15 = vrot.slane %v11556_v26, 7  ;;  %vm14866_vm3 = vmmov %vm14854_vm11 }
 0x536   : > { %4849 = vrot.lane.b32.xlu1 %v3632_v32, %s14623_s29 }
 0x537   : > { %v5594_v45 = vsel %vm14851_vm14, %v5580_v17, %v5581_v43  ;;  %v5596_v38 = vsel %vm14852_vm15, %v5555_v47, %v5581_v43  ;;  %v6143_v62 = vpop.permute.xlu0 %6142  ;;  %vm14861_vm14 = vmmov %vm14854_vm11  ;;  %vm14862_vm15 = vcmask 1039360   ;;  %v4224_v43 = vrot.slane %v11556_v26, 5 }
 0x538   : > { %v5595_v14 = vsel %vm14853_vm13, %v5553_v7, %v5594_v45  ;;  %5630 = vst.msk [vmem:[#allocation4 + $0x648] sm:$0xff] %vm11510_vm1, %v5596_v38  ;;  %v6170_v24 = vrot.slane %v6143_v62, 4  ;;  %v6145_v57 = vpop.permute.xlu1 %6144  ;;  %vm14863_vm13 = vmmov %vm14862_vm15  ;;  %v11877_v45 = vrot.slane %v3306_v27, 4 }
 0x539   : > { %5629 = vst [vmem:[#allocation4 + $0x640] sm:$0xff] %v5595_v14  ;;  %v6171_v1 = vrot.slane %v6145_v57, 4  ;;  %4102 = vrot.lane.b32.xlu0 %v11768_v42, %s14621_s21 }
 0x53a   : > { %5439 = vrot.lane.b32.xlu1 %v3632_v32, %s14627_s19  ;;  %v3313_v27 = vsel %vm11681_vm7, %v11877_v45, %v3312_v15 }
 0x53b   : > { %v6184_v18 = vsel %vm14854_vm11, %v6170_v24, %v6171_v1  ;;  %v6186_v61 = vsel %vm14855_vm9, %v6145_v57, %v6171_v1  ;;  %v3342_v19 = vpop.permute.xlu0 %3341  ;;  %vm14864_vm9 = vcmask 1031168   ;;  %v11885_v24 = vrot.slane %v4218_v39, 4 }
 0x53c   : > { %v6185_v60 = vsel %vm14856_vm4, %v6143_v62, %v6184_v18  ;;  %6220 = vst.msk [vmem:[#allocation4 + $0x7d8] sm:$0xff] %vm11510_vm1, %v6186_v61  ;;  %v11816_v3 = vpop.permute.xlu1 %4253  ;;  %v3369_v53 = vrot.slane %v3342_v19, 4  ;;  %vm14865_vm4 = vmmov %vm14864_vm9  ;;  %v3473_v18 = vrot.slane %v11556_v26, 6 }
 0x53d   : > { %6219 = vst [vmem:[#allocation4 + $0x7d0] sm:$0xff] %v6185_v60  ;;  %3945 = vrot.lane.b32.xlu0 %v11757_v0, %s14632_s20  ;;  %v4225_v39 = vsel %vm11714_vm12, %v11885_v24, %v4224_v43  ;;  %v11905_v60 = vrot.slane %v3467_v4, 4 }
 0x53e   : > { %5282 = vrot.lane.b32.xlu1 %v11768_v42, %s14829_s2 }
 0x53f   : > { %v3503_v51 = vpop.permute.xlu0 %3502  ;;  %v3474_v56 = vsel %vm11729_vm0, %v11905_v60, %v3473_v18 }
 0x540   : > { %v11822_v2 = vpop.permute.xlu1 %4096  ;;  %v3530_v20 = vrot.slane %v3503_v51, 4 }
 0x541   : > { %4692 = vrot.lane.b32.xlu0 %v11768_v42, %s14828_s12 }
 0x542   : > { %6029 = vrot.lane.b32.xlu1 %v3632_v32, %s14622_s11 }
 0x543   : > { %v3664_v30 = vpop.permute.xlu0 %3663 }
 0x544   : > { %v11827_v16 = vpop.permute.xlu1 %3939  ;;  %v3691_v17 = vrot.slane %v3664_v30, 4 }
 0x545   : > { %3790 = vrot.lane.b32.xlu0 %v11556_v26, %s14618_s15 }
 0x546   : > { %3792 = vrot.lane.b32.xlu1 %v11560_v46, %s14618_s15 }
 0x547   : > { %v4530_v0 = vpop.permute.xlu0 %4529 }
 0x548   : > { %v11833_v55 = vpop.permute.xlu1 %4686  ;;  %v4557_v61 = vrot.slane %v4530_v0, 4 }
 0x549   : > { %4380 = vrot.lane.b32.xlu0 %v11556_v26, %s14812_s25 }
 0x54a   : > { %4382 = vrot.lane.b32.xlu1 %v11560_v46, %s14812_s25 }
 0x54b   : > { %v11839_v42 = vpop.permute.xlu0 %5709 }
 0x54c   : > { %v3344_v32 = vpop.permute.xlu1 %3343  ;;  %v5737_v4 = vrot.slane %v11839_v42, 4 }
 0x54d   : > { %v3370_v23 = vrot.slane %v3344_v32, 4  ;;  %4970 = vrot.lane.b32.xlu0 %v11556_v26, %s14616_s18 }
 0x54e   : > { %4972 = vrot.lane.b32.xlu1 %v11560_v46, %s14616_s18 }
 0x54f   : > { %v3383_v52 = vsel %vm14861_vm14, %v3369_v53, %v3370_v23  ;;  %v3385_v41 = vsel %vm14862_vm15, %v3344_v32, %v3370_v23  ;;  %v11853_v25 = vpop.permute.xlu0 %4843  ;;  %vm14868_vm14 = vmmov %vm14867_vm6  ;;  %vm14869_vm15 = vnez %v14643_v21 }
 0x550   : > { %v3384_v28 = vsel %vm14863_vm13, %v3342_v19, %v3383_v52  ;;  %v3505_v35 = vpop.permute.xlu1 %3504  ;;  %3422 = vst.msk [vmem:[#allocation4 + $0x68] sm:$0xee] %vm11845_vm10, %v3385_v41  ;;  %vm14870_vm13 = vmmov %vm14866_vm3 }
 0x551   : > { %3418 = vst [vmem:[#allocation4 + $0x60] sm:$0xee] %v3384_v28  ;;  %v3531_v31 = vrot.slane %v3505_v35, 4  ;;  %5560 = vrot.lane.b32.xlu0 %v11556_v26, %s14819_s0 }
 0x552   : > { %5562 = vrot.lane.b32.xlu1 %v11560_v46, %s14819_s0 }
 0x553   : > { %v3544_v33 = vsel %vm14854_vm11, %v3530_v20, %v3531_v31  ;;  %v3546_v22 = vsel %vm14864_vm9, %v3505_v35, %v3531_v31  ;;  %v11864_v13 = vpop.permute.xlu0 %5433  ;;  %vm14871_vm11 = vcmask 850944   ;;  %v4281_v35 = vrot.slane %v11816_v3, 4 }
 0x554   : > { %v3545_v6 = vsel %vm14865_vm4, %v3503_v51, %v3544_v33  ;;  %3580 = vst.msk [vmem:[#allocation4 + $0xc8] sm:$0xcc] %vm10519_vm8, %v3546_v22  ;;  %v3666_v7 = vpop.permute.xlu1 %3665  ;;  %vm14872_vm9 = vmmov %vm14871_vm11  ;;  %v11929_v22 = vld [vmem:[#allocation3 + $0x20] sm:$0xff] }
 0x555   : > { %3579 = vst [vmem:[#allocation4 + $0xc0] sm:$0xcc] %v3545_v6  ;;  %v3692_v47 = vrot.slane %v3666_v7, 4  ;;  %6150 = vrot.lane.b32.xlu0 %v11556_v26, %s14823_s1  ;;  %vm14873_vm4 = vmmov %vm14866_vm3  ;;  %v4871_v6 = vrot.slane %v11853_v25, 4 }
 0x556   : > { %6152 = vrot.lane.b32.xlu1 %v11560_v46, %s14823_s1 }
 0x557   : > { %v3705_v38 = vsel %vm14866_vm3, %v3691_v17, %v3692_v47  ;;  %v3707_v62 = vsel %vm14867_vm6, %v3666_v7, %v3692_v47  ;;  %v11881_v14 = vpop.permute.xlu0 %5276  ;;  %vm14874_vm3 = vcmask 539648   ;;  %v3315_v17 = vrot.slane %v11560_v46, 7 }
 0x558   : > { %v3706_v57 = vsel %vm14868_vm14, %v3664_v30, %v3705_v38  ;;  %3741 = vst.msk [vmem:[#allocation4 + $0x128] sm:$0x88] %vm14869_vm15, %v3707_v62  ;;  %v4532_v1 = vpop.permute.xlu1 %4531  ;;  %vm14875_vm6 = vmmov %vm14874_vm3  ;;  %v11941_v62 = vld [vmem:[#allocation3 + $0x28] sm:$0xff] }
 0x559   : > { %3740 = vst [vmem:[#allocation4 + $0x120] sm:$0x88] %v3706_v57  ;;  %v4558_v19 = vrot.slane %v4532_v1, 4  ;;  %3349 = vrot.lane.b32.xlu0 %v3313_v27, %s14633_s24  ;;  %vm14876_vm14 = vmmov %vm14873_vm4 }
 0x55a   : > { %4261 = vrot.lane.b32.xlu1 %v4225_v39, %s14630_s30 }
 0x55b   : > { %v4571_v51 = vsel %vm14870_vm13, %v4557_v61, %v4558_v19  ;;  %v4573_v30 = vsel %vm14871_vm11, %v4532_v1, %v4558_v19  ;;  %v11909_v32 = vpop.permute.xlu0 %6023  ;;  %vm14877_vm13 = vcmask 867328  }
 0x55c   : > { %v4572_v53 = vsel %vm14872_vm9, %v4530_v0, %v4571_v51  ;;  %4607 = vst.msk [vmem:[#allocation4 + $0x388] sm:$0xee] %vm11845_vm10, %v4573_v30  ;;  %v5712_v23 = vpop.permute.xlu1 %5711  ;;  %vm14878_vm11 = vmmov %vm14877_vm13  ;;  %v4124_v51 = vrot.slane %v11822_v2, 4 }
 0x55d   : > { %4606 = vst [vmem:[#allocation4 + $0x380] sm:$0xee] %v4572_v53  ;;  %v5738_v52 = vrot.slane %v5712_v23, 4  ;;  %3510 = vrot.lane.b32.xlu0 %v3474_v56, %s14617_s28  ;;  %vm14879_vm9 = vmmov %vm14873_vm4  ;;  %v5461_v53 = vrot.slane %v11864_v13, 4 }
 0x55e   : > { %4104 = vrot.lane.b32.xlu1 %v3474_v56, %s14621_s21 }
 0x55f   : > { %v5751_v0 = vsel %vm14873_vm4, %v5737_v4, %v5738_v52  ;;  %v5753_v41 = vsel %vm14874_vm3, %v5712_v23, %v5738_v52  ;;  %v4256_v28 = vpop.permute.xlu0 %4255  ;;  %vm14880_vm4 = vcmask 711680   ;;  %v3476_v4 = vrot.slane %v11941_v62, 6 }
 0x560   : > { %v5752_v20 = vsel %vm14875_vm6, %v11839_v42, %v5751_v0  ;;  %5787 = vst.msk [vmem:[#allocation4 + $0x6a8] sm:$0xee] %vm11845_vm10, %v5753_v41  ;;  %v4282_v31 = vrot.slane %v4256_v28, 4  ;;  %v4846_v33 = vpop.permute.xlu1 %4845  ;;  %v11939_v42 = vrot.slane %v3309_v58, 4  ;;  %vm14881_vm3 = vmmov %vm14880_vm4  ;;  %v3475_v0 = vrot.slane %v3470_v59, 4 }
 0x561   : > { %5786 = vst [vmem:[#allocation4 + $0x6a0] sm:$0xee] %v5752_v20  ;;  %v4872_v7 = vrot.slane %v4846_v33, 4  ;;  %3671 = vrot.lane.b32.xlu0 %v4225_v39, %s14624_s17  ;;  %v11950_v39 = vrot.slane %v11929_v22, 7  ;;  %vm14882_vm6 = vmmov %vm14879_vm9 }
 0x562   : > { %v4295_v47 = vsel %vm14876_vm14, %v4281_v35, %v4282_v31  ;;  %v4297_v38 = vsel %vm14877_vm13, %v4256_v28, %v4282_v31  ;;  %3947 = vrot.lane.b32.xlu1 %v3313_v27, %s14632_s20  ;;  %v3316_v56 = vsel %vm11681_vm7, %v11939_v42, %v3315_v17  ;;  %vm14883_vm14 = vcmask 875520  }
 0x563   : > { %v4296_v57 = vsel %vm14878_vm11, %v11816_v3, %v4295_v47  ;;  %4331 = vst.msk [vmem:[#allocation4 + $0x2b8] sm:$0x88] %vm14869_vm15, %v4297_v38  ;;  %v4885_v1 = vsel %vm14879_vm9, %v4871_v6, %v4872_v7  ;;  %v4887_v61 = vsel %vm14880_vm4, %v4846_v33, %v4872_v7  ;;  %v4099_v19 = vpop.permute.xlu0 %4098  ;;  %vm14884_vm13 = vmmov %vm14883_vm14  ;;  %vm14886_vm9 = vcmask 556032  }
 0x564   : > { %4330 = vst [vmem:[#allocation4 + $0x2b0] sm:$0x88] %v4296_v57  ;;  %v4886_v58 = vsel %vm14881_vm3, %v11853_v25, %v4885_v1  ;;  %4921 = vst.msk [vmem:[#allocation4 + $0x448] sm:$0x88] %vm14869_vm15, %v4887_v61  ;;  %v4125_v3 = vrot.slane %v4099_v19, 4  ;;  %v5436_v30 = vpop.permute.xlu1 %5435  ;;  %v5681_v20 = vsel %vm11681_vm7, %v11877_v45, %v11950_v39  ;;  %v3967_v31 = vrot.slane %v11827_v16, 4 }
 0x565   : > { %4920 = vst [vmem:[#allocation4 + $0x440] sm:$0x88] %v4886_v58  ;;  %v5462_v23 = vrot.slane %v5436_v30, 4  ;;  %4537 = vrot.lane.b32.xlu0 %v3313_v27, %s14631_s16  ;;  %vm14885_vm11 = vmmov %vm14882_vm6  ;;  %v4814_v6 = vrot.slane %v11929_v22, 5  ;;  %v5304_v7 = vrot.slane %v11881_v14, 4  ;;  %v11992_v45 = vsel %vm11729_vm0, %v3475_v0, %v3476_v4 }
 0x566   : > { %v4138_v25 = vsel %vm14882_vm6, %v4124_v51, %v4125_v3  ;;  %v4140_v52 = vsel %vm14883_vm14, %v4099_v19, %v4125_v3  ;;  %3351 = vrot.lane.b32.xlu1 %v3316_v56, %s14633_s24  ;;  %vm14887_vm4 = vmmov %vm14886_vm9  ;;  %v3636_v1 = vrot.slane %v3631_v44, 4  ;;  %v4657_v3 = vrot.slane %v11929_v22, 6 }
 0x567   : > { %v4139_v27 = vsel %vm14884_vm13, %v11822_v2, %v4138_v25  ;;  %4174 = vst.msk [vmem:[#allocation4 + $0x258] sm:$0xcc] %vm10519_vm8, %v4140_v52  ;;  %v5475_v41 = vsel %vm14885_vm11, %v5461_v53, %v5462_v23  ;;  %v5477_v28 = vsel %vm14886_vm9, %v5436_v30, %v5462_v23  ;;  %v3942_v35 = vpop.permute.xlu0 %3941  ;;  %vm14888_vm3 = vmmov %vm14882_vm6  ;;  %vm14889_vm6 = vcmask 883712  }
 0x568   : > { %4173 = vst [vmem:[#allocation4 + $0x250] sm:$0xcc] %v4139_v27  ;;  %v5476_v59 = vsel %vm14887_vm4, %v11864_v13, %v5475_v41  ;;  %5511 = vst.msk [vmem:[#allocation4 + $0x5d8] sm:$0x88] %vm14869_vm15, %v5477_v28  ;;  %v3968_v2 = vrot.slane %v3942_v35, 4  ;;  %v5279_v33 = vpop.permute.xlu1 %5278  ;;  %v3637_v13 = vrot.slane %v11941_v62, 5  ;;  %v4815_v53 = vsel %vm11714_vm12, %v11885_v24, %v4814_v6 }
 0x569   : > { %5510 = vst [vmem:[#allocation4 + $0x5d0] sm:$0x88] %v5476_v59  ;;  %v5305_v47 = vrot.slane %v5279_v33, 4  ;;  %5717 = vrot.lane.b32.xlu0 %v5681_v20, %s14629_s26  ;;  %vm14890_vm14 = vmmov %vm14889_vm6  ;;  %vm14892_vm11 = vcmask 687104   ;;  %v4714_v30 = vrot.slane %v11833_v55, 4  ;;  %v6051_v23 = vrot.slane %v11909_v32, 4 }
 0x56a   : > { %v3981_v38 = vsel %vm14888_vm3, %v3967_v31, %v3968_v2  ;;  %v3983_v57 = vsel %vm14889_vm6, %v3942_v35, %v3968_v2  ;;  %3512 = vrot.lane.b32.xlu1 %v11992_v45, %s14617_s28  ;;  %vm14891_vm13 = vmmov %vm14888_vm3  ;;  %v12046_v59 = vld [vmem:[#allocation3 + $0x30] sm:$0xff]  ;;  %v12049_v2 = vrot.slane %v11941_v62, 7  ;;  %v5091_v37 = vsel %vm11681_vm7, %v11677_v63, %v11950_v39 }
 0x56b   : > { %v3982_v61 = vsel %vm14890_vm14, %v11827_v16, %v3981_v38  ;;  %4017 = vst.msk [vmem:[#allocation4 + $0x1f8] sm:$0xee] %vm11845_vm10, %v3983_v57  ;;  %v5318_v19 = vsel %vm14891_vm13, %v5304_v7, %v5305_v47  ;;  %v5320_v51 = vsel %vm14892_vm11, %v5279_v33, %v5305_v47  ;;  %v4689_v58 = vpop.permute.xlu0 %4688  ;;  %vm14893_vm9 = vmmov %vm14892_vm11  ;;  %vm14898_vm13 = vcmask 523264  }
 0x56c   : > { %4016 = vst [vmem:[#allocation4 + $0x1f0] sm:$0xee] %v3982_v61  ;;  %v5319_v9 = vsel %vm14893_vm9, %v11881_v14, %v5318_v19  ;;  %5354 = vst.msk [vmem:[#allocation4 + $0x578] sm:$0xcc] %vm10519_vm8, %v5320_v51  ;;  %v4715_v44 = vrot.slane %v4689_v58, 4  ;;  %v6026_v16 = vpop.permute.xlu1 %6025  ;;  %v12024_v14 = vsel %vm11714_vm12, %v3636_v1, %v3637_v13  ;;  %v4504_v1 = vsel %vm11681_vm7, %v11939_v42, %v12049_v2 }
 0x56d   : > { %5353 = vst [vmem:[#allocation4 + $0x570] sm:$0xcc] %v5319_v9  ;;  %v6052_v56 = vrot.slane %v6026_v16, 4  ;;  %4851 = vrot.lane.b32.xlu0 %v4815_v53, %s14623_s29  ;;  %vm14894_vm4 = vmmov %vm14888_vm3  ;;  %vm14895_vm3 = vcmask 719872  }
 0x56e   : > { %v4728_v25 = vsel %vm14894_vm4, %v4714_v30, %v4715_v44  ;;  %v4730_v52 = vsel %vm14895_vm3, %v4689_v58, %v4715_v44  ;;  %3673 = vrot.lane.b32.xlu1 %v12024_v14, %s14624_s17  ;;  %vm14896_vm6 = vmmov %vm14895_vm3 }
 0x56f   : > { %v4729_v24 = vsel %vm14896_vm6, %v11833_v55, %v4728_v25  ;;  %4764 = vst.msk [vmem:[#allocation4 + $0x3e8] sm:$0xcc] %vm10519_vm8, %v4730_v52  ;;  %vm14897_vm14 = vmmov %vm14894_vm4  ;;  %v6067_v27 = vsel %vm14898_vm13, %v6026_v16, %v6052_v56  ;;  %v3787_v41 = vpop.permute.xlu0 %3786  ;;  %v4658_v55 = vsel %vm11729_vm0, %v11905_v60, %v4657_v3 }
 0x570   : > { %v6065_v0 = vsel %vm14897_vm14, %v6051_v23, %v6052_v56  ;;  %4763 = vst [vmem:[#allocation4 + $0x3e0] sm:$0xcc] %v4729_v24  ;;  %vm14899_vm11 = vmmov %vm14898_vm13  ;;  %v3812_v35 = vrot.slane %v3787_v41, 4  ;;  %v3789_v20 = vpop.permute.xlu1 %3788  ;;  %vm14904_vm14 = vcmask 859136  }
 0x571   : > { %v6066_v28 = vsel %vm14899_vm11, %v11909_v32, %v6065_v0  ;;  %6101 = vst.msk [vmem:[#allocation4 + $0x768] sm:$0x88] %vm14869_vm15, %v6067_v27  ;;  %v3813_v31 = vrot.slane %v3789_v20, 4  ;;  %4694 = vrot.lane.b32.xlu0 %v4658_v55, %s14828_s12  ;;  %vm14900_vm9 = vmmov %vm14894_vm4  ;;  %vm14901_vm4 = vcmask 1014784  }
 0x572   : > { %6100 = vst [vmem:[#allocation4 + $0x760] sm:$0x88] %v6066_v28  ;;  %3794 = vrot.lane.b32.xlu1 %v12046_v59, %s14618_s15  ;;  %vm14902_vm3 = vmmov %vm14901_vm4 }
 0x573   : > { %v3827_v32 = vsel %vm14900_vm9, %v3812_v35, %v3813_v31  ;;  %v3829_v33 = vsel %vm14901_vm4, %v3789_v20, %v3813_v31  ;;  %v4377_v7 = vpop.permute.xlu0 %4376  ;;  %vm14903_vm6 = vmmov %vm14900_vm9  ;;  %vm14907_vm9 = vcmask 703488  }
 0x574   : > { %v3828_v47 = vsel %vm14902_vm3, %v3787_v41, %v3827_v32  ;;  %3862 = vst.msk [vmem:[#allocation4 + $0x1a8] sm:$0xff] %vm11510_vm1, %v3829_v33  ;;  %v4402_v60 = vrot.slane %v4377_v7, 4  ;;  %v4379_v38 = vpop.permute.xlu1 %4378  ;;  %vm14905_vm13 = vmmov %vm14904_vm14 }
 0x575   : > { %3861 = vst [vmem:[#allocation4 + $0x1a0] sm:$0xff] %v3828_v47  ;;  %v4403_v57 = vrot.slane %v4379_v38, 4  ;;  %5441 = vrot.lane.b32.xlu0 %v4815_v53, %s14627_s19  ;;  %vm14906_vm11 = vmmov %vm14903_vm6 }
 0x576   : > { %4539 = vrot.lane.b32.xlu1 %v4504_v1, %s14631_s16  ;;  %vm14908_vm4 = vmmov %vm14907_vm9 }
 0x577   : > { %v4417_v61 = vsel %vm14903_vm6, %v4402_v60, %v4403_v57  ;;  %v4419_v19 = vsel %vm14904_vm14, %v4379_v38, %v4403_v57  ;;  %v4967_v51 = vpop.permute.xlu0 %4966  ;;  %vm14909_vm3 = vmmov %vm14903_vm6  ;;  %vm14910_vm6 = vcmask 547840  }
 0x578   : > { %v4418_v58 = vsel %vm14905_vm13, %v4377_v7, %v4417_v61  ;;  %4452 = vst.msk [vmem:[#allocation4 + $0x338] sm:$0xff] %vm11510_vm1, %v4419_v19  ;;  %v4992_v30 = vrot.slane %v4967_v51, 4  ;;  %v4969_v9 = vpop.permute.xlu1 %4968  ;;  %vm14911_vm14 = vmmov %vm14910_vm6 }
 0x579   : > { %4451 = vst [vmem:[#allocation4 + $0x330] sm:$0xff] %v4418_v58  ;;  %v4993_v44 = vrot.slane %v4969_v9, 4  ;;  %5284 = vrot.lane.b32.xlu0 %v4658_v55, %s14829_s2  ;;  %vm14912_vm13 = vmmov %vm14909_vm3 }
 0x57a   : > { %5719 = vrot.lane.b32.xlu1 %v4504_v1, %s14629_s26 }
 0x57b   : > { %v5007_v42 = vsel %vm14906_vm11, %v4992_v30, %v4993_v44  ;;  %v5009_v16 = vsel %vm14907_vm9, %v4969_v9, %v4993_v44  ;;  %v5557_v23 = vpop.permute.xlu0 %5556  ;;  %vm14913_vm11 = vcmask 392192  }
 0x57c   : > { %v5008_v56 = vsel %vm14908_vm4, %v4967_v51, %v5007_v42  ;;  %5042 = vst.msk [vmem:[#allocation4 + $0x4c8] sm:$0xff] %vm11510_vm1, %v5009_v16  ;;  %v5582_v25 = vrot.slane %v5557_v23, 4  ;;  %v5559_v52 = vpop.permute.xlu1 %5558  ;;  %vm14914_vm9 = vmmov %vm14913_vm11  ;;  %v12114_v51 = vld [vmem:[#allocation3 + $0x38] sm:$0xff] }
 0x57d   : > { %5041 = vst [vmem:[#allocation4 + $0x4c0] sm:$0xff] %v5008_v56  ;;  %v5583_v24 = vrot.slane %v5559_v52, 4  ;;  %6031 = vrot.lane.b32.xlu0 %v4815_v53, %s14622_s11  ;;  %vm14915_vm4 = vmmov %vm14909_vm3 }
 0x57e   : > { %4853 = vrot.lane.b32.xlu1 %v12024_v14, %s14623_s29 }
 0x57f   : > { %v5597_v0 = vsel %vm14909_vm3, %v5582_v25, %v5583_v24  ;;  %v5599_v27 = vsel %vm14910_vm6, %v5559_v52, %v5583_v24  ;;  %v6147_v41 = vpop.permute.xlu0 %6146  ;;  %vm14916_vm3 = vcmask 1039360   ;;  %v12137_v52 = vrot.slane %v12046_v59, 5 }
 0x580   : > { %v5598_v28 = vsel %vm14911_vm14, %v5557_v23, %v5597_v0  ;;  %5632 = vst.msk [vmem:[#allocation4 + $0x658] sm:$0xff] %vm11510_vm1, %v5599_v27  ;;  %v6172_v35 = vrot.slane %v6147_v41, 4  ;;  %v6149_v20 = vpop.permute.xlu1 %6148  ;;  %vm14917_vm6 = vmmov %vm14916_vm3  ;;  %v12132_v23 = vrot.slane %v12046_v59, 7  ;;  %v3317_v24 = vrot.slane %v3312_v15, 4 }
 0x581   : > { %5631 = vst [vmem:[#allocation4 + $0x650] sm:$0xff] %v5598_v28  ;;  %v6173_v55 = vrot.slane %v6149_v20, 4  ;;  %4263 = vrot.lane.b32.xlu0 %v12024_v14, %s14630_s30  ;;  %vm14918_vm14 = vmmov %vm14915_vm4  ;;  %v4229_v28 = vrot.slane %v4224_v43, 4  ;;  %v12156_v15 = vrot.slane %v12046_v59, 6 }
 0x582   : > { %4696 = vrot.lane.b32.xlu1 %v11992_v45, %s14828_s12 }
 0x583   : > { %v6187_v53 = vsel %vm14912_vm13, %v6172_v35, %v6173_v55  ;;  %v6189_v31 = vsel %vm14913_vm11, %v6149_v20, %v6173_v55  ;;  %v3346_v32 = vpop.permute.xlu0 %3345  ;;  %vm14919_vm13 = vcmask 1031168   ;;  %v3319_v55 = vsel %vm11681_vm7, %v3317_v24, %v12132_v23 }
 0x584   : > { %v6188_v33 = vsel %vm14914_vm9, %v6147_v41, %v6187_v53  ;;  %6222 = vst.msk [vmem:[#allocation4 + $0x7e8] sm:$0xff] %vm11510_vm1, %v6189_v31  ;;  %v12093_v7 = vpop.permute.xlu1 %4257  ;;  %v3371_v58 = vrot.slane %v3346_v32, 4  ;;  %vm14920_vm11 = vmmov %vm14919_vm13  ;;  %v4231_v43 = vsel %vm11714_vm12, %v4229_v28, %v12137_v52  ;;  %v12187_v24 = vrot.slane %v12114_v51, 7 }
 0x585   : > { %6221 = vst [vmem:[#allocation4 + $0x7e0] sm:$0xff] %v6188_v33  ;;  %4106 = vrot.lane.b32.xlu0 %v11992_v45, %s14621_s21  ;;  %vm14921_vm9 = vmmov %vm14915_vm4  ;;  %v3320_v28 = vrot.slane %v3315_v17, 4  ;;  %v3482_v17 = vrot.slane %v12114_v51, 6 }
 0x586   : > { %5443 = vrot.lane.b32.xlu1 %v12024_v14, %s14627_s19 }
 0x587   : > { %v3507_v47 = vpop.permute.xlu0 %3506  ;;  %v3322_v46 = vsel %vm11681_vm7, %v3320_v28, %v12187_v24 }
 0x588   : > { %v12099_v60 = vpop.permute.xlu1 %4100  ;;  %v3532_v56 = vrot.slane %v3507_v47, 4 }
 0x589   : > { %3949 = vrot.lane.b32.xlu0 %v4504_v1, %s14632_s20 }
 0x58a   : > { %5286 = vrot.lane.b32.xlu1 %v11992_v45, %s14829_s2 }
 0x58b   : > { %v3668_v38 = vpop.permute.xlu0 %3667 }
 0x58c   : > { %v12104_v57 = vpop.permute.xlu1 %3943  ;;  %v3693_v53 = vrot.slane %v3668_v38, 4 }
 0x58d   : > { %4384 = vrot.lane.b32.xlu0 %v12046_v59, %s14812_s25 }
 0x58e   : > { %6033 = vrot.lane.b32.xlu1 %v12024_v14, %s14622_s11 }
 0x58f   : > { %v4534_v61 = vpop.permute.xlu0 %4533 }
 0x590   : > { %v12110_v19 = vpop.permute.xlu1 %4690 }
 0x591   : > { %4974 = vrot.lane.b32.xlu0 %v12046_v59, %s14616_s18 }
 0x592   : > { %4386 = vrot.lane.b32.xlu1 %v12114_v51, %s14812_s25 }
 0x593   : > { %v12118_v45 = vpop.permute.xlu0 %5713 }
 0x594   : > { %v3348_v1 = vpop.permute.xlu1 %3347 }
 0x595   : > { %v3372_v30 = vrot.slane %v3348_v1, 4  ;;  %5564 = vrot.lane.b32.xlu0 %v12046_v59, %s14819_s0 }
 0x596   : > { %4976 = vrot.lane.b32.xlu1 %v12114_v51, %s14616_s18 }
 0x597   : > { %v3386_v14 = vsel %vm14915_vm4, %v3371_v58, %v3372_v30  ;;  %v3388_v9 = vsel %vm14916_vm3, %v3348_v1, %v3372_v30  ;;  %v12126_v44 = vpop.permute.xlu0 %4847  ;;  %vm14922_vm4 = vcmask 1022976  }
 0x598   : > { %v3387_v42 = vsel %vm14917_vm6, %v3346_v32, %v3386_v14  ;;  %3424 = vst.msk [vmem:[#allocation4 + $0x78] sm:$0xff] %vm11510_vm1, %v3388_v9  ;;  %v3509_v16 = vpop.permute.xlu1 %3508  ;;  %v3478_v32 = vrot.slane %v3473_v18, 4  ;;  %vm14923_vm3 = vmmov %vm14922_vm4  ;;  %v4559_v14 = vrot.slane %v4534_v61, 4 }
 0x599   : > { %3423 = vst [vmem:[#allocation4 + $0x70] sm:$0xff] %v3387_v42  ;;  %v3533_v25 = vrot.slane %v3509_v16, 4  ;;  %3796 = vrot.lane.b32.xlu0 %v12114_v51, %s14618_s15  ;;  %vm14924_vm6 = vmmov %vm14921_vm9 }
 0x59a   : > { %5566 = vrot.lane.b32.xlu1 %v12114_v51, %s14819_s0  ;;  %v3480_v30 = vsel %vm11729_vm0, %v3478_v32, %v12156_v15 }
 0x59b   : > { %v3547_v0 = vsel %vm14918_vm14, %v3532_v56, %v3533_v25  ;;  %v3549_v27 = vsel %vm14919_vm13, %v3509_v16, %v3533_v25  ;;  %v12145_v41 = vpop.permute.xlu0 %5437  ;;  %vm14925_vm14 = vcmask 850944   ;;  %v5739_v56 = vrot.slane %v12118_v45, 4 }
 0x59c   : > { %v3548_v35 = vsel %vm14920_vm11, %v3507_v47, %v3547_v0  ;;  %3582 = vst.msk [vmem:[#allocation4 + $0xd8] sm:$0xff] %vm11510_vm1, %v3549_v27  ;;  %v3670_v20 = vpop.permute.xlu1 %3669  ;;  %vm14926_vm13 = vmmov %vm14925_vm14 }
 0x59d   : > { %3581 = vst [vmem:[#allocation4 + $0xd0] sm:$0xff] %v3548_v35  ;;  %v3694_v31 = vrot.slane %v3670_v20, 4  ;;  %3353 = vrot.lane.b32.xlu0 %v3319_v55, %s14633_s24  ;;  %vm14927_vm11 = vmmov %vm14924_vm6  ;;  %v4283_v35 = vrot.slane %v12093_v7, 4 }
 0x59e   : > { %4265 = vrot.lane.b32.xlu1 %v4231_v43, %s14630_s30 }
 0x59f   : > { %v3708_v33 = vsel %vm14921_vm9, %v3693_v53, %v3694_v31  ;;  %v3710_v47 = vsel %vm14922_vm4, %v3670_v20, %v3694_v31  ;;  %v12167_v59 = vpop.permute.xlu0 %5280  ;;  %vm14928_vm9 = vcmask 539648  }
 0x5a0   : > { %v3709_v1 = vsel %vm14923_vm3, %v3668_v38, %v3708_v33  ;;  %3743 = vst.msk [vmem:[#allocation4 + $0x138] sm:$0xff] %vm11510_vm1, %v3710_v47  ;;  %v4536_v58 = vpop.permute.xlu1 %4535  ;;  %vm14929_vm4 = vmmov %vm14928_vm9  ;;  %v5685_v47 = vrot.slane %v11950_v39, 4  ;;  %v10245_v39 = vld [vmem:[#allocation3 + $0x20] sm:$0xff] }
 0x5a1   : > { %3742 = vst [vmem:[#allocation4 + $0x130] sm:$0xff] %v3709_v1  ;;  %v4560_v26 = vrot.slane %v4536_v58, 4  ;;  %3514 = vrot.lane.b32.xlu0 %v3480_v30, %s14617_s28  ;;  %vm14930_vm3 = vmmov %vm14924_vm6 }
 0x5a2   : > { %4108 = vrot.lane.b32.xlu1 %v3480_v30, %s14621_s21 }
 0x5a3   : > { %v4574_v18 = vsel %vm14924_vm6, %v4559_v14, %v4560_v26  ;;  %v4576_v9 = vsel %vm14925_vm14, %v4536_v58, %v4560_v26  ;;  %v12179_v38 = vpop.permute.xlu0 %6027  ;;  %vm14931_vm6 = vcmask 867328   ;;  %v3481_v14 = vrot.slane %v3476_v4, 4 }
 0x5a4   : > { %v4575_v42 = vsel %vm14926_vm13, %v4534_v61, %v4574_v18  ;;  %4609 = vst.msk [vmem:[#allocation4 + $0x398] sm:$0xff] %vm11510_vm1, %v4576_v9  ;;  %v5716_v16 = vpop.permute.xlu1 %5715  ;;  %vm14932_vm14 = vmmov %vm14931_vm6  ;;  %v4126_v26 = vrot.slane %v12099_v60, 4 }
 0x5a5   : > { %4608 = vst [vmem:[#allocation4 + $0x390] sm:$0xff] %v4575_v42  ;;  %v5740_v25 = vrot.slane %v5716_v16, 4  ;;  %3675 = vrot.lane.b32.xlu0 %v4231_v43, %s14624_s17  ;;  %v4873_v43 = vrot.slane %v12126_v44, 4  ;;  %vm14933_vm13 = vmmov %vm14930_vm3  ;;  %v12225_v42 = vsel %vm11681_vm7, %v5685_v47, %v12132_v23 }
 0x5a6   : > { %3951 = vrot.lane.b32.xlu1 %v3319_v55, %s14632_s20 }
 0x5a7   : > { %v5754_v0 = vsel %vm14927_vm11, %v5739_v56, %v5740_v25  ;;  %v5756_v27 = vsel %vm14928_vm9, %v5716_v16, %v5740_v25  ;;  %v4260_v61 = vpop.permute.xlu0 %4259  ;;  %vm14934_vm11 = vcmask 711680   ;;  %v5463_v16 = vrot.slane %v12145_v41, 4 }
 0x5a8   : > { %v5755_v20 = vsel %vm14929_vm4, %v12118_v45, %v5754_v0  ;;  %5789 = vst.msk [vmem:[#allocation4 + $0x6b8] sm:$0xff] %vm11510_vm1, %v5756_v27  ;;  %v4284_v53 = vrot.slane %v4260_v61, 4  ;;  %v4850_v31 = vpop.permute.xlu1 %4849  ;;  %vm14935_vm9 = vmmov %vm14934_vm11  ;;  %v3643_v56 = vrot.slane %v12114_v51, 5  ;;  %v4819_v27 = vrot.slane %v4814_v6, 4 }
 0x5a9   : > { %5788 = vst [vmem:[#allocation4 + $0x6b0] sm:$0xff] %v5755_v20  ;;  %v4874_v32 = vrot.slane %v4850_v31, 4  ;;  %4541 = vrot.lane.b32.xlu0 %v3319_v55, %s14631_s16  ;;  %vm14936_vm4 = vmmov %vm14930_vm3 }
 0x5aa   : > { %v4298_v33 = vsel %vm14930_vm3, %v4283_v35, %v4284_v53  ;;  %v4300_v45 = vsel %vm14931_vm6, %v4260_v61, %v4284_v53  ;;  %3355 = vrot.lane.b32.xlu1 %v3322_v46, %s14633_s24  ;;  %vm14937_vm3 = vcmask 875520   ;;  %v3642_v53 = vrot.slane %v3637_v13, 4 }
 0x5ab   : > { %v4299_v1 = vsel %vm14932_vm14, %v12093_v7, %v4298_v33  ;;  %4333 = vst.msk [vmem:[#allocation4 + $0x2c8] sm:$0xff] %vm11510_vm1, %v4300_v45  ;;  %v4888_v55 = vsel %vm14933_vm13, %v4873_v43, %v4874_v32  ;;  %v4890_v58 = vsel %vm14934_vm11, %v4850_v31, %v4874_v32  ;;  %v4103_v30 = vpop.permute.xlu0 %4102  ;;  %vm14938_vm6 = vmmov %vm14937_vm3  ;;  %vm14940_vm13 = vcmask 556032  }
 0x5ac   : > { %4332 = vst [vmem:[#allocation4 + $0x2c0] sm:$0xff] %v4299_v1  ;;  %v4889_v18 = vsel %vm14935_vm9, %v12126_v44, %v4888_v55  ;;  %4923 = vst.msk [vmem:[#allocation4 + $0x458] sm:$0xff] %vm11510_vm1, %v4890_v58  ;;  %v4127_v7 = vrot.slane %v4103_v30, 4  ;;  %v5440_v9 = vpop.permute.xlu1 %5439  ;;  %v12234_v44 = vsel %vm11729_vm0, %v3481_v14, %v3482_v17  ;;  %v3969_v31 = vrot.slane %v12104_v57, 4 }
 0x5ad   : > { %4922 = vst [vmem:[#allocation4 + $0x450] sm:$0xff] %v4889_v18  ;;  %v5464_v4 = vrot.slane %v5440_v9, 4  ;;  %5721 = vrot.lane.b32.xlu0 %v12225_v42, %s14629_s26  ;;  %vm14939_vm14 = vmmov %vm14936_vm4  ;;  %v12259_v32 = vsel %vm11714_vm12, %v4819_v27, %v12137_v52  ;;  %v5306_v46 = vrot.slane %v12167_v59, 4  ;;  %v12268_v13 = vsel %vm11714_vm12, %v3642_v53, %v3643_v56 }
 0x5ae   : > { %v4141_v25 = vsel %vm14936_vm4, %v4126_v26, %v4127_v7  ;;  %v4143_v0 = vsel %vm14937_vm3, %v4103_v30, %v4127_v7  ;;  %3516 = vrot.lane.b32.xlu1 %v12234_v44, %s14617_s28  ;;  %vm14941_vm11 = vmmov %vm14940_vm13  ;;  %v4662_v45 = vrot.slane %v4657_v3, 4  ;;  %v4716_v30 = vrot.slane %v12110_v19, 4  ;;  %v12292_v7 = vld [vmem:[#allocation3 + $0x40] sm:$0xff] }
 0x5af   : > { %v4142_v61 = vsel %vm14938_vm6, %v12099_v60, %v4141_v25  ;;  %4176 = vst.msk [vmem:[#allocation4 + $0x268] sm:$0xff] %vm11510_vm1, %v4143_v0  ;;  %v5478_v28 = vsel %vm14939_vm14, %v5463_v16, %v5464_v4  ;;  %v5480_v35 = vsel %vm14940_vm13, %v5440_v9, %v5464_v4  ;;  %v3946_v20 = vpop.permute.xlu0 %3945  ;;  %vm14942_vm9 = vmmov %vm14936_vm4  ;;  %vm14943_vm4 = vcmask 883712  }
 0x5b0   : > { %4175 = vst [vmem:[#allocation4 + $0x260] sm:$0xff] %v4142_v61  ;;  %v5479_v6 = vsel %vm14941_vm11, %v12145_v41, %v5478_v28  ;;  %5513 = vst.msk [vmem:[#allocation4 + $0x5e8] sm:$0xff] %vm11510_vm1, %v5480_v35  ;;  %v3970_v60 = vrot.slane %v3946_v20, 4  ;;  %v5283_v43 = vpop.permute.xlu1 %5282  ;;  %vm14946_vm14 = vcmask 687104   ;;  %v6053_v26 = vrot.slane %v12179_v38, 4 }
 0x5b1   : > { %5512 = vst [vmem:[#allocation4 + $0x5e0] sm:$0xff] %v5479_v6  ;;  %v5307_v62 = vrot.slane %v5283_v43, 4  ;;  %4855 = vrot.lane.b32.xlu0 %v12259_v32, %s14623_s29  ;;  %vm14944_vm3 = vmmov %vm14943_vm4  ;;  %v4508_v27 = vrot.slane %v12049_v2, 4 }
 0x5b2   : > { %v3984_v41 = vsel %vm14942_vm9, %v3969_v31, %v3970_v60  ;;  %v3986_v33 = vsel %vm14943_vm4, %v3946_v20, %v3970_v60  ;;  %3677 = vrot.lane.b32.xlu1 %v12268_v13, %s14624_s17  ;;  %vm14945_vm6 = vmmov %vm14942_vm9  ;;  %vm14949_vm9 = vcmask 719872  }
 0x5b3   : > { %v3985_v47 = vsel %vm14944_vm3, %v12104_v57, %v3984_v41  ;;  %4019 = vst.msk [vmem:[#allocation4 + $0x208] sm:$0xff] %vm11510_vm1, %v3986_v33  ;;  %v5321_v1 = vsel %vm14945_vm6, %v5306_v46, %v5307_v62  ;;  %v5323_v55 = vsel %vm14946_vm14, %v5283_v43, %v5307_v62  ;;  %v4693_v58 = vpop.permute.xlu0 %4692  ;;  %vm14947_vm13 = vmmov %vm14946_vm14  ;;  %v4664_v57 = vsel %vm11729_vm0, %v4662_v45, %v12156_v15 }
 0x5b4   : > { %4018 = vst [vmem:[#allocation4 + $0x200] sm:$0xff] %v3985_v47  ;;  %v5322_v14 = vsel %vm14947_vm13, %v12167_v59, %v5321_v1  ;;  %5356 = vst.msk [vmem:[#allocation4 + $0x588] sm:$0xff] %vm11510_vm1, %v5323_v55  ;;  %v4717_v22 = vrot.slane %v4693_v58, 4  ;;  %v6030_v3 = vpop.permute.xlu1 %6029  ;;  %v4510_v20 = vsel %vm11681_vm7, %v4508_v27, %v12187_v24 }
 0x5b5   : > { %5355 = vst [vmem:[#allocation4 + $0x580] sm:$0xff] %v5322_v14  ;;  %v6054_v18 = vrot.slane %v6030_v3, 4  ;;  %4698 = vrot.lane.b32.xlu0 %v4664_v57, %s14828_s12  ;;  %vm14948_vm11 = vmmov %vm14945_vm6 }
 0x5b6   : > { %v4731_v9 = vsel %vm14948_vm11, %v4716_v30, %v4717_v22  ;;  %v4733_v59 = vsel %vm14949_vm9, %v4693_v58, %v4717_v22  ;;  %3798 = vrot.lane.b32.xlu1 %v12292_v7, %s14618_s15  ;;  %vm14950_vm4 = vmmov %vm14949_vm9  ;;  %vm14955_vm11 = vcmask 1014784  }
 0x5b7   : > { %v4732_v16 = vsel %vm14950_vm4, %v12110_v19, %v4731_v9  ;;  %4766 = vst.msk [vmem:[#allocation4 + $0x3f8] sm:$0xff] %vm11510_vm1, %v4733_v59  ;;  %vm14951_vm3 = vmmov %vm14945_vm6  ;;  %vm14952_vm6 = vcmask 523264   ;;  %v3791_v0 = vpop.permute.xlu0 %3790 }
 0x5b8   : > { %v6068_v4 = vsel %vm14951_vm3, %v6053_v26, %v6054_v18  ;;  %v6070_v25 = vsel %vm14952_vm6, %v6030_v3, %v6054_v18  ;;  %4765 = vst [vmem:[#allocation4 + $0x3f0] sm:$0xff] %v4732_v16  ;;  %vm14953_vm14 = vmmov %vm14952_vm6  ;;  %v3814_v28 = vrot.slane %v3791_v0, 4  ;;  %v3793_v35 = vpop.permute.xlu1 %3792 }
 0x5b9   : > { %v6069_v61 = vsel %vm14953_vm14, %v12179_v38, %v6068_v4  ;;  %6103 = vst.msk [vmem:[#allocation4 + $0x778] sm:$0xff] %vm11510_vm1, %v6070_v25  ;;  %v3815_v19 = vrot.slane %v3793_v35, 4  ;;  %5445 = vrot.lane.b32.xlu0 %v12259_v32, %s14627_s19  ;;  %vm14954_vm13 = vmmov %vm14951_vm3 }
 0x5ba   : > { %6102 = vst [vmem:[#allocation4 + $0x770] sm:$0xff] %v6069_v61  ;;  %4543 = vrot.lane.b32.xlu1 %v4510_v20, %s14631_s16  ;;  %vm14956_vm9 = vmmov %vm14955_vm11 }
 0x5bb   : > { %v3830_v53 = vsel %vm14954_vm13, %v3814_v28, %v3815_v19  ;;  %v3832_v38 = vsel %vm14955_vm11, %v3793_v35, %v3815_v19  ;;  %v4381_v31 = vpop.permute.xlu0 %4380  ;;  %vm14957_vm4 = vmmov %vm14951_vm3  ;;  %vm14958_vm3 = vcmask 859136   ;;  %vm14961_vm13 = vcmask 703488  }
 0x5bc   : > { %v3831_v6 = vsel %vm14956_vm9, %v3791_v0, %v3830_v53  ;;  %3864 = vst.msk [vmem:[#allocation4 + $0x1b8] sm:$0xff] %vm11510_vm1, %v3832_v38  ;;  %v4404_v60 = vrot.slane %v4381_v31, 4  ;;  %v4383_v43 = vpop.permute.xlu1 %4382  ;;  %vm14959_vm6 = vmmov %vm14958_vm3 }
 0x5bd   : > { %3863 = vst [vmem:[#allocation4 + $0x1b0] sm:$0xff] %v3831_v6  ;;  %v4405_v46 = vrot.slane %v4383_v43, 4  ;;  %5288 = vrot.lane.b32.xlu0 %v4664_v57, %s14829_s2  ;;  %vm14960_vm14 = vmmov %vm14957_vm4 }
 0x5be   : > { %5723 = vrot.lane.b32.xlu1 %v4510_v20, %s14629_s26  ;;  %vm14962_vm11 = vmmov %vm14961_vm13 }
 0x5bf   : > { %v4420_v62 = vsel %vm14957_vm4, %v4404_v60, %v4405_v46  ;;  %v4422_v41 = vsel %vm14958_vm3, %v4383_v43, %v4405_v46  ;;  %v4971_v33 = vpop.permute.xlu0 %4970  ;;  %vm14963_vm9 = vmmov %vm14957_vm4  ;;  %vm14964_vm4 = vcmask 547840   ;;  %v12372_v43 = vld [vmem:[#allocation3 + $0x48] sm:$0xff] }
 0x5c0   : > { %v4421_v45 = vsel %vm14959_vm6, %v4381_v31, %v4420_v62  ;;  %4454 = vst.msk [vmem:[#allocation4 + $0x348] sm:$0xff] %vm11510_vm1, %v4422_v41  ;;  %v4994_v47 = vrot.slane %v4971_v33, 4  ;;  %v4973_v1 = vpop.permute.xlu1 %4972  ;;  %vm14965_vm3 = vmmov %vm14964_vm4 }
 0x5c1   : > { %4453 = vst [vmem:[#allocation4 + $0x340] sm:$0xff] %v4421_v45  ;;  %v4995_v55 = vrot.slane %v4973_v1, 4  ;;  %6035 = vrot.lane.b32.xlu0 %v12259_v32, %s14622_s11  ;;  %vm14966_vm6 = vmmov %vm14963_vm9 }
 0x5c2   : > { %4857 = vrot.lane.b32.xlu1 %v12268_v13, %s14623_s29 }
 0x5c3   : > { %v5010_v58 = vsel %vm14960_vm14, %v4994_v47, %v4995_v55  ;;  %v5012_v30 = vsel %vm14961_vm13, %v4973_v1, %v4995_v55  ;;  %v5561_v14 = vpop.permute.xlu0 %5560  ;;  %vm14967_vm14 = vcmask 392192  }
 0x5c4   : > { %v5011_v22 = vsel %vm14962_vm11, %v4971_v33, %v5010_v58  ;;  %5044 = vst.msk [vmem:[#allocation4 + $0x4d8] sm:$0xff] %vm11510_vm1, %v5012_v30  ;;  %v5584_v3 = vrot.slane %v5561_v14, 4  ;;  %v5563_v57 = vpop.permute.xlu1 %5562  ;;  %vm14968_vm13 = vmmov %vm14967_vm14 }
 0x5c5   : > { %5043 = vst [vmem:[#allocation4 + $0x4d0] sm:$0xff] %v5011_v22  ;;  %v5585_v26 = vrot.slane %v5563_v57, 4  ;;  %5131 = vrot.lane.b32.xlu0 %v12225_v42, %s14625_s23  ;;  %vm14969_vm11 = vmmov %vm14966_vm6 }
 0x5c6   : > { %4700 = vrot.lane.b32.xlu1 %v12234_v44, %s14828_s12 }
 0x5c7   : > { %v5600_v32 = vsel %vm14963_vm9, %v5584_v3, %v5585_v26  ;;  %v5602_v18 = vsel %vm14964_vm4, %v5563_v57, %v5585_v26  ;;  %v6151_v9 = vpop.permute.xlu0 %6150  ;;  %vm14970_vm9 = vcmask 1039360   ;;  %v4236_v57 = vrot.slane %v12292_v7, 5 }
 0x5c8   : > { %v5601_v59 = vsel %vm14965_vm3, %v5561_v14, %v5600_v32  ;;  %5634 = vst.msk [vmem:[#allocation4 + $0x668] sm:$0xff] %vm11510_vm1, %v5602_v18  ;;  %v6174_v16 = vrot.slane %v6151_v9, 4  ;;  %v6153_v4 = vpop.permute.xlu1 %6152  ;;  %vm14971_vm4 = vmmov %vm14970_vm9  ;;  %v3324_v14 = vrot.slane %v12292_v7, 7  ;;  %v3323_v26 = vrot.slane %v12132_v23, 4 }
 0x5c9   : > { %5633 = vst [vmem:[#allocation4 + $0x660] sm:$0xff] %v5601_v59  ;;  %v6175_v25 = vrot.slane %v6153_v4, 4  ;;  %4267 = vrot.lane.b32.xlu0 %v12268_v13, %s14630_s30  ;;  %vm14972_vm3 = vmmov %vm14966_vm6  ;;  %v4235_v59 = vrot.slane %v12137_v52, 4 }
 0x5ca   : > { %5447 = vrot.lane.b32.xlu1 %v12268_v13, %s14627_s19  ;;  %v12414_v23 = vsel %vm11681_vm7, %v3323_v26, %v3324_v14 }
 0x5cb   : > { %v6190_v42 = vsel %vm14966_vm6, %v6174_v16, %v6175_v25  ;;  %v6192_v0 = vsel %vm14967_vm14, %v6153_v4, %v6175_v25  ;;  %v3350_v27 = vpop.permute.xlu0 %3349  ;;  %vm14973_vm6 = vcmask 1031168   ;;  %v12417_v25 = vrot.slane %v12292_v7, 6 }
 0x5cc   : > { %v6191_v61 = vsel %vm14968_vm13, %v6151_v9, %v6190_v42  ;;  %6224 = vst.msk [vmem:[#allocation4 + $0x7f8] sm:$0xff] %vm11510_vm1, %v6192_v0  ;;  %v12354_v28 = vpop.permute.xlu1 %4261  ;;  %v3373_v60 = vrot.slane %v3350_v27, 4  ;;  %vm14974_vm14 = vmmov %vm14973_vm6  ;;  %v12425_v52 = vsel %vm11714_vm12, %v4235_v59, %v4236_v57  ;;  %v3484_v42 = vrot.slane %v12156_v15, 4 }
 0x5cd   : > { %6223 = vst [vmem:[#allocation4 + $0x7f0] sm:$0xff] %v6191_v61  ;;  %4110 = vrot.lane.b32.xlu0 %v12234_v44, %s14621_s21  ;;  %vm14975_vm13 = vmmov %vm14972_vm3 }
 0x5ce   : > { %5290 = vrot.lane.b32.xlu1 %v12234_v44, %s14829_s2  ;;  %v12435_v61 = vsel %vm11729_vm0, %v3484_v42, %v12417_v25 }
 0x5cf   : > { %v3511_v35 = vpop.permute.xlu0 %3510 }
 0x5d0   : > { %v12360_v19 = vpop.permute.xlu1 %4104  ;;  %v3534_v33 = vrot.slane %v3511_v35, 4 }
 0x5d1   : > { %3953 = vrot.lane.b32.xlu0 %v4510_v20, %s14632_s20 }
 0x5d2   : > { %6037 = vrot.lane.b32.xlu1 %v12268_v13, %s14622_s11 }
 0x5d3   : > { %v3672_v53 = vpop.permute.xlu0 %3671 }
 0x5d4   : > { %v12365_v38 = vpop.permute.xlu1 %3947  ;;  %v3695_v22 = vrot.slane %v3672_v53, 4 }
 0x5d5   : > { %4388 = vrot.lane.b32.xlu0 %v12292_v7, %s14812_s25 }
 0x5d6   : > { %5133 = vrot.lane.b32.xlu1 %v4510_v20, %s14625_s23 }
 0x5d7   : > { %v4538_v31 = vpop.permute.xlu0 %4537 }
 0x5d8   : > { %v3352_v6 = vpop.permute.xlu1 %3351 }
 0x5d9   : > { %v3374_v44 = vrot.slane %v3352_v6, 4  ;;  %4978 = vrot.lane.b32.xlu0 %v12292_v7, %s14616_s18 }
 0x5da   : > { %4390 = vrot.lane.b32.xlu1 %v12372_v43, %s14812_s25 }
 0x5db   : > { %v3389_v13 = vsel %vm14969_vm11, %v3373_v60, %v3374_v44  ;;  %v3391_v46 = vsel %vm14970_vm9, %v3352_v6, %v3374_v44  ;;  %v5718_v62 = vpop.permute.xlu0 %5717  ;;  %vm14976_vm11 = vcmask 1022976  }
 0x5dc   : > { %v3390_v41 = vsel %vm14971_vm4, %v3350_v27, %v3389_v13  ;;  %3426 = vst.msk [vmem:[#allocation4 + $0x88] sm:$0xff] %vm11510_vm1, %v3391_v46  ;;  %v3513_v20 = vpop.permute.xlu1 %3512  ;;  %vm14977_vm9 = vmmov %vm14976_vm11  ;;  %v5741_v46 = vrot.slane %v5718_v62, 4 }
 0x5dd   : > { %3425 = vst [vmem:[#allocation4 + $0x80] sm:$0xff] %v3390_v41  ;;  %v3535_v45 = vrot.slane %v3513_v20, 4  ;;  %5568 = vrot.lane.b32.xlu0 %v12292_v7, %s14819_s0  ;;  %vm14978_vm4 = vmmov %vm14972_vm3 }
 0x5de   : > { %4980 = vrot.lane.b32.xlu1 %v12372_v43, %s14616_s18 }
 0x5df   : > { %v3550_v47 = vsel %vm14972_vm3, %v3534_v33, %v3535_v45  ;;  %v3552_v1 = vsel %vm14973_vm6, %v3513_v20, %v3535_v45  ;;  %v4852_v55 = vpop.permute.xlu0 %4851  ;;  %vm14979_vm3 = vcmask 850944  }
 0x5e0   : > { %v12388_v58 = vsel %vm14974_vm14, %v3511_v35, %v3550_v47  ;;  %3584 = vst.msk [vmem:[#allocation4 + $0xe8] sm:$0xff] %vm11510_vm1, %v3552_v1  ;;  %v3674_v30 = vpop.permute.xlu1 %3673  ;;  %v4561_v35 = vrot.slane %v4538_v31, 4  ;;  %vm14980_vm6 = vmmov %vm14979_vm3  ;;  %v4875_v1 = vrot.slane %v4852_v55, 4 }
 0x5e1   : > { %3583 = vst [vmem:[#allocation4 + $0xe0] sm:$0xff] %v12388_v58  ;;  %v3696_v3 = vrot.slane %v3674_v30, 4  ;;  %3800 = vrot.lane.b32.xlu0 %v12372_v43, %s14618_s15  ;;  %vm14981_vm14 = vmmov %vm14978_vm4 }
 0x5e2   : > { %5570 = vrot.lane.b32.xlu1 %v12372_v43, %s14819_s0 }
 0x5e3   : > { %v3711_v32 = vsel %vm14975_vm13, %v3695_v22, %v3696_v3  ;;  %v3713_v18 = vsel %vm14976_vm11, %v3674_v30, %v3696_v3  ;;  %v12402_v9 = vpop.permute.xlu0 %4694  ;;  %vm14982_vm13 = vcmask 539648   ;;  %v3327_v22 = vrot.slane %v12372_v43, 7 }
 0x5e4   : > { %v3712_v16 = vsel %vm14977_vm9, %v3672_v53, %v3711_v32  ;;  %3745 = vst.msk [vmem:[#allocation4 + $0x148] sm:$0xff] %vm11510_vm1, %v3713_v18  ;;  %v12408_v4 = vpop.permute.xlu1 %3794  ;;  %vm14983_vm11 = vmmov %vm14982_vm13  ;;  %v3326_v32 = vrot.slane %v12187_v24, 4  ;;  %v4285_v18 = vrot.slane %v12354_v28, 4 }
 0x5e5   : > { %3744 = vst [vmem:[#allocation4 + $0x140] sm:$0xff] %v3712_v16  ;;  %3357 = vrot.lane.b32.xlu0 %v12414_v23, %s14633_s24  ;;  %vm14984_vm9 = vmmov %vm14978_vm4 }
 0x5e6   : > { %4269 = vrot.lane.b32.xlu1 %v12425_v52, %s14630_s30  ;;  %v12478_v24 = vsel %vm11681_vm7, %v3326_v32, %v3327_v22 }
 0x5e7   : > { %v12430_v0 = vpop.permute.xlu0 %5441 }
 0x5e8   : > { %v4540_v27 = vpop.permute.xlu1 %4539 }
 0x5e9   : > { %v4562_v53 = vrot.slane %v4540_v27, 4  ;;  %3518 = vrot.lane.b32.xlu0 %v12435_v61, %s14617_s28 }
 0x5ea   : > { %4112 = vrot.lane.b32.xlu1 %v12435_v61, %s14621_s21 }
 0x5eb   : > { %v4577_v6 = vsel %vm14978_vm4, %v4561_v35, %v4562_v53  ;;  %v4579_v15 = vsel %vm14979_vm3, %v4540_v27, %v4562_v53  ;;  %v12443_v60 = vpop.permute.xlu0 %5284  ;;  %vm14985_vm4 = vcmask 711680   ;;  %v4718_v27 = vrot.slane %v12402_v9, 4 }
 0x5ec   : > { %v4578_v44 = vsel %vm14980_vm6, %v4538_v31, %v4577_v6  ;;  %4611 = vst.msk [vmem:[#allocation4 + $0x3a8] sm:$0xff] %vm11510_vm1, %v4579_v15  ;;  %v5720_v13 = vpop.permute.xlu1 %5719  ;;  %vm14986_vm3 = vmmov %vm14985_vm4 }
 0x5ed   : > { %4610 = vst [vmem:[#allocation4 + $0x3a0] sm:$0xff] %v4578_v44  ;;  %v5742_v41 = vrot.slane %v5720_v13, 4  ;;  %3679 = vrot.lane.b32.xlu0 %v12425_v52, %s14624_s17  ;;  %vm14987_vm6 = vmmov %vm14984_vm9 }
 0x5ee   : > { %3955 = vrot.lane.b32.xlu1 %v12414_v23, %s14632_s20 }
 0x5ef   : > { %v5757_v20 = vsel %vm14981_vm14, %v5741_v46, %v5742_v41  ;;  %v5759_v33 = vsel %vm14982_vm13, %v5720_v13, %v5742_v41  ;;  %v12454_v45 = vpop.permute.xlu0 %6031  ;;  %vm14988_vm14 = vcmask 867328   ;;  %v3487_v41 = vrot.slane %v3482_v17, 4 }
 0x5f0   : > { %v5758_v31 = vsel %vm14983_vm11, %v5718_v62, %v5757_v20  ;;  %5791 = vst.msk [vmem:[#allocation4 + $0x6c8] sm:$0xff] %vm11510_vm1, %v5759_v33  ;;  %v4854_v47 = vpop.permute.xlu1 %4853  ;;  %vm14989_vm13 = vmmov %vm14988_vm14  ;;  %v4128_v20 = vrot.slane %v12360_v19, 4 }
 0x5f1   : > { %5790 = vst [vmem:[#allocation4 + $0x6c0] sm:$0xff] %v5758_v31  ;;  %v4876_v30 = vrot.slane %v4854_v47, 4  ;;  %5725 = vrot.lane.b32.xlu0 %v12414_v23, %s14629_s26  ;;  %vm14990_vm11 = vmmov %vm14987_vm6 }
 0x5f2   : > { %4545 = vrot.lane.b32.xlu1 %v12414_v23, %s14631_s16 }
 0x5f3   : > { %v4891_v3 = vsel %vm14984_vm9, %v4875_v1, %v4876_v30  ;;  %v4893_v26 = vsel %vm14985_vm4, %v4854_v47, %v4876_v30  ;;  %v4264_v62 = vpop.permute.xlu0 %4263  ;;  %vm14991_vm9 = vcmask 719872   ;;  %v5465_v47 = vrot.slane %v12430_v0, 4 }
 0x5f4   : > { %v4892_v59 = vsel %vm14986_vm3, %v4852_v55, %v4891_v3  ;;  %4925 = vst.msk [vmem:[#allocation4 + $0x468] sm:$0xff] %vm11510_vm1, %v4893_v26  ;;  %v4286_v16 = vrot.slane %v4264_v62, 4  ;;  %v4697_v42 = vpop.permute.xlu1 %4696  ;;  %v12481_v55 = vrot.slane %v12372_v43, 6  ;;  %vm14992_vm4 = vmmov %vm14991_vm9  ;;  %v3649_v30 = vrot.slane %v12372_v43, 5 }
 0x5f5   : > { %4924 = vst [vmem:[#allocation4 + $0x460] sm:$0xff] %v4892_v59  ;;  %v4719_v35 = vrot.slane %v4697_v42, 4  ;;  %4859 = vrot.lane.b32.xlu0 %v12425_v52, %s14623_s29  ;;  %vm14993_vm3 = vmmov %vm14987_vm6  ;;  %v3648_v59 = vrot.slane %v3643_v56, 4 }
 0x5f6   : > { %v4301_v53 = vsel %vm14987_vm6, %v4285_v18, %v4286_v16  ;;  %v4303_v6 = vsel %vm14988_vm14, %v4264_v62, %v4286_v16  ;;  %3359 = vrot.lane.b32.xlu1 %v12478_v24, %s14633_s24  ;;  %v12506_v17 = vsel %vm11729_vm0, %v3487_v41, %v12481_v55  ;;  %vm14994_vm6 = vcmask 875520  }
 0x5f7   : > { %v4302_v15 = vsel %vm14989_vm13, %v12354_v28, %v4301_v53  ;;  %4335 = vst.msk [vmem:[#allocation4 + $0x2d8] sm:$0xff] %vm11510_vm1, %v4303_v6  ;;  %v4734_v44 = vsel %vm14990_vm11, %v4718_v27, %v4719_v35  ;;  %v4736_v13 = vsel %vm14991_vm9, %v4697_v42, %v4719_v35  ;;  %v4107_v46 = vpop.permute.xlu0 %4106  ;;  %vm14995_vm14 = vmmov %vm14994_vm6  ;;  %vm14997_vm11 = vcmask 556032  }
 0x5f8   : > { %4334 = vst [vmem:[#allocation4 + $0x2d0] sm:$0xff] %v4302_v15  ;;  %v4735_v33 = vsel %vm14992_vm4, %v12402_v9, %v4734_v44  ;;  %4768 = vst.msk [vmem:[#allocation4 + $0x408] sm:$0xff] %vm11510_vm1, %v4736_v13  ;;  %v4129_v28 = vrot.slane %v4107_v46, 4  ;;  %v5444_v31 = vpop.permute.xlu1 %5443  ;;  %v3971_v16 = vrot.slane %v12365_v38, 4  ;;  %v5308_v35 = vrot.slane %v12443_v60, 4 }
 0x5f9   : > { %4767 = vst [vmem:[#allocation4 + $0x400] sm:$0xff] %v4735_v33  ;;  %v5466_v1 = vrot.slane %v5444_v31, 4  ;;  %4702 = vrot.lane.b32.xlu0 %v12435_v61, %s14828_s12  ;;  %vm14996_vm13 = vmmov %vm14993_vm3  ;;  %v12533_v51 = vsel %vm11714_vm12, %v3648_v59, %v3649_v30  ;;  %v12552_v33 = vld [vmem:[#allocation3 + $0x50] sm:$0xff] }
 0x5fa   : > { %v4144_v9 = vsel %vm14993_vm3, %v4128_v20, %v4129_v28  ;;  %v4146_v3 = vsel %vm14994_vm6, %v4107_v46, %v4129_v28  ;;  %3520 = vrot.lane.b32.xlu1 %v12506_v17, %s14617_s28  ;;  %vm14998_vm9 = vmmov %vm14997_vm11  ;;  %v6055_v20 = vrot.slane %v12454_v45, 4 }
 0x5fb   : > { %v4145_v26 = vsel %vm14995_vm14, %v12360_v19, %v4144_v9  ;;  %4178 = vst.msk [vmem:[#allocation4 + $0x278] sm:$0xff] %vm11510_vm1, %v4146_v3  ;;  %v5481_v62 = vsel %vm14996_vm13, %v5465_v47, %v5466_v1  ;;  %v5483_v32 = vsel %vm14997_vm11, %v5444_v31, %v5466_v1  ;;  %v3950_v18 = vpop.permute.xlu0 %3949  ;;  %vm14999_vm4 = vmmov %vm14993_vm3  ;;  %vm15000_vm3 = vcmask 883712   ;;  %v12558_v47 = vld [vmem:[#allocation3 + $0x30] sm:$0xff] }
 0x5fc   : > { %4177 = vst [vmem:[#allocation4 + $0x270] sm:$0xff] %v4145_v26  ;;  %v5482_v42 = vsel %vm14998_vm9, %v12430_v0, %v5481_v62  ;;  %5515 = vst.msk [vmem:[#allocation4 + $0x5f8] sm:$0xff] %vm11510_vm1, %v5483_v32  ;;  %v3972_v19 = vrot.slane %v3950_v18, 4  ;;  %v5287_v27 = vpop.permute.xlu1 %5286  ;;  %vm15003_vm13 = vcmask 687104   ;;  %v5843_v26 = vrot.slane %v12558_v47, 6 }
 0x5fd   : > { %5514 = vst [vmem:[#allocation4 + $0x5f0] sm:$0xff] %v5482_v42  ;;  %v5309_v53 = vrot.slane %v5287_v27, 4  ;;  %5449 = vrot.lane.b32.xlu0 %v12425_v52, %s14627_s19  ;;  %vm15001_vm6 = vmmov %vm15000_vm3 }
 0x5fe   : > { %v3987_v56 = vsel %vm14999_vm4, %v3971_v16, %v3972_v19  ;;  %v3989_v0 = vsel %vm15000_vm3, %v3950_v18, %v3972_v19  ;;  %3681 = vrot.lane.b32.xlu1 %v12533_v51, %s14624_s17  ;;  %vm15002_vm14 = vmmov %vm14999_vm4 }
 0x5ff   : > { %v3988_v6 = vsel %vm15001_vm6, %v12365_v38, %v3987_v56  ;;  %4021 = vst.msk [vmem:[#allocation4 + $0x218] sm:$0xff] %vm11510_vm1, %v3989_v0  ;;  %v5324_v15 = vsel %vm15002_vm14, %v5308_v35, %v5309_v53  ;;  %v5326_v44 = vsel %vm15003_vm13, %v5287_v27, %v5309_v53  ;;  %v4385_v13 = vpop.permute.xlu0 %4384  ;;  %vm15004_vm11 = vmmov %vm15003_vm13  ;;  %vm15009_vm14 = vcmask 859136  }
 0x600   : > { %4020 = vst [vmem:[#allocation4 + $0x210] sm:$0xff] %v3988_v6  ;;  %v5325_v46 = vsel %vm15004_vm11, %v12443_v60, %v5324_v15  ;;  %5358 = vst.msk [vmem:[#allocation4 + $0x598] sm:$0xff] %vm11510_vm1, %v5326_v44  ;;  %v6034_v41 = vpop.permute.xlu1 %6033  ;;  %v3816_v53 = vrot.slane %v12408_v4, 4 }
 0x601   : > { %5357 = vst [vmem:[#allocation4 + $0x590] sm:$0xff] %v5325_v46  ;;  %v6056_v38 = vrot.slane %v6034_v41, 4  ;;  %5292 = vrot.lane.b32.xlu0 %v12435_v61, %s14829_s2  ;;  %vm15005_vm9 = vmmov %vm14999_vm4  ;;  %vm15006_vm4 = vcmask 523264   ;;  %v4406_v61 = vrot.slane %v4385_v13, 4 }
 0x602   : > { %3802 = vrot.lane.b32.xlu1 %v12552_v33, %s14618_s15  ;;  %vm15007_vm3 = vmmov %vm15006_vm4 }
 0x603   : > { %v6071_v28 = vsel %vm15005_vm9, %v6055_v20, %v6056_v38  ;;  %v6073_v60 = vsel %vm15006_vm4, %v6034_v41, %v6056_v38  ;;  %v4975_v31 = vpop.permute.xlu0 %4974  ;;  %vm15008_vm6 = vmmov %vm15005_vm9  ;;  %vm15012_vm9 = vcmask 703488  }
 0x604   : > { %v6072_v1 = vsel %vm15007_vm3, %v12454_v45, %v6071_v28  ;;  %6105 = vst.msk [vmem:[#allocation4 + $0x788] sm:$0xff] %vm11510_vm1, %v6073_v60  ;;  %v4387_v9 = vpop.permute.xlu1 %4386  ;;  %vm15010_vm13 = vmmov %vm15009_vm14  ;;  %v4996_v16 = vrot.slane %v4975_v31, 4 }
 0x605   : > { %6104 = vst [vmem:[#allocation4 + $0x780] sm:$0xff] %v6072_v1  ;;  %v4407_v3 = vrot.slane %v4387_v9, 4  ;;  %6039 = vrot.lane.b32.xlu0 %v12425_v52, %s14622_s11  ;;  %v5848_v52 = vrot.slane %v5843_v26, 4  ;;  %vm15011_vm11 = vmmov %vm15008_vm6 }
 0x606   : > { %5727 = vrot.lane.b32.xlu1 %v12478_v24, %s14629_s26  ;;  %vm15013_vm4 = vmmov %vm15012_vm9 }
 0x607   : > { %v4423_v62 = vsel %vm15008_vm6, %v4406_v61, %v4407_v3  ;;  %v4425_v32 = vsel %vm15009_vm14, %v4387_v9, %v4407_v3  ;;  %v5565_v45 = vpop.permute.xlu0 %5564  ;;  %v5850_v6 = vsel %vm11729_vm0, %v5848_v52, %v12417_v25  ;;  %vm15015_vm3 = vmmov %vm15008_vm6  ;;  %vm15016_vm6 = vcmask 1014784   ;;  %v12617_v3 = vld [vmem:[#allocation3 + $0x38] sm:$0xff] }
 0x608   : > { %v4424_v18 = vsel %vm15010_vm13, %v4385_v13, %v4423_v62  ;;  %4456 = vst.msk [vmem:[#allocation4 + $0x358] sm:$0xff] %vm11510_vm1, %v4425_v32  ;;  %v4977_v59 = vpop.permute.xlu1 %4976  ;;  %v5586_v15 = vrot.slane %v5565_v45, 4  ;;  %vm15017_vm14 = vmmov %vm15016_vm6  ;;  %v5846_v32 = vrot.slane %v12617_v3, 6 }
 0x609   : > { %4455 = vst [vmem:[#allocation4 + $0x350] sm:$0xff] %v4424_v18  ;;  %v4997_v42 = vrot.slane %v4977_v59, 4  ;;  %5135 = vrot.lane.b32.xlu0 %v12414_v23, %s14625_s23  ;;  %vm15018_vm13 = vmmov %vm15015_vm3 }
 0x60a   : > { %4861 = vrot.lane.b32.xlu1 %v12533_v51, %s14623_s29 }
 0x60b   : > { %v5013_v19 = vsel %vm15011_vm11, %v4996_v16, %v4997_v42  ;;  %v5015_v27 = vsel %vm15012_vm9, %v4977_v59, %v4997_v42  ;;  %v3797_v35 = vpop.permute.xlu0 %3796  ;;  %vm15019_vm11 = vcmask 547840  }
 0x60c   : > { %v5014_v56 = vsel %vm15013_vm4, %v4975_v31, %v5013_v19  ;;  %5046 = vst.msk [vmem:[#allocation4 + $0x4e8] sm:$0xff] %vm11510_vm1, %v5015_v27  ;;  %v3817_v0 = vrot.slane %v3797_v35, 4  ;;  %v5567_v23 = vpop.permute.xlu1 %5566  ;;  %vm15020_vm9 = vmmov %vm15019_vm11 }
 0x60d   : > { %5045 = vst [vmem:[#allocation4 + $0x4e0] sm:$0xff] %v5014_v56  ;;  %v5587_v44 = vrot.slane %v5567_v23, 4  ;;  %5882 = vrot.lane.b32.xlu0 %v5850_v6, %s15014_s3  ;;  %vm15021_vm4 = vmmov %vm15015_vm3 }
 0x60e   : > { %v3833_v13 = vsel %vm15015_vm3, %v3816_v53, %v3817_v0  ;;  %v3835_v46 = vsel %vm15016_vm6, %v3797_v35, %v3817_v0  ;;  %4704 = vrot.lane.b32.xlu1 %v12506_v17, %s14828_s12  ;;  %vm15022_vm3 = vcmask 1039360  }
 0x60f   : > { %v3834_v41 = vsel %vm15017_vm14, %v12408_v4, %v3833_v13  ;;  %3866 = vst.msk [vmem:[#allocation4 + $0x1c8] sm:$0xff] %vm11510_vm1, %v3835_v46  ;;  %v5603_v20 = vsel %vm15018_vm13, %v5586_v15, %v5587_v44  ;;  %v5605_v38 = vsel %vm15019_vm11, %v5567_v23, %v5587_v44  ;;  %v3354_v28 = vpop.permute.xlu0 %3353  ;;  %vm15023_vm6 = vmmov %vm15022_vm3  ;;  %vm15025_vm13 = vcmask 1031168   ;;  %v12652_v13 = vld [vmem:[#allocation3 + $0x58] sm:$0xff] }
 0x610   : > { %3865 = vst [vmem:[#allocation4 + $0x1c0] sm:$0xff] %v3834_v41  ;;  %v5604_v60 = vsel %vm15020_vm9, %v5565_v45, %v5603_v20  ;;  %5636 = vst.msk [vmem:[#allocation4 + $0x678] sm:$0xff] %vm11510_vm1, %v5605_v38  ;;  %v12603_v31 = vpop.permute.xlu1 %4265  ;;  %v3375_v18 = vrot.slane %v3354_v28, 4 }
 0x611   : > { %5635 = vst [vmem:[#allocation4 + $0x670] sm:$0xff] %v5604_v60  ;;  %4271 = vrot.lane.b32.xlu0 %v12533_v51, %s14630_s30  ;;  %vm15024_vm14 = vmmov %vm15021_vm4 }
 0x612   : > { %5451 = vrot.lane.b32.xlu1 %v12533_v51, %s14627_s19  ;;  %vm15026_vm11 = vmmov %vm15025_vm13 }
 0x613   : > { %v3515_v4 = vpop.permute.xlu0 %3514  ;;  %vm15027_vm9 = vmmov %vm15021_vm4 }
 0x614   : > { %v12609_v1 = vpop.permute.xlu1 %4108  ;;  %v3536_v27 = vrot.slane %v3515_v4, 4 }
 0x615   : > { %4114 = vrot.lane.b32.xlu0 %v12506_v17, %s14621_s21 }
 0x616   : > { %5294 = vrot.lane.b32.xlu1 %v12506_v17, %s14829_s2 }
 0x617   : > { %v3676_v9 = vpop.permute.xlu0 %3675 }
 0x618   : > { %v12615_v61 = vpop.permute.xlu1 %3951  ;;  %v3697_v15 = vrot.slane %v3676_v9, 4 }
 0x619   : > { %3957 = vrot.lane.b32.xlu0 %v12478_v24, %s14632_s20 }
 0x61a   : > { %6041 = vrot.lane.b32.xlu1 %v12533_v51, %s14622_s11  ;;  %v5851_v51 = vrot.slane %v5846_v32, 4 }
 0x61b   : > { %v4542_v62 = vpop.permute.xlu0 %4541 }
 0x61c   : > { %v3356_v45 = vpop.permute.xlu1 %3355 }
 0x61d   : > { %v3376_v59 = vrot.slane %v3356_v45, 4  ;;  %4547 = vrot.lane.b32.xlu0 %v12478_v24, %s14631_s16 }
 0x61e   : > { %5137 = vrot.lane.b32.xlu1 %v12478_v24, %s14625_s23  ;;  %v5853_v24 = vsel %vm11729_vm0, %v5851_v51, %v12481_v55  ;;  %v4563_v51 = vrot.slane %v4542_v62, 4 }
 0x61f   : > { %v3392_v17 = vsel %vm15021_vm4, %v3375_v18, %v3376_v59  ;;  %v3394_v16 = vsel %vm15022_vm3, %v3356_v45, %v3376_v59  ;;  %v12630_v42 = vpop.permute.xlu0 %5721  ;;  %vm15028_vm4 = vcmask 1022976   ;;  %v3330_v45 = vrot.slane %v12552_v33, 7 }
 0x620   : > { %v3393_v52 = vsel %vm15023_vm6, %v3354_v28, %v3392_v17  ;;  %3428 = vst.msk [vmem:[#allocation4 + $0x98] sm:$0xff] %vm11510_vm1, %v3394_v16  ;;  %v3517_v19 = vpop.permute.xlu1 %3516  ;;  %vm15029_vm3 = vmmov %vm15028_vm4  ;;  %v4084_v59 = vrot.slane %v12417_v25, 4 }
 0x621   : > { %3427 = vst [vmem:[#allocation4 + $0x90] sm:$0xff] %v3393_v52  ;;  %v3537_v35 = vrot.slane %v3517_v19, 4  ;;  %4392 = vrot.lane.b32.xlu0 %v12552_v33, %s14812_s25  ;;  %vm15030_vm6 = vmmov %vm15027_vm9 }
 0x622   : > { %5884 = vrot.lane.b32.xlu1 %v5853_v24, %s15014_s3 }
 0x623   : > { %v3553_v53 = vsel %vm15024_vm14, %v3536_v27, %v3537_v35  ;;  %v3555_v56 = vsel %vm15025_vm13, %v3517_v19, %v3537_v35  ;;  %v12645_v0 = vpop.permute.xlu0 %4855  ;;  %vm15031_vm14 = vcmask 850944  }
 0x624   : > { %v3554_v23 = vsel %vm15026_vm11, %v3515_v4, %v3553_v53  ;;  %3586 = vst.msk [vmem:[#allocation4 + $0xf8] sm:$0xff] %vm11510_vm1, %v3555_v56  ;;  %v3678_v6 = vpop.permute.xlu1 %3677  ;;  %vm15032_vm13 = vmmov %vm15031_vm14  ;;  %v3652_v53 = vrot.slane %v12552_v33, 5  ;;  %v5743_v56 = vrot.slane %v12630_v42, 4  ;;  %v4877_v7 = vrot.slane %v12645_v0, 4 }
 0x625   : > { %3585 = vst [vmem:[#allocation4 + $0xf0] sm:$0xff] %v3554_v23  ;;  %v3698_v44 = vrot.slane %v3678_v6, 4  ;;  %5572 = vrot.lane.b32.xlu0 %v12552_v33, %s14819_s0  ;;  %v9392_v46 = vcombine.low %v12388_v58, %v3554_v23  ;;  %v9393_v41 = vcombine.high %v12388_v58, %v3554_v23  ;;  %v4085_v58 = vrot.slane %v12552_v33, 6  ;;  %vm15033_vm11 = vmmov %vm15030_vm6 }
 0x626   : > { %4394 = vrot.lane.b32.xlu1 %v12652_v13, %s14812_s25 }
 0x627   : > { %v3714_v20 = vsel %vm15027_vm9, %v3697_v15, %v3698_v44  ;;  %v3716_v38 = vsel %vm15028_vm4, %v3678_v6, %v3698_v44  ;;  %v12660_v28 = vpop.permute.xlu0 %4698  ;;  %8786 = vmatprep.subr.bf16.mxu0 %v9393_v41  ;;  %v3651_v6 = vrot.slane %v4236_v57, 4  ;;  %vm15034_vm9 = vcmask 539648  }
 0x628   : > { %v3715_v60 = vsel %vm15029_vm3, %v3676_v9, %v3714_v20  ;;  %3747 = vst.msk [vmem:[#allocation4 + $0x158] sm:$0xff] %vm11510_vm1, %v3716_v38  ;;  %v12665_v4 = vpop.permute.xlu1 %3798  ;;  %8787 = vmatpush1.bf16.msra.mxu0 %v9392_v46  ;;  %v3329_v9 = vrot.slane %v3324_v14, 4  ;;  %v12690_v14 = vsel %vm11729_vm0, %v4084_v59, %v4085_v58  ;;  %vm15035_vm4 = vmmov %vm15034_vm9  ;;  %v3333_v38 = vrot.slane %v12652_v13, 7 }
 0x629   : > { %3746 = vst [vmem:[#allocation4 + $0x150] sm:$0xff] %v3715_v60  ;;  %3804 = vrot.lane.b32.xlu0 %v12652_v13, %s14618_s15  ;;  %v12721_v20 = vsel %vm11714_vm12, %v3651_v6, %v3652_v53  ;;  %vm15036_vm3 = vmmov %vm15030_vm6  ;;  %v3332_v59 = vrot.slane %v3327_v22, 4  ;;  %v3494_v22 = vrot.slane %v12652_v13, 6 }
 0x62a   : > { %5574 = vrot.lane.b32.xlu1 %v12652_v13, %s14819_s0  ;;  %v12682_v16 = vsel %vm11681_vm7, %v3329_v9, %v3330_v45 }
 0x62b   : > { %v12675_v18 = vpop.permute.xlu0 %5445 }
 0x62c   : > { %v4544_v17 = vpop.permute.xlu1 %4543 }
 0x62d   : > { %v4564_v52 = vrot.slane %v4544_v17, 4  ;;  %3361 = vrot.lane.b32.xlu0 %v12682_v16, %s14633_s24 }
 0x62e   : > { %4116 = vrot.lane.b32.xlu1 %v12690_v14, %s14621_s21 }
 0x62f   : > { %v4580_v25 = vsel %vm15030_vm6, %v4563_v51, %v4564_v52  ;;  %v4582_v19 = vsel %vm15031_vm14, %v4544_v17, %v4564_v52  ;;  %v12696_v27 = vpop.permute.xlu0 %5288  ;;  %vm15037_vm6 = vcmask 711680   ;;  %v4720_v52 = vrot.slane %v12660_v28, 4 }
 0x630   : > { %v4581_v35 = vsel %vm15032_vm13, %v4542_v62, %v4580_v25  ;;  %4613 = vst.msk [vmem:[#allocation4 + $0x3b8] sm:$0xff] %vm11510_vm1, %v4582_v19  ;;  %v5724_v24 = vpop.permute.xlu1 %5723  ;;  %vm15038_vm14 = vmmov %vm15037_vm6  ;;  %v12746_v19 = vsel %vm11681_vm7, %v3332_v59, %v3333_v38 }
 0x631   : > { %4612 = vst [vmem:[#allocation4 + $0x3b0] sm:$0xff] %v4581_v35  ;;  %v5744_v23 = vrot.slane %v5724_v24, 4  ;;  %3522 = vrot.lane.b32.xlu0 %v12690_v14, %s14617_s28  ;;  %vm15039_vm13 = vmmov %vm15036_vm3 }
 0x632   : > { %3959 = vrot.lane.b32.xlu1 %v12682_v16, %s14632_s20 }
 0x633   : > { %v5760_v62 = vsel %vm15033_vm11, %v5743_v56, %v5744_v23  ;;  %v5762_v15 = vsel %vm15034_vm9, %v5724_v24, %v5744_v23  ;;  %v12711_v44 = vpop.permute.xlu0 %6035  ;;  %vm15040_vm11 = vcmask 719872   ;;  %v3493_v56 = vrot.slane %v12481_v55, 4 }
 0x634   : > { %v5761_v46 = vsel %vm15035_vm4, %v12630_v42, %v5760_v62  ;;  %5793 = vst.msk [vmem:[#allocation4 + $0x6d8] sm:$0xff] %vm11510_vm1, %v5762_v15  ;;  %v4858_v41 = vpop.permute.xlu1 %4857  ;;  %v4287_v23 = vrot.slane %v12603_v31, 4  ;;  %vm15041_vm9 = vmmov %vm15040_vm11 }
 0x635   : > { %5792 = vst [vmem:[#allocation4 + $0x6d0] sm:$0xff] %v5761_v46  ;;  %v4878_v57 = vrot.slane %v4858_v41, 4  ;;  %3683 = vrot.lane.b32.xlu0 %v12721_v20, %s14624_s17  ;;  %v5467_v46 = vrot.slane %v12675_v18, 4  ;;  %v12766_v55 = vsel %vm11729_vm0, %v3493_v56, %v3494_v22  ;;  %vm15042_vm4 = vmmov %vm15036_vm3 }
 0x636   : > { %4549 = vrot.lane.b32.xlu1 %v12682_v16, %s14631_s16 }
 0x637   : > { %v4894_v42 = vsel %vm15036_vm3, %v4877_v7, %v4878_v57  ;;  %v4896_v60 = vsel %vm15037_vm6, %v4858_v41, %v4878_v57  ;;  %v12731_v9 = vpop.permute.xlu0 %5131  ;;  %vm15043_vm3 = vcmask 867328  }
 0x638   : > { %v4895_v17 = vsel %vm15038_vm14, %v12645_v0, %v4894_v42  ;;  %4927 = vst.msk [vmem:[#allocation4 + $0x478] sm:$0xff] %vm11510_vm1, %v4896_v60  ;;  %v4701_v51 = vpop.permute.xlu1 %4700  ;;  %vm15044_vm6 = vmmov %vm15043_vm3 }
 0x639   : > { %4926 = vst [vmem:[#allocation4 + $0x470] sm:$0xff] %v4895_v17  ;;  %v4721_v25 = vrot.slane %v4701_v51, 4  ;;  %4273 = vrot.lane.b32.xlu0 %v12721_v20, %s14630_s30  ;;  %vm15045_vm14 = vmmov %vm15042_vm4 }
 0x63a   : > { %3363 = vrot.lane.b32.xlu1 %v12746_v19, %s14633_s24 }
 0x63b   : > { %v4737_v0 = vsel %vm15039_vm13, %v4720_v52, %v4721_v25  ;;  %v4739_v35 = vsel %vm15040_vm11, %v4701_v51, %v4721_v25  ;;  %v4268_v24 = vpop.permute.xlu0 %4267  ;;  %vm15046_vm13 = vcmask 556032   ;;  %v3654_v51 = vrot.slane %v3649_v30, 4 }
 0x63c   : > { %v4738_v6 = vsel %vm15041_vm9, %v12660_v28, %v4737_v0  ;;  %4770 = vst.msk [vmem:[#allocation4 + $0x418] sm:$0xff] %vm11510_vm1, %v4739_v35  ;;  %v4288_v62 = vrot.slane %v4268_v24, 4  ;;  %v5448_v15 = vpop.permute.xlu1 %5447  ;;  %v3655_v28 = vrot.slane %v12652_v13, 5  ;;  %v4130_v52 = vrot.slane %v12609_v1, 4  ;;  %vm15047_vm11 = vmmov %vm15046_vm13 }
 0x63d   : > { %4769 = vst [vmem:[#allocation4 + $0x410] sm:$0xff] %v4738_v6  ;;  %v5468_v41 = vrot.slane %v5448_v15, 4  ;;  %5729 = vrot.lane.b32.xlu0 %v12682_v16, %s14629_s26  ;;  %v5310_v35 = vrot.slane %v12696_v27, 4  ;;  %vm15048_vm9 = vmmov %vm15042_vm4 }
 0x63e   : > { %v4304_v7 = vsel %vm15042_vm4, %v4287_v23, %v4288_v62  ;;  %v4306_v57 = vsel %vm15043_vm3, %v4268_v24, %v4288_v62  ;;  %3524 = vrot.lane.b32.xlu1 %v12766_v55, %s14617_s28  ;;  %v12795_v43 = vsel %vm11714_vm12, %v3654_v51, %v3655_v28  ;;  %vm15049_vm4 = vcmask 875520  }
 0x63f   : > { %v12775_v42 = vsel %vm15044_vm6, %v12603_v31, %v4304_v7  ;;  %4337 = vst.msk [vmem:[#allocation4 + $0x2e8] sm:$0xff] %vm11510_vm1, %v4306_v57  ;;  %v5484_v60 = vsel %vm15045_vm14, %v5467_v46, %v5468_v41  ;;  %v5486_v59 = vsel %vm15046_vm13, %v5448_v15, %v5468_v41  ;;  %v4111_v17 = vpop.permute.xlu0 %4110  ;;  %vm15050_vm3 = vmmov %vm15049_vm4  ;;  %vm15052_vm14 = vcmask 687104  }
 0x640   : > { %v5485_v25 = vsel %vm15047_vm11, %v12675_v18, %v5484_v60  ;;  %5517 = vst.msk [vmem:[#allocation4 + $0x608] sm:$0xff] %vm11510_vm1, %v5486_v59  ;;  %v4131_v31 = vrot.slane %v4111_v17, 4  ;;  %v5291_v0 = vpop.permute.xlu1 %5290  ;;  %vm15051_vm6 = vmmov %vm15048_vm9  ;;  %v3973_v15 = vrot.slane %v12615_v61, 4  ;;  %v3766_v60 = vld [vmem:[#allocation3 + $0x60] sm:$0x11] }
 0x641   : > { %5516 = vst [vmem:[#allocation4 + $0x600] sm:$0xff] %v5485_v25  ;;  %v5311_v24 = vrot.slane %v5291_v0, 4  ;;  %4863 = vrot.lane.b32.xlu0 %v12721_v20, %s14623_s29  ;;  %vm15053_vm13 = vmmov %vm15052_vm14 }
 0x642   : > { %v4147_v30 = vsel %vm15048_vm9, %v4130_v52, %v4131_v31  ;;  %v4149_v18 = vsel %vm15049_vm4, %v4111_v17, %v4131_v31  ;;  %3685 = vrot.lane.b32.xlu1 %v12795_v43, %s14624_s17  ;;  %vm15054_vm11 = vmmov %vm15051_vm6  ;;  %vm15055_vm9 = vcmask 883712  }
 0x643   : > { %v4148_v56 = vsel %vm15050_vm3, %v12609_v1, %v4147_v30  ;;  %4180 = vst.msk [vmem:[#allocation4 + $0x288] sm:$0xff] %vm11510_vm1, %v4149_v18  ;;  %v5327_v23 = vsel %vm15051_vm6, %v5310_v35, %v5311_v24  ;;  %v5329_v6 = vsel %vm15052_vm14, %v5291_v0, %v5311_v24  ;;  %v3954_v62 = vpop.permute.xlu0 %3953  ;;  %v6057_v1 = vrot.slane %v12711_v44, 4  ;;  %vm15056_vm4 = vmmov %vm15055_vm9 }
 0x644   : > { %4179 = vst [vmem:[#allocation4 + $0x280] sm:$0xff] %v4148_v56  ;;  %v5328_v46 = vsel %vm15053_vm13, %v12696_v27, %v5327_v23  ;;  %5360 = vst.msk [vmem:[#allocation4 + $0x5a8] sm:$0xff] %vm11510_vm1, %v5329_v6  ;;  %v3974_v41 = vrot.slane %v3954_v62, 4  ;;  %v6038_v7 = vpop.permute.xlu1 %6037  ;;  %v5153_v35 = vrot.slane %v12731_v9, 4 }
 0x645   : > { %5359 = vst [vmem:[#allocation4 + $0x5a0] sm:$0xff] %v5328_v46  ;;  %v6058_v57 = vrot.slane %v6038_v7, 4  ;;  %4706 = vrot.lane.b32.xlu0 %v12690_v14, %s14828_s12  ;;  %vm15057_vm3 = vmmov %vm15051_vm6  ;;  %vm15058_vm6 = vcmask 523264  }
 0x646   : > { %v3990_v59 = vsel %vm15054_vm11, %v3973_v15, %v3974_v41  ;;  %v3992_v17 = vsel %vm15055_vm9, %v3954_v62, %v3974_v41  ;;  %3806 = vrot.lane.b32.xlu1 %v3766_v60, %s14618_s15  ;;  %vm15059_vm14 = vmmov %vm15058_vm6  ;;  %vm15061_vm11 = vcmask 695296  }
 0x647   : > { %v3991_v27 = vsel %vm15056_vm4, %v12615_v61, %v3990_v59  ;;  %4023 = vst.msk [vmem:[#allocation4 + $0x228] sm:$0xff] %vm11510_vm1, %v3992_v17  ;;  %v6074_v51 = vsel %vm15057_vm3, %v6057_v1, %v6058_v57  ;;  %v6076_v52 = vsel %vm15058_vm6, %v6038_v7, %v6058_v57  ;;  %v4389_v25 = vpop.permute.xlu0 %4388  ;;  %vm15060_vm13 = vmmov %vm15057_vm3  ;;  %v3818_v17 = vrot.slane %v12665_v4, 4 }
 0x648   : > { %4022 = vst [vmem:[#allocation4 + $0x220] sm:$0xff] %v3991_v27  ;;  %v6075_v31 = vsel %vm15059_vm14, %v12711_v44, %v6074_v51  ;;  %6107 = vst.msk [vmem:[#allocation4 + $0x798] sm:$0xff] %vm11510_vm1, %v6076_v52  ;;  %v5134_v0 = vpop.permute.xlu1 %5133  ;;  %v4408_v23 = vrot.slane %v4389_v25, 4 }
 0x649   : > { %6106 = vst [vmem:[#allocation4 + $0x790] sm:$0xff] %v6075_v31  ;;  %v5154_v61 = vrot.slane %v5134_v0, 4  ;;  %5453 = vrot.lane.b32.xlu0 %v12721_v20, %s14627_s19  ;;  %vm15062_vm9 = vmmov %vm15061_vm11 }
 0x64a   : > { %4275 = vrot.lane.b32.xlu1 %v12795_v43, %s14630_s30  ;;  %vm15063_vm4 = vmmov %vm15057_vm3  ;;  %vm15064_vm3 = vcmask 859136  }
 0x64b   : > { %v5170_v24 = vsel %vm15060_vm13, %v5153_v35, %v5154_v61  ;;  %v5172_v30 = vsel %vm15061_vm11, %v5134_v0, %v5154_v61  ;;  %v4979_v18 = vpop.permute.xlu0 %4978  ;;  %vm15065_vm6 = vmmov %vm15064_vm3  ;;  %vm15067_vm13 = vcmask 703488  }
 0x64c   : > { %v5171_v44 = vsel %vm15062_vm9, %v12731_v9, %v5170_v24  ;;  %5203 = vst.msk [vmem:[#allocation4 + $0x548] sm:$0xff] %vm11510_vm1, %v5172_v30  ;;  %v4391_v56 = vpop.permute.xlu1 %4390  ;;  %v4998_v7 = vrot.slane %v4979_v18, 4  ;;  %vm15066_vm14 = vmmov %vm15063_vm4 }
 0x64d   : > { %5202 = vst [vmem:[#allocation4 + $0x540] sm:$0xff] %v5171_v44  ;;  %v4409_v6 = vrot.slane %v4391_v56, 4  ;;  %5296 = vrot.lane.b32.xlu0 %v12690_v14, %s14829_s2  ;;  %vm15068_vm11 = vmmov %vm15067_vm13 }
 0x64e   : > { %5731 = vrot.lane.b32.xlu1 %v12746_v19, %s14629_s26  ;;  %vm15069_vm9 = vmmov %vm15063_vm4 }
 0x64f   : > { %v4426_v62 = vsel %vm15063_vm4, %v4408_v23, %v4409_v6  ;;  %v4428_v15 = vsel %vm15064_vm3, %v4391_v56, %v4409_v6  ;;  %v5569_v46 = vpop.permute.xlu0 %5568  ;;  %vm15070_vm4 = vcmask 1014784  }
 0x650   : > { %v4427_v9 = vsel %vm15065_vm6, %v4389_v25, %v4426_v62  ;;  %4458 = vst.msk [vmem:[#allocation4 + $0x368] sm:$0xff] %vm11510_vm1, %v4428_v15  ;;  %v4981_v41 = vpop.permute.xlu1 %4980  ;;  %v5588_v25 = vrot.slane %v5569_v46, 4  ;;  %vm15071_vm3 = vmmov %vm15070_vm4 }
 0x651   : > { %4457 = vst [vmem:[#allocation4 + $0x360] sm:$0xff] %v4427_v9  ;;  %v4999_v1 = vrot.slane %v4981_v41, 4  ;;  %6043 = vrot.lane.b32.xlu0 %v12721_v20, %s14622_s11  ;;  %vm15072_vm6 = vmmov %vm15069_vm9 }
 0x652   : > { %4865 = vrot.lane.b32.xlu1 %v12795_v43, %s14623_s29 }
 0x653   : > { %v5016_v57 = vsel %vm15066_vm14, %v4998_v7, %v4999_v1  ;;  %v5018_v60 = vsel %vm15067_vm13, %v4981_v41, %v4999_v1  ;;  %v3801_v59 = vpop.permute.xlu0 %3800  ;;  %vm15073_vm14 = vcmask 547840  }
 0x654   : > { %v5017_v27 = vsel %vm15068_vm11, %v4979_v18, %v5016_v57  ;;  %5048 = vst.msk [vmem:[#allocation4 + $0x4f8] sm:$0xff] %vm11510_vm1, %v5018_v60  ;;  %v3819_v51 = vrot.slane %v3801_v59, 4  ;;  %v5571_v52 = vpop.permute.xlu1 %5570  ;;  %vm15074_vm13 = vmmov %vm15073_vm14  ;;  %v5536_v60 = vld [vmem:[#allocation3 + $0x60] sm:$0x11] }
 0x655   : > { %5047 = vst [vmem:[#allocation4 + $0x4f0] sm:$0xff] %v5017_v27  ;;  %v5589_v20 = vrot.slane %v5571_v52, 4  ;;  %5139 = vrot.lane.b32.xlu0 %v12682_v16, %s14625_s23  ;;  %vm15075_vm11 = vmmov %vm15072_vm6  ;;  %v4357_v27 = vld [vmem:[#allocation3 + $0x68] sm:$0x11] }
 0x656   : > { %v3836_v31 = vsel %vm15069_vm9, %v3818_v17, %v3819_v51  ;;  %v3838_v0 = vsel %vm15070_vm4, %v3801_v59, %v3819_v51  ;;  %4708 = vrot.lane.b32.xlu1 %v12766_v55, %s14828_s12  ;;  %vm15076_vm9 = vcmask 1039360   ;;  %v4042_v51 = vld [vmem:[#allocation3 + $0x60] sm:$0x11] }
 0x657   : > { %v3837_v35 = vsel %vm15071_vm3, %v12665_v4, %v3836_v31  ;;  %3868 = vst.msk [vmem:[#allocation4 + $0x1d8] sm:$0xff] %vm11510_vm1, %v3838_v0  ;;  %v5606_v61 = vsel %vm15072_vm6, %v5588_v25, %v5589_v20  ;;  %v5608_v24 = vsel %vm15073_vm14, %v5571_v52, %v5589_v20  ;;  %v3358_v30 = vpop.permute.xlu0 %3357  ;;  %vm15077_vm4 = vmmov %vm15076_vm9 }
 0x658   : > { %3867 = vst [vmem:[#allocation4 + $0x1d0] sm:$0xff] %v3837_v35  ;;  %v5607_v16 = vsel %vm15074_vm13, %v5569_v46, %v5606_v61  ;;  %5638 = vst.msk [vmem:[#allocation4 + $0x688] sm:$0xff] %vm11510_vm1, %v5608_v24  ;;  %v12873_v18 = vpop.permute.xlu1 %4269  ;;  %v4356_v46 = vld [vmem:[#allocation3 + $0x60] sm:$0x11]  ;;  %v3377_v9 = vrot.slane %v3358_v30, 4 }
 0x659   : > { %5637 = vst [vmem:[#allocation4 + $0x680] sm:$0xff] %v5607_v16  ;;  %5886 = vrot.lane.b32.xlu0 %v12690_v14, %s15014_s3  ;;  %vm15078_vm3 = vmmov %vm15072_vm6  ;;  %vm15079_vm6 = vcmask 1031168   ;;  %v3767_v35 = vld [vmem:[#allocation3 + $0x68] sm:$0x11] }
 0x65a   : > { %5455 = vrot.lane.b32.xlu1 %v12795_v43, %s14627_s19  ;;  %vm15080_vm14 = vmmov %vm15079_vm6  ;;  %v5537_v61 = vld [vmem:[#allocation3 + $0x68] sm:$0x11] }
 0x65b   : > { %v3519_v4 = vpop.permute.xlu0 %3518  ;;  %vm15081_vm13 = vmmov %vm15078_vm3 }
 0x65c   : > { %v12879_v44 = vpop.permute.xlu1 %4112  ;;  %v3538_v59 = vrot.slane %v3519_v4, 4 }
 0x65d   : > { %4118 = vrot.lane.b32.xlu0 %v12766_v55, %s14621_s21 }
 0x65e   : > { %5298 = vrot.lane.b32.xlu1 %v12766_v55, %s14829_s2 }
 0x65f   : > { %v3680_v56 = vpop.permute.xlu0 %3679 }
 0x660   : > { %v12885_v23 = vpop.permute.xlu1 %3955 }
 0x661   : > { %3961 = vrot.lane.b32.xlu0 %v12746_v19, %s14632_s20 }
 0x662   : > { %6045 = vrot.lane.b32.xlu1 %v12795_v43, %s14622_s11 }
 0x663   : > { %v12891_v14 = vpop.permute.xlu0 %5725 }
 0x664   : > { %v12893_v6 = vpop.permute.xlu1 %4545 }
 0x665   : > { %4551 = vrot.lane.b32.xlu0 %v12746_v19, %s14631_s16 }
 0x666   : > { %5141 = vrot.lane.b32.xlu1 %v12746_v19, %s14625_s23 }
 0x667   : > { %v12899_v62 = vpop.permute.xlu0 %4859 }
 0x668   : > { %v3360_v15 = vpop.permute.xlu1 %3359 }
 0x669   : > { %v3378_v41 = vrot.slane %v3360_v15, 4  ;;  %4396 = vrot.lane.b32.xlu0 %v4356_v46, %s14812_s25  ;;  %v3447_v46 = vld [vmem:[#allocation3 + $0x60] sm:$0x11] }
 0x66a   : > { %5888 = vrot.lane.b32.xlu1 %v12766_v55, %s15014_s3  ;;  %v3286_v55 = vld [vmem:[#allocation3 + $0x60] sm:$0x11] }
 0x66b   : > { %v3395_v43 = vsel %vm15075_vm11, %v3377_v9, %v3378_v41  ;;  %v3397_v7 = vsel %vm15076_vm9, %v3360_v15, %v3378_v41  ;;  %v12906_v1 = vpop.permute.xlu0 %4702  ;;  %v3336_v24 = vrot.slane %v3286_v55, 7  ;;  %v4091_v15 = vrot.slane %v4042_v51, 6 }
 0x66c   : > { %v3396_v57 = vsel %vm15077_vm4, %v3358_v30, %v3395_v43  ;;  %3430 = vst.msk [vmem:[#allocation4 + $0xa8] sm:$0xff] %vm11510_vm1, %v3397_v7  ;;  %v3521_v19 = vpop.permute.xlu1 %3520  ;;  %v3699_v30 = vrot.slane %v3680_v56, 4  ;;  %v12924_v9 = vrot.slane %v3330_v45, 4  ;;  %vm15082_vm11 = vcmask 1022976   ;;  %vm15084_vm4 = vmmov %vm15078_vm3 }
 0x66d   : > { %3429 = vst [vmem:[#allocation4 + $0xa0] sm:$0xff] %v3396_v57  ;;  %v3539_v17 = vrot.slane %v3521_v19, 4  ;;  %5576 = vrot.lane.b32.xlu0 %v5536_v60, %s14819_s0  ;;  %v12932_v57 = vrot.slane %v4085_v58, 4  ;;  %vm15083_vm9 = vmmov %vm15082_vm11 }
 0x66e   : > { %4398 = vrot.lane.b32.xlu1 %v4357_v27, %s14812_s25  ;;  %v3337_v45 = vsel %vm11681_vm7, %v12924_v9, %v3336_v24  ;;  %v3608_v27 = vld [vmem:[#allocation3 + $0x60] sm:$0x11] }
 0x66f   : > { %v3556_v52 = vsel %vm15078_vm3, %v3538_v59, %v3539_v17  ;;  %v3558_v25 = vsel %vm15079_vm6, %v3521_v19, %v3539_v17  ;;  %v12915_v20 = vpop.permute.xlu0 %5449  ;;  %v3497_v59 = vrot.slane %v3447_v46, 6  ;;  %v4092_v58 = vsel %vm11729_vm0, %v12932_v57, %v4091_v15  ;;  %v4199_v24 = vld [vmem:[#allocation3 + $0x60] sm:$0x11] }
 0x670   : > { %v3557_v31 = vsel %vm15080_vm14, %v3519_v4, %v3556_v52  ;;  %3588 = vst.msk [vmem:[#allocation4 + $0x108] sm:$0xff] %vm11510_vm1, %v3558_v25  ;;  %v3682_v0 = vpop.permute.xlu1 %3681  ;;  %v3885_v4 = vld [vmem:[#allocation3 + $0x60] sm:$0x11]  ;;  %v3658_v25 = vrot.slane %v3608_v27, 5  ;;  %vm15085_vm3 = vcmask 539648   ;;  %vm15087_vm14 = vmmov %vm15084_vm4 }
 0x671   : > { %3587 = vst [vmem:[#allocation4 + $0x100] sm:$0xff] %v3557_v31  ;;  %v3700_v16 = vrot.slane %v3682_v0, 4  ;;  %3808 = vrot.lane.b32.xlu0 %v3767_v35, %s14618_s15  ;;  %v3934_v17 = vrot.slane %v3885_v4, 7  ;;  %v3498_v52 = vsel %vm11729_vm0, %v12932_v57, %v3497_v59  ;;  %v5745_v31 = vrot.slane %v12891_v14, 4  ;;  %vm15086_vm6 = vmmov %vm15085_vm3 }
 0x672   : > { %5578 = vrot.lane.b32.xlu1 %v5537_v61, %s14819_s0 }
 0x673   : > { %v3717_v41 = vsel %vm15081_vm13, %v3699_v30, %v3700_v16  ;;  %v3719_v43 = vsel %vm15082_vm11, %v3682_v0, %v3700_v16  ;;  %v12928_v7 = vpop.permute.xlu0 %5292  ;;  %v3935_v35 = vsel %vm11681_vm7, %v12924_v9, %v3934_v17  ;;  %v12960_v30 = vrot.slane %v3652_v53, 4  ;;  %v3287_v16 = vld [vmem:[#allocation3 + $0x68] sm:$0x11] }
 0x674   : > { %v3718_v19 = vsel %vm15083_vm9, %v3680_v56, %v3717_v41  ;;  %3749 = vst.msk [vmem:[#allocation4 + $0x168] sm:$0xff] %vm11510_vm1, %v3719_v43  ;;  %v12937_v60 = vpop.permute.xlu1 %3802  ;;  %v4475_v56 = vld [vmem:[#allocation3 + $0x60] sm:$0x11]  ;;  %v4248_v53 = vrot.slane %v4199_v24, 5  ;;  %v3448_v17 = vld [vmem:[#allocation3 + $0x68] sm:$0x11]  ;;  %vm15090_vm9 = vmmov %vm15084_vm4 }
 0x675   : > { %3748 = vst [vmem:[#allocation4 + $0x160] sm:$0xff] %v3718_v19  ;;  %3365 = vrot.lane.b32.xlu0 %v3337_v45, %s14633_s24  ;;  %v4524_v61 = vrot.slane %v4475_v56, 7  ;;  %v3659_v33 = vsel %vm11714_vm12, %v12960_v30, %v3658_v25  ;;  %v4789_v19 = vld [vmem:[#allocation3 + $0x60] sm:$0x11]  ;;  %v4879_v45 = vrot.slane %v12899_v62, 4  ;;  %vm15088_vm13 = vcmask 711680  }
 0x676   : > { %4120 = vrot.lane.b32.xlu1 %v4092_v58, %s14621_s21  ;;  %v3339_v58 = vrot.slane %v3287_v16, 7  ;;  %v4838_v25 = vrot.slane %v4789_v19, 5  ;;  %vm15089_vm11 = vmmov %vm15088_vm13  ;;  %v4722_v24 = vrot.slane %v12906_v1, 4 }
 0x677   : > { %v12947_v55 = vpop.permute.xlu0 %6039 }
 0x678   : > { %v5728_v51 = vpop.permute.xlu1 %5727 }
 0x679   : > { %v5746_v0 = vrot.slane %v5728_v51, 4  ;;  %3526 = vrot.lane.b32.xlu0 %v3498_v52, %s14617_s28  ;;  %v12985_v52 = vrot.slane %v3333_v38, 4 }
 0x67a   : > { %3963 = vrot.lane.b32.xlu1 %v3935_v35, %s14632_s20 }
 0x67b   : > { %v5763_v15 = vsel %vm15084_vm4, %v5745_v31, %v5746_v0  ;;  %v5765_v46 = vsel %vm15085_vm3, %v5728_v51, %v5746_v0  ;;  %v12964_v4 = vpop.permute.xlu0 %5135  ;;  %v4632_v31 = vld [vmem:[#allocation3 + $0x60] sm:$0x11]  ;;  %v3340_v38 = vsel %vm11681_vm7, %v12985_v52, %v3339_v58  ;;  %vm15091_vm4 = vcmask 719872  }
 0x67c   : > { %v5764_v41 = vsel %vm15086_vm6, %v12891_v14, %v5763_v15  ;;  %5795 = vst.msk [vmem:[#allocation4 + $0x6e8] sm:$0xff] %vm11510_vm1, %v5765_v46  ;;  %v4862_v43 = vpop.permute.xlu1 %4861  ;;  %v4525_v14 = vsel %vm11681_vm7, %v12924_v9, %v4524_v61  ;;  %v4249_v61 = vsel %vm11714_vm12, %v12960_v30, %v4248_v53  ;;  %v3500_v15 = vrot.slane %v3448_v17, 6  ;;  %vm15092_vm3 = vmmov %vm15091_vm4 }
 0x67d   : > { %5794 = vst [vmem:[#allocation4 + $0x6e0] sm:$0xff] %v5764_v41  ;;  %v4880_v59 = vrot.slane %v4862_v43, 4  ;;  %3687 = vrot.lane.b32.xlu0 %v3659_v33, %s14624_s17  ;;  %v13002_v46 = vrot.slane %v3494_v22, 4  ;;  %v4681_v41 = vrot.slane %v4632_v31, 6  ;;  %v4289_v22 = vrot.slane %v12873_v18, 4  ;;  %vm15093_vm6 = vmmov %vm15090_vm9 }
 0x67e   : > { %4553 = vrot.lane.b32.xlu1 %v4525_v14, %s14631_s16  ;;  %v13015_v14 = vld [vmem:[#allocation3 + $0x8] sm:$0xff]  ;;  %v5469_v31 = vrot.slane %v12915_v20, 4 }
 0x67f   : > { %v4897_v27 = vsel %vm15087_vm14, %v4879_v45, %v4880_v59  ;;  %v4899_v56 = vsel %vm15088_vm13, %v4862_v43, %v4880_v59  ;;  %v12981_v51 = vpop.permute.xlu0 %5882  ;;  %v13004_v43 = vld [vmem:[#allocation3 + $0x60] sm:$0x11]  ;;  %v4839_v45 = vsel %vm11714_vm12, %v12960_v30, %v4838_v25  ;;  %v13013_v59 = vrot.slane %v3655_v28, 4 }
 0x680   : > { %v4898_v0 = vsel %vm15089_vm11, %v12899_v62, %v4897_v27  ;;  %4929 = vst.msk [vmem:[#allocation4 + $0x488] sm:$0xff] %vm11510_vm1, %v4899_v56  ;;  %v4705_v35 = vpop.permute.xlu1 %4704  ;;  %v3609_v62 = vld [vmem:[#allocation3 + $0x68] sm:$0x11]  ;;  %v3501_v13 = vsel %vm11729_vm0, %v13002_v46, %v3500_v15  ;;  %v5428_v28 = vrot.slane %v13004_v43, 5  ;;  %vm15094_vm14 = vcmask 867328   ;;  %vm15096_vm11 = vmmov %vm15093_vm6 }
 0x681   : > { %4928 = vst [vmem:[#allocation4 + $0x480] sm:$0xff] %v4898_v0  ;;  %v4723_v16 = vrot.slane %v4705_v35, 4  ;;  %4277 = vrot.lane.b32.xlu0 %v4249_v61, %s14630_s30  ;;  %v3661_v56 = vrot.slane %v3609_v62, 5  ;;  %v13034_v61 = vld [vmem:[#allocation3 + $0x18] sm:$0xff]  ;;  %vm15095_vm13 = vmmov %vm15094_vm14 }
 0x682   : > { %3367 = vrot.lane.b32.xlu1 %v3340_v38, %s14633_s24 }
 0x683   : > { %v4740_v33 = vsel %vm15090_vm9, %v4722_v24, %v4723_v16  ;;  %v4742_v53 = vsel %vm15091_vm4, %v4705_v35, %v4723_v16  ;;  %v4272_v19 = vpop.permute.xlu0 %4271  ;;  %v4682_v35 = vsel %vm11729_vm0, %v12932_v57, %v4681_v41  ;;  %v13037_v24 = vrot.slane %v13015_v14, 7 }
 0x684   : > { %v4741_v58 = vsel %vm15092_vm3, %v12906_v1, %v4740_v33  ;;  %4772 = vst.msk [vmem:[#allocation4 + $0x428] sm:$0xff] %vm11510_vm1, %v4742_v53  ;;  %v4290_v17 = vrot.slane %v4272_v19, 4  ;;  %v5452_v27 = vpop.permute.xlu1 %5451  ;;  %v4132_v16 = vrot.slane %v12879_v44, 4  ;;  %vm15097_vm9 = vcmask 556032   ;;  %v5222_v33 = vld [vmem:[#allocation3 + $0x60] sm:$0x11]  ;;  %vm15099_vm3 = vmmov %vm15093_vm6 }
 0x685   : > { %4771 = vst [vmem:[#allocation4 + $0x420] sm:$0xff] %v4741_v58  ;;  %v5470_v25 = vrot.slane %v5452_v27, 4  ;;  %4867 = vrot.lane.b32.xlu0 %v4839_v45, %s14623_s29  ;;  %vm15098_vm4 = vmmov %vm15097_vm9 }
 0x686   : > { %v4307_v1 = vsel %vm15093_vm6, %v4289_v22, %v4290_v17  ;;  %v4309_v0 = vsel %vm15094_vm14, %v4272_v19, %v4290_v17  ;;  %3528 = vrot.lane.b32.xlu1 %v3501_v13, %s14617_s28  ;;  %v5312_v22 = vrot.slane %v12928_v7, 4  ;;  %v3662_v17 = vsel %vm11714_vm12, %v13013_v59, %v3661_v56 }
 0x687   : > { %v4308_v38 = vsel %vm15095_vm13, %v12873_v18, %v4307_v1  ;;  %4339 = vst.msk [vmem:[#allocation4 + $0x2f8] sm:$0xff] %vm11510_vm1, %v4309_v0  ;;  %v5487_v15 = vsel %vm15096_vm11, %v5469_v31, %v5470_v25  ;;  %v5489_v62 = vsel %vm15097_vm9, %v5452_v27, %v5470_v25  ;;  %v4115_v43 = vpop.permute.xlu0 %4114  ;;  %vm15100_vm6 = vcmask 875520   ;;  %vm15102_vm13 = vmmov %vm15099_vm3 }
 0x688   : > { %v5488_v41 = vsel %vm15098_vm4, %v12915_v20, %v5487_v15  ;;  %5519 = vst.msk [vmem:[#allocation4 + $0x618] sm:$0xff] %vm11510_vm1, %v5489_v62  ;;  %v4133_v53 = vrot.slane %v4115_v43, 4  ;;  %v5295_v19 = vpop.permute.xlu1 %5294  ;;  %v9456_v45 = vcombine.low %v12775_v42, %v4308_v38  ;;  %v9457_v18 = vcombine.high %v12775_v42, %v4308_v38  ;;  %v9851_v42 = vld [vmem:[#allocation4 + $0x2c4] ss:$16 sps:$4 sm:$0xff]   ;;  %vm15101_vm14 = vmmov %vm15100_vm6 }
 0x689   : > { %5518 = vst [vmem:[#allocation4 + $0x610] sm:$0xff] %v5488_v41  ;;  %v5313_v58 = vrot.slane %v5295_v19, 4  ;;  %4710 = vrot.lane.b32.xlu0 %v4682_v35, %s14828_s12  ;;  %v5087_v20 = vrot.slane %v13034_v61, 7  ;;  %v5271_v25 = vrot.slane %v5222_v33, 6  ;;  %vm15103_vm11 = vcmask 687104   ;;  %vm15105_vm4 = vmmov %vm15099_vm3 }
 0x68a   : > { %v4150_v27 = vsel %vm15099_vm3, %v4132_v16, %v4133_v53  ;;  %v4152_v31 = vsel %vm15100_vm6, %v4115_v43, %v4133_v53  ;;  %3689 = vrot.lane.b32.xlu1 %v3662_v17, %s14624_s17  ;;  %8827 = vmatprep.subr.bf16.mxu1 %v9457_v18  ;;  %v5086_v35 = vrot.slane %v13037_v24, 4  ;;  %v5969_v16 = vld [vmem:[#allocation3 + $0x60] sm:$0x11]  ;;  %v3975_v38 = vrot.slane %v12885_v23, 4  ;;  %vm15104_vm9 = vmmov %vm15103_vm11 }
 0x68b   : > { %v4151_v13 = vsel %vm15101_vm14, %v12879_v44, %v4150_v27  ;;  %4182 = vst.msk [vmem:[#allocation4 + $0x298] sm:$0xff] %vm11510_vm1, %v4152_v31  ;;  %v5330_v1 = vsel %vm15102_vm13, %v5312_v22, %v5313_v58  ;;  %v5332_v56 = vsel %vm15103_vm11, %v5295_v19, %v5313_v58  ;;  %v3958_v0 = vpop.permute.xlu0 %3957  ;;  %8828 = vmatpush1.bf16.msra.mxu1 %v9456_v45  ;;  %v6059_v33 = vrot.slane %v12947_v55, 4  ;;  %v13088_v22 = vld [vmem:[#allocation3 + $0x28] sm:$0xff]  ;;  %vm15108_vm14 = vmmov %vm15105_vm4 }
 0x68c   : > { %4181 = vst [vmem:[#allocation4 + $0x290] sm:$0xff] %v4151_v13  ;;  %v5331_v15 = vsel %vm15104_vm9, %v12928_v7, %v5330_v1  ;;  %5362 = vst.msk [vmem:[#allocation4 + $0x5b8] sm:$0xff] %vm11510_vm1, %v5332_v56  ;;  %v3976_v44 = vrot.slane %v3958_v0, 4  ;;  %v6042_v62 = vpop.permute.xlu1 %6041  ;;  %v5429_v43 = vsel %vm11714_vm12, %v12960_v30, %v5428_v28  ;;  %8829 = vmatprep.subr.bf16.mxu1 %v9851_v42  ;;  %v9849_v7 = vld [vmem:[#allocation4 + $0x2c0] ss:$16 sps:$4 sm:$0xff]   ;;  %vm15106_vm3 = vcmask 883712  }
 0x68d   : > { %5361 = vst [vmem:[#allocation4 + $0x5b0] sm:$0xff] %v5331_v15  ;;  %v6060_v41 = vrot.slane %v6042_v62, 4  ;;  %5457 = vrot.lane.b32.xlu0 %v5429_v43, %s14627_s19  ;;  %v13080_v53 = vsel %vm11681_vm7, %v5086_v35, %v5087_v20  ;;  %v13086_v28 = vrot.slane %v5087_v20, 4  ;;  %v6018_v18 = vrot.slane %v5969_v16, 5  ;;  %vm15107_vm6 = vmmov %vm15106_vm3 }
 0x68e   : > { %v3993_v19 = vsel %vm15105_vm4, %v3975_v38, %v3976_v44  ;;  %v3995_v45 = vsel %vm15106_vm3, %v3958_v0, %v3976_v44  ;;  %5125 = vrot.lane.b32.xlu1 %v13080_v53, %s14625_s23  ;;  %vm15109_vm13 = vcmask 523264   ;;  %v5834_v42 = vrot.slane %v13034_v61, 6  ;;  %v5065_v38 = vld [vmem:[#allocation3 + $0x60] sm:$0x11]  ;;  %vm15111_vm9 = vmmov %vm15105_vm4 }
 0x68f   : > { %v3994_v58 = vsel %vm15107_vm6, %v12885_v23, %v3993_v19  ;;  %4025 = vst.msk [vmem:[#allocation4 + $0x238] sm:$0xff] %vm11510_vm1, %v3995_v45  ;;  %v6077_v17 = vsel %vm15108_vm14, %v6059_v33, %v6060_v41  ;;  %v6079_v27 = vsel %vm15109_vm13, %v6042_v62, %v6060_v41  ;;  %v4548_v31 = vpop.permute.xlu0 %4547  ;;  %8830 = vmatpush1.bf16.msra.mxu1 %v9849_v7  ;;  %v4565_v20 = vrot.slane %v12893_v6, 4  ;;  %vm15110_vm11 = vmmov %vm15109_vm13 }
 0x690   : > { %4024 = vst [vmem:[#allocation4 + $0x230] sm:$0xff] %v3994_v58  ;;  %v6078_v13 = vsel %vm15110_vm11, %v12947_v55, %v6077_v17  ;;  %6109 = vst.msk [vmem:[#allocation4 + $0x7a8] sm:$0xff] %vm11510_vm1, %v6079_v27  ;;  %v4566_v23 = vrot.slane %v4548_v31, 4  ;;  %v5138_v1 = vpop.permute.xlu1 %5137  ;;  %v5272_v56 = vsel %vm11729_vm0, %v12932_v57, %v5271_v25  ;;  %v5155_v0 = vrot.slane %v12964_v4, 4 }
 0x691   : > { %6108 = vst [vmem:[#allocation4 + $0x7a0] sm:$0xff] %v6078_v13  ;;  %v5156_v35 = vrot.slane %v5138_v1, 4  ;;  %5300 = vrot.lane.b32.xlu0 %v5272_v56, %s14829_s2  ;;  %v5094_v55 = vsel %vm11681_vm7, %v13086_v28, %v12049_v2  ;;  %v5840_v16 = vrot.slane %v13088_v22, 6  ;;  %vm15112_vm4 = vcmask 850944   ;;  %vm15114_vm6 = vmmov %vm15111_vm9  ;;  %v4043_v56 = vld [vmem:[#allocation3 + $0x68] sm:$0x11] }
 0x692   : > { %v4583_v15 = vsel %vm15111_vm9, %v4565_v20, %v4566_v23  ;;  %v4585_v44 = vsel %vm15112_vm4, %v4548_v31, %v4566_v23  ;;  %5129 = vrot.lane.b32.xlu1 %v5094_v55, %s14625_s23  ;;  %vm15113_vm3 = vmmov %vm15112_vm4  ;;  %vm15115_vm14 = vcmask 695296   ;;  %v5839_v33 = vrot.slane %v5834_v42, 4 }
 0x693   : > { %v4584_v25 = vsel %vm15113_vm3, %v12893_v6, %v4583_v15  ;;  %4615 = vst.msk [vmem:[#allocation4 + $0x3c8] sm:$0xff] %vm11510_vm1, %v4585_v44  ;;  %v5173_v62 = vsel %vm15114_vm6, %v5155_v0, %v5156_v35  ;;  %v5175_v43 = vsel %vm15115_vm14, %v5138_v1, %v5156_v35  ;;  %v4393_v2 = vpop.permute.xlu0 %4392  ;;  %vm15116_vm13 = vmmov %vm15115_vm14  ;;  %v6019_v6 = vsel %vm11714_vm12, %v12960_v30, %v6018_v18  ;;  %v13158_v44 = vld [vmem:[#allocation3] sm:$0xff] }
 0x694   : > { %4614 = vst [vmem:[#allocation4 + $0x3c0] sm:$0xff] %v4584_v25  ;;  %v5174_v41 = vsel %vm15116_vm13, %v12964_v4, %v5173_v62  ;;  %5205 = vst.msk [vmem:[#allocation4 + $0x558] sm:$0xff] %vm11510_vm1, %v5175_v43  ;;  %v5885_v7 = vpop.permute.xlu1 %5884  ;;  %v5114_v19 = vrot.slane %v5065_v38, 7  ;;  %v5902_v45 = vrot.slane %v12981_v51, 4  ;;  %v13134_v17 = vsel %vm11729_vm0, %v5839_v33, %v5840_v16  ;;  %v5812_v4 = vld [vmem:[#allocation3 + $0x60] sm:$0x11] }
 0x695   : > { %5204 = vst [vmem:[#allocation4 + $0x550] sm:$0xff] %v5174_v41  ;;  %v5903_v58 = vrot.slane %v5885_v7, 4  ;;  %6047 = vrot.lane.b32.xlu0 %v6019_v6, %s14622_s11  ;;  %vm15117_vm11 = vmmov %vm15114_vm6  ;;  %vm15118_vm9 = vcmask 531456   ;;  %v13140_v18 = vrot.slane %v5840_v16, 4  ;;  %v5861_v1 = vrot.slane %v5812_v4, 6 }
 0x696   : > { %5876 = vrot.lane.b32.xlu1 %v13134_v17, %s15014_s3  ;;  %vm15119_vm4 = vmmov %vm15118_vm9  ;;  %v5115_v23 = vsel %vm11681_vm7, %v12924_v9, %v5114_v19  ;;  %v4410_v0 = vrot.slane %v4393_v2, 4  ;;  %v4094_v15 = vrot.slane %v4043_v56, 6  ;;  %v3820_v25 = vrot.slane %v12937_v60, 4  ;;  %v3886_v56 = vld [vmem:[#allocation3 + $0x68] sm:$0x11] }
 0x697   : > { %v5920_v27 = vsel %vm15117_vm11, %v5902_v45, %v5903_v58  ;;  %v5922_v31 = vsel %vm15118_vm9, %v5885_v7, %v5903_v58  ;;  %v5573_v30 = vpop.permute.xlu0 %5572  ;;  %vm15120_vm3 = vmmov %vm15114_vm6  ;;  %vm15121_vm6 = vcmask 859136   ;;  %v13168_v7 = vld [vmem:[#allocation3 + $0x58] sm:$0xff]  ;;  %vm15124_vm11 = vcmask 1014784  }
 0x698   : > { %v5921_v20 = vsel %vm15119_vm4, %v12981_v51, %v5920_v27  ;;  %5952 = vst.msk [vmem:[#allocation4 + $0x748] sm:$0xff] %vm11510_vm1, %v5922_v31  ;;  %v4395_v13 = vpop.permute.xlu1 %4394  ;;  %v5847_v51 = vsel %vm11729_vm0, %v13140_v18, %v5846_v32  ;;  %vm15122_vm14 = vmmov %vm15121_vm6  ;;  %v5862_v32 = vsel %vm11729_vm0, %v12932_v57, %v5861_v1  ;;  %v5590_v33 = vrot.slane %v5573_v30, 4 }
 0x699   : > { %5951 = vst [vmem:[#allocation4 + $0x740] sm:$0xff] %v5921_v20  ;;  %v4411_v35 = vrot.slane %v4395_v13, 4  ;;  %5143 = vrot.lane.b32.xlu0 %v5115_v23, %s14625_s23  ;;  %vm15123_vm13 = vmmov %vm15120_vm3  ;;  %v13175_v19 = vrot.slane %v13158_v44, 7  ;;  %v4947_v20 = vld [vmem:[#allocation3 + $0x68] sm:$0x11] }
 0x69a   : > { %5880 = vrot.lane.b32.xlu1 %v5847_v51, %s15014_s3  ;;  %vm15125_vm9 = vmmov %vm15124_vm11 }
 0x69b   : > { %v4429_v55 = vsel %vm15120_vm3, %v4410_v0, %v4411_v35  ;;  %v4431_v16 = vsel %vm15121_vm6, %v4395_v13, %v4411_v35  ;;  %v3805_v38 = vpop.permute.xlu0 %3804  ;;  %vm15126_vm4 = vmmov %vm15120_vm3  ;;  %vm15127_vm3 = vcmask 547840   ;;  %v5083_v13 = vrot.slane %v13175_v19, 4 }
 0x69c   : > { %v4430_v62 = vsel %vm15122_vm14, %v4393_v2, %v4429_v55  ;;  %4460 = vst.msk [vmem:[#allocation4 + $0x378] sm:$0xff] %vm11510_vm1, %v4431_v16  ;;  %v3821_v3 = vrot.slane %v3805_v38, 4  ;;  %v5575_v43 = vpop.permute.xlu1 %5574  ;;  %vm15128_vm6 = vmmov %vm15127_vm3  ;;  %v13207_v35 = vrot.slane %v13015_v14, 6  ;;  %v13215_v55 = vld [vmem:[#allocation3 + $0x48] sm:$0xff]  ;;  %v13220_v16 = vld [vmem:[#allocation3 + $0x10] sm:$0xff] }
 0x69d   : > { %4459 = vst [vmem:[#allocation4 + $0x370] sm:$0xff] %v4430_v62  ;;  %v5591_v41 = vrot.slane %v5575_v43, 4  ;;  %5890 = vrot.lane.b32.xlu0 %v5862_v32, %s15014_s3  ;;  %v6442_v62 = vrot.slane %v13215_v55, 6  ;;  %vm15129_vm14 = vmmov %vm15126_vm4 }
 0x69e   : > { %v3839_v6 = vsel %vm15123_vm13, %v3820_v25, %v3821_v3  ;;  %v3841_v2 = vsel %vm15124_vm11, %v3805_v38, %v3821_v3  ;;  %4984 = vrot.lane.b32.xlu1 %v13168_v7, %s14616_s18  ;;  %v5831_v38 = vrot.slane %v13220_v16, 6  ;;  %v5833_v25 = vrot.slane %v13207_v35, 4 }
 0x69f   : > { %v3840_v57 = vsel %vm15125_vm9, %v12937_v60, %v3839_v6  ;;  %3870 = vst.msk [vmem:[#allocation4 + $0x1e8] sm:$0xff] %vm11510_vm1, %v3841_v2  ;;  %v5609_v45 = vsel %vm15126_vm4, %v5590_v33, %v5591_v41  ;;  %v5611_v58 = vsel %vm15127_vm3, %v5575_v43, %v5591_v41  ;;  %v3362_v4 = vpop.permute.xlu0 %3361  ;;  %v4095_v60 = vsel %vm11729_vm0, %v13002_v46, %v4094_v15  ;;  %vm15133_vm9 = vmmov %vm15126_vm4 }
 0x6a0   : > { %3869 = vst [vmem:[#allocation4 + $0x1e0] sm:$0xff] %v3840_v57  ;;  %v5610_v27 = vsel %vm15128_vm6, %v5573_v30, %v5609_v45  ;;  %5640 = vst.msk [vmem:[#allocation4 + $0x698] sm:$0xff] %vm11510_vm1, %v5611_v58  ;;  %v13186_v31 = vpop.permute.xlu1 %4116  ;;  %v13200_v30 = vsel %vm11681_vm7, %v5083_v13, %v5084_v48  ;;  %v3937_v48 = vrot.slane %v3886_v56, 7  ;;  %v5837_v43 = vrot.slane %v10245_v39, 6  ;;  %v4476_v56 = vld [vmem:[#allocation3 + $0x68] sm:$0x11] }
 0x6a1   : > { %5639 = vst [vmem:[#allocation4 + $0x690] sm:$0xff] %v5610_v27  ;;  %4122 = vrot.lane.b32.xlu0 %v4095_v60, %s14621_s21  ;;  %v3379_v32 = vrot.slane %v3362_v4, 4  ;;  %v13235_v41 = vsel %vm11729_vm0, %v5833_v25, %v5834_v42  ;;  %v14581_v6 = vrot.slane %v13168_v7, 6  ;;  %v5836_v2 = vrot.slane %v5831_v38, 4  ;;  %vm15136_vm6 = vmmov %vm15133_vm9  ;;  %s9687_s21 = sshll.u32 %s15368_s14, 4 }
 0x6a2   : > { %4988 = vrot.lane.b32.xlu1 %v4947_v20, %s14616_s18  ;;  %v3938_v63 = vsel %vm11681_vm7, %v12985_v52, %v3937_v48  ;;  %vm15130_vm13 = vcmask 1039360   ;;  %v6447_v61 = vrot.slane %v6442_v62, 4  ;;  %v13267_v48 = vld [vmem:[#allocation3 + $0x38] sm:$0xff]  ;;  %vm15134_vm4 = vcmask 1031168   ;;  %s14463_s17 = scalar_lea.vmem %s14484_s10, %s9687_s21 }
 0x6a3   : > { %v3523_v23 = vpop.permute.xlu0 %3522  ;;  %vm15131_vm11 = vmmov %vm15130_vm13  ;;  %v13255_v60 = vsel %vm11729_vm0, %v5836_v2, %v5837_v43  ;;  %v4527_v2 = vrot.slane %v4476_v56, 7 }
 0x6a4   : > { %v13194_v1 = vpop.permute.xlu1 %3959  ;;  %v3540_v20 = vrot.slane %v3523_v23, 4  ;;  %vm15135_vm3 = vmmov %vm15134_vm4 }
 0x6a5   : > { %5123 = vrot.lane.b32.xlu0 %v13200_v30, %s14625_s23 }
 0x6a6   : > { %5121 = vrot.lane.b32.xlu1 %v13037_v24, %s14625_s23 }
 0x6a7   : > { %v3684_v0 = vpop.permute.xlu0 %3683 }
 0x6a8   : > { %v13209_v51 = vpop.permute.xlu1 %4549 }
 0x6a9   : > { %5127 = vrot.lane.b32.xlu0 %v5091_v37, %s14625_s23  ;;  %v13265_v37 = vrot.slane %v5837_v43, 4 }
 0x6aa   : > { %5868 = vrot.lane.b32.xlu1 %v13207_v35, %s15014_s3 }
 0x6ab   : > { %v13223_v15 = vpop.permute.xlu0 %4273  ;;  %v5844_v43 = vsel %vm11729_vm0, %v13265_v37, %v5843_v26 }
 0x6ac   : > { %v3364_v3 = vpop.permute.xlu1 %3363 }
 0x6ad   : > { %v3380_v33 = vrot.slane %v3364_v3, 4  ;;  %3965 = vrot.lane.b32.xlu0 %v3938_v63, %s14632_s20  ;;  %s15132_s20 = smov 46  }
 0x6ae   : > { %5872 = vrot.lane.b32.xlu1 %v13235_v41, %s15014_s3 }
 0x6af   : > { %v3398_v57 = vsel %vm15129_vm14, %v3379_v32, %v3380_v33  ;;  %v3400_v45 = vsel %vm15130_vm13, %v3364_v3, %v3380_v33  ;;  %v13244_v58 = vpop.permute.xlu0 %5729  ;;  %v14579_v33 = vrot.slane %v13015_v14, 5  ;;  %vm15137_vm14 = vcmask 1022976  }
 0x6b0   : > { %v13249_v42 = vsel %vm15131_vm11, %v3362_v4, %v3398_v57  ;;  %3432 = vst.msk [vmem:[#allocation4 + $0xb8] sm:$0xff] %vm11510_vm1, %v3400_v45  ;;  %v3525_v27 = vpop.permute.xlu1 %3524  ;;  %v6449_v4 = vsel %vm11729_vm0, %v6447_v61, %v14581_v6  ;;  %v3701_v57 = vrot.slane %v3684_v0, 4  ;;  %vm15138_vm13 = vmmov %vm15137_vm14 }
 0x6b1   : > { %3431 = vst [vmem:[#allocation4 + $0xb0] sm:$0xff] %v13249_v42  ;;  %v3541_v13 = vrot.slane %v3525_v27, 4  ;;  %5874 = vrot.lane.b32.xlu0 %v13255_v60, %s15014_s3  ;;  %vm15139_vm11 = vmmov %vm15136_vm6 }
 0x6b2   : > { %6478 = vrot.lane.b32.xlu1 %v6449_v4, %s15132_s20 }
 0x6b3   : > { %v3559_v25 = vsel %vm15133_vm9, %v3540_v20, %v3541_v13  ;;  %v3561_v3 = vsel %vm15134_vm4, %v3525_v27, %v3541_v13  ;;  %v13271_v63 = vpop.permute.xlu0 %4863  ;;  %v4528_v13 = vsel %vm11681_vm7, %v12985_v52, %v4527_v2  ;;  %vm15140_vm9 = vcmask 867328  }
 0x6b4   : > { %v3560_v39 = vsel %vm15135_vm3, %v3523_v23, %v3559_v25  ;;  %3590 = vst.msk [vmem:[#allocation4 + $0x118] sm:$0xff] %vm11510_vm1, %v3561_v3  ;;  %v3686_v32 = vpop.permute.xlu1 %3685  ;;  %v6436_v23 = vrot.slane %v13267_v48, 6  ;;  %v13306_v3 = vld [vmem:[#allocation3 + $0x50] sm:$0xff]  ;;  %vm15141_vm4 = vmmov %vm15140_vm9 }
 0x6b5   : > { %3589 = vst [vmem:[#allocation4 + $0x110] sm:$0xff] %v3560_v39  ;;  %v3702_v45 = vrot.slane %v3686_v32, 4  ;;  %5878 = vrot.lane.b32.xlu0 %v5844_v43, %s15014_s3  ;;  %v4291_v39 = vrot.slane %v13223_v15, 4  ;;  %vm15142_vm3 = vmmov %vm15136_vm6 }
 0x6b6   : > { %6615 = vrot.lane.b32.xlu1 %v14579_v33, %s14626_s27  ;;  %v6437_v4 = vsel %vm11729_vm0, %v13140_v18, %v6436_v23  ;;  %v6445_v33 = vrot.slane %v13306_v3, 6 }
 0x6b7   : > { %v3720_v47 = vsel %vm15136_vm6, %v3701_v57, %v3702_v45  ;;  %v3722_v61 = vsel %vm15137_vm14, %v3686_v32, %v3702_v45  ;;  %v13289_v27 = vpop.permute.xlu0 %4706  ;;  %vm15143_vm6 = vcmask 539648  }
 0x6b8   : > { %v3721_v26 = vsel %vm15138_vm13, %v3684_v0, %v3720_v47  ;;  %3751 = vst.msk [vmem:[#allocation4 + $0x178] sm:$0xff] %vm11510_vm1, %v3722_v61  ;;  %v13294_v20 = vpop.permute.xlu1 %3806  ;;  %v6441_v0 = vrot.slane %v6436_v23, 4  ;;  %v4946_v47 = vld [vmem:[#allocation3 + $0x60] sm:$0x11]  ;;  %v5747_v61 = vrot.slane %v13244_v58, 4  ;;  %vm15144_vm14 = vmmov %vm15143_vm6 }
 0x6b9   : > { %3750 = vst [vmem:[#allocation4 + $0x170] sm:$0xff] %v3721_v26  ;;  %4555 = vrot.lane.b32.xlu0 %v4528_v13, %s14631_s16  ;;  %v5655_v26 = vld [vmem:[#allocation3 + $0x60] sm:$0x11]  ;;  %v13329_v13 = vld [vmem:[%s14481_s7] sm:$0xff]  ;;  %vm15145_vm13 = vmmov %vm15142_vm3 }
 0x6ba   : > { %6470 = vrot.lane.b32.xlu1 %v6437_v4, %s15132_s20  ;;  %v6443_v43 = vsel %vm11729_vm0, %v6441_v0, %v6442_v62 }
 0x6bb   : > { %v13304_v56 = vpop.permute.xlu0 %5453 }
 0x6bc   : > { %v4276_v25 = vpop.permute.xlu1 %4275 }
 0x6bd   : > { %v4292_v32 = vrot.slane %v4276_v25, 4  ;;  %4982 = vrot.lane.b32.xlu0 %v13306_v3, %s14616_s18 }
 0x6be   : > { %6474 = vrot.lane.b32.xlu1 %v6443_v43, %s15132_s20 }
 0x6bf   : > { %v4310_v18 = vsel %vm15139_vm11, %v4291_v39, %v4292_v32  ;;  %v4312_v2 = vsel %vm15140_vm9, %v4276_v25, %v4292_v32  ;;  %v13318_v57 = vpop.permute.xlu0 %5296  ;;  %v6285_v39 = vrot.slane %v13215_v55, 7  ;;  %vm15146_vm11 = vcmask 711680  }
 0x6c0   : > { %v4311_v45 = vsel %vm15141_vm4, %v13223_v15, %v4310_v18  ;;  %4341 = vst.msk [vmem:[#allocation4 + $0x308] sm:$0xff] %vm11510_vm1, %v4312_v2  ;;  %v5732_v23 = vpop.permute.xlu1 %5731  ;;  %v13335_v15 = vrot.slane %v13329_v13, %v10355_v5  ;;  %v4881_v2 = vrot.slane %v13271_v63, 4  ;;  %vm15147_vm9 = vmmov %vm15146_vm11 }
 0x6c1   : > { %4340 = vst [vmem:[#allocation4 + $0x300] sm:$0xff] %v4311_v45  ;;  %v5748_v62 = vrot.slane %v5732_v23, 4  ;;  %4986 = vrot.lane.b32.xlu0 %v4946_v47, %s14616_s18  ;;  %vm15148_vm4 = vmmov %vm15142_vm3 }
 0x6c2   : > { %6462 = vrot.lane.b32.xlu1 %v13235_v41, %s15132_s20  ;;  %v5704_v41 = vrot.slane %v5655_v26, 7  ;;  %v13348_v18 = vcombine.high %v13335_v15, %v13335_v15 }
 0x6c3   : > { %v5766_v4 = vsel %vm15142_vm3, %v5747_v61, %v5748_v62  ;;  %v5768_v0 = vsel %vm15143_vm6, %v5732_v23, %v5748_v62  ;;  %v13339_v25 = vpop.permute.xlu0 %6043  ;;  %v14580_v23 = vrot.slane %v13168_v7, 7  ;;  %v6290_v62 = vrot.slane %v6285_v39, 4 }
 0x6c4   : > { %v5767_v32 = vsel %vm15144_vm14, %v13244_v58, %v5766_v4  ;;  %5797 = vst.msk [vmem:[#allocation4 + $0x6f8] sm:$0xff] %vm11510_vm1, %v5768_v0  ;;  %v4866_v43 = vpop.permute.xlu1 %4865  ;;  %8818 = vmatprep.mubr.bf16.mxu0 %v13348_v18  ;;  %v4724_v0 = vrot.slane %v13289_v27, 4  ;;  %vm15149_vm3 = vcmask 719872   ;;  %vm15151_vm14 = vmmov %vm15148_vm4 }
 0x6c5   : > { %5796 = vst [vmem:[#allocation4 + $0x6f0] sm:$0xff] %v5767_v32  ;;  %v4882_v45 = vrot.slane %v4866_v43, 4  ;;  %5119 = vrot.lane.b32.xlu0 %v13175_v19, %s14625_s23  ;;  %vm15150_vm6 = vmmov %vm15149_vm3 }
 0x6c6   : > { %6466 = vrot.lane.b32.xlu1 %v13134_v17, %s15132_s20  ;;  %v5705_v17 = vsel %vm11681_vm7, %v12924_v9, %v5704_v41 }
 0x6c7   : > { %v4900_v58 = vsel %vm15145_vm13, %v4881_v2, %v4882_v45  ;;  %v4902_v47 = vsel %vm15146_vm11, %v4866_v43, %v4882_v45  ;;  %v13359_v61 = vpop.permute.xlu0 %5139  ;;  %v6292_v43 = vsel %vm11681_vm7, %v6290_v62, %v14580_v23  ;;  %v14583_v45 = vrot.slane %v13088_v22, 7 }
 0x6c8   : > { %v4901_v26 = vsel %vm15147_vm9, %v13271_v63, %v4900_v58  ;;  %4931 = vst.msk [vmem:[#allocation4 + $0x498] sm:$0xff] %vm11510_vm1, %v4902_v47  ;;  %v4709_v4 = vpop.permute.xlu1 %4708  ;;  %v13378_v63 = vrot.slane %v13158_v44, 6  ;;  %v13385_v58 = vld [vmem:[#allocation3 + $0x40] sm:$0xff]  ;;  %vm15152_vm13 = vcmask 556032   ;;  %v4134_v23 = vrot.slane %v13186_v31, 4  ;;  %vm15154_vm9 = vmmov %vm15148_vm4 }
 0x6c9   : > { %4930 = vst [vmem:[#allocation4 + $0x490] sm:$0xff] %v4901_v26  ;;  %v4725_v32 = vrot.slane %v4709_v4, 4  ;;  %5733 = vrot.lane.b32.xlu0 %v5705_v17, %s14629_s26  ;;  %v5471_v26 = vrot.slane %v13304_v56, 4  ;;  %vm15153_vm11 = vmmov %vm15152_vm13 }
 0x6ca   : > { %6321 = vrot.lane.b32.xlu1 %v6292_v43, %s14628_s22 }
 0x6cb   : > { %v4743_v2 = vsel %vm15148_vm4, %v4724_v0, %v4725_v32  ;;  %v4745_v9 = vsel %vm15149_vm3, %v4709_v4, %v4725_v32  ;;  %v13382_v41 = vpop.permute.xlu0 %5886  ;;  %v6279_v4 = vrot.slane %v13267_v48, 7  ;;  %v5830_v0 = vrot.slane %v13378_v63, 4  ;;  %v4200_v32 = vld [vmem:[#allocation3 + $0x68] sm:$0x11] }
 0x6cc   : > { %v4744_v47 = vsel %vm15150_vm6, %v13289_v27, %v4743_v2  ;;  %4774 = vst.msk [vmem:[#allocation4 + $0x438] sm:$0xff] %vm11510_vm1, %v4745_v9  ;;  %v5456_v62 = vpop.permute.xlu1 %5455  ;;  %v6439_v27 = vrot.slane %v13385_v58, 6  ;;  %vm15155_vm4 = vcmask 875520   ;;  %vm15157_vm6 = vmmov %vm15154_vm9 }
 0x6cd   : > { %4773 = vst [vmem:[#allocation4 + $0x430] sm:$0xff] %v4744_v47  ;;  %v5472_v17 = vrot.slane %v5456_v62, 4  ;;  %5866 = vrot.lane.b32.xlu0 %v13378_v63, %s15014_s3  ;;  %v6278_v47 = vrot.slane %v14583_v45, 4  ;;  %vm15156_vm3 = vmmov %vm15155_vm4 }
 0x6ce   : > { %6458 = vrot.lane.b32.xlu1 %v13207_v35, %s15132_s20 }
 0x6cf   : > { %v5490_v43 = vsel %vm15151_vm14, %v5471_v26, %v5472_v17  ;;  %v5492_v2 = vsel %vm15152_vm13, %v5456_v62, %v5472_v17  ;;  %v4119_v9 = vpop.permute.xlu0 %4118  ;;  %v13413_v62 = vsel %vm11729_vm0, %v5830_v0, %v5831_v38  ;;  %v6402_v26 = vld [vmem:[#allocation3 + $0x60] sm:$0x11]  ;;  %v5314_v17 = vrot.slane %v13318_v57, 4 }
 0x6d0   : > { %v5491_v35 = vsel %vm15153_vm11, %v13304_v56, %v5490_v43  ;;  %5521 = vst.msk [vmem:[#allocation4 + $0x628] sm:$0xff] %vm11510_vm1, %v5492_v2  ;;  %v4135_v6 = vrot.slane %v4119_v9, 4  ;;  %v5299_v50 = vpop.permute.xlu1 %5298  ;;  %v6280_v56 = vsel %vm11681_vm7, %v6278_v47, %v6279_v4  ;;  %v4251_v43 = vrot.slane %v4200_v32, 5  ;;  %vm15160_vm11 = vmmov %vm15157_vm6 }
 0x6d1   : > { %5520 = vst [vmem:[#allocation4 + $0x620] sm:$0xff] %v5491_v35  ;;  %v5315_v45 = vrot.slane %v5299_v50, 4  ;;  %5870 = vrot.lane.b32.xlu0 %v13413_v62, %s15014_s3  ;;  %v6444_v38 = vrot.slane %v6439_v27, 4  ;;  %vm15158_vm14 = vcmask 687104  }
 0x6d2   : > { %v4153_v2 = vsel %vm15154_vm9, %v4134_v23, %v4135_v6  ;;  %v4155_v16 = vsel %vm15155_vm4, %v4119_v9, %v4135_v6  ;;  %6313 = vrot.lane.b32.xlu1 %v6280_v56, %s14628_s22  ;;  %v6451_v23 = vrot.slane %v6402_v26, 6  ;;  %v3977_v6 = vrot.slane %v13194_v1, 4  ;;  %vm15159_vm13 = vmmov %vm15158_vm14 }
 0x6d3   : > { %v13427_v0 = vsel %vm15156_vm3, %v13186_v31, %v4153_v2  ;;  %4184 = vst.msk [vmem:[#allocation4 + $0x2a8] sm:$0xff] %vm11510_vm1, %v4155_v16  ;;  %v5333_v35 = vsel %vm15157_vm6, %v5314_v17, %v5315_v45  ;;  %v5335_v32 = vsel %vm15158_vm14, %v5299_v50, %v5315_v45  ;;  %v3962_v47 = vpop.permute.xlu0 %3961  ;;  %v6446_v2 = vsel %vm11729_vm0, %v6444_v38, %v6445_v33  ;;  %vm15163_vm3 = vmmov %vm15157_vm6 }
 0x6d4   : > { %v5334_v9 = vsel %vm15159_vm13, %v13318_v57, %v5333_v35  ;;  %5364 = vst.msk [vmem:[#allocation4 + $0x5c8] sm:$0xff] %vm11510_vm1, %v5335_v32  ;;  %v3978_v56 = vrot.slane %v3962_v47, 4  ;;  %v6046_v31 = vpop.permute.xlu1 %6045  ;;  %v6061_v16 = vrot.slane %v13339_v25, 4  ;;  %v4252_v50 = vsel %vm11714_vm12, %v13013_v59, %v4251_v43  ;;  %vm15166_vm13 = vmmov %vm15163_vm3 }
 0x6d5   : > { %5363 = vst [vmem:[#allocation4 + $0x5c0] sm:$0xff] %v5334_v9  ;;  %v6062_v17 = vrot.slane %v6046_v31, 4  ;;  %6476 = vrot.lane.b32.xlu0 %v6446_v2, %s15132_s20  ;;  %vm15161_vm9 = vcmask 883712   ;;  %v6450_v26 = vrot.slane %v6445_v33, 4  ;;  %vm15164_vm6 = vcmask 523264  }
 0x6d6   : > { %v3996_v57 = vsel %vm15160_vm11, %v3977_v6, %v3978_v56  ;;  %v3998_v45 = vsel %vm15161_vm9, %v3962_v47, %v3978_v56  ;;  %4279 = vrot.lane.b32.xlu1 %v4252_v50, %s14630_s30  ;;  %vm15162_vm4 = vmmov %vm15161_vm9  ;;  %v6284_v43 = vrot.slane %v6279_v4, 4  ;;  %v4567_v6 = vrot.slane %v13209_v51, 4 }
 0x6d7   : > { %v13450_v38 = vsel %vm15162_vm4, %v13194_v1, %v3996_v57  ;;  %4027 = vst.msk [vmem:[#allocation4 + $0x248] sm:$0xff] %vm11510_vm1, %v3998_v45  ;;  %v6080_v35 = vsel %vm15163_vm3, %v6061_v16, %v6062_v17  ;;  %v6082_v32 = vsel %vm15164_vm6, %v6046_v31, %v6062_v17  ;;  %v4552_v9 = vpop.permute.xlu0 %4551  ;;  %vm15165_vm14 = vmmov %vm15164_vm6  ;;  %v6452_v56 = vsel %vm11729_vm0, %v6450_v26, %v6451_v23  ;;  %v4790_v23 = vld [vmem:[#allocation3 + $0x68] sm:$0x11] }
 0x6d8   : > { %v6081_v47 = vsel %vm15165_vm14, %v13339_v25, %v6080_v35  ;;  %6111 = vst.msk [vmem:[#allocation4 + $0x7b8] sm:$0xff] %vm11510_vm1, %v6082_v32  ;;  %v4568_v33 = vrot.slane %v4552_v9, 4  ;;  %v5142_v1 = vpop.permute.xlu1 %5141  ;;  %v5157_v2 = vrot.slane %v13359_v61, 4  ;;  %v6286_v4 = vsel %vm11681_vm7, %v6284_v43, %v6285_v39  ;;  %v13469_v25 = vld [vmem:[#allocation3 + $0x30] sm:$0xff]  ;;  %vm15169_vm4 = vmmov %vm15163_vm3 }
 0x6d9   : > { %6110 = vst [vmem:[#allocation4 + $0x7b0] sm:$0xff] %v6081_v47  ;;  %v5158_v16 = vrot.slane %v5142_v1, 4  ;;  %6480 = vrot.lane.b32.xlu0 %v6452_v56, %s15132_s20  ;;  %vm15167_vm11 = vcmask 850944   ;;  %vm15170_vm3 = vcmask 695296   ;;  %v14588_v26 = vrot.slane %v13158_v44, 5  ;;  %vm15172_vm14 = vmmov %vm15169_vm4 }
 0x6da   : > { %v4586_v31 = vsel %vm15166_vm13, %v4567_v6, %v4568_v33  ;;  %v4588_v17 = vsel %vm15167_vm11, %v4552_v9, %v4568_v33  ;;  %6317 = vrot.lane.b32.xlu1 %v6286_v4, %s14628_s22  ;;  %vm15168_vm9 = vmmov %vm15167_vm11  ;;  %v5904_v9 = vrot.slane %v13382_v41, 4  ;;  %v4841_v6 = vrot.slane %v4790_v23, 5 }
 0x6db   : > { %v13476_v50 = vsel %vm15168_vm9, %v13209_v51, %v4586_v31  ;;  %4617 = vst.msk [vmem:[#allocation4 + $0x3d8] sm:$0xff] %vm11510_vm1, %v4588_v17  ;;  %v5176_v57 = vsel %vm15169_vm4, %v5157_v2, %v5158_v16  ;;  %v5178_v39 = vsel %vm15170_vm3, %v5142_v1, %v5158_v16  ;;  %v4397_v45 = vpop.permute.xlu0 %4396  ;;  %vm15171_vm6 = vmmov %vm15170_vm3  ;;  %v6433_v51 = vrot.slane %v13469_v25, 6 }
 0x6dc   : > { %v5177_v35 = vsel %vm15171_vm6, %v13359_v61, %v5176_v57  ;;  %5207 = vst.msk [vmem:[#allocation4 + $0x568] sm:$0xff] %vm11510_vm1, %v5178_v39  ;;  %v5889_v32 = vpop.permute.xlu1 %5888  ;;  %v7149_v47 = vcombine.high %v13329_v13, %v13329_v13  ;;  %vm15173_vm13 = vcmask 531456   ;;  %v4842_v31 = vsel %vm11714_vm12, %v13013_v59, %v4841_v6  ;;  %vm15175_vm9 = vmmov %vm15169_vm4 }
 0x6dd   : > { %5206 = vst [vmem:[#allocation4 + $0x560] sm:$0xff] %v5177_v35  ;;  %v5905_v43 = vrot.slane %v5889_v32, 4  ;;  %6613 = vrot.lane.b32.xlu0 %v14588_v26, %s14626_s27  ;;  %vm15174_vm11 = vmmov %vm15173_vm13  ;;  %v6434_v13 = vsel %vm11729_vm0, %v13265_v37, %v6433_v51  ;;  %v6438_v17 = vrot.slane %v6433_v51, 4  ;;  %vm15176_vm4 = vcmask 859136  }
 0x6de   : > { %6305 = vrot.lane.b32.xlu1 %v13080_v53, %s14628_s22  ;;  %v13499_v56 = vrot.slane %v7149_v47, %v10355_v5  ;;  %v4412_v53 = vrot.slane %v4397_v45, 4  ;;  %v3822_v39 = vrot.slane %v13294_v20, 4  ;;  %vm15177_vm3 = vmmov %vm15176_vm4  ;;  %v15178_v47 = vrot.slane %v13088_v22, 7 }
 0x6df   : > { %v5923_v61 = vsel %vm15172_vm14, %v5904_v9, %v5905_v43  ;;  %v5925_v33 = vsel %vm15173_vm13, %v5889_v32, %v5905_v43  ;;  %v5577_v1 = vpop.permute.xlu0 %5576  ;;  %v6440_v51 = vsel %vm11729_vm0, %v6438_v17, %v6439_v27  ;;  %vm15179_vm6 = vmmov %vm15175_vm9  ;;  %vm15180_vm14 = vcmask 1014784  }
 0x6e0   : > { %v5924_v2 = vsel %vm15174_vm11, %v13382_v41, %v5923_v61  ;;  %5954 = vst.msk [vmem:[#allocation4 + $0x758] sm:$0xff] %vm11510_vm1, %v5925_v33  ;;  %v4399_v16 = vpop.permute.xlu1 %4398  ;;  %v13514_v41 = vcombine.high %v13499_v56, %v13499_v56  ;;  %v5592_v43 = vrot.slane %v5577_v1, 4  ;;  %vm15181_vm13 = vmmov %vm15180_vm14 }
 0x6e1   : > { %5953 = vst [vmem:[#allocation4 + $0x750] sm:$0xff] %v5924_v2  ;;  %v4413_v4 = vrot.slane %v4399_v16, 4  ;;  %6468 = vrot.lane.b32.xlu0 %v6434_v13, %s15132_s20  ;;  %v4633_v2 = vld [vmem:[#allocation3 + $0x68] sm:$0x11]  ;;  %vm15182_vm11 = vmmov %vm15179_vm6 }
 0x6e2   : > { %4869 = vrot.lane.b32.xlu1 %v4842_v31, %s14623_s29  ;;  %8859 = vmatprep.mubr.bf16.mxu1 %v13514_v41  ;;  %v5380_v31 = vld [vmem:[#allocation3 + $0x68] sm:$0x11] }
 0x6e3   : > { %v4432_v23 = vsel %vm15175_vm9, %v4412_v53, %v4413_v4  ;;  %v4434_v37 = vsel %vm15176_vm4, %v4399_v16, %v4413_v4  ;;  %v3809_v57 = vpop.permute.xlu0 %3808  ;;  %vm15183_vm9 = vcmask 547840   ;;  %v6282_v4 = vrot.slane %v13385_v58, 7 }
 0x6e4   : > { %v4433_v35 = vsel %vm15177_vm3, %v4397_v45, %v4432_v23  ;;  %4462 = vst.msk [vmem:[#allocation4 + $0x388] sm:$0x11] %vm11306_vm5, %v4434_v37  ;;  %v3823_v32 = vrot.slane %v3809_v57, 4  ;;  %v5579_v9 = vpop.permute.xlu1 %5578  ;;  %v6274_v45 = vsel %vm11681_vm7, %v13086_v28, %v15178_v47  ;;  %vm15184_vm4 = vmmov %vm15183_vm9 }
 0x6e5   : > { %4461 = vst [vmem:[#allocation4 + $0x380] sm:$0x11] %v4433_v35  ;;  %v5593_v6 = vrot.slane %v5579_v9, 4  ;;  %6472 = vrot.lane.b32.xlu0 %v6440_v51, %s15132_s20  ;;  %vm15185_vm3 = vmmov %vm15179_vm6 }
 0x6e6   : > { %v3842_v61 = vsel %vm15179_vm6, %v3822_v39, %v3823_v32  ;;  %v3844_v33 = vsel %vm15180_vm14, %v3809_v57, %v3823_v32  ;;  %6309 = vrot.lane.b32.xlu1 %v6274_v45, %s14628_s22  ;;  %v6245_v57 = vld [vmem:[#allocation3 + $0x60] sm:$0x11]  ;;  %v6287_v39 = vrot.slane %v6282_v4, 4  ;;  %vm15186_vm6 = vcmask 1039360  }
 0x6e7   : > { %v3843_v27 = vsel %vm15181_vm13, %v13294_v20, %v3842_v61  ;;  %3872 = vst.msk [vmem:[#allocation4 + $0x1f8] sm:$0x11] %vm11306_vm5, %v3844_v33  ;;  %v5612_v16 = vsel %vm15182_vm11, %v5592_v43, %v5593_v6  ;;  %v5614_v22 = vsel %vm15183_vm9, %v5579_v9, %v5593_v6  ;;  %v3366_v13 = vpop.permute.xlu0 %3365  ;;  %v4684_v20 = vrot.slane %v4633_v2, 6  ;;  %v5223_v6 = vld [vmem:[#allocation3 + $0x68] sm:$0x11]  ;;  %vm15187_vm14 = vmmov %vm15186_vm6 }
 0x6e8   : > { %3871 = vst [vmem:[#allocation4 + $0x1f0] sm:$0x11] %v3843_v27  ;;  %v5613_v28 = vsel %vm15184_vm4, %v5577_v1, %v5612_v16  ;;  %5642 = vst.msk [vmem:[#allocation4 + $0x6a8] sm:$0x11] %vm11306_vm5, %v5614_v22  ;;  %v13546_v53 = vpop.permute.xlu1 %4120  ;;  %v6288_v1 = vrot.slane %v13306_v3, 7  ;;  %v6294_v51 = vrot.slane %v6245_v57, 7 }
 0x6e9   : > { %5641 = vst [vmem:[#allocation4 + $0x6a0] sm:$0x11] %v5613_v28  ;;  %6460 = vrot.lane.b32.xlu0 %v13413_v62, %s15132_s20  ;;  %v4685_v37 = vsel %vm11729_vm0, %v13002_v46, %v4684_v20  ;;  %v5431_v62 = vrot.slane %v5380_v31, 5  ;;  %v3381_v33 = vrot.slane %v3366_v13, 4  ;;  %v6127_v27 = vld [vmem:[#allocation3 + $0x68] sm:$0x11]  ;;  %vm15193_vm4 = vmmov %vm15185_vm3 }
 0x6ea   : > { %6164 = vrot.lane.b32.xlu1 %v13168_v7, %s14823_s1  ;;  %v6289_v9 = vsel %vm11681_vm7, %v6287_v39, %v6288_v1  ;;  %v6293_v43 = vrot.slane %v6288_v1, 4  ;;  %v5274_v16 = vrot.slane %v5223_v6, 6  ;;  %v5970_v22 = vld [vmem:[#allocation3 + $0x68] sm:$0x11]  ;;  %vm15188_vm13 = vcmask 1042432  }
 0x6eb   : > { %v3527_v17 = vpop.permute.xlu0 %3526  ;;  %vm15189_vm11 = vcmask 129028  }
 0x6ec   : > { %v13553_v23 = vpop.permute.xlu1 %3963  ;;  %v6295_v61 = vsel %vm11681_vm7, %v6293_v43, %v6294_v51  ;;  %vm13589_vm9 = vmor %vm15189_vm11, %vm15188_vm13  ;;  %v3542_v39 = vrot.slane %v3527_v17, 4  ;;  %v6021_v51 = vrot.slane %v5970_v22, 5  ;;  %vm15197_vm13 = vcmask 1022976  }
 0x6ed   : > { %6464 = vrot.lane.b32.xlu0 %v13255_v60, %s15132_s20  ;;  %v5432_v60 = vsel %vm11714_vm12, %v13013_v59, %v5431_v62  ;;  %v6276_v62 = vrot.slane %v13469_v25, 7  ;;  %vm15198_vm11 = vmmov %vm15197_vm13 }
 0x6ee   : > { %4712 = vrot.lane.b32.xlu1 %v4685_v37, %s14828_s12 }
 0x6ef   : > { %v3688_v35 = vpop.permute.xlu0 %3687  ;;  %v6281_v22 = vrot.slane %v6276_v62, 4 }
 0x6f0   : > { %v13564_v32 = vpop.permute.xlu1 %4553 }
 0x6f1   : > { %6319 = vrot.lane.b32.xlu0 %v6289_v9, %s14628_s22 }
 0x6f2   : > { %5459 = vrot.lane.b32.xlu1 %v5432_v60, %s14627_s19  ;;  %v15192_v60 = vrot.slane %v11668_v8, 7  ;;  %v6022_v8 = vsel %vm11714_vm12, %v13013_v59, %v6021_v51  ;;  %v6283_v59 = vsel %vm11681_vm7, %v6281_v22, %v6282_v4  ;;  %v6846_v51 = vld [vmem:[#allocation4 + $0xa0] sm:$0xff] }
 0x6f3   : > { %v13573_v47 = vpop.permute.xlu0 %4277  ;;  %v9855_v22 = vld [vmem:[#allocation4 + $0x80] ss:$16 sps:$4 sm:$0xff]  }
 0x6f4   : > { %v3368_v45 = vpop.permute.xlu1 %3367  ;;  %v6275_v43 = vrot.slane %v15192_v60, 4 }
 0x6f5   : > { %v3382_v2 = vrot.slane %v3368_v45, 4  ;;  %6323 = vrot.lane.b32.xlu0 %v6295_v61, %s14628_s22 }
 0x6f6   : > { %6168 = vrot.lane.b32.xlu1 %v6127_v27, %s14823_s1  ;;  %v3703_v27 = vrot.slane %v3688_v35, 4 }
 0x6f7   : > { %v3401_v28 = vsel %vm15185_vm3, %v3381_v33, %v3382_v2  ;;  %v3403_v20 = vsel %vm15186_vm6, %v3368_v45, %v3382_v2  ;;  %v13581_v31 = vpop.permute.xlu0 %4867  ;;  %vm15194_vm3 = vcmask 1031168   ;;  %v6277_v2 = vsel %vm11681_vm7, %v6275_v43, %v6276_v62  ;;  %v5813_v43 = vld [vmem:[#allocation3 + $0x68] sm:$0x11] }
 0x6f8   : > { %v3402_v1 = vsel %vm15187_vm14, %v3366_v13, %v3401_v28  ;;  %3434 = vst.msk [vmem:[#allocation4 + $0xc8] sm:$0x33] %vm10369_vm2, %v3403_v20  ;;  %v3529_v37 = vpop.permute.xlu1 %3528  ;;  %v5275_v13 = vsel %vm11729_vm0, %v13002_v46, %v5274_v16  ;;  %vm15195_vm6 = vmmov %vm15194_vm3 }
 0x6f9   : > { %3433 = vst [vmem:[#allocation4 + $0xc0] sm:$0x33] %v3402_v1  ;;  %v3543_v9 = vrot.slane %v3529_v37, 4  ;;  %6456 = vrot.lane.b32.xlu0 %v13378_v63, %s15132_s20  ;;  %vm15196_vm14 = vmmov %vm15193_vm4 }
 0x6fa   : > { %5302 = vrot.lane.b32.xlu1 %v5275_v13, %s14829_s2  ;;  %s15213_s2 = smov 44  }
 0x6fb   : > { %v3562_v6 = vsel %vm15193_vm4, %v3542_v39, %v3543_v9  ;;  %v3564_v45 = vsel %vm15194_vm3, %v3529_v37, %v3543_v9  ;;  %v13603_v61 = vpop.permute.xlu0 %4710  ;;  %vm15199_vm4 = vcmask 695296  }
 0x6fc   : > { %v3563_v33 = vsel %vm15195_vm6, %v3527_v17, %v3562_v6  ;;  %3595 = vst.msk [vmem:[#allocation4 + $0x128] sm:$0x77] %vm13589_vm9, %v3564_v45  ;;  %v3690_v63 = vpop.permute.xlu1 %3689  ;;  %v5066_v17 = vld [vmem:[#allocation3 + $0x68] sm:$0x11]  ;;  %vm15200_vm3 = vmmov %vm15199_vm4  ;;  %vm15201_vm6 = vcmask 531456  }
 0x6fd   : > { %3591 = vst [vmem:[#allocation4 + $0x120] sm:$0x77] %v3563_v33  ;;  %v3704_v16 = vrot.slane %v3690_v63, 4  ;;  %6311 = vrot.lane.b32.xlu0 %v6277_v2, %s14628_s22  ;;  %v5117_v60 = vrot.slane %v5066_v17, 7  ;;  %v9384_v33 = vcombine.low %v6846_v51, %v13249_v42  ;;  %v5864_v2 = vrot.slane %v5813_v43, 6 }
 0x6fe   : > { %6049 = vrot.lane.b32.xlu1 %v6022_v8, %s14622_s11 }
 0x6ff   : > { %v3723_v28 = vsel %vm15196_vm14, %v3703_v27, %v3704_v16  ;;  %v3725_v20 = vsel %vm15197_vm13, %v3690_v63, %v3704_v16  ;;  %v13617_v1 = vpop.permute.xlu0 %5457  ;;  %v5118_v63 = vsel %vm11681_vm7, %v12985_v52, %v5117_v60  ;;  %v9857_v27 = vld [vmem:[#allocation4 + $0x84] ss:$16 sps:$4 sm:$0xff]   ;;  %v5865_v17 = vsel %vm11729_vm0, %v13002_v46, %v5864_v2  ;;  %v9858_v46 = vld [vmem:[#allocation4 + $0x60] ss:$16 sps:$4 sm:$0xff]   ;;  %vm15202_vm14 = vmmov %vm15201_vm6 }
 0x700   : > { %v13620_v37 = vsel %vm15198_vm11, %v3688_v35, %v3723_v28  ;;  %3753 = vst.msk [vmem:[#allocation4 + $0x188] sm:$0xff] %vm11510_vm1, %v3725_v20  ;;  %v13624_v39 = vpop.permute.xlu1 %5125  ;;  %v9852_v62 = vld [vmem:[#allocation4 + $0xc0] ss:$16 sps:$4 sm:$0xff]   ;;  %v9854_v9 = vld [vmem:[#allocation4 + $0xc4] ss:$16 sps:$4 sm:$0xff]   ;;  %v9385_v35 = vcombine.high %v6846_v51, %v13249_v42  ;;  %vm15203_vm13 = vcmask 703488  }
 0x701   : > { %v5150_v13 = vrot.slane %v13624_v39, 4  ;;  %6315 = vrot.lane.b32.xlu0 %v6283_v59, %s14628_s22  ;;  %8788 = vmatprep.subr.bf16.mxu0 %v9854_v9  ;;  %v9860_v28 = vld [vmem:[#allocation4 + $0x64] ss:$16 sps:$4 sm:$0xff]   ;;  %v5656_v51 = vld [vmem:[#allocation3 + $0x68] sm:$0x11]  ;;  %vm15204_vm11 = vcmask 1043456  }
 0x702   : > { %6301 = vrot.lane.b32.xlu1 %v13037_v24, %s14628_s22  ;;  %8789 = vmatpush1.bf16.msra.mxu0 %v9852_v62  ;;  %v9863_v9 = vld [vmem:[#allocation4 + $0x44] ss:$16 sps:$4 sm:$0xff]   ;;  %v6403_v2 = vld [vmem:[#allocation3 + $0x68] sm:$0x11] }
 0x703   : > { %v5166_v4 = vsel %vm15199_vm4, %v13624_v39, %v5150_v13  ;;  %v13639_v6 = vpop.permute.xlu0 %5300  ;;  %8790 = vmatprep.subr.bf16.mxu0 %v9385_v35  ;;  %vm15205_vm4 = vcmask 875520  }
 0x704   : > { %5199 = vst.msk [vmem:[#allocation4 + $0x528] sm:$0xff] %vm11510_vm1, %v5166_v4  ;;  %v13643_v45 = vpop.permute.xlu1 %5129 }
 0x705   : > { %v5152_v24 = vrot.slane %v13643_v45, 4  ;;  %6303 = vrot.lane.b32.xlu0 %v13200_v30, %s14628_s22 }
 0x706   : > { %5145 = vrot.lane.b32.xlu1 %v5118_v63, %s14625_s23  ;;  %8791 = vmatpush1.bf16.msra.mxu0 %v9384_v33  ;;  %v5707_v33 = vrot.slane %v5656_v51, 7  ;;  %v9866_v63 = vld [vmem:[#allocation4 + $0x24] ss:$16 sps:$4 sm:$0xff]  }
 0x707   : > { %v5169_v16 = vsel %vm15200_vm3, %v13643_v45, %v5152_v24  ;;  %v13657_v8 = vpop.permute.xlu0 %6047  ;;  %8792 = vmatprep.subr.bf16.mxu0 %v9857_v27  ;;  %vm15206_vm3 = vmmov %vm15205_vm4 }
 0x708   : > { %5201 = vst.msk [vmem:[#allocation4 + $0x538] sm:$0xff] %vm11510_vm1, %v5169_v16  ;;  %v13661_v30 = vpop.permute.xlu1 %5876 }
 0x709   : > { %v5899_v42 = vrot.slane %v13661_v30, 4  ;;  %6307 = vrot.lane.b32.xlu0 %v11690_v54, %s14628_s22 }
 0x70a   : > { %5892 = vrot.lane.b32.xlu1 %v5865_v17, %s15014_s3  ;;  %8793 = vmatpush1.bf16.msra.mxu0 %v9855_v22  ;;  %v4136_v22 = vrot.slane %v13546_v53, 4 }
 0x70b   : > { %v5916_v20 = vsel %vm15201_vm6, %v13661_v30, %v5899_v42  ;;  %v13674_v59 = vpop.permute.xlu0 %5143  ;;  %8794 = vmatprep.subr.bf16.mxu0 %v9860_v28  ;;  %vm15207_vm6 = vmmov %vm15203_vm13 }
 0x70c   : > { %5948 = vst.msk [vmem:[#allocation4 + $0x728] sm:$0xff] %vm11510_vm1, %v5916_v20  ;;  %v13678_v54 = vpop.permute.xlu1 %5880  ;;  %v9864_v20 = vld [vmem:[#allocation4 + $0x20] ss:$16 sps:$4 sm:$0xff]  }
 0x70d   : > { %v5901_v62 = vrot.slane %v13678_v54, 4  ;;  %6162 = vrot.lane.b32.xlu0 %v13306_v3, %s14823_s1  ;;  %v6126_v3 = vld [vmem:[#allocation3 + $0x60] sm:$0x11] }
 0x70e   : > { %6156 = vrot.lane.b32.xlu1 %v13267_v48, %s14823_s1  ;;  %8795 = vmatpush1.bf16.msra.mxu0 %v9858_v46  ;;  %v9861_v48 = vld [vmem:[#allocation4 + $0x40] ss:$16 sps:$4 sm:$0xff]   ;;  %v5708_v46 = vsel %vm11681_vm7, %v12985_v52, %v5707_v33  ;;  %v15208_v33 = vrot.slane %v13168_v7, 6 }
 0x70f   : > { %v5919_v60 = vsel %vm15202_vm14, %v13678_v54, %v5901_v62  ;;  %v13689_v35 = vpop.permute.xlu0 %5890  ;;  %8796 = vmatprep.subr.bf16.mxu0 %v9863_v9  ;;  %v6454_v9 = vrot.slane %v6403_v2, 6  ;;  %vm15209_vm14 = vmmov %vm15204_vm11 }
 0x710   : > { %5950 = vst.msk [vmem:[#allocation4 + $0x738] sm:$0xff] %vm11510_vm1, %v5919_v60  ;;  %v13693_v43 = vpop.permute.xlu1 %4984 }
 0x711   : > { %v5001_v4 = vrot.slane %v13693_v43, 4  ;;  %6166 = vrot.lane.b32.xlu0 %v6126_v3, %s14823_s1  ;;  %v9869_v3 = vld [vmem:[#allocation4 + $0x4] ss:$16 sps:$4 sm:$0xff]  }
 0x712   : > { %6160 = vrot.lane.b32.xlu1 %v13215_v55, %s14823_s1  ;;  %8797 = vmatpush1.bf16.msra.mxu0 %v9861_v48 }
 0x713   : > { %v5021_v27 = vsel %vm15203_vm13, %v13693_v43, %v5001_v4  ;;  %v4123_v16 = vpop.permute.xlu0 %4122  ;;  %8798 = vmatprep.subr.bf16.mxu0 %v9866_v63  ;;  %v6453_v63 = vrot.slane %v15208_v33, 4  ;;  %vm15210_vm13 = vcmask 695296  }
 0x714   : > { %5050 = vst.msk [vmem:[#allocation4 + $0x508] sm:$0xff] %vm11510_vm1, %v5021_v27  ;;  %v4137_v17 = vrot.slane %v4123_v16, 4  ;;  %v13706_v28 = vpop.permute.xlu1 %4988 }
 0x715   : > { %v5003_v55 = vrot.slane %v13706_v28, 4  ;;  %6299 = vrot.lane.b32.xlu0 %v13175_v19, %s14628_s22 }
 0x716   : > { %v4156_v51 = vsel %vm15204_vm11, %v4136_v22, %v4137_v17  ;;  %v4158_v60 = vsel %vm15205_vm4, %v4123_v16, %v4137_v17  ;;  %5735 = vrot.lane.b32.xlu1 %v5708_v46, %s14629_s26  ;;  %8799 = vmatpush1.bf16.msra.mxu0 %v9864_v20  ;;  %v9867_v16 = vld [vmem:[#allocation4] ss:$16 sps:$4 sm:$0xff]   ;;  %v6455_v22 = vsel %vm11729_vm0, %v6453_v63, %v6454_v9  ;;  %v9872_v20 = vld [vmem:[#allocation4 + $0x1e4] ss:$16 sps:$4 sm:$0xff]   ;;  %vm15211_vm11 = vmmov %vm15210_vm13 }
 0x717   : > { %v4157_v48 = vsel %vm15206_vm3, %v13546_v53, %v4156_v51  ;;  %4186 = vst.msk [vmem:[#allocation4 + $0x2b8] sm:$0x77] %vm13589_vm9, %v4158_v60  ;;  %v5024_v19 = vsel %vm15207_vm6, %v13706_v28, %v5003_v55  ;;  %v5124_v52 = vpop.permute.xlu0 %5123  ;;  %8800 = vmatprep.subr.bf16.mxu0 %v9869_v3  ;;  %v9870_v9 = vld [vmem:[#allocation4 + $0x1e0] ss:$16 sps:$4 sm:$0xff]   ;;  %v6717_v3 = vld [vmem:[#allocation3 + $0x68] sm:$0x11]  ;;  %vm15212_vm0 = vmmov %vm15209_vm14 }
 0x718   : > { %4185 = vst [vmem:[#allocation4 + $0x2b0] sm:$0x77] %v4157_v48  ;;  %5052 = vst.msk [vmem:[#allocation4 + $0x518] sm:$0x11] %vm11306_vm5, %v5024_v19  ;;  %v5149_v2 = vrot.slane %v5124_v52, 4  ;;  %v13729_v27 = vpop.permute.xlu1 %5121  ;;  %vm15215_vm3 = vcmask 531456  }
 0x719   : > { %v5148_v53 = vrot.slane %v13729_v27, 4  ;;  %6154 = vrot.lane.b32.xlu0 %v13469_v25, %s14823_s1  ;;  %v9875_v19 = vld [vmem:[#allocation4 + $0x1c4] ss:$16 sps:$4 sm:$0xff]   ;;  %vm15214_vm4 = vmmov %vm15211_vm11 }
 0x71a   : > { %v5164_v17 = vsel %vm15209_vm14, %v5149_v2, %v5150_v13  ;;  %6482 = vrot.lane.b32.xlu1 %v6455_v22, %s15132_s20  ;;  %8801 = vmatpush1.bf16.msra.mxu0 %v9867_v16  ;;  %v3979_v22 = vrot.slane %v13553_v23, 4  ;;  %vm15216_vm6 = vmmov %vm15212_vm0  ;;  %vm15217_vm14 = vcmask 883712  }
 0x71b   : > { %v5165_v46 = vsel %vm15210_vm13, %v5124_v52, %v5164_v17  ;;  %v5163_v51 = vsel %vm15211_vm11, %v13729_v27, %v5148_v53  ;;  %v5128_v60 = vpop.permute.xlu0 %5127  ;;  %8802 = vmatprep.subr.bf16.mxu0 %v9872_v20  ;;  %v6246_v52 = vld [vmem:[#allocation3 + $0x68] sm:$0x11]  ;;  %v6716_v17 = vld [vmem:[#allocation3 + $0x60] sm:$0x11]  ;;  %vm15218_vm13 = vmmov %vm15217_vm14 }
 0x71c   : > { %5198 = vst [vmem:[#allocation4 + $0x520] sm:$0xff] %v5165_v46  ;;  %5197 = vst.msk [vmem:[#allocation4 + $0x518] sm:$0xee] %vm11845_vm10, %v5163_v51  ;;  %v5151_v10 = vrot.slane %v5128_v60, 4  ;;  %v13747_v39 = vpop.permute.xlu1 %5868 }
 0x71d   : > { %v5895_v13 = vrot.slane %v13747_v39, 4  ;;  %6158 = vrot.lane.b32.xlu0 %v13385_v58, %s14823_s1  ;;  %vm15219_vm11 = vmmov %vm15215_vm3 }
 0x71e   : > { %v5167_v48 = vsel %vm15212_vm0, %v5151_v10, %v5152_v24  ;;  %6758 = vrot.lane.b32.xlu1 %v6717_v3, %s15213_s2  ;;  %8803 = vmatpush2.bf16.msra.mxu0 %v9870_v9  ;;  %v13770_v10 = vld [vmem:[#allocation3 + $0x48] sm:$0xff]  ;;  %v6297_v9 = vrot.slane %v6246_v52, 7 }
 0x71f   : > { %v5168_v33 = vsel %vm15214_vm4, %v5128_v60, %v5167_v48  ;;  %v5910_v63 = vsel %vm15215_vm3, %v13747_v39, %v5895_v13  ;;  %v3966_v2 = vpop.permute.xlu0 %3965  ;;  %v6912_v16 = vld [vmem:[#allocation4 + $0x2b0] sm:$0xff]  ;;  %8804 = vmatprep.subr.bf16.mxu0 %v9875_v19  ;;  %vm15221_vm4 = vmmov %vm15215_vm3  ;;  %vm15222_vm3 = vcmask 375808  }
 0x720   : > { %5200 = vst [vmem:[#allocation4 + $0x530] sm:$0xff] %v5168_v33  ;;  %5944 = vst.msk [vmem:[#allocation4 + $0x708] sm:$0xcc] %vm10519_vm8, %v5910_v63  ;;  %v3980_v45 = vrot.slane %v3966_v2, 4  ;;  %v13764_v24 = vpop.permute.xlu1 %5872  ;;  %v9448_v20 = vcombine.low %v13427_v0, %v6912_v16  ;;  %v9449_v46 = vcombine.high %v13427_v0, %v6912_v16  ;;  %v9873_v60 = vld [vmem:[#allocation4 + $0x1c0] ss:$16 sps:$4 sm:$0xff]  }
 0x721   : > { %v5897_v51 = vrot.slane %v13764_v24, 4  ;;  %6756 = vrot.lane.b32.xlu0 %v6716_v17, %s15213_s2  ;;  %v9878_v19 = vld [vmem:[#allocation4 + $0x284] ss:$16 sps:$4 sm:$0xff]  }
 0x722   : > { %v3999_v3 = vsel %vm15216_vm6, %v3979_v22, %v3980_v45  ;;  %v4001_v48 = vsel %vm15217_vm14, %v3966_v2, %v3980_v45  ;;  %6750 = vrot.lane.b32.xlu1 %v13770_v10, %s15213_s2  ;;  %8831 = vmatprep.subr.bf16.mxu1 %v9449_v46  ;;  %v9881_v33 = vld [vmem:[#allocation4 + $0x1a4] ss:$16 sps:$4 sm:$0xff]   ;;  %v15220_v2 = vrot.slane %v13168_v7, 7  ;;  %v9876_v45 = vld [vmem:[#allocation4 + $0x280] ss:$16 sps:$4 sm:$0xff]   ;;  %vm15224_vm6 = vmmov %vm15221_vm4  ;;  %vm15225_vm14 = vcmask 367616  }
 0x723   : > { %v4000_v0 = vsel %vm15218_vm13, %v13553_v23, %v3999_v3  ;;  %4029 = vst.msk [vmem:[#allocation4 + $0x258] sm:$0x33] %vm10369_vm2, %v4001_v48  ;;  %v5913_v52 = vsel %vm15219_vm11, %v13764_v24, %v5897_v51  ;;  %v5875_v63 = vpop.permute.xlu0 %5874  ;;  %8832 = vmatpush1.bf16.msra.mxu1 %v9448_v20  ;;  %8805 = vmatpush2.bf16.msra.mxu0 %v9873_v60  ;;  %v9879_v20 = vld [vmem:[#allocation4 + $0x1a0] ss:$16 sps:$4 sm:$0xff]   ;;  %v9884_v3 = vld [vmem:[#allocation4 + $0x264] ss:$16 sps:$4 sm:$0xff]   ;;  %vm15226_vm13 = vmmov %vm15212_vm0 }
 0x724   : > { %v6296_v16 = vrot.slane %v15220_v2, 4  ;;  %4028 = vst [vmem:[#allocation4 + $0x250] sm:$0x33] %v4000_v0  ;;  %5946 = vst.msk [vmem:[#allocation4 + $0x718] sm:$0xff] %vm11510_vm1, %v5913_v52  ;;  %v5898_v22 = vrot.slane %v5875_v63, 4  ;;  %8833 = vmatprep.subr.bf16.mxu1 %v9878_v19  ;;  %v13788_v23 = vpop.permute.xlu1 %6478  ;;  %8806 = vmatprep.subr.bf16.mxu0 %v9881_v33  ;;  %v6876_v46 = vld [vmem:[#allocation4 + $0x190] sm:$0xff] }
 0x725   : > { %v14590_v17 = vrot.slane %v13788_v23, 4  ;;  %6748 = vrot.lane.b32.xlu0 %v13385_v58, %s15213_s2  ;;  %v9413_v48 = vcombine.high %v13620_v37, %v6876_v46  ;;  %v9412_v52 = vcombine.low %v13620_v37, %v6876_v46  ;;  %v13832_v46 = vld [vmem:[#allocation3 + $0x20] sm:$0xff] }
 0x726   : > { %v6298_v7 = vsel %vm11681_vm7, %v6296_v16, %v6297_v9  ;;  %v5914_v60 = vsel %vm15212_vm0, %v5898_v22, %v5899_v42  ;;  %v13809_v42 = vld [vmem:[#allocation3 + $0x50] sm:$0xff]  ;;  %vm15223_vm7 = vmmov %vm15212_vm0 }
 0x727   : > { %6325 = vrot.lane.b32.xlu1 %v6298_v7, %s14628_s22  ;;  %v5915_v19 = vsel %vm15221_vm4, %v5875_v63, %v5914_v60  ;;  %v6515_v58 = vsel %vm15222_vm3, %v13788_v23, %v14590_v17  ;;  %v5879_v33 = vpop.permute.xlu0 %5878  ;;  %8834 = vmatpush1.bf16.msra.mxu1 %v9876_v45  ;;  %v9882_v9 = vld [vmem:[#allocation4 + $0x260] ss:$16 sps:$4 sm:$0xff]   ;;  %v13815_v63 = vld [vmem:[#allocation3 + $0x58] sm:$0xff]  ;;  %v9887_v16 = vld [vmem:[#allocation4 + $0x164] ss:$16 sps:$4 sm:$0xff]   ;;  %v4569_v7 = vrot.slane %v13564_v32, 4 }
 0x728   : > { %8807 = vmatpush2.bf16.msra.mxu0 %v9879_v20  ;;  %5947 = vst [vmem:[#allocation4 + $0x720] sm:$0xff] %v5915_v19  ;;  %6544 = vst.msk [vmem:[#allocation4 + $0x8e8] sm:$0xff] %vm11510_vm1, %v6515_v58  ;;  %v5900_v40 = vrot.slane %v5879_v33, 4  ;;  %8835 = vmatprep.subr.bf16.mxu1 %v9884_v3  ;;  %v13807_v30 = vpop.permute.xlu1 %6615  ;;  %v9885_v19 = vld [vmem:[#allocation4 + $0x160] ss:$16 sps:$4 sm:$0xff]   ;;  %v13839_v58 = vld [vmem:[#allocation3 + $0x28] sm:$0xff] }
 0x729   : > { %8808 = vmatprep.subr.bf16.mxu0 %v9413_v48  ;;  %v14587_v0 = vrot.slane %v13807_v30, 4  ;;  %6752 = vrot.lane.b32.xlu0 %v13809_v42, %s15213_s2  ;;  %vm15229_vm0 = vmmov %vm15222_vm3  ;;  %vm15231_vm3 = vcmask 703488  }
 0x72a   : > { %v5917_v2 = vsel %vm15223_vm7, %v5900_v40, %v5901_v62  ;;  %v9890_v40 = vld [vmem:[#allocation4 + $0x224] ss:$16 sps:$4 sm:$0xff]   ;;  %vm15230_vm4 = vmmov %vm15223_vm7 }
 0x72b   : > { %6754 = vrot.lane.b32.xlu1 %v13815_v63, %s15213_s2  ;;  %v5918_v22 = vsel %vm15224_vm6, %v5879_v33, %v5917_v2  ;;  %v6657_v45 = vsel %vm15225_vm14, %v13807_v30, %v14587_v0  ;;  %v4556_v20 = vpop.permute.xlu0 %4555  ;;  %8836 = vmatpush1.bf16.msra.mxu1 %v9882_v9  ;;  %v6900_v37 = vld [vmem:[#allocation4 + $0x250] sm:$0xff]  ;;  %vm15232_vm7 = vmmov %vm15229_vm0 }
 0x72c   : > { %8809 = vmatpush2.bf16.msra.mxu0 %v9412_v52  ;;  %5949 = vst [vmem:[#allocation4 + $0x730] sm:$0xff] %v5918_v22  ;;  %6691 = vst.msk [vmem:[#allocation4 + $0x8f8] sm:$0x88] %vm14869_vm15, %v6657_v45  ;;  %v4570_v54 = vrot.slane %v4556_v20, 4  ;;  %v13830_v62 = vpop.permute.xlu1 %6470  ;;  %v9436_v60 = vcombine.low %v13450_v38, %v6900_v37  ;;  %v9437_v3 = vcombine.high %v13450_v38, %v6900_v37  ;;  %vm15227_vm15 = vcmask 850944   ;;  %v13860_v37 = vld [vmem:[#allocation3 + $0x38] sm:$0xff] }
 0x72d   : > { %8810 = vmatprep.subr.bf16.mxu0 %v9887_v16  ;;  %v14586_v48 = vrot.slane %v13830_v62, 4  ;;  %6740 = vrot.lane.b32.xlu0 %v13832_v46, %s15213_s2  ;;  %v9893_v9 = vld [vmem:[#allocation4 + $0x144] ss:$16 sps:$4 sm:$0xff]   ;;  %vm15228_vm11 = vmmov %vm15227_vm15 }
 0x72e   : > { %v4589_v21 = vsel %vm15226_vm13, %v4569_v7, %v4570_v54  ;;  %v4591_v33 = vsel %vm15227_vm15, %v4556_v20, %v4570_v54  ;;  %8837 = vmatprep.subr.bf16.mxu1 %v9437_v3  ;;  %v9891_v20 = vld [vmem:[#allocation4 + $0x140] ss:$16 sps:$4 sm:$0xff]   ;;  %v9896_v54 = vld [vmem:[#allocation4 + $0x204] ss:$16 sps:$4 sm:$0xff]   ;;  %vm15233_vm6 = vmmov %vm15230_vm4 }
 0x72f   : > { %6742 = vrot.lane.b32.xlu1 %v13839_v58, %s15213_s2  ;;  %v4590_v38 = vsel %vm15228_vm11, %v13564_v32, %v4589_v21  ;;  %4619 = vst.msk [vmem:[#allocation4 + $0x3e8] sm:$0x33] %vm10369_vm2, %v4591_v33  ;;  %v6509_v52 = vsel %vm15229_vm0, %v13830_v62, %v14586_v48  ;;  %v4983_v2 = vpop.permute.xlu0 %4982  ;;  %8838 = vmatpush1.bf16.msra.mxu1 %v9436_v60  ;;  %v9888_v32 = vld [vmem:[#allocation4 + $0x220] ss:$16 sps:$4 sm:$0xff]   ;;  %v9899_v60 = vld [vmem:[#allocation4 + $0x124] ss:$16 sps:$4 sm:$0xff]   ;;  %vm15234_vm14 = vmmov %vm15231_vm3 }
 0x730   : > { %8811 = vmatpush2.bf16.msra.mxu0 %v9885_v19  ;;  %4618 = vst [vmem:[#allocation4 + $0x3e0] sm:$0x33] %v4590_v38  ;;  %6540 = vst.msk [vmem:[#allocation4 + $0x8c8] sm:$0xff] %vm11510_vm1, %v6509_v52  ;;  %v5000_v16 = vrot.slane %v4983_v2, 4  ;;  %8839 = vmatprep.subr.bf16.mxu1 %v9890_v40  ;;  %v13855_v22 = vpop.permute.xlu1 %6474  ;;  %v13872_v21 = vld [vmem:[#allocation3 + $0x40] sm:$0xff]  ;;  %v6705_v52 = vld [vmem:[#allocation3 + $0x8] sm:$0xff] }
 0x731   : > { %8812 = vmatprep.subr.bf16.mxu0 %v9893_v9  ;;  %v14585_v45 = vrot.slane %v13855_v22, 4  ;;  %6744 = vrot.lane.b32.xlu0 %v13469_v25, %s15213_s2  ;;  %v6704_v33 = vld [vmem:[#allocation3] sm:$0xff]  ;;  %vm15235_vm13 = vmmov %vm15229_vm0  ;;  %vm15237_vm11 = vcmask 695296  }
 0x732   : > { %v5019_v7 = vsel %vm15230_vm4, %v5000_v16, %v5001_v4  ;;  %v9894_v40 = vld [vmem:[#allocation4 + $0x200] ss:$16 sps:$4 sm:$0xff]   ;;  %vm15236_vm15 = vmmov %vm15230_vm4  ;;  %v9908_v48 = vld [vmem:[#allocation4 + $0x4e4] ss:$16 sps:$4 sm:$0xff]   ;;  %vm15238_vm4 = vcmask 384000  }
 0x733   : > { %6746 = vrot.lane.b32.xlu1 %v13860_v37, %s15213_s2  ;;  %v5020_v3 = vsel %vm15231_vm3, %v4983_v2, %v5019_v7  ;;  %v6512_v19 = vsel %vm15232_vm7, %v13855_v22, %v14585_v45  ;;  %v4987_v25 = vpop.permute.xlu0 %4986  ;;  %8840 = vmatpush1.bf16.msra.mxu1 %v9888_v32  ;;  %v9897_v38 = vld [vmem:[#allocation4 + $0x120] ss:$16 sps:$4 sm:$0xff]   ;;  %v9902_v32 = vld [vmem:[#allocation4 + $0x104] ss:$16 sps:$4 sm:$0xff]   ;;  %v13890_v7 = vld [vmem:[%s14481_s7 + $0x8] sm:$0xff]  ;;  %vm15240_vm7 = vcmask 531456  }
 0x734   : > { %8813 = vmatpush2.bf16.msra.mxu0 %v9891_v20  ;;  %5049 = vst [vmem:[#allocation4 + $0x500] sm:$0xff] %v5020_v3  ;;  %6542 = vst.msk [vmem:[#allocation4 + $0x8d8] sm:$0xff] %vm11510_vm1, %v6512_v19  ;;  %v5002_v43 = vrot.slane %v4987_v25, 4  ;;  %8841 = vmatprep.subr.bf16.mxu1 %v9896_v54  ;;  %v13876_v4 = vpop.permute.xlu1 %6462  ;;  %v13884_v16 = vld [vmem:[#allocation3 + $0x10] sm:$0xff]  ;;  %v14591_v20 = vrot.slane %v13872_v21, 5  ;;  %v6599_v19 = vrot.slane %v13770_v10, 5 }
 0x735   : > { %8814 = vmatprep.subr.bf16.mxu0 %v9899_v60  ;;  %v14584_v9 = vrot.slane %v13876_v4, 4  ;;  %6732 = vrot.lane.b32.xlu0 %v6704_v33, %s15213_s2  ;;  %v13897_v60 = vld [vmem:[#allocation3 + $0x18] sm:$0xff]  ;;  %vm15239_vm3 = vmmov %vm15233_vm6 }
 0x736   : > { %v5022_v2 = vsel %vm15233_vm6, %v5002_v43, %v5003_v55  ;;  %v6601_v45 = vrot.slane %v14591_v20, 4  ;;  %v6604_v27 = vrot.slane %v6599_v19, 4  ;;  %vm15241_vm6 = vmmov %vm15229_vm0 }
 0x737   : > { %6734 = vrot.lane.b32.xlu1 %v6705_v52, %s15213_s2  ;;  %v5023_v54 = vsel %vm15234_vm14, %v4987_v25, %v5022_v2  ;;  %v6503_v28 = vsel %vm15235_vm13, %v13876_v4, %v14584_v9  ;;  %v5120_v55 = vpop.permute.xlu0 %5119  ;;  %8842 = vmatpush1.bf16.msra.mxu1 %v9894_v40  ;;  %v9905_v3 = vld [vmem:[#allocation4 + $0x3e4] ss:$16 sps:$4 sm:$0xff]   ;;  %v6602_v25 = vrot.slane %v13809_v42, 5  ;;  %v14592_v52 = vrot.slane %v13815_v63, 5  ;;  %v9903_v9 = vld [vmem:[#allocation4 + $0x3e0] ss:$16 sps:$4 sm:$0xff]   ;;  %vm15243_vm14 = vmmov %vm15240_vm7 }
 0x738   : > { %8815 = vmatpush2.bf16.msra.mxu0 %v9897_v38  ;;  %5051 = vst [vmem:[#allocation4 + $0x510] sm:$0x11] %v5023_v54  ;;  %6536 = vst.msk [vmem:[#allocation4 + $0x8a8] sm:$0xff] %vm11510_vm1, %v6503_v28  ;;  %v5147_v43 = vrot.slane %v5120_v55, 4  ;;  %v13902_v33 = vpop.permute.xlu1 %6466  ;;  %v6559_v2 = vld [vmem:[#allocation3 + $0x60] sm:$0x11]  ;;  %8843 = vmatprep.subr.bf16.mxu1 %v9905_v3  ;;  %v13911_v28 = vrot.slane %v13890_v7, %v10355_v5 }
 0x739   : > { %8816 = vmatprep.subr.bf16.mxu0 %v9902_v32  ;;  %v14589_v40 = vrot.slane %v13902_v33, 4  ;;  %6736 = vrot.lane.b32.xlu0 %v13884_v16, %s15213_s2  ;;  %v9900_v38 = vld [vmem:[#allocation4 + $0x100] ss:$16 sps:$4 sm:$0xff]   ;;  %vm15244_vm13 = vmmov %vm15238_vm4 }
 0x73a   : > { %v6946_v54 = vld [vmem:[#allocation4 + $0x3c0] sm:$0xff]  ;;  %v5161_v42 = vsel %vm15236_vm15, %v5147_v43, %v5148_v53  ;;  %v6587_v53 = vrot.slane %v13839_v58, 5  ;;  %v6603_v43 = vsel %vm11714_vm12, %v6601_v45, %v6602_v25  ;;  %v13947_v45 = vcombine.high %v13911_v28, %v13911_v28  ;;  %vm15248_vm15 = vmmov %vm15239_vm3 }
 0x73b   : > { %6738 = vrot.lane.b32.xlu1 %v13897_v60, %s15213_s2  ;;  %v9485_v32 = vcombine.high %v6946_v54, %v13476_v50  ;;  %v5162_v3 = vsel %vm15237_vm11, %v5120_v55, %v5161_v42  ;;  %v6506_v0 = vsel %vm15229_vm0, %v13902_v33, %v14589_v40  ;;  %v13926_v26 = vpop.permute.xlu0 %5733  ;;  %8844 = vmatpush2.bf16.msra.mxu1 %v9903_v9  ;;  %v6608_v42 = vrot.slane %v6559_v2, 5  ;;  %vm15250_vm11 = vmmov %vm15229_vm0 }
 0x73c   : > { %8817 = vmatpush2.bf16.msra.mxu0 %v9900_v38  ;;  %5196 = vst [vmem:[#allocation4 + $0x510] sm:$0xee] %v5162_v3  ;;  %6538 = vst.msk [vmem:[#allocation4 + $0x8b8] sm:$0xff] %vm11510_vm1, %v6506_v0  ;;  %v13933_v55 = vpop.permute.xlu1 %6321  ;;  %v6593_v9 = vrot.slane %v13860_v37, 5  ;;  %v9484_v38 = vcombine.low %v6946_v54, %v13476_v50  ;;  %v9906_v3 = vld [vmem:[#allocation4 + $0x4e0] ss:$16 sps:$4 sm:$0xff]   ;;  %v6606_v0 = vsel %vm11714_vm12, %v6604_v27, %v14592_v52 }
 0x73d   : > { %8845 = vmatprep.subr.bf16.mxu1 %v9485_v32  ;;  %8868 = vmatprep.subr.bf16.mxu0 %v9908_v48  ;;  %v14593_v40 = vrot.slane %v13933_v55, 4  ;;  %v6553_v32 = vld [vmem:[#allocation3 + $0x30] sm:$0xff]  ;;  %v6607_v48 = vrot.slane %v6602_v25, 4  ;;  %v6584_v2 = vrot.slane %v13832_v46, 5  ;;  %vm15251_vm0 = vmmov %vm15239_vm3 }
 0x73e   : > { %6633 = vrot.lane.b32.xlu0 %v6603_v43, %s14626_s27  ;;  %v9911_v50 = vld [vmem:[#allocation4 + $0x3a4] ss:$16 sps:$4 sm:$0xff]   ;;  %v6592_v43 = vrot.slane %v6587_v53, 4  ;;  %v6590_v20 = vrot.slane %v6553_v32, 5  ;;  %v9909_v52 = vld [vmem:[#allocation4 + $0x3a0] ss:$16 sps:$4 sm:$0xff]  }
 0x73f   : > { %6635 = vrot.lane.b32.xlu1 %v6606_v0, %s14626_s27  ;;  %8819 = vmatmul.mubr.bf16.vlgmr.msra.gmra.mxu0 %v13335_v15  ;;  %v9914_v37 = vld [vmem:[#allocation4 + $0x4c4] ss:$16 sps:$4 sm:$0xff]   ;;  %v6358_v54 = vsel %vm15238_vm4, %v13933_v55, %v14593_v40  ;;  %v5867_v27 = vpop.permute.xlu0 %5866  ;;  %v6609_v17 = vsel %vm11714_vm12, %v6607_v48, %v6608_v42  ;;  %v6589_v32 = vrot.slane %v6584_v2, 4  ;;  %v6560_v48 = vld [vmem:[#allocation3 + $0x68] sm:$0x11]  ;;  %v6598_v39 = vrot.slane %v6593_v9, 4 }
 0x740   : > { %8846 = vmatpush2.bf16.msra.mxu1 %v9484_v38  ;;  %8869 = vmatpush1.bf16.msra.mxu0 %v9906_v3  ;;  %6387 = vst.msk [vmem:[#allocation4 + $0x888] sm:$0xff] %vm11510_vm1, %v6358_v54  ;;  %v5894_v0 = vrot.slane %v5867_v27, 4  ;;  %v13960_v25 = vpop.permute.xlu1 %6458  ;;  %v9912_v38 = vld [vmem:[#allocation4 + $0x4c0] ss:$16 sps:$4 sm:$0xff]   ;;  %v6594_v3 = vsel %vm11714_vm12, %v6592_v43, %v6593_v9  ;;  %v9917_v42 = vld [vmem:[#allocation4 + $0x384] ss:$16 sps:$4 sm:$0xff]  }
 0x741   : > { %8847 = vmatprep.subr.bf16.mxu1 %v9911_v50  ;;  %8870 = vmatprep.subr.bf16.mxu0 %v9914_v37  ;;  %v6485_v40 = vrot.slane %v13960_v25, 4  ;;  %v6611_v9 = vrot.slane %v6560_v48, 5  ;;  %vm15252_vm4 = vcmask 867328  }
 0x742   : > { %6637 = vrot.lane.b32.xlu0 %v6609_v17, %s14626_s27  ;;  %8900 = vmatprep.mubr.bf16.mxu0 %v13947_v45  ;;  %v5908_v50 = vsel %vm15239_vm3, %v5894_v0, %v5895_v13  ;;  %v9915_v0 = vld [vmem:[#allocation4 + $0x380] ss:$16 sps:$4 sm:$0xff]  }
 0x743   : > { %6627 = vrot.lane.b32.xlu1 %v6594_v3, %s14626_s27  ;;  %v5909_v37 = vsel %vm15240_vm7, %v5867_v27, %v5908_v50  ;;  %v6500_v17 = vsel %vm15241_vm6, %v13960_v25, %v6485_v40  ;;  %v5871_v54 = vpop.permute.xlu0 %5870  ;;  %v6591_v27 = vsel %vm11714_vm12, %v6589_v32, %v6590_v20  ;;  %v6595_v50 = vrot.slane %v6590_v20, 4  ;;  %vm15255_vm7 = vmmov %vm15244_vm13 }
 0x744   : > { %8848 = vmatpush2.bf16.msra.mxu1 %v9909_v52  ;;  %8871 = vmatpush1.bf16.msra.mxu0 %v9912_v38  ;;  %5943 = vst [vmem:[#allocation4 + $0x700] sm:$0xcc] %v5909_v37  ;;  %6534 = vst.msk [vmem:[#allocation4 + $0x898] sm:$0xcc] %vm10519_vm8, %v6500_v17  ;;  %v5896_v13 = vrot.slane %v5871_v54, 4  ;;  %v13982_v43 = vpop.permute.xlu1 %6313  ;;  %v6600_v52 = vsel %vm11714_vm12, %v6598_v39, %v6599_v19  ;;  %v15245_v19 = vrot.slane %v13815_v63, 5 }
 0x745   : > { %8849 = vmatprep.subr.bf16.mxu1 %v9917_v42  ;;  %v6334_v3 = vrot.slane %v13982_v43, 4  ;;  %vm15242_vm8 = vmmov %vm15239_vm3  ;;  %v9920_v38 = vld [vmem:[#allocation4 + $0x364] ss:$16 sps:$4 sm:$0xff]   ;;  %v15246_v20 = vrot.slane %v13872_v21, 5  ;;  %v6578_v17 = vrot.slane %v13884_v16, 5  ;;  %v15249_v16 = vrot.slane %v13158_v44, 5 }
 0x746   : > { %6625 = vrot.lane.b32.xlu0 %v6591_v27, %s14626_s27  ;;  %v5911_v34 = vsel %vm15242_vm8, %v5896_v13, %v5897_v51  ;;  %v6610_v48 = vrot.slane %v15245_v19, 4  ;;  %v9918_v39 = vld [vmem:[#allocation4 + $0x360] ss:$16 sps:$4 sm:$0xff]   ;;  %v6581_v27 = vrot.slane %v13897_v60, 5  ;;  %vm15254_vm3 = vmmov %vm15252_vm4  ;;  %vm15258_vm8 = vcmask 367616  }
 0x747   : > { %6631 = vrot.lane.b32.xlu1 %v6600_v52, %s14626_s27  ;;  %v13997_v42 = vsel %vm15243_vm14, %v5871_v54, %v5911_v34  ;;  %v6352_v10 = vsel %vm15244_vm13, %v13982_v43, %v6334_v3  ;;  %v6477_v32 = vpop.permute.xlu0 %6476  ;;  %v6597_v37 = vsel %vm11714_vm12, %v6595_v50, %v15246_v20  ;;  %v4293_v54 = vrot.slane %v13573_v47, 4  ;;  %v9923_v52 = vld [vmem:[#allocation4 + $0x344] ss:$16 sps:$4 sm:$0xff]   ;;  %vm15257_vm6 = vmmov %vm15251_vm0 }
 0x748   : > { %8850 = vmatpush2.bf16.msra.mxu1 %v9915_v0  ;;  %6383 = vst.msk [vmem:[#allocation4 + $0x868] sm:$0xff] %vm11510_vm1, %v6352_v10  ;;  %v6494_v24 = vrot.slane %v6477_v32, 4  ;;  %v4280_v51 = vpop.permute.xlu1 %4279  ;;  %v6612_v63 = vsel %vm11714_vm12, %v6610_v48, %v6611_v9  ;;  %v15247_v0 = vrot.slane %v13788_v23, 4  ;;  %v6577_v34 = vrot.slane %v15249_v16, 4  ;;  %v9921_v48 = vld [vmem:[#allocation4 + $0x340] ss:$16 sps:$4 sm:$0xff]   ;;  %vm15261_vm14 = vmmov %vm15251_vm0 }
 0x749   : > { %8851 = vmatprep.subr.bf16.mxu1 %v9920_v38  ;;  %v4294_v13 = vrot.slane %v4280_v51, 4  ;;  %v15253_v23 = vrot.slane %v13015_v14, 5  ;;  %v15256_v16 = vrot.slane %v13807_v30, 4  ;;  %vm15262_vm13 = vmmov %vm15250_vm11 }
 0x74a   : > { %6629 = vrot.lane.b32.xlu0 %v6597_v37, %s14626_s27  ;;  %v6513_v21 = vsel %vm15248_vm15, %v6494_v24, %v15247_v0  ;;  %vm15263_vm15 = vmmov %vm15251_vm0 }
 0x74b   : > { %6639 = vrot.lane.b32.xlu1 %v6612_v63, %s14626_s27  ;;  %v14024_v38 = vsel %vm15250_vm11, %v6477_v32, %v6513_v21  ;;  %v4313_v50 = vsel %vm15251_vm0, %v4293_v54, %v4294_v13  ;;  %v4315_v10 = vsel %vm15252_vm4, %v4280_v51, %v4294_v13  ;;  %v14028_v9 = vpop.permute.xlu0 %6480  ;;  %v6580_v60 = vrot.slane %v15253_v23, 4  ;;  %v9924_v63 = vld [vmem:[#allocation4 + $0x320] ss:$16 sps:$4 sm:$0xff]   ;;  %vm15267_vm4 = vmmov %vm15257_vm6 }
 0x74c   : > { %8852 = vmatpush2.bf16.msra.mxu1 %v9918_v39  ;;  %v4314_v19 = vsel %vm15254_vm3, %v13573_v47, %v4313_v50  ;;  %4343 = vst.msk [vmem:[#allocation4 + $0x318] sm:$0xff] %vm11510_vm1, %v4315_v10  ;;  %v14036_v44 = vpop.permute.xlu1 %6317  ;;  %v6579_v32 = vsel %vm11714_vm12, %v6577_v34, %v6578_v17  ;;  %v9926_v47 = vld [vmem:[#allocation4 + $0x324] ss:$16 sps:$4 sm:$0xff]   ;;  %v6583_v51 = vrot.slane %v6578_v17, 4  ;;  %v6586_v54 = vrot.slane %v6581_v27, 4  ;;  %vm15268_vm3 = vmmov %vm15262_vm13 }
 0x74d   : > { %8853 = vmatprep.subr.bf16.mxu1 %v9923_v52  ;;  %v6336_v24 = vrot.slane %v14036_v44, 4  ;;  %v6582_v14 = vsel %vm11714_vm12, %v6580_v60, %v6581_v27  ;;  %v6922_v21 = vld [vmem:[#allocation4 + $0x300] sm:$0xff]  ;;  %v7166_v52 = vcombine.high %v13890_v7, %v13890_v7  ;;  %v4883_v50 = vrot.slane %v13581_v31, 4 }
 0x74e   : > { %6617 = vrot.lane.b32.xlu0 %v6579_v32, %s14626_s27  ;;  %v6585_v17 = vsel %vm11714_vm12, %v6583_v51, %v6584_v2  ;;  %v6588_v27 = vsel %vm11714_vm12, %v6586_v54, %v6587_v53  ;;  %v7140_v2 = vld [vmem:[%s14482_s8] sm:$0x7]  ;;  %v9461_v34 = vcombine.high %v6922_v21, %v4314_v19  ;;  %vm15259_vm12 = vmmov %vm15255_vm7  ;;  %v9460_v23 = vcombine.low %v6922_v21, %v4314_v19  ;;  %v6976_v54 = vld [vmem:[#allocation4 + $0x4b0] sm:$0xff] }
 0x74f   : > { %6619 = vrot.lane.b32.xlu1 %v6582_v14, %s14626_s27  ;;  %v6355_v20 = vsel %vm15255_vm7, %v14036_v44, %v6336_v24  ;;  %v6614_v37 = vpop.permute.xlu0 %6613  ;;  %v14081_v60 = vrot.slane %v7166_v52, %v10355_v5  ;;  %v15260_v32 = vrot.slane %v13830_v62, 4  ;;  %v9929_v14 = vld [vmem:[#allocation4 + $0x6e4] ss:$16 sps:$4 sm:$0xff]   ;;  %vm15264_vm11 = vcmask 711680  }
 0x750   : > { %8854 = vmatpush2.bf16.msra.mxu1 %v9921_v48  ;;  %6385 = vst.msk [vmem:[#allocation4 + $0x878] sm:$0xff] %vm11510_vm1, %v6355_v20  ;;  %v6641_v39 = vrot.slane %v6614_v37, 4  ;;  %v14051_v13 = vpop.permute.xlu1 %6305  ;;  %vm15265_vm0 = vmmov %vm15264_vm11  ;;  %v15266_v52 = vrot.slane %v13855_v22, 4 }
 0x751   : > { %8855 = vmatprep.subr.bf16.mxu1 %v9926_v47  ;;  %v6330_v0 = vrot.slane %v14051_v13, 4  ;;  %v14100_v21 = vcombine.high %v14081_v60, %v14081_v60 }
 0x752   : > { %6621 = vrot.lane.b32.xlu0 %v6585_v17, %s14626_s27  ;;  %v6655_v46 = vsel %vm15257_vm6, %v6641_v39, %v15256_v16  ;;  %v9927_v17 = vld [vmem:[#allocation4 + $0x6e0] ss:$16 sps:$4 sm:$0xff]   ;;  %v9932_v16 = vld [vmem:[#allocation4 + $0x6c4] ss:$16 sps:$4 sm:$0xff]   ;;  %vm15270_vm6 = vmmov %vm15267_vm4 }
 0x753   : > { %6623 = vrot.lane.b32.xlu1 %v6588_v27, %s14626_s27  ;;  %v6656_v58 = vsel %vm15258_vm8, %v6614_v37, %v6655_v46  ;;  %v6346_v29 = vsel %vm15259_vm12, %v14051_v13, %v6330_v0  ;;  %v6469_v53 = vpop.permute.xlu0 %6468  ;;  %vm15271_vm8 = vmmov %vm15268_vm3  ;;  %vm15272_vm12 = vcmask 392192  }
 0x754   : > { %8856 = vmatpush2.bf16.msra.mxu1 %v9924_v63  ;;  %6690 = vst [vmem:[#allocation4 + $0x8f0] sm:$0x88] %v6656_v58  ;;  %6379 = vst.msk [vmem:[#allocation4 + $0x848] sm:$0xff] %vm11510_vm1, %v6346_v29  ;;  %v6490_v30 = vrot.slane %v6469_v53, 4  ;;  %v4870_v7 = vpop.permute.xlu1 %4869  ;;  %v9938_v58 = vld [vmem:[#allocation4 + $0x484] ss:$16 sps:$4 sm:$0xff]  }
 0x755   : > { %8857 = vmatprep.subr.bf16.mxu1 %v9461_v34  ;;  %v4884_v10 = vrot.slane %v4870_v7, 4 }
 0x756   : > { %7143 = vperm.xlu0 %9740, %v7140_v2   ;;  %v6507_v48 = vsel %vm15261_vm14, %v6490_v30, %v15260_v32  ;;  %v9936_v32 = vld [vmem:[#allocation4 + $0x480] ss:$16 sps:$4 sm:$0xff]   ;;  %vm15274_vm14 = vmmov %vm15267_vm4 }
 0x757   : > { %v14087_v47 = vsel %vm15262_vm13, %v6469_v53, %v6507_v48  ;;  %v4903_v51 = vsel %vm15263_vm15, %v4883_v50, %v4884_v10  ;;  %v4905_v20 = vsel %vm15264_vm11, %v4870_v7, %v4884_v10  ;;  %v6473_v37 = vpop.permute.xlu0 %6472  ;;  %v9930_v7 = vld [vmem:[#allocation4 + $0x6c0] ss:$16 sps:$4 sm:$0xff]   ;;  %v15269_v50 = vrot.slane %v13876_v4, 4  ;;  %vm15275_vm13 = vmmov %vm15268_vm3 }
 0x758   : > { %8858 = vmatpush2.bf16.msra.mxu1 %v9460_v23  ;;  %v4904_v19 = vsel %vm15265_vm0, %v13581_v31, %v4903_v51  ;;  %4933 = vst.msk [vmem:[#allocation4 + $0x4a8] sm:$0xff] %vm11510_vm1, %v4905_v20  ;;  %v6492_v5 = vrot.slane %v6473_v37, 4  ;;  %v14095_v62 = vpop.permute.xlu1 %6309  ;;  %v9935_v23 = vld [vmem:[#allocation4 + $0x6a4] ss:$16 sps:$4 sm:$0xff]   ;;  %vm15276_vm15 = vmmov %vm15267_vm4  ;;  %vm15277_vm11 = vcmask 719872  }
 0x759   : > { %8909 = vmatprep.subr.bf16.mxu1 %v9929_v14  ;;  %v6332_v39 = vrot.slane %v14095_v62, 4  ;;  %v9512_v63 = vcombine.low %v4904_v19, %v6976_v54  ;;  %v9513_v27 = vcombine.high %v4904_v19, %v6976_v54  ;;  %v9944_v20 = vld [vmem:[#allocation4 + $0x464] ss:$16 sps:$4 sm:$0xff]   ;;  %v4726_v19 = vrot.slane %v13603_v61, 4  ;;  %v9933_v54 = vld [vmem:[#allocation4 + $0x6a0] ss:$16 sps:$4 sm:$0xff]   ;;  %vm15278_vm0 = vmmov %vm15277_vm11 }
 0x75a   : > { %v6510_v31 = vsel %vm15267_vm4, %v6492_v5, %v15266_v52  ;;  %v9942_v52 = vld [vmem:[#allocation4 + $0x460] ss:$16 sps:$4 sm:$0xff]  }
 0x75b   : > { %8860 = vmatmul.mubr.bf16.vlgmr.msra.gmra.mxu1 %v13499_v56  ;;  %v14107_v46 = vsel %vm15268_vm3, %v6473_v37, %v6510_v31  ;;  %v6349_v2 = vsel %vm15255_vm7, %v14095_v62, %v6332_v39  ;;  %v6461_v34 = vpop.permute.xlu0 %6460  ;;  %8872 = vmatprep.subr.bf16.mxu0 %v9513_v27  ;;  %v9941_v27 = vld [vmem:[#allocation4 + $0x684] ss:$16 sps:$4 sm:$0xff]   ;;  %vm15280_vm3 = vmmov %vm15255_vm7 }
 0x75c   : > { %8910 = vmatpush1.bf16.msra.mxu1 %v9927_v17  ;;  %6381 = vst.msk [vmem:[#allocation4 + $0x858] sm:$0xff] %vm11510_vm1, %v6349_v2  ;;  %v6486_v22 = vrot.slane %v6461_v34, 4  ;;  %v14115_v29 = vpop.permute.xlu1 %6164  ;;  %8873 = vmatpush1.bf16.msra.mxu0 %v9512_v63  ;;  %v9644_v53 = vcombine.low %v14087_v47, %v14107_v46  ;;  %v15273_v17 = vrot.slane %v13902_v33, 4  ;;  %vm15281_vm7 = vmmov %vm15267_vm4 }
 0x75d   : > { %8911 = vmatprep.subr.bf16.mxu1 %v9932_v16  ;;  %v6181_v30 = vrot.slane %v14115_v29, 4  ;;  %8874 = vmatprep.subr.bf16.mxu0 %v9938_v58 }
 0x75e   : > { %8941 = vmatprep.mubr.bf16.mxu1 %v14100_v21  ;;  %v6501_v10 = vsel %vm15270_vm6, %v6486_v22, %v15269_v50  ;;  %vm15282_vm6 = vcmask 556032  }
 0x75f   : > { %v14125_v48 = vsel %vm15271_vm8, %v6461_v34, %v6501_v10  ;;  %v6201_v14 = vsel %vm15272_vm12, %v14115_v29, %v6181_v30  ;;  %v6465_v51 = vpop.permute.xlu0 %6464  ;;  %v9939_v10 = vld [vmem:[#allocation4 + $0x680] ss:$16 sps:$4 sm:$0xff]   ;;  %vm15283_vm8 = vmmov %vm15282_vm6 }
 0x760   : > { %8912 = vmatpush1.bf16.msra.mxu1 %v9930_v7  ;;  %6230 = vst.msk [vmem:[#allocation4 + $0x828] sm:$0xff] %vm11510_vm1, %v6201_v14  ;;  %v6488_v37 = vrot.slane %v6465_v51, 4  ;;  %v4713_v4 = vpop.permute.xlu1 %4712  ;;  %8875 = vmatpush1.bf16.msra.mxu0 %v9936_v32  ;;  %v5473_v7 = vrot.slane %v13617_v1, 4  ;;  %v9947_v14 = vld [vmem:[#allocation4 + $0x664] ss:$16 sps:$4 sm:$0xff]  }
 0x761   : > { %8913 = vmatprep.subr.bf16.mxu1 %v9935_v23  ;;  %v4727_v5 = vrot.slane %v4713_v4, 4  ;;  %8876 = vmatprep.subr.bf16.mxu0 %v9944_v20  ;;  %v15279_v23 = vrot.slane %v13933_v55, 4 }
 0x762   : > { %v6504_v63 = vsel %vm15274_vm14, %v6488_v37, %v15273_v17  ;;  %vm15284_vm14 = vmmov %vm15267_vm4 }
 0x763   : > { %v14138_v31 = vsel %vm15275_vm13, %v6465_v51, %v6504_v63  ;;  %v4746_v16 = vsel %vm15276_vm15, %v4726_v19, %v4727_v5  ;;  %v4748_v2 = vsel %vm15277_vm11, %v4713_v4, %v4727_v5  ;;  %v6320_v34 = vpop.permute.xlu0 %6319  ;;  %v9945_v5 = vld [vmem:[#allocation4 + $0x660] ss:$16 sps:$4 sm:$0xff]   ;;  %vm15285_vm15 = vmmov %vm15267_vm4  ;;  %vm15286_vm11 = vcmask 687104  }
 0x764   : > { %8914 = vmatpush1.bf16.msra.mxu1 %v9933_v54  ;;  %v4747_v58 = vsel %vm15278_vm0, %v13603_v61, %v4746_v16  ;;  %4776 = vst.msk [vmem:[#allocation4 + $0x448] sm:$0x77] %vm13589_vm9, %v4748_v2  ;;  %v6337_v33 = vrot.slane %v6320_v34, 4  ;;  %v5460_v22 = vpop.permute.xlu1 %5459  ;;  %8877 = vmatpush1.bf16.msra.mxu0 %v9942_v52  ;;  %v9950_v54 = vld [vmem:[#allocation4 + $0x644] ss:$16 sps:$4 sm:$0xff]   ;;  %v5316_v2 = vrot.slane %v13639_v6, 4  ;;  %vm15287_vm0 = vmmov %vm15286_vm11 }
 0x765   : > { %8915 = vmatprep.subr.bf16.mxu1 %v9941_v27  ;;  %4775 = vst [vmem:[#allocation4 + $0x440] sm:$0x77] %v4747_v58  ;;  %v5474_v50 = vrot.slane %v5460_v22, 4  ;;  %v9948_v58 = vld [vmem:[#allocation4 + $0x640] ss:$16 sps:$4 sm:$0xff]  }
 0x766   : > { %v6356_v32 = vsel %vm15267_vm4, %v6337_v33, %v15279_v23  ;;  %v7022_v33 = vld [vmem:[#allocation4 + $0x620] sm:$0xff] }
 0x767   : > { %v14151_v51 = vsel %vm15280_vm3, %v6320_v34, %v6356_v32  ;;  %v5493_v61 = vsel %vm15281_vm7, %v5473_v7, %v5474_v50  ;;  %v5495_v20 = vsel %vm15282_vm6, %v5460_v22, %v5474_v50  ;;  %v14155_v37 = vpop.permute.xlu0 %6323  ;;  %v9956_v7 = vld [vmem:[#allocation4 + $0x424] ss:$16 sps:$4 sm:$0xff]   ;;  %vm15288_vm7 = vmmov %vm15267_vm4  ;;  %vm15289_vm6 = vcmask 523264  }
 0x768   : > { %8916 = vmatpush1.bf16.msra.mxu1 %v9939_v10  ;;  %v5494_v4 = vsel %vm15283_vm8, %v13617_v1, %v5493_v61  ;;  %5523 = vst.msk [vmem:[#allocation4 + $0x638] sm:$0xff] %vm11510_vm1, %v5495_v20  ;;  %v14161_v55 = vpop.permute.xlu1 %6168  ;;  %v6063_v20 = vrot.slane %v13657_v8, 4  ;;  %vm15290_vm8 = vmmov %vm15289_vm6 }
 0x769   : > { %8917 = vmatprep.subr.bf16.mxu1 %v9947_v14  ;;  %v6183_v19 = vrot.slane %v14161_v55, 4  ;;  %v9561_v50 = vcombine.high %v7022_v33, %v5494_v4 }
 0x76b   : > { %v6204_v17 = vsel %vm15272_vm12, %v14161_v55, %v6183_v19  ;;  %v6457_v63 = vpop.permute.xlu0 %6456  ;;  %vm15291_vm12 = vmmov %vm15267_vm4 }
 0x76c   : > { %8918 = vmatpush1.bf16.msra.mxu1 %v9945_v5  ;;  %6232 = vst.msk [vmem:[#allocation4 + $0x838] sm:$0x11] %vm11306_vm5, %v6204_v17  ;;  %v6484_v1 = vrot.slane %v6457_v63, 4  ;;  %v5303_v27 = vpop.permute.xlu1 %5302  ;;  %v9951_v52 = vld [vmem:[#allocation4 + $0x440] ss:$16 sps:$4 sm:$0xff]   ;;  %v9560_v17 = vcombine.low %v7022_v33, %v5494_v4 }
 0x76d   : > { %8919 = vmatprep.subr.bf16.mxu1 %v9950_v54  ;;  %v9953_v16 = vld [vmem:[#allocation4 + $0x444] ss:$16 sps:$4 sm:$0xff]   ;;  %v5317_v34 = vrot.slane %v5303_v27, 4  ;;  %v9954_v54 = vld [vmem:[#allocation4 + $0x420] ss:$16 sps:$4 sm:$0xff]  }
 0x76e   : > { %v6498_v22 = vsel %vm15284_vm14, %v6484_v1, %v6485_v40  ;;  %8878 = vmatprep.subr.bf16.mxu0 %v9953_v16  ;;  %v9959_v1 = vld [vmem:[#allocation4 + $0x404] ss:$16 sps:$4 sm:$0xff]   ;;  %v9960_v33 = vld [vmem:[#allocation4 + $0x600] ss:$16 sps:$4 sm:$0xff]   ;;  %vm15292_vm14 = vmmov %vm15280_vm3 }
 0x76f   : > { %v6499_v10 = vsel %vm15275_vm13, %v6457_v63, %v6498_v22  ;;  %v5336_v23 = vsel %vm15285_vm15, %v5316_v2, %v5317_v34  ;;  %v5338_v32 = vsel %vm15286_vm11, %v5303_v27, %v5317_v34  ;;  %v6312_v14 = vpop.permute.xlu0 %6311  ;;  %8879 = vmatpush1.bf16.msra.mxu0 %v9951_v52  ;;  %v9962_v27 = vld [vmem:[#allocation4 + $0x604] ss:$16 sps:$4 sm:$0xff]   ;;  %vm15293_vm13 = vmmov %vm15280_vm3 }
 0x770   : > { %8920 = vmatpush1.bf16.msra.mxu1 %v9948_v58  ;;  %6533 = vst [vmem:[#allocation4 + $0x890] sm:$0xcc] %v6499_v10  ;;  %v5337_v61 = vsel %vm15287_vm0, %v13639_v6, %v5336_v23  ;;  %5366 = vst.msk [vmem:[#allocation4 + $0x5d8] sm:$0x77] %vm13589_vm9, %v5338_v32  ;;  %v6333_v40 = vrot.slane %v6312_v14, 4  ;;  %v6050_v25 = vpop.permute.xlu1 %6049  ;;  %8880 = vmatprep.subr.bf16.mxu0 %v9956_v7  ;;  %vm15297_vm0 = vcmask 695296  }
 0x771   : > { %8921 = vmatprep.subr.bf16.mxu1 %v9561_v50  ;;  %5365 = vst [vmem:[#allocation4 + $0x5d0] sm:$0x77] %v5337_v61  ;;  %v6064_v5 = vrot.slane %v6050_v25, 4  ;;  %v9957_v58 = vld [vmem:[#allocation4 + $0x400] ss:$16 sps:$4 sm:$0xff]   ;;  %vm15294_vm15 = vmmov %vm15267_vm4 }
 0x772   : > { %v6350_v63 = vsel %vm15267_vm4, %v6333_v40, %v6334_v3  ;;  %v9965_v7 = vld [vmem:[#allocation4 + $0x5e4] ss:$16 sps:$4 sm:$0xff]   ;;  %v9963_v40 = vld [vmem:[#allocation4 + $0x5e0] ss:$16 sps:$4 sm:$0xff]   ;;  %vm15295_vm11 = vmmov %vm15280_vm3 }
 0x773   : > { %v14186_v6 = vsel %vm15280_vm3, %v6312_v14, %v6350_v63  ;;  %v6083_v52 = vsel %vm15288_vm7, %v6063_v20, %v6064_v5  ;;  %v6085_v16 = vsel %vm15289_vm6, %v6050_v25, %v6064_v5  ;;  %v6316_v2 = vpop.permute.xlu0 %6315  ;;  %8881 = vmatpush1.bf16.msra.mxu0 %v9954_v54  ;;  %v9968_v50 = vld [vmem:[#allocation4 + $0x7e4] ss:$16 sps:$4 sm:$0xff]   ;;  %v5159_v14 = vrot.slane %v13674_v59, 4  ;;  %v9966_v25 = vld [vmem:[#allocation4 + $0x7e0] ss:$16 sps:$4 sm:$0xff]   ;;  %vm15299_vm3 = vmmov %vm15288_vm7 }
 0x774   : > { %8922 = vmatpush1.bf16.msra.mxu1 %v9560_v17  ;;  %v6084_v34 = vsel %vm15290_vm8, %v13657_v8, %v6083_v52  ;;  %6113 = vst.msk [vmem:[#allocation4 + $0x7c8] sm:$0xff] %vm11510_vm1, %v6085_v16  ;;  %v6335_v43 = vrot.slane %v6316_v2, 4  ;;  %v14194_v3 = vpop.permute.xlu1 %6301  ;;  %8882 = vmatprep.subr.bf16.mxu0 %v9959_v1  ;;  %v5906_v52 = vrot.slane %v13689_v35, 4  ;;  %vm15300_vm7 = vmmov %vm15295_vm11  ;;  %vm15302_vm8 = vcmask 531456  }
 0x775   : > { %8923 = vmatprep.subr.bf16.mxu1 %v9962_v27  ;;  %v6328_v4 = vrot.slane %v14194_v3, 4  ;;  %vm15301_vm6 = vmmov %vm15299_vm3 }
 0x776   : > { %v6353_v22 = vsel %vm15291_vm12, %v6335_v43, %v6336_v24  ;;  %v7076_v24 = vld [vmem:[#allocation4 + $0x7d0] sm:$0xff]  ;;  %vm15303_vm12 = vmmov %vm15302_vm8 }
 0x777   : > { %v14201_v8 = vsel %vm15292_vm14, %v6316_v2, %v6353_v22  ;;  %v6343_v10 = vsel %vm15293_vm13, %v14194_v3, %v6328_v4  ;;  %v6304_v23 = vpop.permute.xlu0 %6303  ;;  %8883 = vmatpush1.bf16.msra.mxu0 %v9957_v58  ;;  %v9613_v54 = vcombine.high %v6084_v34, %v7076_v24  ;;  %v9612_v43 = vcombine.low %v6084_v34, %v7076_v24  ;;  %v9977_v22 = vld [vmem:[#allocation4 + $0x7a4] ss:$16 sps:$4 sm:$0xff]   ;;  %vm15304_vm14 = vmmov %vm15299_vm3 }
 0x778   : > { %8924 = vmatpush1.bf16.msra.mxu1 %v9960_v33  ;;  %6377 = vst.msk [vmem:[#allocation4 + $0x838] sm:$0xee] %vm11845_vm10, %v6343_v10  ;;  %v6329_v32 = vrot.slane %v6304_v23, 4  ;;  %v5146_v44 = vpop.permute.xlu1 %5145  ;;  %8884 = vmatprep.subr.bf16.mxu0 %v9965_v7  ;;  %v9971_v5 = vld [vmem:[#allocation4 + $0x5c4] ss:$16 sps:$4 sm:$0xff]   ;;  %vm15296_vm10 = vmmov %vm15267_vm4  ;;  %vm15305_vm13 = vcmask 392192  }
 0x779   : > { %8925 = vmatprep.subr.bf16.mxu1 %v9968_v50  ;;  %v5160_v61 = vrot.slane %v5146_v44, 4  ;;  %vm15298_vm4 = vmmov %vm15297_vm0  ;;  %v9969_v2 = vld [vmem:[#allocation4 + $0x5c0] ss:$16 sps:$4 sm:$0xff]   ;;  %v9974_v33 = vld [vmem:[#allocation4 + $0x5a4] ss:$16 sps:$4 sm:$0xff]  }
 0x77a   : > { %v6344_v20 = vsel %vm15294_vm15, %v6329_v32, %v6330_v0  ;;  %v9972_v32 = vld [vmem:[#allocation4 + $0x5a0] ss:$16 sps:$4 sm:$0xff]   ;;  %vm15306_vm15 = vmmov %vm15305_vm13 }
 0x77b   : > { %v14214_v17 = vsel %vm15295_vm11, %v6304_v23, %v6344_v20  ;;  %v5179_v49 = vsel %vm15296_vm10, %v5159_v14, %v5160_v61  ;;  %v5181_v63 = vsel %vm15297_vm0, %v5146_v44, %v5160_v61  ;;  %v6308_v1 = vpop.permute.xlu0 %6307  ;;  %8885 = vmatpush2.bf16.msra.mxu0 %v9963_v40  ;;  %v9975_v44 = vld [vmem:[#allocation4 + $0x7a0] ss:$16 sps:$4 sm:$0xff]   ;;  %v9980_v14 = vld [vmem:[#allocation4 + $0x584] ss:$16 sps:$4 sm:$0xff]   ;;  %vm15307_vm11 = vmmov %vm15299_vm3 }
 0x77c   : > { %8926 = vmatpush2.bf16.msra.mxu1 %v9966_v25  ;;  %v5180_v27 = vsel %vm15298_vm4, %v13674_v59, %v5179_v49  ;;  %5209 = vst.msk [vmem:[#allocation4 + $0x578] sm:$0x33] %vm10369_vm2, %v5181_v63  ;;  %v6331_v13 = vrot.slane %v6308_v1, 4  ;;  %v5893_v0 = vpop.permute.xlu1 %5892  ;;  %8886 = vmatprep.subr.bf16.mxu0 %v9971_v5  ;;  %v9983_v61 = vld [vmem:[#allocation4 + $0x784] ss:$16 sps:$4 sm:$0xff]   ;;  %vm15308_vm10 = vmmov %vm15305_vm13 }
 0x77d   : > { %8927 = vmatprep.subr.bf16.mxu1 %v9613_v54  ;;  %5208 = vst [vmem:[#allocation4 + $0x570] sm:$0x33] %v5180_v27  ;;  %v5907_v16 = vrot.slane %v5893_v0, 4  ;;  %v9981_v54 = vld [vmem:[#allocation4 + $0x780] ss:$16 sps:$4 sm:$0xff]   ;;  %vm15309_vm0 = vmmov %vm15308_vm10 }
 0x77e   : > { %v6347_v58 = vsel %vm15299_vm3, %v6331_v13, %v6332_v39  ;;  %vm15310_vm4 = vmmov %vm15299_vm3 }
 0x77f   : > { %v14227_v59 = vsel %vm15300_vm7, %v6308_v1, %v6347_v58  ;;  %v5926_v7 = vsel %vm15301_vm6, %v5906_v52, %v5907_v16  ;;  %v5928_v50 = vsel %vm15302_vm8, %v5893_v0, %v5907_v16  ;;  %v6163_v10 = vpop.permute.xlu0 %6162  ;;  %8887 = vmatpush2.bf16.msra.mxu0 %v9969_v2  ;;  %vm15311_vm3 = vmmov %vm15300_vm7  ;;  %vm15313_vm6 = vcmask 539648  }
 0x780   : > { %8928 = vmatpush2.bf16.msra.mxu1 %v9612_v43  ;;  %v5927_v23 = vsel %vm15303_vm12, %v13689_v35, %v5926_v7  ;;  %5956 = vst.msk [vmem:[#allocation4 + $0x768] sm:$0x77] %vm13589_vm9, %v5928_v50  ;;  %v6180_v62 = vrot.slane %v6163_v10, 4  ;;  %v14235_v39 = vpop.permute.xlu1 %6156  ;;  %8888 = vmatprep.subr.bf16.mxu0 %v9974_v33  ;;  %v9992_v33 = vld [vmem:[#allocation4 + $0x544] ss:$16 sps:$4 sm:$0xff]   ;;  %vm15312_vm7 = vmmov %vm15310_vm4 }
 0x781   : > { %8929 = vmatprep.subr.bf16.mxu1 %v9977_v22  ;;  %5955 = vst [vmem:[#allocation4 + $0x760] sm:$0x77] %v5927_v23  ;;  %v6177_v34 = vrot.slane %v14235_v39, 4  ;;  %v9995_v22 = vld [vmem:[#allocation4 + $0x744] ss:$16 sps:$4 sm:$0xff]   ;;  %vm15314_vm8 = vmmov %vm15313_vm6 }
 0x782   : > { %v6199_v24 = vsel %vm15304_vm14, %v6180_v62, %v6181_v30  ;;  %v9978_v30 = vld [vmem:[#allocation4 + $0x580] ss:$16 sps:$4 sm:$0xff]   ;;  %vm15315_vm12 = vmmov %vm15310_vm4 }
 0x783   : > { %v14242_v35 = vsel %vm15305_vm13, %v6163_v10, %v6199_v24  ;;  %v6195_v40 = vsel %vm15306_vm15, %v14235_v39, %v6177_v34  ;;  %v6167_v25 = vpop.permute.xlu0 %6166  ;;  %8889 = vmatpush2.bf16.msra.mxu0 %v9972_v32  ;;  %v6496_v39 = vrot.slane %v14028_v9, 4  ;;  %v9993_v24 = vld [vmem:[#allocation4 + $0x740] ss:$16 sps:$4 sm:$0xff]   ;;  %vm15316_vm14 = vmmov %vm15309_vm0  ;;  %vm15318_vm15 = vcmask 375808  }
 0x784   : > { %8930 = vmatpush2.bf16.msra.mxu1 %v9975_v44  ;;  %6226 = vst.msk [vmem:[#allocation4 + $0x808] sm:$0xff] %vm11510_vm1, %v6195_v40  ;;  %v6182_v20 = vrot.slane %v6167_v25, 4  ;;  %v14248_v5 = vpop.permute.xlu1 %6160  ;;  %8890 = vmatprep.subr.bf16.mxu0 %v9980_v14  ;;  %v9986_v63 = vld [vmem:[#allocation4 + $0x564] ss:$16 sps:$4 sm:$0xff]   ;;  %v9984_v43 = vld [vmem:[#allocation4 + $0x560] ss:$16 sps:$4 sm:$0xff]   ;;  %vm15317_vm13 = vmmov %vm15310_vm4 }
 0x785   : > { %8931 = vmatprep.subr.bf16.mxu1 %v9983_v61  ;;  %v6179_v29 = vrot.slane %v14248_v5, 4  ;;  %v9990_v44 = vld [vmem:[#allocation4 + $0x540] ss:$16 sps:$4 sm:$0xff]   ;;  %v9998_v61 = vld [vmem:[#allocation4 + $0x524] ss:$16 sps:$4 sm:$0xff]  }
 0x786   : > { %v6202_v49 = vsel %vm15307_vm11, %v6182_v20, %v6183_v19  ;;  %v5749_v19 = vrot.slane %v13926_v26, 4  ;;  %v10001_v40 = vld [vmem:[#allocation4 + $0x724] ss:$16 sps:$4 sm:$0xff]   ;;  %vm15319_vm11 = vmmov %vm15318_vm15 }
 0x787   : > { %v6203_v1 = vsel %vm15308_vm10, %v6167_v25, %v6202_v49  ;;  %v6198_v27 = vsel %vm15309_vm0, %v14248_v5, %v6179_v29  ;;  %v6300_v13 = vpop.permute.xlu0 %6299  ;;  %8891 = vmatpush2.bf16.msra.mxu0 %v9978_v30  ;;  %vm15320_vm10 = vmmov %vm15310_vm4 }
 0x788   : > { %8932 = vmatpush2.bf16.msra.mxu1 %v9981_v54  ;;  %6231 = vst [vmem:[#allocation4 + $0x830] sm:$0x11] %v6203_v1  ;;  %6228 = vst.msk [vmem:[#allocation4 + $0x818] sm:$0xff] %vm11510_vm1, %v6198_v27  ;;  %v6327_v0 = vrot.slane %v6300_v13, 4  ;;  %v5736_v52 = vpop.permute.xlu1 %5735  ;;  %8892 = vmatprep.subr.bf16.mxu0 %v9986_v63  ;;  %v9987_v16 = vld [vmem:[#allocation4 + $0x760] ss:$16 sps:$4 sm:$0xff]  }
 0x789   : > { %v9989_v55 = vld [vmem:[#allocation4 + $0x764] ss:$16 sps:$4 sm:$0xff]   ;;  %v5750_v2 = vrot.slane %v5736_v52, 4  ;;  %v9996_v63 = vld [vmem:[#allocation4 + $0x520] ss:$16 sps:$4 sm:$0xff]  }
 0x78a   : > { %v6341_v58 = vsel %vm15310_vm4, %v6327_v0, %v6328_v4  ;;  %8933 = vmatprep.subr.bf16.mxu1 %v9989_v55  ;;  %v9999_v1 = vld [vmem:[#allocation4 + $0x720] ss:$16 sps:$4 sm:$0xff]   ;;  %vm15321_vm4 = vcmask 359424  }
 0x78b   : > { %v6342_v7 = vsel %vm15311_vm3, %v6300_v13, %v6341_v58  ;;  %v5769_v50 = vsel %vm15312_vm7, %v5749_v19, %v5750_v2  ;;  %v5771_v10 = vsel %vm15313_vm6, %v5736_v52, %v5750_v2  ;;  %v6155_v23 = vpop.permute.xlu0 %6154  ;;  %8893 = vmatpush2.bf16.msra.mxu0 %v9984_v43  ;;  %v10004_v13 = vld [vmem:[#allocation4 + $0x504] ss:$16 sps:$4 sm:$0xff]   ;;  %v10002_v43 = vld [vmem:[#allocation4 + $0x500] ss:$16 sps:$4 sm:$0xff]   ;;  %vm15322_vm3 = vmmov %vm15312_vm7 }
 0x78c   : > { %8934 = vmatpush2.bf16.msra.mxu1 %v9987_v16  ;;  %6376 = vst [vmem:[#allocation4 + $0x830] sm:$0xee] %v6342_v7  ;;  %v5770_v62 = vsel %vm15314_vm8, %v13926_v26, %v5769_v50  ;;  %5799 = vst.msk [vmem:[#allocation4 + $0x708] sm:$0x33] %vm10369_vm2, %v5771_v10  ;;  %v6176_v3 = vrot.slane %v6155_v23, 4  ;;  %v6483_v4 = vpop.permute.xlu1 %6482  ;;  %8894 = vmatprep.subr.bf16.mxu0 %v9992_v33 }
 0x78d   : > { %8935 = vmatprep.subr.bf16.mxu1 %v9995_v22  ;;  %5798 = vst [vmem:[#allocation4 + $0x700] sm:$0x33] %v5770_v62  ;;  %v6497_v32 = vrot.slane %v6483_v4, 4  ;;  %v10007_v22 = vld [vmem:[#allocation4 + $0xec] ss:$16 sps:$4 sm:$0xff]   ;;  %vm15323_vm7 = vmmov %vm15321_vm4 }
 0x78e   : > { %v6193_v14 = vsel %vm15315_vm12, %v6176_v3, %v6177_v34  ;;  %vm15324_vm6 = vmmov %vm15321_vm4  ;;  %v6339_v3 = vrot.slane %v14155_v37, 4 }
 0x78f   : > { %v14273_v25 = vsel %vm15316_vm14, %v6155_v23, %v6193_v14  ;;  %v6516_v26 = vsel %vm15317_vm13, %v6496_v39, %v6497_v32  ;;  %v6518_v20 = vsel %vm15318_vm15, %v6483_v4, %v6497_v32  ;;  %v6159_v5 = vpop.permute.xlu0 %6158  ;;  %8895 = vmatpush2.bf16.msra.mxu0 %v9990_v44  ;;  %v9645_v14 = vcombine.high %v14087_v47, %v14107_v46  ;;  %vm15326_vm8 = vmmov %vm15321_vm4 }
 0x790   : > { %8936 = vmatpush2.bf16.msra.mxu1 %v9993_v24  ;;  %v6517_v30 = vsel %vm15319_vm11, %v14028_v9, %v6516_v26  ;;  %6546 = vst.msk [vmem:[#allocation4 + $0x8f8] sm:$0x77] %vm13589_vm9, %v6518_v20  ;;  %v6178_v54 = vrot.slane %v6159_v5, 4  ;;  %v6759_v34 = vpop.permute.xlu1 %6758  ;;  %8896 = vmatprep.subr.bf16.mxu0 %v9998_v61  ;;  %v10005_v24 = vld [vmem:[#allocation4 + $0xe8] ss:$16 sps:$4 sm:$0xff]   ;;  %v14309_v61 = vcombine.high %v14296_v36, %v14296_v36  ;;  %vm15327_vm12 = vmmov %vm15322_vm3  ;;  %vm15328_vm14 = vcmask 384000  }
 0x791   : > { %8937 = vmatprep.subr.bf16.mxu1 %v10001_v40  ;;  %6545 = vst [vmem:[#allocation4 + $0x8f0] sm:$0x77] %v6517_v30  ;;  %v6773_v49 = vrot.slane %v6759_v34, 4  ;;  %vm8770_vm13 = vcmask 801792   ;;  %vm15329_vm15 = vmmov %vm15328_vm14 }
 0x792   : > { %v6196_v27 = vsel %vm15320_vm10, %v6178_v54, %v6179_v29  ;;  %vm15330_vm11 = vmmov %vm15322_vm3 }
 0x793   : > { %v14283_v0 = vsel %vm15309_vm0, %v6159_v5, %v6196_v27  ;;  %v6794_v52 = vsel %vm15321_vm4, %v6759_v34, %v6773_v49  ;;  %v6757_v9 = vpop.permute.xlu0 %6756  ;;  %8897 = vmatpush2.bf16.msra.mxu0 %v9996_v63  ;;  %v10011_v5 = vld [vmem:[#allocation4 + $0xcc] ss:$16 sps:$4 sm:$0xff]   ;;  %v10009_v63 = vld [vmem:[#allocation4 + $0xc8] ss:$16 sps:$4 sm:$0xff]   ;;  %vm15331_vm10 = vmmov %vm15321_vm4  ;;  %v9641_v27 = vcombine.high %v14125_v48, %v14138_v31 }
 0x794   : > { %8938 = vmatpush2.bf16.msra.mxu1 %v9999_v1  ;;  %6822 = vst.msk [vmem:[#allocation4 + $0x9c8] sm:$0x11] %vm11306_vm5, %v6794_v52  ;;  %v6772_v16 = vrot.slane %v6757_v9, 4  ;;  %v6751_v55 = vpop.permute.xlu1 %6750  ;;  %8898 = vmatprep.subr.bf16.mxu0 %v10004_v13  ;;  %v7050_v19 = vld [vmem:[#allocation4 + $0x700] sm:$0xff]  ;;  %vm15325_vm5 = vmmov %vm15322_vm3  ;;  %v10014_v13 = vld [vmem:[#allocation4 + $0xac] ss:$16 sps:$4 sm:$0xff]  }
 0x795   : > { %v6769_v2 = vrot.slane %v6751_v55, 4  ;;  %v9588_v29 = vcombine.low %v7050_v19, %v13997_v42  ;;  %v9589_v58 = vcombine.high %v7050_v19, %v13997_v42  ;;  %v10012_v19 = vld [vmem:[#allocation4 + $0xa8] ss:$16 sps:$4 sm:$0xff]   ;;  %vm15333_vm0 = vmmov %vm15322_vm3 }
 0x796   : > { %v6792_v33 = vsel %vm15322_vm3, %v6772_v16, %v6773_v49 }
 0x797   : > { %v6793_v7 = vsel %vm15323_vm7, %v6757_v9, %v6792_v33  ;;  %v6788_v50 = vsel %vm15324_vm6, %v6751_v55, %v6769_v2  ;;  %v6749_v10 = vpop.permute.xlu0 %6748  ;;  %8939 = vmatprep.subr.bf16.mxu1 %v9589_v58  ;;  %8899 = vmatpush2.bf16.msra.mxu0 %v10002_v43  ;;  %v9640_v55 = vcombine.low %v14125_v48, %v14138_v31  ;;  %v10017_v58 = vld [vmem:[#allocation4 + $0x8c] ss:$16 sps:$4 sm:$0xff]   ;;  %vm15336_vm7 = vmmov %vm15333_vm0 }
 0x798   : > { %6821 = vst [vmem:[#allocation4 + $0x9c0] sm:$0x11] %v6793_v7  ;;  %6818 = vst.msk [vmem:[#allocation4 + $0x9a8] sm:$0xff] %vm11510_vm1, %v6788_v50  ;;  %v6768_v42 = vrot.slane %v6749_v10, 4  ;;  %8940 = vmatpush2.bf16.msra.mxu1 %v9588_v29  ;;  %v7112_v62 = vld [vmem:[#allocation4 + $0x8f0] sm:$0xff] }
 0x799   : > { %v6326_v23 = vpop.permute.xlu1 %6325  ;;  %8991 = vmatprep.subr.bf16.mxu1 %v10007_v22  ;;  %v9648_v39 = vcombine.low %v14024_v38, %v7112_v62  ;;  %v9649_v32 = vcombine.high %v14024_v38, %v7112_v62  ;;  %v10015_v7 = vld [vmem:[#allocation4 + $0x88] ss:$16 sps:$4 sm:$0xff]   ;;  %v10020_v62 = vld [vmem:[#allocation4 + $0x6c] ss:$16 sps:$4 sm:$0xff]  }
 0x79a   : > { %v6340_v4 = vrot.slane %v6326_v23, 4  ;;  %v6786_v44 = vsel %vm15325_vm5, %v6768_v42, %v6769_v2  ;;  %8901 = vmatmul.mubr.bf16.vlgmr.msra.gmra.mxu0 %v13911_v28 }
 0x79b   : > { %v14312_v40 = vsel %vm15326_vm8, %v6749_v10, %v6786_v44  ;;  %v6753_v38 = vpop.permute.xlu0 %6752  ;;  %8942 = vmatmul.mubr.bf16.vlgmr.msra.gmra.mxu1 %v14081_v60  ;;  %8950 = vmatprep.subr.bf16.mxu0 %v9649_v32  ;;  %v9632_v32 = vcombine.low %v14186_v6, %v14201_v8  ;;  %v10018_v44 = vld [vmem:[#allocation4 + $0x68] ss:$16 sps:$4 sm:$0xff]   ;;  %vm15339_vm8 = vmmov %vm15333_vm0 }
 0x79c   : > { %v6359_v26 = vsel %vm15327_vm12, %v6339_v3, %v6340_v4  ;;  %v6361_v20 = vsel %vm15328_vm14, %v6326_v23, %v6340_v4  ;;  %v6770_v54 = vrot.slane %v6753_v38, 4  ;;  %8951 = vmatpush1.bf16.msra.mxu0 %v9648_v39  ;;  %8992 = vmatpush1.bf16.msra.mxu1 %v10005_v24  ;;  %v9633_v23 = vcombine.high %v14186_v6, %v14201_v8  ;;  %v7088_v8 = vld [vmem:[#allocation4 + $0x830] sm:$0xff] }
 0x79d   : > { %v6360_v30 = vsel %vm15329_vm15, %v14155_v37, %v6359_v26  ;;  %6389 = vst.msk [vmem:[#allocation4 + $0x898] sm:$0x33] %vm10369_vm2, %v6361_v20  ;;  %v6755_v34 = vpop.permute.xlu1 %6754  ;;  %8952 = vmatprep.subr.bf16.mxu0 %v9645_v14  ;;  %8993 = vmatprep.subr.bf16.mxu1 %v10011_v5  ;;  %vm15332_vm2 = vmmov %vm15321_vm4  ;;  %v9629_v20 = vcombine.high %v14214_v17, %v14227_v59 }
 0x79e   : > { %6388 = vst [vmem:[#allocation4 + $0x890] sm:$0x33] %v6360_v30  ;;  %v6771_v49 = vrot.slane %v6755_v34, 4  ;;  %9681 = vmatprep.mubr.msk.bf16.mxu0 %vm8770_vm13, %v14309_v61  ;;  %9023 = vmatprep.mubr.bf16.mxu1 %v13348_v18  ;;  %vm15334_vm4 = vmmov %vm15332_vm2 }
 0x79f   : > { %v6741_v11 = vpop.permute.xlu0 %6740  ;;  %vm15335_vm3 = vmmov %vm15332_vm2 }
 0x7a0   : > { %v6789_v1 = vsel %vm15330_vm11, %v6770_v54, %v6771_v49  ;;  %v6791_v37 = vsel %vm15331_vm10, %v6755_v34, %v6771_v49  ;;  %v6764_v9 = vrot.slane %v6741_v11, 4  ;;  %8953 = vmatpush1.bf16.msra.mxu0 %v9644_v53  ;;  %8994 = vmatpush1.bf16.msra.mxu1 %v10009_v63  ;;  %vm15337_vm6 = vmmov %vm15332_vm2  ;;  %v9628_v34 = vcombine.low %v14214_v17, %v14227_v59  ;;  %v10021_v49 = vld [vmem:[#allocation4 + $0x48] ss:$16 sps:$4 sm:$0xff]  }
 0x7a1   : > { %v14329_v52 = vsel %vm15332_vm2, %v6753_v38, %v6789_v1  ;;  %6820 = vst.msk [vmem:[#allocation4 + $0x9b8] sm:$0xff] %vm11510_vm1, %v6791_v37  ;;  %v6743_v18 = vpop.permute.xlu1 %6742  ;;  %8954 = vmatprep.subr.bf16.mxu0 %v9641_v27  ;;  %8995 = vmatprep.subr.bf16.mxu1 %v10014_v13  ;;  %vm15338_vm5 = vmmov %vm15332_vm2  ;;  %v10023_v38 = vld [vmem:[#allocation4 + $0x4c] ss:$16 sps:$4 sm:$0xff]   ;;  %v9624_v59 = vcombine.low %v14242_v35, %v7088_v8 }
 0x7a2   : > { %v6765_v16 = vrot.slane %v6743_v18, 4  ;;  %vm15340_vm12 = vmmov %vm15332_vm2  ;;  %v10026_v27 = vld [vmem:[#allocation4 + $0x2c] ss:$16 sps:$4 sm:$0xff]  }
 0x7a3   : > { %v6745_v29 = vpop.permute.xlu0 %6744  ;;  %vm15341_vm14 = vmmov %vm15332_vm2 }
 0x7a4   : > { %v6780_v2 = vsel %vm15333_vm0, %v6764_v9, %v6765_v16  ;;  %v6782_v43 = vsel %vm15334_vm4, %v6743_v18, %v6765_v16  ;;  %v6766_v47 = vrot.slane %v6745_v29, 4  ;;  %8955 = vmatpush1.bf16.msra.mxu0 %v9640_v55  ;;  %8996 = vmatpush1.bf16.msra.mxu1 %v10012_v19  ;;  %vm15342_vm15 = vmmov %vm15333_vm0  ;;  %v10024_v16 = vld [vmem:[#allocation4 + $0x28] ss:$16 sps:$4 sm:$0xff]  }
 0x7a5   : > { %v14341_v33 = vsel %vm15335_vm3, %v6741_v11, %v6780_v2  ;;  %6814 = vst.msk [vmem:[#allocation4 + $0x988] sm:$0xff] %vm11510_vm1, %v6782_v43  ;;  %v6747_v46 = vpop.permute.xlu1 %6746  ;;  %v7100_v53 = vld [vmem:[#allocation4 + $0x890] sm:$0xff]  ;;  %8997 = vmatprep.subr.bf16.mxu1 %v10017_v58  ;;  %vm15343_vm11 = vmmov %vm15332_vm2  ;;  %v9625_v11 = vcombine.high %v14242_v35, %v7088_v8  ;;  %v9621_v43 = vcombine.high %v14273_v25, %v14283_v0  ;;  %v7138_v35 = vld [vmem:[#allocation4 + $0x9c0] sm:$0x11] }
 0x7a6   : > { %v6767_v22 = vrot.slane %v6747_v46, 4  ;;  %v9636_v48 = vcombine.low %v14151_v51, %v7100_v53  ;;  %v9637_v31 = vcombine.high %v14151_v51, %v7100_v53  ;;  %vm15344_vm10 = vmmov %vm15332_vm2  ;;  %v9620_v53 = vcombine.low %v14273_v25, %v14283_v0  ;;  %v10031_v0 = vld [vmem:[#allocation4 + $0x1e8] ss:$16 sps:$4 sm:$0xff]  }
 0x7a7   : > { %v6733_v42 = vpop.permute.xlu0 %6732  ;;  %vm15345_vm2 = vmmov %vm15333_vm0  ;;  %vm15346_vm0 = vcmask 367616   ;;  %v10035_v8 = vld [vmem:[#allocation4 + $0x1c8] ss:$16 sps:$4 sm:$0xff]  }
 0x7a8   : > { %v6783_v50 = vsel %vm15336_vm7, %v6766_v47, %v6767_v22  ;;  %v6785_v10 = vsel %vm15337_vm6, %v6747_v46, %v6767_v22  ;;  %8956 = vmatprep.subr.bf16.mxu0 %v9637_v31  ;;  %v6760_v4 = vrot.slane %v6733_v42, 4  ;;  %8998 = vmatpush1.bf16.msra.mxu1 %v10015_v7  ;;  %vm15347_vm4 = vmmov %vm15346_vm0  ;;  %v10027_v22 = vld [vmem:[#allocation4 + $0x8] ss:$16 sps:$4 sm:$0xff]   ;;  %v9677_v7 = vcombine.high %v7138_v35, %v7138_v35 }
 0x7a9   : > { %v14352_v3 = vsel %vm15338_vm5, %v6745_v29, %v6783_v50  ;;  %6816 = vst.msk [vmem:[#allocation4 + $0x998] sm:$0xff] %vm11510_vm1, %v6785_v10  ;;  %8957 = vmatpush1.bf16.msra.mxu0 %v9636_v48  ;;  %v6735_v51 = vpop.permute.xlu1 %6734  ;;  %8999 = vmatprep.subr.bf16.mxu1 %v10020_v62  ;;  %v10029_v29 = vld [vmem:[#allocation4 + $0xc] ss:$16 sps:$4 sm:$0xff]   ;;  %vm15348_vm3 = vmmov %vm15346_vm0  ;;  %v9676_v10 = vcombine.low %v7138_v35, %v7138_v35  ;;  %vm15349_vm7 = vcmask 1040384  }
 0x7aa   : > { %v6761_v39 = vrot.slane %v6735_v51, 4  ;;  %8958 = vmatprep.subr.bf16.mxu0 %v9633_v23  ;;  %v10033_v50 = vld [vmem:[#allocation4 + $0x1ec] ss:$16 sps:$4 sm:$0xff]   ;;  %vm15350_vm6 = vmmov %vm15345_vm2 }
 0x7ab   : > { %v6737_v26 = vpop.permute.xlu0 %6736  ;;  %vm15351_vm5 = vmmov %vm15346_vm0 }
 0x7ac   : > { %v6774_v24 = vsel %vm15339_vm8, %v6760_v4, %v6761_v39  ;;  %v6776_v14 = vsel %vm15340_vm12, %v6735_v51, %v6761_v39  ;;  %v6762_v30 = vrot.slane %v6737_v26, 4  ;;  %9000 = vmatpush1.bf16.msra.mxu1 %v10018_v44  ;;  %vm15352_vm8 = vmmov %vm15346_vm0  ;;  %v9673_v44 = vcombine.high %v14312_v40, %v14329_v52 }
 0x7ad   : > { %v14363_v5 = vsel %vm15341_vm14, %v6733_v42, %v6774_v24  ;;  %6810 = vst.msk [vmem:[#allocation4 + $0x968] sm:$0xff] %vm11510_vm1, %v6776_v14  ;;  %8959 = vmatpush1.bf16.msra.mxu0 %v9632_v32  ;;  %v6739_v6 = vpop.permute.xlu1 %6738  ;;  %9001 = vmatprep.subr.bf16.mxu1 %v10023_v38  ;;  %vm15353_vm12 = vmmov %vm15349_vm7  ;;  %v10037_v24 = vld [vmem:[#allocation4 + $0x1cc] ss:$16 sps:$4 sm:$0xff]  }
 0x7ae   : > { %v6763_v54 = vrot.slane %v6739_v6, 4  ;;  %8960 = vmatprep.subr.bf16.mxu0 %v9629_v20  ;;  %v8775_v32 = vsel %vm15353_vm12, %v9676_v10, 0  ;;  %vm15354_vm14 = vmmov %vm15345_vm2  ;;  %v10047_v10 = vld [vmem:[#allocation4 + $0x148] ss:$16 sps:$4 sm:$0xff]  }
 0x7b0   : > { %v6777_v63 = vsel %vm15342_vm15, %v6762_v30, %v6763_v54  ;;  %v6779_v1 = vsel %vm15343_vm11, %v6739_v6, %v6763_v54  ;;  %v6634_v37 = vpop.permute.xlu0 %6633  ;;  %9002 = vmatpush1.bf16.msra.mxu1 %v10021_v49  ;;  %v9672_v6 = vcombine.low %v14312_v40, %v14329_v52  ;;  %vm15355_vm15 = vmmov %vm15346_vm0 }
 0x7b1   : > { %v14373_v13 = vsel %vm15344_vm10, %v6737_v26, %v6777_v63  ;;  %6812 = vst.msk [vmem:[#allocation4 + $0x978] sm:$0xff] %vm11510_vm1, %v6779_v1  ;;  %v6651_v9 = vrot.slane %v6634_v37, 4  ;;  %8961 = vmatpush1.bf16.msra.mxu0 %v9628_v34  ;;  %v6636_v18 = vpop.permute.xlu1 %6635  ;;  %9003 = vmatprep.subr.bf16.mxu1 %v10026_v27  ;;  %vm15356_vm11 = vmmov %vm15345_vm2  ;;  %v9669_v1 = vcombine.high %v14341_v33, %v14352_v3 }
 0x7b2   : > { %v6652_v17 = vrot.slane %v6636_v18, 4  ;;  %8962 = vmatprep.subr.bf16.mxu0 %v9625_v11  ;;  %vm15357_vm10 = vmmov %vm15346_vm0 }
 0x7b4   : > { %v6670_v55 = vsel %vm15345_vm2, %v6651_v9, %v6652_v17  ;;  %v6672_v19 = vsel %vm15346_vm0, %v6636_v18, %v6652_v17  ;;  %v6638_v2 = vpop.permute.xlu0 %6637  ;;  %9004 = vmatpush1.bf16.msra.mxu1 %v10024_v16  ;;  %vm15358_vm2 = vmmov %vm15346_vm0  ;;  %v9668_v9 = vcombine.low %v14341_v33, %v14352_v3  ;;  %v10038_v18 = vld [vmem:[#allocation4 + $0x1a8] ss:$16 sps:$4 sm:$0xff]   ;;  %v9664_v3 = vcombine.low %v14363_v5, %v14373_v13 }
 0x7b5   : > { %v14383_v58 = vsel %vm15347_vm4, %v6634_v37, %v6670_v55  ;;  %6701 = vst.msk [vmem:[#allocation4 + $0x948] sm:$0xff] %vm11510_vm1, %v6672_v19  ;;  %8963 = vmatpush1.bf16.msra.mxu0 %v9624_v59  ;;  %v6628_v47 = vpop.permute.xlu1 %6627  ;;  %9005 = vmatprep.subr.bf16.mxu1 %v10029_v29  ;;  %v6653_v20 = vrot.slane %v6638_v2, 4  ;;  %v10040_v37 = vld [vmem:[#allocation4 + $0x1ac] ss:$16 sps:$4 sm:$0xff]   ;;  %vm15359_vm0 = vmmov %vm15350_vm6  ;;  %v9665_v55 = vcombine.high %v14363_v5, %v14373_v13 }
 0x7b6   : > { %v6648_v46 = vrot.slane %v6628_v47, 4  ;;  %8964 = vmatprep.subr.bf16.mxu0 %v9621_v43  ;;  %vm15360_vm4 = vmmov %vm15358_vm2  ;;  %v10043_v19 = vld [vmem:[#allocation4 + $0x18c] ss:$16 sps:$4 sm:$0xff]  }
 0x7b8   : > { %v6666_v48 = vsel %vm15348_vm3, %v6628_v47, %v6648_v46  ;;  %v6626_v31 = vpop.permute.xlu0 %6625  ;;  %9006 = vmatpush1.bf16.msra.mxu1 %v10027_v22  ;;  %vm15361_vm3 = vmmov %vm15358_vm2  ;;  %v10041_v47 = vld [vmem:[#allocation4 + $0x188] ss:$16 sps:$4 sm:$0xff]  }
 0x7b9   : > { %6697 = vst.msk [vmem:[#allocation4 + $0x928] sm:$0xff] %vm11510_vm1, %v6666_v48  ;;  %v6647_v42 = vrot.slane %v6626_v31, 4  ;;  %8965 = vmatpush1.bf16.msra.mxu0 %v9620_v53  ;;  %v6632_v23 = vpop.permute.xlu1 %6631  ;;  %9007 = vmatprep.subr.bf16.mxu1 %v10033_v50  ;;  %v10046_v53 = vld [vmem:[#allocation4 + $0x16c] ss:$16 sps:$4 sm:$0xff]  }
 0x7ba   : > { %v6650_v62 = vrot.slane %v6632_v23, 4  ;;  %9680 = vmatprep.subr.msk.bf16.mxu0 %vm15349_vm7, %v9677_v7  ;;  %vm15362_vm7 = vmmov %vm15359_vm0  ;;  %v10049_v7 = vld [vmem:[#allocation4 + $0x14c] ss:$16 sps:$4 sm:$0xff]  }
 0x7bb   : > { %v6664_v25 = vsel %vm15350_vm6, %v6647_v42, %v6648_v46  ;;  %vm15363_vm6 = vmmov %vm15358_vm2  ;;  %v10052_v42 = vld [vmem:[#allocation4 + $0x12c] ss:$16 sps:$4 sm:$0xff]  }
 0x7bc   : > { %v14395_v4 = vsel %vm15351_vm5, %v6626_v31, %v6664_v25  ;;  %v6669_v51 = vsel %vm15352_vm8, %v6632_v23, %v6650_v62  ;;  %v6630_v39 = vpop.permute.xlu0 %6629  ;;  %9008 = vmatpush2.bf16.msra.mxu1 %v10031_v0  ;;  %vm15364_vm5 = vmmov %vm15358_vm2  ;;  %v10044_v31 = vld [vmem:[#allocation4 + $0x168] ss:$16 sps:$4 sm:$0xff]   ;;  %v10055_v25 = vld [vmem:[#allocation4 + $0x10c] ss:$16 sps:$4 sm:$0xff]  }
 0x7bd   : > { %6699 = vst.msk [vmem:[#allocation4 + $0x938] sm:$0xff] %vm11510_vm1, %v6669_v51  ;;  %v6649_v14 = vrot.slane %v6630_v39, 4  ;;  %8969 = vmatpush2.bf16.msra.mxu0 %v8775_v32  ;;  %v6640_v26 = vpop.permute.xlu1 %6639  ;;  %9009 = vmatprep.subr.bf16.mxu1 %v10037_v24  ;;  %v10050_v23 = vld [vmem:[#allocation4 + $0x128] ss:$16 sps:$4 sm:$0xff]   ;;  %v10067_v24 = vld [vmem:[#allocation4 + $0x2ac] ss:$16 sps:$4 sm:$0xff]  }
 0x7be   : > { %v6654_v38 = vrot.slane %v6640_v26, 4  ;;  %8970 = vmatprep.subr.bf16.mxu0 %v9673_v44  ;;  %v10053_v0 = vld [vmem:[#allocation4 + $0x108] ss:$16 sps:$4 sm:$0xff]  }
 0x7bf   : > { %v6667_v30 = vsel %vm15354_vm14, %v6649_v14, %v6650_v62  ;;  %v10056_v51 = vld [vmem:[#allocation4 + $0x2e8] ss:$16 sps:$4 sm:$0xff]   ;;  %v10070_v14 = vld [vmem:[#allocation4 + $0x4cc] ss:$16 sps:$4 sm:$0xff]  }
 0x7c0   : > { %v6668_v54 = vsel %vm15355_vm15, %v6630_v39, %v6667_v30  ;;  %v6673_v34 = vsel %vm15356_vm11, %v6653_v20, %v6654_v38  ;;  %v6675_v49 = vsel %vm15357_vm10, %v6640_v26, %v6654_v38  ;;  %v6618_v63 = vpop.permute.xlu0 %6617  ;;  %9010 = vmatpush2.bf16.msra.mxu1 %v10035_v8  ;;  %v10064_v39 = vld [vmem:[#allocation4 + $0x4ec] ss:$16 sps:$4 sm:$0xff]   ;;  %v10059_v32 = vld [vmem:[#allocation4 + $0x2c8] ss:$16 sps:$4 sm:$0xff]  }
 0x7c1   : > { %v6674_v11 = vsel %vm15358_vm2, %v6638_v2, %v6673_v34  ;;  %6703 = vst.msk [vmem:[#allocation4 + $0x958] sm:$0xff] %vm11510_vm1, %v6675_v49  ;;  %v6643_v27 = vrot.slane %v6618_v63, 4  ;;  %8971 = vmatpush2.bf16.msra.mxu0 %v9672_v6  ;;  %v6620_v40 = vpop.permute.xlu1 %6619  ;;  %9011 = vmatprep.subr.bf16.mxu1 %v10040_v37  ;;  %v9657_v13 = vcombine.high %v14395_v4, %v6668_v54  ;;  %v10062_v44 = vld [vmem:[#allocation4 + $0x4e8] ss:$16 sps:$4 sm:$0xff]   ;;  %v10073_v20 = vld [vmem:[#allocation4 + $0x28c] ss:$16 sps:$4 sm:$0xff]  }
 0x7c2   : > { %v6644_v52 = vrot.slane %v6620_v40, 4  ;;  %8972 = vmatprep.subr.bf16.mxu0 %v9669_v1  ;;  %v9661_v22 = vcombine.high %v14383_v58, %v6674_v11  ;;  %v9660_v5 = vcombine.low %v14383_v58, %v6674_v11  ;;  %v9656_v50 = vcombine.low %v14395_v4, %v6668_v54  ;;  %v10058_v58 = vld [vmem:[#allocation4 + $0x2ec] ss:$16 sps:$4 sm:$0xff]   ;;  %v10065_v26 = vld [vmem:[#allocation4 + $0x2a8] ss:$16 sps:$4 sm:$0xff]  }
 0x7c3   : > { %v10061_v4 = vld [vmem:[#allocation4 + $0x2cc] ss:$16 sps:$4 sm:$0xff]   ;;  %v10071_v30 = vld [vmem:[#allocation4 + $0x288] ss:$16 sps:$4 sm:$0xff]  }
 0x7c4   : > { %v6658_v17 = vsel %vm15359_vm0, %v6643_v27, %v6644_v52  ;;  %v6660_v59 = vsel %vm15360_vm4, %v6620_v40, %v6644_v52  ;;  %v6622_v16 = vpop.permute.xlu0 %6621  ;;  %9012 = vmatpush2.bf16.msra.mxu1 %v10038_v18  ;;  %v10076_v38 = vld [vmem:[#allocation4 + $0x4ac] ss:$16 sps:$4 sm:$0xff]   ;;  %v10077_v8 = vld [vmem:[#allocation4 + $0x268] ss:$16 sps:$4 sm:$0xff]  }
 0x7c5   : > { %v6659_v2 = vsel %vm15361_vm3, %v6618_v63, %v6658_v17  ;;  %6693 = vst.msk [vmem:[#allocation4 + $0x908] sm:$0xff] %vm11510_vm1, %v6660_v59  ;;  %v6645_v43 = vrot.slane %v6622_v16, 4  ;;  %8973 = vmatpush2.bf16.msra.mxu0 %v9668_v9  ;;  %v6624_v29 = vpop.permute.xlu1 %6623  ;;  %9013 = vmatprep.subr.bf16.mxu1 %v10043_v19  ;;  %v10079_v6 = vld [vmem:[#allocation4 + $0x26c] ss:$16 sps:$4 sm:$0xff]   ;;  %v10080_v54 = vld [vmem:[#allocation4 + $0x488] ss:$16 sps:$4 sm:$0xff]  }
 0x7c6   : > { %v6646_v33 = vrot.slane %v6624_v29, 4  ;;  %8974 = vmatprep.subr.bf16.mxu0 %v9665_v55  ;;  %v10085_v34 = vld [vmem:[#allocation4 + $0x24c] ss:$16 sps:$4 sm:$0xff]   ;;  %v10086_v63 = vld [vmem:[#allocation4 + $0x468] ss:$16 sps:$4 sm:$0xff]  }
 0x7c7   : > { %v10088_v49 = vld [vmem:[#allocation4 + $0x46c] ss:$16 sps:$4 sm:$0xff]   ;;  %v10089_v11 = vld [vmem:[#allocation4 + $0x228] ss:$16 sps:$4 sm:$0xff]  }
 0x7c8   : > { %v6661_v35 = vsel %vm15362_vm7, %v6645_v43, %v6646_v33  ;;  %v6663_v46 = vsel %vm15363_vm6, %v6624_v29, %v6646_v33  ;;  %9014 = vmatpush2.bf16.msra.mxu1 %v10041_v47  ;;  %v10091_v1 = vld [vmem:[#allocation4 + $0x22c] ss:$16 sps:$4 sm:$0xff]   ;;  %v10092_v27 = vld [vmem:[#allocation4 + $0x448] ss:$16 sps:$4 sm:$0xff]  }
 0x7c9   : > { %v6662_v48 = vsel %vm15364_vm5, %v6622_v16, %v6661_v35  ;;  %6695 = vst.msk [vmem:[#allocation4 + $0x918] sm:$0xff] %vm11510_vm1, %v6663_v46  ;;  %8975 = vmatpush2.bf16.msra.mxu0 %v9664_v3  ;;  %9015 = vmatprep.subr.bf16.mxu1 %v10046_v53  ;;  %v10094_v37 = vld [vmem:[#allocation4 + $0x44c] ss:$16 sps:$4 sm:$0xff]   ;;  %v10095_v9 = vld [vmem:[#allocation4 + $0x208] ss:$16 sps:$4 sm:$0xff]   ;;  %vm15365_vm1 = vmmov %vm15353_vm12 }
 0x7ca   : > { %8976 = vmatprep.subr.bf16.mxu0 %v9661_v22  ;;  %v9653_v12 = vcombine.high %v6659_v2, %v6662_v48  ;;  %v9652_v62 = vcombine.low %v6659_v2, %v6662_v48  ;;  %v10097_v40 = vld [vmem:[#allocation4 + $0x20c] ss:$16 sps:$4 sm:$0xff]   ;;  %v10098_v18 = vld [vmem:[#allocation4 + $0x428] ss:$16 sps:$4 sm:$0xff]  }
 0x7cb   : > { %v10100_v52 = vld [vmem:[#allocation4 + $0x42c] ss:$16 sps:$4 sm:$0xff]   ;;  %v10101_v16 = vld [vmem:[#allocation4 + $0x3e8] ss:$16 sps:$4 sm:$0xff]  }
 0x7cc   : > { %9016 = vmatpush2.bf16.msra.mxu1 %v10044_v31  ;;  %v10103_v17 = vld [vmem:[#allocation4 + $0x3ec] ss:$16 sps:$4 sm:$0xff]   ;;  %v10104_v55 = vld [vmem:[#allocation4 + $0x408] ss:$16 sps:$4 sm:$0xff]  }
 0x7cd   : > { %8977 = vmatpush2.bf16.msra.mxu0 %v9660_v5  ;;  %9017 = vmatprep.subr.bf16.mxu1 %v10049_v7  ;;  %v10106_v59 = vld [vmem:[#allocation4 + $0x40c] ss:$16 sps:$4 sm:$0xff]   ;;  %v10107_v43 = vld [vmem:[#allocation4 + $0x3c8] ss:$16 sps:$4 sm:$0xff]  }
 0x7ce   : > { %8978 = vmatprep.subr.bf16.mxu0 %v9657_v13  ;;  %v10109_v19 = vld [vmem:[#allocation4 + $0x3cc] ss:$16 sps:$4 sm:$0xff]   ;;  %v10110_v29 = vld [vmem:[#allocation4 + $0x5e8] ss:$16 sps:$4 sm:$0xff]  }
 0x7cf   : > { %v10112_v2 = vld [vmem:[#allocation4 + $0x5ec] ss:$16 sps:$4 sm:$0xff]   ;;  %v10113_v47 = vld [vmem:[#allocation4 + $0x3a8] ss:$16 sps:$4 sm:$0xff]  }
 0x7d0   : > { %9018 = vmatpush2.bf16.msra.mxu1 %v10047_v10  ;;  %v10115_v33 = vld [vmem:[#allocation4 + $0x3ac] ss:$16 sps:$4 sm:$0xff]   ;;  %v10116_v35 = vld [vmem:[#allocation4 + $0x5c8] ss:$16 sps:$4 sm:$0xff]  }
 0x7d1   : > { %8979 = vmatpush2.bf16.msra.mxu0 %v9656_v50  ;;  %9019 = vmatprep.subr.bf16.mxu1 %v10052_v42  ;;  %v10118_v3 = vld [vmem:[#allocation4 + $0x5cc] ss:$16 sps:$4 sm:$0xff]   ;;  %v10119_v31 = vld [vmem:[#allocation4 + $0x388] ss:$16 sps:$4 sm:$0xff]  }
 0x7d2   : > { %8980 = vmatprep.subr.bf16.mxu0 %v9653_v12  ;;  %v10121_v53 = vld [vmem:[#allocation4 + $0x38c] ss:$16 sps:$4 sm:$0xff]   ;;  %v10122_v5 = vld [vmem:[#allocation4 + $0x5a8] ss:$16 sps:$4 sm:$0xff]  }
 0x7d3   : > { %v10124_v22 = vld [vmem:[#allocation4 + $0x5ac] ss:$16 sps:$4 sm:$0xff]   ;;  %v10125_v42 = vld [vmem:[#allocation4 + $0x368] ss:$16 sps:$4 sm:$0xff]  }
 0x7d4   : > { %9020 = vmatpush2.bf16.msra.mxu1 %v10050_v23  ;;  %v10127_v7 = vld [vmem:[#allocation4 + $0x36c] ss:$16 sps:$4 sm:$0xff]   ;;  %v10128_v12 = vld [vmem:[#allocation4 + $0x588] ss:$16 sps:$4 sm:$0xff]  }
 0x7d5   : > { %8981 = vmatpush2.bf16.msra.mxu0 %v9652_v62  ;;  %9021 = vmatprep.subr.bf16.mxu1 %v10055_v25  ;;  %v10130_v50 = vld [vmem:[#allocation4 + $0x58c] ss:$16 sps:$4 sm:$0xff]   ;;  %v10131_v25 = vld [vmem:[#allocation4 + $0x348] ss:$16 sps:$4 sm:$0xff]  }
 0x7d6   : > { %9032 = vmatprep.subr.bf16.mxu0 %v10058_v58  ;;  %v10133_v23 = vld [vmem:[#allocation4 + $0x34c] ss:$16 sps:$4 sm:$0xff]   ;;  %v10134_v58 = vld [vmem:[#allocation4 + $0x568] ss:$16 sps:$4 sm:$0xff]  }
 0x7d7   : > { %v10136_v62 = vld [vmem:[#allocation4 + $0x56c] ss:$16 sps:$4 sm:$0xff]  }
 0x7d8   : > { %8983 = vmatmul.mubr.bf16.vlgmr.msra.gmra.mxu0 %v14296_v36  ;;  %9022 = vmatpush2.bf16.msra.mxu1 %v10053_v0  ;;  %v10068_v36 = vld [vmem:[#allocation4 + $0x4c8] ss:$16 sps:$4 sm:$0xff]   ;;  %v10139_v0 = vld [vmem:[#allocation4 + $0x32c] ss:$16 sps:$4 sm:$0xff]  }
 0x7d9   : > { %9033 = vmatpush1.bf16.msra.mxu0 %v10056_v51  ;;  %9073 = vmatprep.subr.bf16.mxu1 %v10064_v39  ;;  %v10142_v51 = vld [vmem:[#allocation4 + $0x54c] ss:$16 sps:$4 sm:$0xff]   ;;  %v10140_v39 = vld [vmem:[#allocation4 + $0x548] ss:$16 sps:$4 sm:$0xff]  }
 0x7da   : > { %9034 = vmatprep.subr.bf16.mxu0 %v10061_v4  ;;  %9064 = vmatprep.mubr.bf16.mxu0 %v13514_v41  ;;  %v10074_v41 = vld [vmem:[#allocation4 + $0x4a8] ss:$16 sps:$4 sm:$0xff]  }
 0x7db   : > { %9024 = vmatmul.mubr.bf16.vlgmr.msra.gmra.mxu1 %v13335_v15  ;;  %v10082_v15 = vld [vmem:[#allocation4 + $0x48c] ss:$16 sps:$4 sm:$0xff]   ;;  %v10137_v4 = vld [vmem:[#allocation4 + $0x328] ss:$16 sps:$4 sm:$0xff]  }
 0x7dc   : > { %9074 = vmatpush1.bf16.msra.mxu1 %v10062_v44  ;;  %9105 = vmatprep.mubr.bf16.mxu1 %v13947_v45  ;;  %v10083_v45 = vld [vmem:[#allocation4 + $0x248] ss:$16 sps:$4 sm:$0xff]   ;;  %v10148_v44 = vld [vmem:[#allocation4 + $0x52c] ss:$16 sps:$4 sm:$0xff]  }
 0x7dd   : > { %9035 = vmatpush1.bf16.msra.mxu0 %v10059_v32  ;;  %9075 = vmatprep.subr.bf16.mxu1 %v10070_v14  ;;  %v10145_v32 = vld [vmem:[#allocation4 + $0x30c] ss:$16 sps:$4 sm:$0xff]   ;;  %v10146_v14 = vld [vmem:[#allocation4 + $0x528] ss:$16 sps:$4 sm:$0xff]  }
 0x7de   : > { %9036 = vmatprep.subr.bf16.mxu0 %v10067_v24  ;;  %v10143_v24 = vld [vmem:[#allocation4 + $0x308] ss:$16 sps:$4 sm:$0xff]  }
 0x7e0   : > { %9076 = vmatpush1.bf16.msra.mxu1 %v10068_v36  ;;  %v10154_v36 = vld [vmem:[#allocation4 + $0x6ec] ss:$16 sps:$4 sm:$0xff]  }
 0x7e1   : > { %9037 = vmatpush1.bf16.msra.mxu0 %v10065_v26  ;;  %9077 = vmatprep.subr.bf16.mxu1 %v10076_v38  ;;  %v10151_v26 = vld [vmem:[#allocation4 + $0x50c] ss:$16 sps:$4 sm:$0xff]   ;;  %v10152_v38 = vld [vmem:[#allocation4 + $0x6e8] ss:$16 sps:$4 sm:$0xff]  }
 0x7e2   : > { %9038 = vmatprep.subr.bf16.mxu0 %v10073_v20  ;;  %v10149_v20 = vld [vmem:[#allocation4 + $0x508] ss:$16 sps:$4 sm:$0xff]  }
 0x7e4   : > { %9078 = vmatpush1.bf16.msra.mxu1 %v10074_v41  ;;  %v10160_v41 = vld [vmem:[#allocation4 + $0x8ec] ss:$16 sps:$4 sm:$0xff]  }
 0x7e5   : > { %9039 = vmatpush1.bf16.msra.mxu0 %v10071_v30  ;;  %9079 = vmatprep.subr.bf16.mxu1 %v10082_v15  ;;  %v10157_v30 = vld [vmem:[#allocation4 + $0x6cc] ss:$16 sps:$4 sm:$0xff]  }
 0x7e6   : > { %9040 = vmatprep.subr.bf16.mxu0 %v10079_v6  ;;  %v14439_v6 = vpop.permute.xlu0 %7143 }
 0x7e8   : > { %9080 = vmatpush1.bf16.msra.mxu1 %v10080_v54  ;;  %v10158_v54 = vld [vmem:[#allocation4 + $0x8e8] ss:$16 sps:$4 sm:$0xff]  }
 0x7e9   : > { %9041 = vmatpush1.bf16.msra.mxu0 %v10077_v8  ;;  %9081 = vmatprep.subr.bf16.mxu1 %v10088_v49  ;;  %v10155_v8 = vld [vmem:[#allocation4 + $0x6c8] ss:$16 sps:$4 sm:$0xff]  }
 0x7ea   : > { %9042 = vmatprep.subr.bf16.mxu0 %v10085_v34 }
 0x7ec   : > { %9082 = vmatpush1.bf16.msra.mxu1 %v10086_v63  ;;  %v10166_v63 = vld [vmem:[#allocation4 + $0x8cc] ss:$16 sps:$4 sm:$0xff]  }
 0x7ed   : > { %9043 = vmatpush1.bf16.msra.mxu0 %v10083_v45  ;;  %9083 = vmatprep.subr.bf16.mxu1 %v10094_v37 }
 0x7ee   : > { %9044 = vmatprep.subr.bf16.mxu0 %v10091_v1 }
 0x7f0   : > { %9084 = vmatpush1.bf16.msra.mxu1 %v10092_v27  ;;  %v10164_v27 = vld [vmem:[#allocation4 + $0x8c8] ss:$16 sps:$4 sm:$0xff]  }
 0x7f1   : > { %9045 = vmatpush1.bf16.msra.mxu0 %v10089_v11  ;;  %9085 = vmatprep.subr.bf16.mxu1 %v10100_v52  ;;  %v10161_v11 = vld [vmem:[#allocation4 + $0x6a8] ss:$16 sps:$4 sm:$0xff]   ;;  %v10172_v52 = vld [vmem:[#allocation4 + $0x8ac] ss:$16 sps:$4 sm:$0xff]  }
 0x7f2   : > { %9046 = vmatprep.subr.bf16.mxu0 %v10097_v40 }
 0x7f4   : > { %9086 = vmatpush1.bf16.msra.mxu1 %v10098_v18  ;;  %v10170_v18 = vld [vmem:[#allocation4 + $0x8a8] ss:$16 sps:$4 sm:$0xff]  }
 0x7f5   : > { %9047 = vmatpush1.bf16.msra.mxu0 %v10095_v9  ;;  %9087 = vmatprep.subr.bf16.mxu1 %v10106_v59  ;;  %v10167_v9 = vld [vmem:[#allocation4 + $0x688] ss:$16 sps:$4 sm:$0xff]   ;;  %v10178_v59 = vld [vmem:[#allocation4 + $0x88c] ss:$16 sps:$4 sm:$0xff]  }
 0x7f6   : > { %9048 = vmatprep.subr.bf16.mxu0 %v10103_v17  ;;  %v10175_v17 = vld [vmem:[#allocation4 + $0x66c] ss:$16 sps:$4 sm:$0xff]  }
 0x7f8   : > { %9088 = vmatpush1.bf16.msra.mxu1 %v10104_v55  ;;  %v10176_v55 = vld [vmem:[#allocation4 + $0x888] ss:$16 sps:$4 sm:$0xff]  }
 0x7f9   : > { %9049 = vmatpush2.bf16.msra.mxu0 %v10101_v16  ;;  %9089 = vmatprep.subr.bf16.mxu1 %v10112_v2  ;;  %v10173_v16 = vld [vmem:[#allocation4 + $0x668] ss:$16 sps:$4 sm:$0xff]   ;;  %v10184_v2 = vld [vmem:[#allocation4 + $0x86c] ss:$16 sps:$4 sm:$0xff]  }
 0x7fa   : > { %9050 = vmatprep.subr.bf16.mxu0 %v10109_v19  ;;  %v10181_v19 = vld [vmem:[#allocation4 + $0x64c] ss:$16 sps:$4 sm:$0xff]  }
 0x7fc   : > { %9090 = vmatpush2.bf16.msra.mxu1 %v10110_v29  ;;  %v10187_v29 = vld [vmem:[#allocation4 + $0x62c] ss:$16 sps:$4 sm:$0xff]  }
 0x7fd   : > { %9051 = vmatpush2.bf16.msra.mxu0 %v10107_v43  ;;  %9091 = vmatprep.subr.bf16.mxu1 %v10118_v3  ;;  %v10182_v43 = vld [vmem:[#allocation4 + $0x868] ss:$16 sps:$4 sm:$0xff]  }
 0x7fe   : > { %9052 = vmatprep.subr.bf16.mxu0 %v10115_v33  ;;  %v10190_v33 = vld [vmem:[#allocation4 + $0x84c] ss:$16 sps:$4 sm:$0xff]   ;;  %v10185_v3 = vld [vmem:[#allocation4 + $0x628] ss:$16 sps:$4 sm:$0xff]  }
 0x7ff   : > { %v8820_v46 = vpop.f32.mrf.mxu0 }
 0x800   : > { %9092 = vmatpush2.bf16.msra.mxu1 %v10116_v35  ;;  %v8821_v15 = vadd.f32 %v8820_v46, %v14439_v6  ;;  %v10193_v35 = vld [vmem:[#allocation4 + $0x60c] ss:$16 sps:$4 sm:$0xff]  }
 0x801   : > { %9053 = vmatpush2.bf16.msra.mxu0 %v10113_v47  ;;  %v8822_v48 = vpop.f32.mrf.mxu0  ;;  %9093 = vmatprep.subr.bf16.mxu1 %v10124_v22  ;;  %v10188_v47 = vld [vmem:[#allocation4 + $0x848] ss:$16 sps:$4 sm:$0xff]   ;;  %v10196_v46 = vld [vmem:[#allocation4 + $0x82c] ss:$16 sps:$4 sm:$0xff]  }
 0x802   : > { %9054 = vmatprep.subr.bf16.mxu0 %v10121_v53  ;;  %v8823_v49 = vadd.f32 %v8822_v48, %v14439_v6  ;;  %v10191_v53 = vld [vmem:[#allocation4 + $0x608] ss:$16 sps:$4 sm:$0xff]   ;;  %v10199_v48 = vld [vmem:[#allocation4 + $0x7ec] ss:$16 sps:$4 sm:$0xff]  }
 0x803   : > { %v8824_v13 = vpop.f32.mrf.mxu0  ;;  %v10194_v22 = vld [vmem:[#allocation4 + $0x828] ss:$16 sps:$4 sm:$0xff]  }
 0x804   : > { %9094 = vmatpush2.bf16.msra.mxu1 %v10122_v5  ;;  %v7139_v5 = vld [vmem:[#allocation4 + $0x9c8] sm:$0x11] }
 0x805   : > { %9055 = vmatpush2.bf16.msra.mxu0 %v10119_v31  ;;  %v8825_v10 = vpop.f32.mrf.mxu0  ;;  %9095 = vmatprep.subr.bf16.mxu1 %v10130_v50  ;;  %v10202_v31 = vld [vmem:[#allocation4 + $0x80c] ss:$16 sps:$4 sm:$0xff]   ;;  %v10197_v13 = vld [vmem:[#allocation4 + $0x7e8] ss:$16 sps:$4 sm:$0xff]  }
 0x806   : > { %9056 = vmatprep.subr.bf16.mxu0 %v10127_v7  ;;  %v10200_v7 = vld [vmem:[#allocation4 + $0x808] ss:$16 sps:$4 sm:$0xff]   ;;  %v10205_v50 = vld [vmem:[#allocation4 + $0x7cc] ss:$16 sps:$4 sm:$0xff]   ;;  %v9679_v10 = vcombine.high %v7139_v5, %v7139_v5 }
 0x808   : > { %9096 = vmatpush2.bf16.msra.mxu1 %v10128_v12  ;;  %v10203_v12 = vld [vmem:[#allocation4 + $0x7c8] ss:$16 sps:$4 sm:$0xff]  }
 0x809   : > { %9057 = vmatpush2.bf16.msra.mxu0 %v10125_v42  ;;  %9097 = vmatprep.subr.bf16.mxu1 %v10136_v62  ;;  %v9678_v42 = vcombine.low %v7139_v5, %v7139_v5  ;;  %v10210_v62 = vld [vmem:[#allocation4 + $0x7ac] ss:$16 sps:$4 sm:$0xff]  }
 0x80a   : > { %9058 = vmatprep.subr.bf16.mxu0 %v10133_v23 }
 0x80c   : > { %9098 = vmatpush2.bf16.msra.mxu1 %v10134_v58  ;;  %v10208_v58 = vld [vmem:[#allocation4 + $0x7a8] ss:$16 sps:$4 sm:$0xff]  }
 0x80d   : > { %9059 = vmatpush2.bf16.msra.mxu0 %v10131_v25  ;;  %9099 = vmatprep.subr.bf16.mxu1 %v10142_v51  ;;  %v10213_v25 = vld [vmem:[#allocation4 + $0x9ac] ss:$16 sps:$4 sm:$0xff]  }
 0x80e   : > { %9060 = vmatprep.subr.bf16.mxu0 %v10139_v0  ;;  %v10211_v0 = vld [vmem:[#allocation4 + $0x9a8] ss:$16 sps:$4 sm:$0xff]   ;;  %v10216_v51 = vld [vmem:[#allocation4 + $0x78c] ss:$16 sps:$4 sm:$0xff]  }
 0x810   : > { %9100 = vmatpush2.bf16.msra.mxu1 %v10140_v39  ;;  %v10214_v39 = vld [vmem:[#allocation4 + $0x788] ss:$16 sps:$4 sm:$0xff]  }
 0x811   : > { %9061 = vmatpush2.bf16.msra.mxu0 %v10137_v4  ;;  %9101 = vmatprep.subr.bf16.mxu1 %v10148_v44  ;;  %v10219_v4 = vld [vmem:[#allocation4 + $0x98c] ss:$16 sps:$4 sm:$0xff]  }
 0x812   : > { %9062 = vmatprep.subr.bf16.mxu0 %v10145_v32  ;;  %v10217_v32 = vld [vmem:[#allocation4 + $0x988] ss:$16 sps:$4 sm:$0xff]   ;;  %v10222_v44 = vld [vmem:[#allocation4 + $0x76c] ss:$16 sps:$4 sm:$0xff]  }
 0x814   : > { %9102 = vmatpush2.bf16.msra.mxu1 %v10146_v14  ;;  %v10220_v14 = vld [vmem:[#allocation4 + $0x768] ss:$16 sps:$4 sm:$0xff]  }
 0x815   : > { %9063 = vmatpush2.bf16.msra.mxu0 %v10143_v24  ;;  %9103 = vmatprep.subr.bf16.mxu1 %v10151_v26  ;;  %v10225_v24 = vld [vmem:[#allocation4 + $0x96c] ss:$16 sps:$4 sm:$0xff]   ;;  %v10223_v26 = vld [vmem:[#allocation4 + $0x968] ss:$16 sps:$4 sm:$0xff]  }
 0x816   : > { %9114 = vmatprep.subr.bf16.mxu0 %v10154_v36  ;;  %v10228_v36 = vld [vmem:[#allocation4 + $0x74c] ss:$16 sps:$4 sm:$0xff]  }
 0x818   : > { %9065 = vmatmul.mubr.bf16.vlgmr.msra.gmra.mxu0 %v13499_v56  ;;  %9104 = vmatpush2.bf16.msra.mxu1 %v10149_v20  ;;  %v10163_v56 = vld [vmem:[#allocation4 + $0x6ac] ss:$16 sps:$4 sm:$0xff]  }
 0x819   : > { %9115 = vmatpush1.bf16.msra.mxu0 %v10152_v38  ;;  %9155 = vmatprep.subr.bf16.mxu1 %v10160_v41  ;;  %v10231_v20 = vld [vmem:[#allocation4 + $0x94c] ss:$16 sps:$4 sm:$0xff]   ;;  %v10226_v38 = vld [vmem:[#allocation4 + $0x748] ss:$16 sps:$4 sm:$0xff]  }
 0x81a   : > { %9116 = vmatprep.subr.bf16.mxu0 %v10157_v30  ;;  %9146 = vmatprep.mubr.bf16.mxu0 %v14100_v21  ;;  %v10169_v21 = vld [vmem:[#allocation4 + $0x68c] ss:$16 sps:$4 sm:$0xff]   ;;  %v10229_v30 = vld [vmem:[#allocation4 + $0x948] ss:$16 sps:$4 sm:$0xff]  }
 0x81b   : > { %v8861_v34 = vpop.f32.mrf.mxu1  ;;  %9106 = vmatmul.mubr.bf16.vlgmr.msra.gmra.mxu1 %v13911_v28  ;;  %v10234_v41 = vld [vmem:[#allocation4 + $0x72c] ss:$16 sps:$4 sm:$0xff]  }
 0x81c   : > { %v14444_v45 = vadd.f32 %v8861_v34, %v8821_v15  ;;  %9156 = vmatpush1.bf16.msra.mxu1 %v10158_v54  ;;  %9683 = vmatprep.mubr.msk.bf16.mxu1 %vm8770_vm13, %v14309_v61  ;;  %v10179_v61 = vld [vmem:[#allocation4 + $0x648] ss:$16 sps:$4 sm:$0xff]   ;;  %vm15366_vm13 = vmmov %vm15365_vm1  ;;  %v10237_v15 = vld [vmem:[#allocation4 + $0x92c] ss:$16 sps:$4 sm:$0xff]  }
 0x81d   : > { %9117 = vmatpush1.bf16.msra.mxu0 %v10155_v8  ;;  %v8863_v1 = vpop.f32.mrf.mxu1  ;;  %9157 = vmatprep.subr.bf16.mxu1 %v10166_v63  ;;  %v8781_v23 = vsel %vm15366_vm13, %v9678_v42, 0  ;;  %v10232_v8 = vld [vmem:[#allocation4 + $0x728] ss:$16 sps:$4 sm:$0xff]   ;;  %v10240_v34 = vld [vmem:[#allocation4 + $0x70c] ss:$16 sps:$4 sm:$0xff]  }
 0x81e   : > { %v14447_v37 = vadd.f32 %v8863_v1, %v8823_v49  ;;  %9118 = vmatprep.subr.bf16.mxu0 %v10163_v56  ;;  %v10235_v54 = vld [vmem:[#allocation4 + $0x928] ss:$16 sps:$4 sm:$0xff]   ;;  %v10243_v49 = vld [vmem:[#allocation4 + $0x90c] ss:$16 sps:$4 sm:$0xff]  }
 0x81f   : > { %v8865_v40 = vpop.f32.mrf.mxu1  ;;  %v10238_v56 = vld [vmem:[#allocation4 + $0x708] ss:$16 sps:$4 sm:$0xff]   ;;  %v10246_v1 = vld.sshfl [vmem:[%s14481_s7 + $0x10] sm:$0x33 pattern:$0x76325410] }
 0x820   : > { %9158 = vmatpush1.bf16.msra.mxu1 %v10164_v27  ;;  %v10241_v63 = vld [vmem:[#allocation4 + $0x908] ss:$16 sps:$4 sm:$0xff]  }
 0x821   : > { %9119 = vmatpush1.bf16.msra.mxu0 %v10161_v11  ;;  %v8866_v28 = vpop.f32.mrf.mxu1  ;;  %9159 = vmatprep.subr.bf16.mxu1 %v10172_v52 }
 0x822   : > { %9120 = vmatprep.subr.bf16.mxu0 %v10169_v21 }
 0x824   : > { %9160 = vmatpush1.bf16.msra.mxu1 %v10170_v18 }
 0x825   : > { %9121 = vmatpush1.bf16.msra.mxu0 %v10167_v9  ;;  %9161 = vmatprep.subr.bf16.mxu1 %v10178_v59 }
 0x826   : > { %9122 = vmatprep.subr.bf16.mxu0 %v10175_v17 }
 0x828   : > { %9162 = vmatpush1.bf16.msra.mxu1 %v10176_v55 }
 0x829   : > { %9123 = vmatpush1.bf16.msra.mxu0 %v10173_v16  ;;  %9163 = vmatprep.subr.bf16.mxu1 %v10184_v2 }
 0x82a   : > { %9124 = vmatprep.subr.bf16.mxu0 %v10181_v19 }
 0x82c   : > { %9164 = vmatpush1.bf16.msra.mxu1 %v10182_v43 }
 0x82d   : > { %9125 = vmatpush1.bf16.msra.mxu0 %v10179_v61  ;;  %9165 = vmatprep.subr.bf16.mxu1 %v10190_v33 }
 0x82e   : > { %9126 = vmatprep.subr.bf16.mxu0 %v10187_v29 }
 0x830   : > { %9166 = vmatpush1.bf16.msra.mxu1 %v10188_v47 }
 0x831   : > { %9127 = vmatpush1.bf16.msra.mxu0 %v10185_v3  ;;  %9167 = vmatprep.subr.bf16.mxu1 %v10196_v46 }
 0x832   : > { %9128 = vmatprep.subr.bf16.mxu0 %v10193_v35 }
 0x834   : > { %9168 = vmatpush1.bf16.msra.mxu1 %v10194_v22 }
 0x835   : > { %9129 = vmatpush1.bf16.msra.mxu0 %v10191_v53  ;;  %9169 = vmatprep.subr.bf16.mxu1 %v10202_v31 }
 0x836   : > { %9130 = vmatprep.subr.bf16.mxu0 %v10199_v48 }
 0x838   : > { %9170 = vmatpush1.bf16.msra.mxu1 %v10200_v7 }
 0x839   : > { %9131 = vmatpush2.bf16.msra.mxu0 %v10197_v13  ;;  %9682 = vmatprep.subr.msk.bf16.mxu1 %vm15365_vm1, %v9679_v10 }
 0x83a   : > { %9132 = vmatprep.subr.bf16.mxu0 %v10205_v50 }
 0x83c   : > { %9174 = vmatpush2.bf16.msra.mxu1 %v8781_v23 }
 0x83d   : > { %9133 = vmatpush2.bf16.msra.mxu0 %v10203_v12  ;;  %9175 = vmatprep.subr.bf16.mxu1 %v10213_v25 }
 0x83e   : > { %9134 = vmatprep.subr.bf16.mxu0 %v10210_v62 }
 0x840   : > { %9176 = vmatpush2.bf16.msra.mxu1 %v10211_v0 }
 0x841   : > { %9135 = vmatpush2.bf16.msra.mxu0 %v10208_v58  ;;  %9177 = vmatprep.subr.bf16.mxu1 %v10219_v4 }
 0x842   : > { %9136 = vmatprep.subr.bf16.mxu0 %v10216_v51 }
 0x844   : > { %9178 = vmatpush2.bf16.msra.mxu1 %v10217_v32 }
 0x845   : > { %9137 = vmatpush2.bf16.msra.mxu0 %v10214_v39  ;;  %9179 = vmatprep.subr.bf16.mxu1 %v10225_v24 }
 0x846   : > { %9138 = vmatprep.subr.bf16.mxu0 %v10222_v44 }
 0x848   : > { %9180 = vmatpush2.bf16.msra.mxu1 %v10223_v26 }
 0x849   : > { %9139 = vmatpush2.bf16.msra.mxu0 %v10220_v14  ;;  %9181 = vmatprep.subr.bf16.mxu1 %v10231_v20 }
 0x84a   : > { %9140 = vmatprep.subr.bf16.mxu0 %v10228_v36 }
 0x84c   : > { %9182 = vmatpush2.bf16.msra.mxu1 %v10229_v30 }
 0x84d   : > { %9141 = vmatpush2.bf16.msra.mxu0 %v10226_v38  ;;  %9183 = vmatprep.subr.bf16.mxu1 %v10237_v15 }
 0x84e   : > { %9142 = vmatprep.subr.bf16.mxu0 %v10234_v41 }
 0x850   : > { %9184 = vmatpush2.bf16.msra.mxu1 %v10235_v54 }
 0x851   : > { %9143 = vmatpush2.bf16.msra.mxu0 %v10232_v8  ;;  %9185 = vmatprep.subr.bf16.mxu1 %v10243_v49 }
 0x852   : > { %9144 = vmatprep.subr.bf16.mxu0 %v10240_v34 }
 0x854   : > { %9186 = vmatpush2.bf16.msra.mxu1 %v10241_v63 }
 0x855   : > { %9145 = vmatpush2.bf16.msra.mxu0 %v10238_v56 }
 0x857   : > { %9188 = vmatmul.mubr.bf16.vlgmr.msra.gmra.mxu1 %v10246_v1 }
 0x858   : > { %9147 = vmatmul.mubr.bf16.vlgmr.msra.gmra.mxu0 %v14081_v60 }
 0x85a   : > { %v8902_v11 = vpop.f32.mrf.mxu0 }
 0x85b   : > { %v8943_v27 = vpop.f32.mrf.mxu1  ;;  %v8903_v17 = vadd.f32 %v8902_v11, %v14444_v45 }
 0x85c   : > { %v8904_v40 = vpop.f32.mrf.mxu0 }
 0x85d   : > { %v8945_v21 = vpop.f32.mrf.mxu1  ;;  %v8905_v59 = vadd.f32 %v8904_v40, %v14447_v37  ;;  %v8944_v60 = vadd.f32 %v8943_v27, %v8903_v17 }
 0x85e   : > { %v8906_v52 = vpop.f32.mrf.mxu0 }
 0x85f   : > { %v8947_v28 = vpop.f32.mrf.mxu1  ;;  %v8946_v55 = vadd.f32 %v8945_v21, %v8905_v59 }
 0x860   : > { %v8907_v9 = vpop.f32.mrf.mxu0 }
 0x861   : > { %v8948_v18 = vpop.f32.mrf.mxu1 }
 0x898   : > { %v8984_v16 = vpop.f32.mrf.mxu0 }
 0x899   : > { %v8985_v2 = vadd.f32 %v8984_v16, %v8944_v60 }
 0x89a   : > { %v8986_v19 = vpop.f32.mrf.mxu0 }
 0x89b   : > { %v8987_v61 = vadd.f32 %v8986_v19, %v8946_v55  ;;  %v9025_v29 = vpop.f32.mrf.mxu1 }
 0x89c   : > { %v8988_v43 = vpop.f32.mrf.mxu0  ;;  %v9026_v7 = vadd.f32 %v9025_v29, %v14439_v6 }
 0x89d   : > { %v9200_v33 = vcombine.low %v8985_v2, %v8987_v61  ;;  %v9027_v45 = vpop.f32.mrf.mxu1 }
 0x89e   : > { %v8989_v3 = vpop.f32.mrf.mxu0  ;;  %v9028_v50 = vadd.f32 %v9027_v45, %v14439_v6 }
 0x89f   : > { %9204 = vst [vmem:[%s14463_s17] sm:$0x77] %v9200_v33  ;;  %v9029_v37 = vpop.f32.mrf.mxu1 }
 0x8a1   : > { %v9030_v47 = vpop.f32.mrf.mxu1 }
 0x8d8   : > { %v9066_v35 = vpop.f32.mrf.mxu0 }
 0x8d9   : > { %v9067_v10 = vadd.f32 %v9066_v35, %v9026_v7 }
 0x8da   : > { %v9068_v46 = vpop.f32.mrf.mxu0 }
 0x8db   : > { %v9107_v22 = vpop.f32.mrf.mxu1  ;;  %v9069_v42 = vadd.f32 %v9068_v46, %v9028_v50 }
 0x8dc   : > { %v9070_v53 = vpop.f32.mrf.mxu0  ;;  %v9108_v12 = vadd.f32 %v9107_v22, %v9067_v10 }
 0x8dd   : > { %v9109_v31 = vpop.f32.mrf.mxu1 }
 0x8de   : > { %v9071_v48 = vpop.f32.mrf.mxu0  ;;  %v9110_v25 = vadd.f32 %v9109_v31, %v9069_v42 }
 0x8df   : > { %v9111_v5 = vpop.f32.mrf.mxu1 }
 0x8e1   : > { %v9112_v13 = vpop.f32.mrf.mxu1 }
 0x917   : > { %v9189_v62 = vpop.f32.mrf.mxu1 }
 0x918   : > { %v9148_v23 = vpop.f32.mrf.mxu0 }
 0x919   : > { %v9149_v58 = vadd.f32 %v9148_v23, %v9108_v12  ;;  %v9191_v51 = vpop.f32.mrf.mxu1 }
 0x91a   : > { %v9150_v0 = vpop.f32.mrf.mxu0 }
 0x91b   : > { %v9151_v4 = vadd.f32 %v9150_v0, %v9110_v25  ;;  %v9193_v32 = vpop.f32.mrf.mxu1  ;;  %v9190_v44 = vadd.f32 %v9189_v62, %v9149_v58 }
 0x91c   : > { %v9152_v39 = vpop.f32.mrf.mxu0 }
 0x91d   : > { %v9192_v24 = vadd.f32 %v9191_v51, %v9151_v4  ;;  %v9194_v26 = vpop.f32.mrf.mxu1 }
 0x91e   : > { %v9153_v14 = vpop.f32.mrf.mxu0 }
 0x91f   : > { %v9201_v36 = vcombine.low %v9190_v44, %v9192_v24 }
 0x921   : > { %9205 = vst.msk [vmem:[%s14463_s17 + $0x8] sm:$0x77] %vm13589_vm9, %v9201_v36 }
 0x922 PF: > { %s20_s13 = sadd.s32 1, %s10253_s13  }
 0x923   : > { %p17_p4 = scmp.ge.s32.totalorder %s20_s13, 4  }
 0x925   :  { %19 = sbr.rel (!%p17_p4) target bundleno = 5 (0x5), region = 90 }

</bundles_post_ra>
